<compile_context>
chip_gen: v7x
topology: tpu7x:2x2x1
jax: 0.10.0
libtpu: 0.0.40
codegen_flags: <defaults>
</compile_context>

<pallas_src>
import functools

import jax
import jax.numpy as jnp
from jax import lax
from jax.experimental import pallas as pl
from jax.experimental.pallas import tpu as pltpu

BN_EPS = 1e-5
LANE = 128
# f32 MXU operands: matches the f32 reference tightly.  Set to jnp.bfloat16 for
# production throughput (v6e/v7x) if ~1e-2 end-to-end error is acceptable.
MXU_DTYPE = jnp.float32
VMEM_LIMIT_BYTES = 48 * 1024 * 1024  # headroom vs v7x 64 MiB physical VMEM


# ----------------------------------------------------------------------------- helpers
def _round_up(x, m):
    return (x + m - 1) // m * m


def _pick_tile_m(m):
    t = min(512, _round_up(m, 8))
    return max(8, (t // 8) * 8)


def _im2col(x_nhwc, kh, kw, pad):
    """(N,H,W,C) -> (N*H*W, kh*kw*C) patch matrix (wrapper-side XLA glue)."""
    n, h, w, c = x_nhwc.shape
    xp = jnp.pad(x_nhwc, ((0, 0), (pad, pad), (pad, pad), (0, 0)))
    taps = []
    for i in range(kh):
        for j in range(kw):
            taps.append(lax.slice(xp, (0, i, j, 0), (n, i + h, j + w, c)))
    patches = jnp.concatenate(taps, axis=-1)          # (N,H,W,kh*kw*C)
    return patches.reshape(n * h * w, kh * kw * c)


def _pixel_shuffle_nhwc(x, r):
    """NHWC pixel shuffle matching torch.nn.PixelShuffle channel ordering."""
    n, h, w, crr = x.shape
    c = crr // (r * r)
    x = x.reshape(n, h, w, c, r, r)
    x = jnp.transpose(x, (0, 1, 4, 2, 5, 3))          # (N, H, i, W, j, C)
    return x.reshape(n, h * r, w * r, c)


# ----------------------------------------------------------------------------- kernels
def _conv_bias_act_kernel(act, patch_ref, w_ref, bias_ref, alpha_ref, o_ref):
    """One im2col matmul tile + bias + optional PReLU / tanh epilogue."""
    y = jnp.dot(patch_ref[...], w_ref[...], preferred_element_type=jnp.float32)
    y = y + bias_ref[...]
    if act == "prelu":
        y = jnp.where(y > 0, y, alpha_ref[...] * y)
    elif act == "tanh":
        y = jnp.tanh(y)
    o_ref[...] = y


def _conv_stats_kernel(patch_ref, w_ref, conv_ref, stats_ref):
    """Conv tile (single matmul) + per-channel sum / sum-of-squares accumulation."""
    y = jnp.dot(patch_ref[...], w_ref[...], preferred_element_type=jnp.float32)
    conv_ref[...] = y

    @pl.when(pl.program_id(0) == 0)
    def _():
        stats_ref[...] = jnp.zeros_like(stats_ref)

    part = jnp.concatenate(
        [jnp.sum(y, axis=0, keepdims=True),
         jnp.sum(y * y, axis=0, keepdims=True)], axis=0)
    stats_ref[...] = stats_ref[...] + part


def _bn_act_kernel(use_prelu, has_residual, inv_count,
                   conv_ref, stats_ref, gamma_ref, beta_ref, alpha_ref, *rest):
    """Normalize with full-batch stats + optional PReLU + optional residual add."""
    if has_residual:
        res_ref, o_ref = rest
    else:
        (o_ref,) = rest
    mean = stats_ref[0:1, :] * inv_count
    var = jnp.maximum(stats_ref[1:2, :] * inv_count - mean * mean, 0.0)
    scale = gamma_ref[...] * lax.rsqrt(var + BN_EPS)
    shift = beta_ref[...] - mean * scale
    y = conv_ref[...] * scale + shift
    if use_prelu:
        y = jnp.where(y > 0, y, alpha_ref[...] * y)
    if has_residual:
        y = y + res_ref[...]
    o_ref[...] = y


# ----------------------------------------------------------------------------- layer wrappers
def conv2d_bias_act(x_nhwc, weight, bias, alpha=None, *, pad, act=None):
    """Fused Conv2d(stride=1) + bias (+ PReLU / tanh).  weight: (KH,KW,Cin,Cout)."""
    n, h, w, cin = x_nhwc.shape
    kh, kw, _, cout = weight.shape
    m = n * h * w
    kdim = kh * kw * cin
    cpad = _round_up(cout, LANE)
    tile_m = _pick_tile_m(m)
    m_pad = _round_up(m, tile_m)
    n_tiles = m_pad // tile_m

    patches = _im2col(x_nhwc.astype(jnp.float32), kh, kw, pad)
    patches = jnp.pad(patches, ((0, m_pad - m), (0, 0))).astype(MXU_DTYPE)
    w2 = jnp.pad(weight.reshape(kdim, cout), ((0, 0), (0, cpad - cout))).astype(MXU_DTYPE)
    b2 = jnp.pad(bias, (0, cpad - cout)).reshape(1, cpad).astype(jnp.float32)
    if alpha is None:
        a2 = jnp.zeros((1, cpad), jnp.float32)
    else:
        a2 = jnp.pad(alpha, (0, cpad - cout)).reshape(1, cpad).astype(jnp.float32)

    bpe = jnp.dtype(MXU_DTYPE).itemsize
    cost = pl.CostEstimate(
        flops=2 * m_pad * kdim * cpad + 2 * m_pad * cpad,
        transcendentals=m_pad * cpad if act == "tanh" else 0,
        bytes_accessed=patches.size * bpe + w2.size * bpe + m_pad * cpad * 4)

    out = pl.pallas_call(
        functools.partial(_conv_bias_act_kernel, act),
        grid=(n_tiles,),
        in_specs=[
            pl.BlockSpec((tile_m, kdim), lambda i: (i, 0)),
            pl.BlockSpec((kdim, cpad), lambda i: (0, 0)),
            pl.BlockSpec((1, cpad), lambda i: (0, 0)),
            pl.BlockSpec((1, cpad), lambda i: (0, 0)),
        ],
        out_specs=pl.BlockSpec((tile_m, cpad), lambda i: (i, 0)),
        out_shape=jax.ShapeDtypeStruct((m_pad, cpad), jnp.float32),
        compiler_params=pltpu.CompilerParams(
            dimension_semantics=("parallel",),
            vmem_limit_bytes=VMEM_LIMIT_BYTES),
        cost_estimate=cost,
    )(patches, w2, b2, a2)
    return out[:m, :cout].reshape(n, h, w, cout)


def conv2d_bn_act(x_nhwc, weight, gamma, beta, alpha=None, *,
                  pad, use_prelu, residual=None):
    """Fused Conv2d(stride=1, no bias) + BatchNorm2d(batch stats) (+ PReLU)(+ residual)."""
    n, h, w, cin = x_nhwc.shape
    kh, kw, _, cout = weight.shape
    m = n * h * w
    kdim = kh * kw * cin
    cpad = _round_up(cout, LANE)
    tile_m = _pick_tile_m(m)
    m_pad = _round_up(m, tile_m)
    n_tiles = m_pad // tile_m

    patches = _im2col(x_nhwc.astype(jnp.float32), kh, kw, pad)
    patches = jnp.pad(patches, ((0, m_pad - m), (0, 0))).astype(MXU_DTYPE)
    w2 = jnp.pad(weight.reshape(kdim, cout), ((0, 0), (0, cpad - cout))).astype(MXU_DTYPE)

    bpe = jnp.dtype(MXU_DTYPE).itemsize
    # -- pass 1: conv + per-channel sum / sum-of-squares (reduction -> "arbitrary") --
    # Padded rows are all-zero patches (no bias), so they contribute 0 to the stats;
    # dividing by the true element count M keeps BN semantics exact.
    conv_flat, stats = pl.pallas_call(
        _conv_stats_kernel,
        grid=(n_tiles,),
        in_specs=[
            pl.BlockSpec((tile_m, kdim), lambda i: (i, 0)),
            pl.BlockSpec((kdim, cpad), lambda i: (0, 0)),
        ],
        out_specs=(
            pl.BlockSpec((tile_m, cpad), lambda i: (i, 0)),
            pl.BlockSpec((2, cpad), lambda i: (0, 0)),
        ),
        out_shape=(
            jax.ShapeDtypeStruct((m_pad, cpad), jnp.float32),
            jax.ShapeDtypeStruct((2, cpad), jnp.float32),
        ),
        compiler_params=pltpu.CompilerParams(
            dimension_semantics=("arbitrary",),
            vmem_limit_bytes=VMEM_LIMIT_BYTES),
        cost_estimate=pl.CostEstimate(
            flops=2 * m_pad * kdim * cpad + 3 * m_pad * cpad,
            transcendentals=0,
            bytes_accessed=patches.size * bpe + w2.size * bpe + m_pad * cpad * 4),
    )(patches, w2)

    g2 = jnp.pad(gamma, (0, cpad - cout)).reshape(1, cpad).astype(jnp.float32)
    bt2 = jnp.pad(beta, (0, cpad - cout)).reshape(1, cpad).astype(jnp.float32)
    if alpha is None:
        a2 = jnp.zeros((1, cpad), jnp.float32)
    else:
        a2 = jnp.pad(alpha, (0, cpad - cout)).reshape(1, cpad).astype(jnp.float32)

    args = [conv_flat, stats, g2, bt2, a2]
    in_specs = [
        pl.BlockSpec((tile_m, cpad), lambda i: (i, 0)),
        pl.BlockSpec((2, cpad), lambda i: (0, 0)),
        pl.BlockSpec((1, cpad), lambda i: (0, 0)),
        pl.BlockSpec((1, cpad), lambda i: (0, 0)),
        pl.BlockSpec((1, cpad), lambda i: (0, 0)),
    ]
    has_residual = residual is not None
    if has_residual:
        res_slab = jnp.pad(residual.astype(jnp.float32).reshape(m, cout),
                           ((0, m_pad - m), (0, cpad - cout)))
        args.append(res_slab)
        in_specs.append(pl.BlockSpec((tile_m, cpad), lambda i: (i, 0)))

    # -- pass 2: normalize + PReLU + residual add, tile-parallel --
    out = pl.pallas_call(
        functools.partial(_bn_act_kernel, use_prelu, has_residual, 1.0 / m),
        grid=(n_tiles,),
        in_specs=in_specs,
        out_specs=pl.BlockSpec((tile_m, cpad), lambda i: (i, 0)),
        out_shape=jax.ShapeDtypeStruct((m_pad, cpad), jnp.float32),
        compiler_params=pltpu.CompilerParams(
            dimension_semantics=("parallel",),
            vmem_limit_bytes=VMEM_LIMIT_BYTES),
        cost_estimate=pl.CostEstimate(
            flops=6 * m_pad * cpad,
            transcendentals=n_tiles * cpad,
            bytes_accessed=(2 + int(has_residual)) * m_pad * cpad * 4),
    )(*args)
    return out[:m, :cout].reshape(n, h, w, cout)


# ----------------------------------------------------------------------------- Generator
def init_generator_params(key, sf, in_c, num_c, b):
    def conv_w(k, kh, kw, cin, cout):
        return (1.0 / (kh * kw * cin) ** 0.5) * jax.random.normal(
            k, (kh, kw, cin, cout), jnp.float32)

    keys = iter(jax.random.split(key, 64))
    p = {}
    p["initial"] = dict(
        w=conv_w(next(keys), 9, 9, in_c, num_c),
        b=0.1 * jax.random.normal(next(keys), (num_c,), jnp.float32),
        alpha=jnp.full((num_c,), 0.25, jnp.float32))
    p["residuals"] = []
    for _ in range(b):
        p["residuals"].append(dict(
            w1=conv_w(next(keys), 3, 3, num_c, num_c),
            g1=jnp.ones((num_c,), jnp.float32),
            bt1=jnp.zeros((num_c,), jnp.float32),
            a1=jnp.full((num_c,), 0.25, jnp.float32),
            w2=conv_w(next(keys), 3, 3, num_c, num_c),
            g2=jnp.ones((num_c,), jnp.float32),
            bt2=jnp.zeros((num_c,), jnp.float32)))
    p["mid"] = dict(
        w=conv_w(next(keys), 3, 3, num_c, num_c),
        g=jnp.ones((num_c,), jnp.float32),
        bt=jnp.zeros((num_c,), jnp.float32))
    p["ups"] = []
    for _ in range(2):
        p["ups"].append(dict(
            w=conv_w(next(keys), 3, 3, num_c, num_c * sf * sf),
            b=0.1 * jax.random.normal(next(keys), (num_c * sf * sf,), jnp.float32),
            alpha=jnp.full((num_c,), 0.25, jnp.float32)))
    p["final"] = dict(
        w=conv_w(next(keys), 9, 9, num_c, in_c),
        b=0.1 * jax.random.normal(next(keys), (in_c,), jnp.float32))
    return p


def generator_forward(x_nchw, params, *, sf):
    x = jnp.transpose(x_nchw, (0, 2, 3, 1)).astype(jnp.float32)   # NHWC

    pi = params["initial"]
    initial = conv2d_bias_act(x, pi["w"], pi["b"], pi["alpha"], pad=4, act="prelu")

    out = initial
    for rb in params["residuals"]:
        h = conv2d_bn_act(out, rb["w1"], rb["g1"], rb["bt1"], rb["a1"],
                          pad=1, use_prelu=True)
        out = conv2d_bn_act(h, rb["w2"], rb["g2"], rb["bt2"],
                            pad=1, use_prelu=False, residual=out)

    pm = params["mid"]
    out = conv2d_bn_act(out, pm["w"], pm["g"], pm["bt"],
                        pad=1, use_prelu=False, residual=initial)

    for up in params["ups"]:
        # PReLU is per post-shuffle channel c; applying it pre-shuffle with alpha
        # repeated sf*sf times is mathematically identical (shuffle is a permutation).
        alpha_exp = jnp.repeat(up["alpha"], sf * sf)
        out = conv2d_bias_act(out, up["w"], up["b"], alpha_exp, pad=1, act="prelu")
        out = _pixel_shuffle_nhwc(out, sf)

    pf = params["final"]
    out = conv2d_bias_act(out, pf["w"], pf["b"], None, pad=4, act="tanh")
    return jnp.transpose(out, (0, 3, 1, 2))                        # back to NCHW


# ----------------------------------------------------------------------------- reference
def _ref_conv(x_nhwc, w_khwc, bias, pad):
    # Full-precision f32 reference (precision=HIGHEST avoids TPU bf16 downcast).
    y = lax.conv_general_dilated(
        x_nhwc.astype(jnp.float32), w_khwc.astype(jnp.float32),
        window_strides=(1, 1), padding=[(pad, pad), (pad, pad)],
        dimension_numbers=("NHWC", "HWIO", "NHWC"),
        precision=lax.Precision.HIGHEST,
        preferred_element_type=jnp.float32)
    if bias is not None:
        y = y + bias
    return y


def _ref_bn(y, gamma, beta):
    mean = jnp.mean(y, axis=(0, 1, 2), keepdims=True)
    var = jnp.mean((y - mean) ** 2, axis=(0, 1, 2), keepdims=True)
    return (y - mean) * lax.rsqrt(var + BN_EPS) * gamma + beta


def _ref_prelu(y, alpha):
    return jnp.where(y > 0, y, alpha * y)


def _ref_pixel_shuffle_nchw(x_nchw, r):
    n, crr, h, w = x_nchw.shape
    c = crr // (r * r)
    x = x_nchw.reshape(n, c, r, r, h, w)
    x = jnp.transpose(x, (0, 1, 4, 2, 5, 3))
    return x.reshape(n, c, h * r, w * r)


def generator_reference(x_nchw, params, sf):
    x = jnp.transpose(x_nchw, (0, 2, 3, 1)).astype(jnp.float32)
    pi = params["initial"]
    initial = _ref_prelu(_ref_conv(x, pi["w"], pi["b"], 4), pi["alpha"])
    out = initial
    for rb in params["residuals"]:
        h = _ref_prelu(_ref_bn(_ref_conv(out, rb["w1"], None, 1),
                               rb["g1"], rb["bt1"]), rb["a1"])
        out = _ref_bn(_ref_conv(h, rb["w2"], None, 1), rb["g2"], rb["bt2"]) + out
    pm = params["mid"]
    out = _ref_bn(_ref_conv(out, pm["w"], None, 1), pm["g"], pm["bt"]) + initial
    for up in params["ups"]:
        y = _ref_conv(out, up["w"], up["b"], 1)
        y = jnp.transpose(y, (0, 3, 1, 2))                 # torch-style PixelShuffle
        y = _ref_pixel_shuffle_nchw(y, sf)
        y = jnp.transpose(y, (0, 2, 3, 1))
        out = _ref_prelu(y, up["alpha"])
    pf = params["final"]
    out = jnp.tanh(_ref_conv(out, pf["w"], pf["b"], 4))
    return jnp.transpose(out, (0, 3, 1, 2))


# ----------------------------------------------------------------------------- main
if __name__ == "__main__":
    key = jax.random.PRNGKey(0)
    sf, in_c, num_c, B = 2, 3, 32, 2          # small Generator config
    N, H, W = 2, 8, 8                         # LR input; output is 4x (two sf=2 stages)

    k_x, k_p = jax.random.split(key)
    x = jax.random.normal(k_x, (N, in_c, H, W), jnp.float32)
    params = init_generator_params(k_p, sf, in_c, num_c, B)

    fwd = jax.jit(generator_forward, static_argnames=("sf",))
    out = jax.block_until_ready(fwd(x, params, sf=sf))
    assert out.shape == (N, in_c, H * sf * sf, W * sf * sf), out.shape

    ref = jax.block_until_ready(generator_reference(x, params, sf))
    max_err = float(jnp.max(jnp.abs(out - ref)))
    # f32 MXU path tracks the f32 reference to ~1e-4 end-to-end; tolerance leaves
    # headroom for MXU f32 pass-decomposition differences across TPU generations.
    assert jnp.allclose(out, ref, rtol=2e-2, atol=2e-2), \
        f"mismatch, max abs err {max_err}"

    print("KERNEL_OK")
</pallas_src>

<mosaic_0001>
module attributes {stable_mosaic.version = 11 : i64} {
  func.func @_conv_bias_act_kernel(%arg0: i32, %arg1: memref<128x243xf32, #tpu.memory_space<vmem>>, %arg2: memref<243x128xf32, #tpu.memory_space<vmem>>, %arg3: memref<1x128xf32, #tpu.memory_space<vmem>>, %arg4: memref<1x128xf32, #tpu.memory_space<vmem>>, %arg5: memref<128x128xf32, #tpu.memory_space<vmem>>) attributes {dimension_semantics = [#tpu.dimension_semantics<parallel>], iteration_bounds = array<i64: 1>, scalar_prefetch = 0 : i64, scratch_operands = 0 : i64, tpu.core_type = #tpu.core_type<tc>, window_params = [{transform_indices = @transform_0, window_bounds = array<i64: 128, 243>}, {pipeline_mode = #tpu.pipeline_mode<synchronous>, transform_indices = @transform_1, window_bounds = array<i64: 243, 128>}, {pipeline_mode = #tpu.pipeline_mode<synchronous>, transform_indices = @transform_2, window_bounds = array<i64: 1, 128>}, {pipeline_mode = #tpu.pipeline_mode<synchronous>, transform_indices = @transform_3, window_bounds = array<i64: 1, 128>}, {transform_indices = @transform_4, window_bounds = array<i64: 128, 128>}]} {
    %c0 = arith.constant 0 : index
    %c0_0 = arith.constant 0 : index
    %0 = vector.load %arg1[%c0, %c0_0] : memref<128x243xf32, #tpu.memory_space<vmem>>, vector<128x243xf32>
    %c0_1 = arith.constant 0 : index
    %c0_2 = arith.constant 0 : index
    %1 = vector.load %arg2[%c0_1, %c0_2] : memref<243x128xf32, #tpu.memory_space<vmem>>, vector<243x128xf32>
    %cst = arith.constant dense<0.000000e+00> : vector<128x128xf32>
    %2 = tpu.matmul %0, %1, %cst {dimension_numbers = #tpu.dot_dimension_numbers<[1], [0], [0], [1], [0, 0, 1, 1], [], []>} : vector<128x243xf32>, vector<243x128xf32>, vector<128x128xf32> -> vector<128x128xf32>
    %c0_3 = arith.constant 0 : index
    %c0_4 = arith.constant 0 : index
    %3 = vector.load %arg3[%c0_3, %c0_4] : memref<1x128xf32, #tpu.memory_space<vmem>>, vector<1x128xf32>
    %4 = vector.broadcast %3 : vector<1x128xf32> to vector<128x128xf32>
    %5 = arith.addf %2, %4 : vector<128x128xf32>
    %cst_5 = arith.constant 0.000000e+00 : f32
    %6 = vector.broadcast %cst_5 : f32 to vector<128x128xf32>
    %7 = arith.cmpf ogt, %5, %6 : vector<128x128xf32>
    %c0_6 = arith.constant 0 : index
    %c0_7 = arith.constant 0 : index
    %8 = vector.load %arg4[%c0_6, %c0_7] : memref<1x128xf32, #tpu.memory_space<vmem>>, vector<1x128xf32>
    %9 = vector.broadcast %8 : vector<1x128xf32> to vector<128x128xf32>
    %10 = arith.mulf %9, %5 : vector<128x128xf32>
    %11 = arith.select %7, %5, %10 : vector<128x128xi1>, vector<128x128xf32>
    %c0_8 = arith.constant 0 : index
    %c0_9 = arith.constant 0 : index
    %12 = vector.load %arg5[%c0_8, %c0_9] : memref<128x128xf32, #tpu.memory_space<vmem>>, vector<128x128xf32>
    tpu.vector_store %arg5[%c0_8, %c0_9], %11 {strides = array<i32>} : memref<128x128xf32, #tpu.memory_space<vmem>>, vector<128x128xf32>,
    return
  }
  func.func @transform_0(%arg0: i32) -> (i32, i32) {
    %c0_i32 = arith.constant 0 : i32
    %c0_i32_0 = arith.constant 0 : i32
    return %arg0, %c0_i32 : i32, i32
  }
  func.func @transform_1(%arg0: i32) -> (i32, i32) {
    %c0_i32 = arith.constant 0 : i32
    %c0_i32_0 = arith.constant 0 : i32
    %c0_i32_1 = arith.constant 0 : i32
    return %c0_i32, %c0_i32_0 : i32, i32
  }
  func.func @transform_2(%arg0: i32) -> (i32, i32) {
    %c0_i32 = arith.constant 0 : i32
    %c0_i32_0 = arith.constant 0 : i32
    %c0_i32_1 = arith.constant 0 : i32
    return %c0_i32, %c0_i32_0 : i32, i32
  }
  func.func @transform_3(%arg0: i32) -> (i32, i32) {
    %c0_i32 = arith.constant 0 : i32
    %c0_i32_0 = arith.constant 0 : i32
    %c0_i32_1 = arith.constant 0 : i32
    return %c0_i32, %c0_i32_0 : i32, i32
  }
  func.func @transform_4(%arg0: i32) -> (i32, i32) {
    %c0_i32 = arith.constant 0 : i32
    %c0_i32_0 = arith.constant 0 : i32
    return %arg0, %c0_i32 : i32, i32
  }
}

module attributes {stable_mosaic.version = 11 : i64} {
  func.func @_conv_stats_kernel(%arg0: i32, %arg1: memref<128x288xf32, #tpu.memory_space<vmem>>, %arg2: memref<288x128xf32, #tpu.memory_space<vmem>>, %arg3: memref<128x128xf32, #tpu.memory_space<vmem>>, %arg4: memref<2x128xf32, #tpu.memory_space<vmem>>) attributes {dimension_semantics = [#tpu.dimension_semantics<arbitrary>], iteration_bounds = array<i64: 1>, scalar_prefetch = 0 : i64, scratch_operands = 0 : i64, tpu.core_type = #tpu.core_type<tc>, window_params = [{transform_indices = @transform_0, window_bounds = array<i64: 128, 288>}, {pipeline_mode = #tpu.pipeline_mode<synchronous>, transform_indices = @transform_1, window_bounds = array<i64: 288, 128>}, {transform_indices = @transform_2, window_bounds = array<i64: 128, 128>}, {pipeline_mode = #tpu.pipeline_mode<synchronous>, transform_indices = @transform_3, window_bounds = array<i64: 2, 128>}]} {
    %c0 = arith.constant 0 : index
    %c0_0 = arith.constant 0 : index
    %0 = vector.load %arg1[%c0, %c0_0] : memref<128x288xf32, #tpu.memory_space<vmem>>, vector<128x288xf32>
    %c0_1 = arith.constant 0 : index
    %c0_2 = arith.constant 0 : index
    %1 = vector.load %arg2[%c0_1, %c0_2] : memref<288x128xf32, #tpu.memory_space<vmem>>, vector<288x128xf32>
    %cst = arith.constant dense<0.000000e+00> : vector<128x128xf32>
    %2 = tpu.matmul %0, %1, %cst {dimension_numbers = #tpu.dot_dimension_numbers<[1], [0], [0], [1], [0, 0, 1, 1], [], []>} : vector<128x288xf32>, vector<288x128xf32>, vector<128x128xf32> -> vector<128x128xf32>
    %c0_3 = arith.constant 0 : index
    %c0_4 = arith.constant 0 : index
    %3 = vector.load %arg3[%c0_3, %c0_4] : memref<128x128xf32, #tpu.memory_space<vmem>>, vector<128x128xf32>
    tpu.vector_store %arg3[%c0_3, %c0_4], %2 {strides = array<i32>} : memref<128x128xf32, #tpu.memory_space<vmem>>, vector<128x128xf32>,
    %c0_i32 = arith.constant 0 : i32
    %4 = arith.cmpi eq, %arg0, %c0_i32 : i32
    %5 = arith.extui %4 : i1 to i32
    %c0_i32_5 = arith.constant 0 : i32
    %6 = arith.cmpi ne, %5, %c0_i32_5 : i32
    scf.if %6 {
      %cst_12 = arith.constant 0.000000e+00 : f32
      %16 = vector.broadcast %cst_12 : f32 to vector<2x128xf32>
      %c0_13 = arith.constant 0 : index
      %c0_14 = arith.constant 0 : index
      %17 = vector.load %arg4[%c0_13, %c0_14] : memref<2x128xf32, #tpu.memory_space<vmem>>, vector<2x128xf32>
      tpu.vector_store %arg4[%c0_13, %c0_14], %16 {strides = array<i32>} : memref<2x128xf32, #tpu.memory_space<vmem>>, vector<2x128xf32>,
    } else {
    }
    %cst_6 = arith.constant dense<0.000000e+00> : vector<128xf32>
    %7 = vector.multi_reduction <add>, %2, %cst_6 [0] : vector<128x128xf32> to vector<128xf32>
    %8 = vector.shape_cast %7 : vector<128xf32> to vector<1x128xf32>
    %9 = arith.mulf %2, %2 : vector<128x128xf32>
    %cst_7 = arith.constant dense<0.000000e+00> : vector<128xf32>
    %10 = vector.multi_reduction <add>, %9, %cst_7 [0] : vector<128x128xf32> to vector<128xf32>
    %11 = vector.shape_cast %10 : vector<128xf32> to vector<1x128xf32>
    %12 = tpu.concatenate %8, %11 in 0 : vector<1x128xf32>, vector<1x128xf32> -> vector<2x128xf32>
    %c0_8 = arith.constant 0 : index
    %c0_9 = arith.constant 0 : index
    %13 = vector.load %arg4[%c0_8, %c0_9] : memref<2x128xf32, #tpu.memory_space<vmem>>, vector<2x128xf32>
    %14 = arith.addf %13, %12 : vector<2x128xf32>
    %c0_10 = arith.constant 0 : index
    %c0_11 = arith.constant 0 : index
    %15 = vector.load %arg4[%c0_10, %c0_11] : memref<2x128xf32, #tpu.memory_space<vmem>>, vector<2x128xf32>
    tpu.vector_store %arg4[%c0_10, %c0_11], %14 {strides = array<i32>} : memref<2x128xf32, #tpu.memory_space<vmem>>, vector<2x128xf32>,
    return
  }
  func.func @transform_0(%arg0: i32) -> (i32, i32) {
    %c0_i32 = arith.constant 0 : i32
    %c0_i32_0 = arith.constant 0 : i32
    return %arg0, %c0_i32 : i32, i32
  }
  func.func @transform_1(%arg0: i32) -> (i32, i32) {
    %c0_i32 = arith.constant 0 : i32
    %c0_i32_0 = arith.constant 0 : i32
    %c0_i32_1 = arith.constant 0 : i32
    return %c0_i32, %c0_i32_0 : i32, i32
  }
  func.func @transform_2(%arg0: i32) -> (i32, i32) {
    %c0_i32 = arith.constant 0 : i32
    %c0_i32_0 = arith.constant 0 : i32
    return %arg0, %c0_i32 : i32, i32
  }
  func.func @transform_3(%arg0: i32) -> (i32, i32) {
    %c0_i32 = arith.constant 0 : i32
    %c0_i32_0 = arith.constant 0 : i32
    %c0_i32_1 = arith.constant 0 : i32
    return %c0_i32, %c0_i32_0 : i32, i32
  }
}

module attributes {stable_mosaic.version = 11 : i64} {
  func.func @_bn_act_kernel(%arg0: i32, %arg1: memref<128x128xf32, #tpu.memory_space<vmem>>, %arg2: memref<2x128xf32, #tpu.memory_space<vmem>>, %arg3: memref<1x128xf32, #tpu.memory_space<vmem>>, %arg4: memref<1x128xf32, #tpu.memory_space<vmem>>, %arg5: memref<1x128xf32, #tpu.memory_space<vmem>>, %arg6: memref<128x128xf32, #tpu.memory_space<vmem>>) attributes {dimension_semantics = [#tpu.dimension_semantics<parallel>], iteration_bounds = array<i64: 1>, scalar_prefetch = 0 : i64, scratch_operands = 0 : i64, tpu.core_type = #tpu.core_type<tc>, window_params = [{transform_indices = @transform_0, window_bounds = array<i64: 128, 128>}, {pipeline_mode = #tpu.pipeline_mode<synchronous>, transform_indices = @transform_1, window_bounds = array<i64: 2, 128>}, {pipeline_mode = #tpu.pipeline_mode<synchronous>, transform_indices = @transform_2, window_bounds = array<i64: 1, 128>}, {pipeline_mode = #tpu.pipeline_mode<synchronous>, transform_indices = @transform_3, window_bounds = array<i64: 1, 128>}, {pipeline_mode = #tpu.pipeline_mode<synchronous>, transform_indices = @transform_4, window_bounds = array<i64: 1, 128>}, {transform_indices = @transform_5, window_bounds = array<i64: 128, 128>}]} {
    %c0 = arith.constant 0 : index
    %c0_0 = arith.constant 0 : index
    %0 = vector.load %arg2[%c0, %c0_0] : memref<2x128xf32, #tpu.memory_space<vmem>>, vector<1x128xf32>
    %cst = arith.constant 7.812500e-03 : f32
    %1 = vector.broadcast %cst : f32 to vector<1x128xf32>
    %2 = arith.mulf %0, %1 : vector<1x128xf32>
    %c1 = arith.constant 1 : index
    %c0_1 = arith.constant 0 : index
    %3 = vector.load %arg2[%c1, %c0_1] : memref<2x128xf32, #tpu.memory_space<vmem>>, vector<1x128xf32>
    %cst_2 = arith.constant 7.812500e-03 : f32
    %4 = vector.broadcast %cst_2 : f32 to vector<1x128xf32>
    %5 = arith.mulf %3, %4 : vector<1x128xf32>
    %6 = arith.mulf %2, %2 : vector<1x128xf32>
    %7 = arith.subf %5, %6 : vector<1x128xf32>
    %cst_3 = arith.constant 0.000000e+00 : f32
    %8 = vector.broadcast %cst_3 : f32 to vector<1x128xf32>
    %9 = arith.maximumf %7, %8 : vector<1x128xf32>
    %c0_4 = arith.constant 0 : index
    %c0_5 = arith.constant 0 : index
    %10 = vector.load %arg3[%c0_4, %c0_5] : memref<1x128xf32, #tpu.memory_space<vmem>>, vector<1x128xf32>
    %cst_6 = arith.constant 9.99999974E-6 : f32
    %11 = vector.broadcast %cst_6 : f32 to vector<1x128xf32>
    %12 = arith.addf %9, %11 : vector<1x128xf32>
    %13 = math.rsqrt %12 : vector<1x128xf32>
    %14 = arith.mulf %10, %13 : vector<1x128xf32>
    %c0_7 = arith.constant 0 : index
    %c0_8 = arith.constant 0 : index
    %15 = vector.load %arg4[%c0_7, %c0_8] : memref<1x128xf32, #tpu.memory_space<vmem>>, vector<1x128xf32>
    %16 = arith.mulf %2, %14 : vector<1x128xf32>
    %17 = arith.subf %15, %16 : vector<1x128xf32>
    %c0_9 = arith.constant 0 : index
    %c0_10 = arith.constant 0 : index
    %18 = vector.load %arg1[%c0_9, %c0_10] : memref<128x128xf32, #tpu.memory_space<vmem>>, vector<128x128xf32>
    %19 = vector.broadcast %14 : vector<1x128xf32> to vector<128x128xf32>
    %20 = arith.mulf %18, %19 : vector<128x128xf32>
    %21 = vector.broadcast %17 : vector<1x128xf32> to vector<128x128xf32>
    %22 = arith.addf %20, %21 : vector<128x128xf32>
    %cst_11 = arith.constant 0.000000e+00 : f32
    %23 = vector.broadcast %cst_11 : f32 to vector<128x128xf32>
    %24 = arith.cmpf ogt, %22, %23 : vector<128x128xf32>
    %c0_12 = arith.constant 0 : index
    %c0_13 = arith.constant 0 : index
    %25 = vector.load %arg5[%c0_12, %c0_13] : memref<1x128xf32, #tpu.memory_space<vmem>>, vector<1x128xf32>
    %26 = vector.broadcast %25 : vector<1x128xf32> to vector<128x128xf32>
    %27 = arith.mulf %26, %22 : vector<128x128xf32>
    %28 = arith.select %24, %22, %27 : vector<128x128xi1>, vector<128x128xf32>
    %c0_14 = arith.constant 0 : index
    %c0_15 = arith.constant 0 : index
    %29 = vector.load %arg6[%c0_14, %c0_15] : memref<128x128xf32, #tpu.memory_space<vmem>>, vector<128x128xf32>
    tpu.vector_store %arg6[%c0_14, %c0_15], %28 {strides = array<i32>} : memref<128x128xf32, #tpu.memory_space<vmem>>, vector<128x128xf32>,
    return
  }
  func.func @transform_0(%arg0: i32) -> (i32, i32) {
    %c0_i32 = arith.constant 0 : i32
    %c0_i32_0 = arith.constant 0 : i32
    return %arg0, %c0_i32 : i32, i32
  }
  func.func @transform_1(%arg0: i32) -> (i32, i32) {
    %c0_i32 = arith.constant 0 : i32
    %c0_i32_0 = arith.constant 0 : i32
    %c0_i32_1 = arith.constant 0 : i32
    return %c0_i32, %c0_i32_0 : i32, i32
  }
  func.func @transform_2(%arg0: i32) -> (i32, i32) {
    %c0_i32 = arith.constant 0 : i32
    %c0_i32_0 = arith.constant 0 : i32
    %c0_i32_1 = arith.constant 0 : i32
    return %c0_i32, %c0_i32_0 : i32, i32
  }
  func.func @transform_3(%arg0: i32) -> (i32, i32) {
    %c0_i32 = arith.constant 0 : i32
    %c0_i32_0 = arith.constant 0 : i32
    %c0_i32_1 = arith.constant 0 : i32
    return %c0_i32, %c0_i32_0 : i32, i32
  }
  func.func @transform_4(%arg0: i32) -> (i32, i32) {
    %c0_i32 = arith.constant 0 : i32
    %c0_i32_0 = arith.constant 0 : i32
    %c0_i32_1 = arith.constant 0 : i32
    return %c0_i32, %c0_i32_0 : i32, i32
  }
  func.func @transform_5(%arg0: i32) -> (i32, i32) {
    %c0_i32 = arith.constant 0 : i32
    %c0_i32_0 = arith.constant 0 : i32
    return %arg0, %c0_i32 : i32, i32
  }
}

module attributes {stable_mosaic.version = 11 : i64} {
  func.func @_bn_act_kernel(%arg0: i32, %arg1: memref<128x128xf32, #tpu.memory_space<vmem>>, %arg2: memref<2x128xf32, #tpu.memory_space<vmem>>, %arg3: memref<1x128xf32, #tpu.memory_space<vmem>>, %arg4: memref<1x128xf32, #tpu.memory_space<vmem>>, %arg5: memref<1x128xf32, #tpu.memory_space<vmem>>, %arg6: memref<128x128xf32, #tpu.memory_space<vmem>>, %arg7: memref<128x128xf32, #tpu.memory_space<vmem>>) attributes {dimension_semantics = [#tpu.dimension_semantics<parallel>], iteration_bounds = array<i64: 1>, scalar_prefetch = 0 : i64, scratch_operands = 0 : i64, tpu.core_type = #tpu.core_type<tc>, window_params = [{transform_indices = @transform_0, window_bounds = array<i64: 128, 128>}, {pipeline_mode = #tpu.pipeline_mode<synchronous>, transform_indices = @transform_1, window_bounds = array<i64: 2, 128>}, {pipeline_mode = #tpu.pipeline_mode<synchronous>, transform_indices = @transform_2, window_bounds = array<i64: 1, 128>}, {pipeline_mode = #tpu.pipeline_mode<synchronous>, transform_indices = @transform_3, window_bounds = array<i64: 1, 128>}, {pipeline_mode = #tpu.pipeline_mode<synchronous>, transform_indices = @transform_4, window_bounds = array<i64: 1, 128>}, {transform_indices = @transform_5, window_bounds = array<i64: 128, 128>}, {transform_indices = @transform_6, window_bounds = array<i64: 128, 128>}]} {
    %c0 = arith.constant 0 : index
    %c0_0 = arith.constant 0 : index
    %0 = vector.load %arg2[%c0, %c0_0] : memref<2x128xf32, #tpu.memory_space<vmem>>, vector<1x128xf32>
    %cst = arith.constant 7.812500e-03 : f32
    %1 = vector.broadcast %cst : f32 to vector<1x128xf32>
    %2 = arith.mulf %0, %1 : vector<1x128xf32>
    %c1 = arith.constant 1 : index
    %c0_1 = arith.constant 0 : index
    %3 = vector.load %arg2[%c1, %c0_1] : memref<2x128xf32, #tpu.memory_space<vmem>>, vector<1x128xf32>
    %cst_2 = arith.constant 7.812500e-03 : f32
    %4 = vector.broadcast %cst_2 : f32 to vector<1x128xf32>
    %5 = arith.mulf %3, %4 : vector<1x128xf32>
    %6 = arith.mulf %2, %2 : vector<1x128xf32>
    %7 = arith.subf %5, %6 : vector<1x128xf32>
    %cst_3 = arith.constant 0.000000e+00 : f32
    %8 = vector.broadcast %cst_3 : f32 to vector<1x128xf32>
    %9 = arith.maximumf %7, %8 : vector<1x128xf32>
    %c0_4 = arith.constant 0 : index
    %c0_5 = arith.constant 0 : index
    %10 = vector.load %arg3[%c0_4, %c0_5] : memref<1x128xf32, #tpu.memory_space<vmem>>, vector<1x128xf32>
    %cst_6 = arith.constant 9.99999974E-6 : f32
    %11 = vector.broadcast %cst_6 : f32 to vector<1x128xf32>
    %12 = arith.addf %9, %11 : vector<1x128xf32>
    %13 = math.rsqrt %12 : vector<1x128xf32>
    %14 = arith.mulf %10, %13 : vector<1x128xf32>
    %c0_7 = arith.constant 0 : index
    %c0_8 = arith.constant 0 : index
    %15 = vector.load %arg4[%c0_7, %c0_8] : memref<1x128xf32, #tpu.memory_space<vmem>>, vector<1x128xf32>
    %16 = arith.mulf %2, %14 : vector<1x128xf32>
    %17 = arith.subf %15, %16 : vector<1x128xf32>
    %c0_9 = arith.constant 0 : index
    %c0_10 = arith.constant 0 : index
    %18 = vector.load %arg1[%c0_9, %c0_10] : memref<128x128xf32, #tpu.memory_space<vmem>>, vector<128x128xf32>
    %19 = vector.broadcast %14 : vector<1x128xf32> to vector<128x128xf32>
    %20 = arith.mulf %18, %19 : vector<128x128xf32>
    %21 = vector.broadcast %17 : vector<1x128xf32> to vector<128x128xf32>
    %22 = arith.addf %20, %21 : vector<128x128xf32>
    %c0_11 = arith.constant 0 : index
    %c0_12 = arith.constant 0 : index
    %23 = vector.load %arg6[%c0_11, %c0_12] : memref<128x128xf32, #tpu.memory_space<vmem>>, vector<128x128xf32>
    %24 = arith.addf %22, %23 : vector<128x128xf32>
    %c0_13 = arith.constant 0 : index
    %c0_14 = arith.constant 0 : index
    %25 = vector.load %arg7[%c0_13, %c0_14] : memref<128x128xf32, #tpu.memory_space<vmem>>, vector<128x128xf32>
    tpu.vector_store %arg7[%c0_13, %c0_14], %24 {strides = array<i32>} : memref<128x128xf32, #tpu.memory_space<vmem>>, vector<128x128xf32>,
    return
  }
  func.func @transform_0(%arg0: i32) -> (i32, i32) {
    %c0_i32 = arith.constant 0 : i32
    %c0_i32_0 = arith.constant 0 : i32
    return %arg0, %c0_i32 : i32, i32
  }
  func.func @transform_1(%arg0: i32) -> (i32, i32) {
    %c0_i32 = arith.constant 0 : i32
    %c0_i32_0 = arith.constant 0 : i32
    %c0_i32_1 = arith.constant 0 : i32
    return %c0_i32, %c0_i32_0 : i32, i32
  }
  func.func @transform_2(%arg0: i32) -> (i32, i32) {
    %c0_i32 = arith.constant 0 : i32
    %c0_i32_0 = arith.constant 0 : i32
    %c0_i32_1 = arith.constant 0 : i32
    return %c0_i32, %c0_i32_0 : i32, i32
  }
  func.func @transform_3(%arg0: i32) -> (i32, i32) {
    %c0_i32 = arith.constant 0 : i32
    %c0_i32_0 = arith.constant 0 : i32
    %c0_i32_1 = arith.constant 0 : i32
    return %c0_i32, %c0_i32_0 : i32, i32
  }
  func.func @transform_4(%arg0: i32) -> (i32, i32) {
    %c0_i32 = arith.constant 0 : i32
    %c0_i32_0 = arith.constant 0 : i32
    %c0_i32_1 = arith.constant 0 : i32
    return %c0_i32, %c0_i32_0 : i32, i32
  }
  func.func @transform_5(%arg0: i32) -> (i32, i32) {
    %c0_i32 = arith.constant 0 : i32
    %c0_i32_0 = arith.constant 0 : i32
    return %arg0, %c0_i32 : i32, i32
  }
  func.func @transform_6(%arg0: i32) -> (i32, i32) {
    %c0_i32 = arith.constant 0 : i32
    %c0_i32_0 = arith.constant 0 : i32
    return %arg0, %c0_i32 : i32, i32
  }
}

module attributes {stable_mosaic.version = 11 : i64} {
  func.func @_conv_bias_act_kernel(%arg0: i32, %arg1: memref<128x288xf32, #tpu.memory_space<vmem>>, %arg2: memref<288x128xf32, #tpu.memory_space<vmem>>, %arg3: memref<1x128xf32, #tpu.memory_space<vmem>>, %arg4: memref<1x128xf32, #tpu.memory_space<vmem>>, %arg5: memref<128x128xf32, #tpu.memory_space<vmem>>) attributes {dimension_semantics = [#tpu.dimension_semantics<parallel>], iteration_bounds = array<i64: 1>, scalar_prefetch = 0 : i64, scratch_operands = 0 : i64, tpu.core_type = #tpu.core_type<tc>, window_params = [{transform_indices = @transform_0, window_bounds = array<i64: 128, 288>}, {pipeline_mode = #tpu.pipeline_mode<synchronous>, transform_indices = @transform_1, window_bounds = array<i64: 288, 128>}, {pipeline_mode = #tpu.pipeline_mode<synchronous>, transform_indices = @transform_2, window_bounds = array<i64: 1, 128>}, {pipeline_mode = #tpu.pipeline_mode<synchronous>, transform_indices = @transform_3, window_bounds = array<i64: 1, 128>}, {transform_indices = @transform_4, window_bounds = array<i64: 128, 128>}]} {
    %c0 = arith.constant 0 : index
    %c0_0 = arith.constant 0 : index
    %0 = vector.load %arg1[%c0, %c0_0] : memref<128x288xf32, #tpu.memory_space<vmem>>, vector<128x288xf32>
    %c0_1 = arith.constant 0 : index
    %c0_2 = arith.constant 0 : index
    %1 = vector.load %arg2[%c0_1, %c0_2] : memref<288x128xf32, #tpu.memory_space<vmem>>, vector<288x128xf32>
    %cst = arith.constant dense<0.000000e+00> : vector<128x128xf32>
    %2 = tpu.matmul %0, %1, %cst {dimension_numbers = #tpu.dot_dimension_numbers<[1], [0], [0], [1], [0, 0, 1, 1], [], []>} : vector<128x288xf32>, vector<288x128xf32>, vector<128x128xf32> -> vector<128x128xf32>
    %c0_3 = arith.constant 0 : index
    %c0_4 = arith.constant 0 : index
    %3 = vector.load %arg3[%c0_3, %c0_4] : memref<1x128xf32, #tpu.memory_space<vmem>>, vector<1x128xf32>
    %4 = vector.broadcast %3 : vector<1x128xf32> to vector<128x128xf32>
    %5 = arith.addf %2, %4 : vector<128x128xf32>
    %cst_5 = arith.constant 0.000000e+00 : f32
    %6 = vector.broadcast %cst_5 : f32 to vector<128x128xf32>
    %7 = arith.cmpf ogt, %5, %6 : vector<128x128xf32>
    %c0_6 = arith.constant 0 : index
    %c0_7 = arith.constant 0 : index
    %8 = vector.load %arg4[%c0_6, %c0_7] : memref<1x128xf32, #tpu.memory_space<vmem>>, vector<1x128xf32>
    %9 = vector.broadcast %8 : vector<1x128xf32> to vector<128x128xf32>
    %10 = arith.mulf %9, %5 : vector<128x128xf32>
    %11 = arith.select %7, %5, %10 : vector<128x128xi1>, vector<128x128xf32>
    %c0_8 = arith.constant 0 : index
    %c0_9 = arith.constant 0 : index
    %12 = vector.load %arg5[%c0_8, %c0_9] : memref<128x128xf32, #tpu.memory_space<vmem>>, vector<128x128xf32>
    tpu.vector_store %arg5[%c0_8, %c0_9], %11 {strides = array<i32>} : memref<128x128xf32, #tpu.memory_space<vmem>>, vector<128x128xf32>,
    return
  }
  func.func @transform_0(%arg0: i32) -> (i32, i32) {
    %c0_i32 = arith.constant 0 : i32
    %c0_i32_0 = arith.constant 0 : i32
    return %arg0, %c0_i32 : i32, i32
  }
  func.func @transform_1(%arg0: i32) -> (i32, i32) {
    %c0_i32 = arith.constant 0 : i32
    %c0_i32_0 = arith.constant 0 : i32
    %c0_i32_1 = arith.constant 0 : i32
    return %c0_i32, %c0_i32_0 : i32, i32
  }
  func.func @transform_2(%arg0: i32) -> (i32, i32) {
    %c0_i32 = arith.constant 0 : i32
    %c0_i32_0 = arith.constant 0 : i32
    %c0_i32_1 = arith.constant 0 : i32
    return %c0_i32, %c0_i32_0 : i32, i32
  }
  func.func @transform_3(%arg0: i32) -> (i32, i32) {
    %c0_i32 = arith.constant 0 : i32
    %c0_i32_0 = arith.constant 0 : i32
    %c0_i32_1 = arith.constant 0 : i32
    return %c0_i32, %c0_i32_0 : i32, i32
  }
  func.func @transform_4(%arg0: i32) -> (i32, i32) {
    %c0_i32 = arith.constant 0 : i32
    %c0_i32_0 = arith.constant 0 : i32
    return %arg0, %c0_i32 : i32, i32
  }
}

module attributes {stable_mosaic.version = 11 : i64} {
  func.func @_conv_bias_act_kernel(%arg0: i32, %arg1: memref<512x288xf32, #tpu.memory_space<vmem>>, %arg2: memref<288x128xf32, #tpu.memory_space<vmem>>, %arg3: memref<1x128xf32, #tpu.memory_space<vmem>>, %arg4: memref<1x128xf32, #tpu.memory_space<vmem>>, %arg5: memref<512x128xf32, #tpu.memory_space<vmem>>) attributes {dimension_semantics = [#tpu.dimension_semantics<parallel>], iteration_bounds = array<i64: 1>, scalar_prefetch = 0 : i64, scratch_operands = 0 : i64, tpu.core_type = #tpu.core_type<tc>, window_params = [{transform_indices = @transform_0, window_bounds = array<i64: 512, 288>}, {pipeline_mode = #tpu.pipeline_mode<synchronous>, transform_indices = @transform_1, window_bounds = array<i64: 288, 128>}, {pipeline_mode = #tpu.pipeline_mode<synchronous>, transform_indices = @transform_2, window_bounds = array<i64: 1, 128>}, {pipeline_mode = #tpu.pipeline_mode<synchronous>, transform_indices = @transform_3, window_bounds = array<i64: 1, 128>}, {transform_indices = @transform_4, window_bounds = array<i64: 512, 128>}]} {
    %c0 = arith.constant 0 : index
    %c0_0 = arith.constant 0 : index
    %0 = vector.load %arg1[%c0, %c0_0] : memref<512x288xf32, #tpu.memory_space<vmem>>, vector<512x288xf32>
    %c0_1 = arith.constant 0 : index
    %c0_2 = arith.constant 0 : index
    %1 = vector.load %arg2[%c0_1, %c0_2] : memref<288x128xf32, #tpu.memory_space<vmem>>, vector<288x128xf32>
    %cst = arith.constant dense<0.000000e+00> : vector<512x128xf32>
    %2 = tpu.matmul %0, %1, %cst {dimension_numbers = #tpu.dot_dimension_numbers<[1], [0], [0], [1], [0, 0, 1, 1], [], []>} : vector<512x288xf32>, vector<288x128xf32>, vector<512x128xf32> -> vector<512x128xf32>
    %c0_3 = arith.constant 0 : index
    %c0_4 = arith.constant 0 : index
    %3 = vector.load %arg3[%c0_3, %c0_4] : memref<1x128xf32, #tpu.memory_space<vmem>>, vector<1x128xf32>
    %4 = vector.broadcast %3 : vector<1x128xf32> to vector<512x128xf32>
    %5 = arith.addf %2, %4 : vector<512x128xf32>
    %cst_5 = arith.constant 0.000000e+00 : f32
    %6 = vector.broadcast %cst_5 : f32 to vector<512x128xf32>
    %7 = arith.cmpf ogt, %5, %6 : vector<512x128xf32>
    %c0_6 = arith.constant 0 : index
    %c0_7 = arith.constant 0 : index
    %8 = vector.load %arg4[%c0_6, %c0_7] : memref<1x128xf32, #tpu.memory_space<vmem>>, vector<1x128xf32>
    %9 = vector.broadcast %8 : vector<1x128xf32> to vector<512x128xf32>
    %10 = arith.mulf %9, %5 : vector<512x128xf32>
    %11 = arith.select %7, %5, %10 : vector<512x128xi1>, vector<512x128xf32>
    %c0_8 = arith.constant 0 : index
    %c0_9 = arith.constant 0 : index
    %12 = vector.load %arg5[%c0_8, %c0_9] : memref<512x128xf32, #tpu.memory_space<vmem>>, vector<512x128xf32>
    tpu.vector_store %arg5[%c0_8, %c0_9], %11 {strides = array<i32>} : memref<512x128xf32, #tpu.memory_space<vmem>>, vector<512x128xf32>,
    return
  }
  func.func @transform_0(%arg0: i32) -> (i32, i32) {
    %c0_i32 = arith.constant 0 : i32
    %c0_i32_0 = arith.constant 0 : i32
    return %arg0, %c0_i32 : i32, i32
  }
  func.func @transform_1(%arg0: i32) -> (i32, i32) {
    %c0_i32 = arith.constant 0 : i32
    %c0_i32_0 = arith.constant 0 : i32
    %c0_i32_1 = arith.constant 0 : i32
    return %c0_i32, %c0_i32_0 : i32, i32
  }
  func.func @transform_2(%arg0: i32) -> (i32, i32) {
    %c0_i32 = arith.constant 0 : i32
    %c0_i32_0 = arith.constant 0 : i32
    %c0_i32_1 = arith.constant 0 : i32
    return %c0_i32, %c0_i32_0 : i32, i32
  }
  func.func @transform_3(%arg0: i32) -> (i32, i32) {
    %c0_i32 = arith.constant 0 : i32
    %c0_i32_0 = arith.constant 0 : i32
    %c0_i32_1 = arith.constant 0 : i32
    return %c0_i32, %c0_i32_0 : i32, i32
  }
  func.func @transform_4(%arg0: i32) -> (i32, i32) {
    %c0_i32 = arith.constant 0 : i32
    %c0_i32_0 = arith.constant 0 : i32
    return %arg0, %c0_i32 : i32, i32
  }
}

module attributes {stable_mosaic.version = 11 : i64} {
  func.func @_conv_bias_act_kernel(%arg0: i32, %arg1: memref<512x2592xf32, #tpu.memory_space<vmem>>, %arg2: memref<2592x128xf32, #tpu.memory_space<vmem>>, %arg3: memref<1x128xf32, #tpu.memory_space<vmem>>, %arg4: memref<1x128xf32, #tpu.memory_space<vmem>>, %arg5: memref<512x128xf32, #tpu.memory_space<vmem>>) attributes {dimension_semantics = [#tpu.dimension_semantics<parallel>], iteration_bounds = array<i64: 4>, scalar_prefetch = 0 : i64, scratch_operands = 0 : i64, tpu.core_type = #tpu.core_type<tc>, window_params = [{transform_indices = @transform_0, window_bounds = array<i64: 512, 2592>}, {pipeline_mode = #tpu.pipeline_mode<synchronous>, transform_indices = @transform_1, window_bounds = array<i64: 2592, 128>}, {pipeline_mode = #tpu.pipeline_mode<synchronous>, transform_indices = @transform_2, window_bounds = array<i64: 1, 128>}, {pipeline_mode = #tpu.pipeline_mode<synchronous>, transform_indices = @transform_3, window_bounds = array<i64: 1, 128>}, {transform_indices = @transform_4, window_bounds = array<i64: 512, 128>}]} {
    %c0 = arith.constant 0 : index
    %c0_0 = arith.constant 0 : index
    %0 = vector.load %arg1[%c0, %c0_0] : memref<512x2592xf32, #tpu.memory_space<vmem>>, vector<512x2592xf32>
    %c0_1 = arith.constant 0 : index
    %c0_2 = arith.constant 0 : index
    %1 = vector.load %arg2[%c0_1, %c0_2] : memref<2592x128xf32, #tpu.memory_space<vmem>>, vector<2592x128xf32>
    %cst = arith.constant dense<0.000000e+00> : vector<512x128xf32>
    %2 = tpu.matmul %0, %1, %cst {dimension_numbers = #tpu.dot_dimension_numbers<[1], [0], [0], [1], [0, 0, 1, 1], [], []>} : vector<512x2592xf32>, vector<2592x128xf32>, vector<512x128xf32> -> vector<512x128xf32>
    %c0_3 = arith.constant 0 : index
    %c0_4 = arith.constant 0 : index
    %3 = vector.load %arg3[%c0_3, %c0_4] : memref<1x128xf32, #tpu.memory_space<vmem>>, vector<1x128xf32>
    %4 = vector.broadcast %3 : vector<1x128xf32> to vector<512x128xf32>
    %5 = arith.addf %2, %4 : vector<512x128xf32>
    %6 = math.tanh %5 : vector<512x128xf32>
    %c0_5 = arith.constant 0 : index
    %c0_6 = arith.constant 0 : index
    %7 = vector.load %arg5[%c0_5, %c0_6] : memref<512x128xf32, #tpu.memory_space<vmem>>, vector<512x128xf32>
    tpu.vector_store %arg5[%c0_5, %c0_6], %6 {strides = array<i32>} : memref<512x128xf32, #tpu.memory_space<vmem>>, vector<512x128xf32>,
    return
  }
  func.func @transform_0(%arg0: i32) -> (i32, i32) {
    %c0_i32 = arith.constant 0 : i32
    %c0_i32_0 = arith.constant 0 : i32
    return %arg0, %c0_i32 : i32, i32
  }
  func.func @transform_1(%arg0: i32) -> (i32, i32) {
    %c0_i32 = arith.constant 0 : i32
    %c0_i32_0 = arith.constant 0 : i32
    %c0_i32_1 = arith.constant 0 : i32
    return %c0_i32, %c0_i32_0 : i32, i32
  }
  func.func @transform_2(%arg0: i32) -> (i32, i32) {
    %c0_i32 = arith.constant 0 : i32
    %c0_i32_0 = arith.constant 0 : i32
    %c0_i32_1 = arith.constant 0 : i32
    return %c0_i32, %c0_i32_0 : i32, i32
  }
  func.func @transform_3(%arg0: i32) -> (i32, i32) {
    %c0_i32 = arith.constant 0 : i32
    %c0_i32_0 = arith.constant 0 : i32
    %c0_i32_1 = arith.constant 0 : i32
    return %c0_i32, %c0_i32_0 : i32, i32
  }
  func.func @transform_4(%arg0: i32) -> (i32, i32) {
    %c0_i32 = arith.constant 0 : i32
    %c0_i32_0 = arith.constant 0 : i32
    return %arg0, %c0_i32 : i32, i32
  }
}

</mosaic_0001>

<bundles_post_ra>
// kernel: generator_forward.15
= control target key start
LH: loop header
LB: loop body
LE: loop exit
PB: predicated region body
PF: predicated region fallthrough
CT: control target
= control target key end

     0   :  { %vm97_vm0 = vcmask 261120   ;;  %vm515_vm1 = vcmask 1040384   ;;  %s1091_s1 = inlined_call_operand.vmem [shape: f32[288,128], index: 1, kind: input, shape index: {}]   ;;  %s1092_s0 = inlined_call_operand.vmem [shape: f32[128,288], index: 0, kind: input, shape index: {}]   ;;  %s1093_s3 = inlined_call_operand.vmem [shape: f32[2,128], index: 3, kind: output, shape index: {1}]   ;;  %s1094_s2 = inlined_call_operand.vmem [shape: f32[128,128], index: 2, kind: output, shape index: {0}]  }
   0x1   :  { %v77_v0 = vld [vmem:[%s1091_s1 + $0x80] sm:$0xff]  ;;  %v78_v1 = vld [vmem:[%s1091_s1 + $0x88] sm:$0xff]  ;;  %v79_v5 = vld [vmem:[%s1091_s1 + $0x90] sm:$0xff] }
   0x2   :  { %v61_v2 = vld [vmem:[%s1091_s1] sm:$0xff]  ;;  %v676_v3 = vpack.c.bf16 %v78_v1, %v77_v0  ;;  %v62_v4 = vld [vmem:[%s1091_s1 + $0x8] sm:$0xff]  ;;  %v80_v6 = vld [vmem:[%s1091_s1 + $0x98] sm:$0xff] }
   0x3   :  { %v678_v7 = vpack.c.bf16 %v62_v4, %v61_v2  ;;  %v680_v8 = vpack.c.bf16 %v80_v6, %v79_v5  ;;  %v63_v9 = vld [vmem:[%s1091_s1 + $0x10] sm:$0xff]  ;;  %v64_v10 = vld [vmem:[%s1091_s1 + $0x18] sm:$0xff]  ;;  %v81_v11 = vld [vmem:[%s1091_s1 + $0xa0] sm:$0xff] }
   0x4   :  { %677 = vmatprep.subr.bf16.mxu0 %v676_v3  ;;  %716 = vmatprep.subr.bf16.mxu1 %v676_v3  ;;  %v82_v12 = vld [vmem:[%s1091_s1 + $0xa8] sm:$0xff]  ;;  %v682_v13 = vpack.c.bf16 %v64_v10, %v63_v9  ;;  %v65_v15 = vld [vmem:[%s1091_s1 + $0x20] sm:$0xff]  ;;  %v83_v17 = vld [vmem:[%s1091_s1 + $0xb0] sm:$0xff] }
   0x5   :  { %679 = vmatpush3.bf16.msra.mxu0 %v678_v7  ;;  %724 = vmatpush3.bf16.msra.mxu1 %v678_v7  ;;  %v684_v14 = vpack.c.bf16 %v82_v12, %v81_v11  ;;  %v66_v16 = vld [vmem:[%s1091_s1 + $0x28] sm:$0xff]  ;;  %v84_v18 = vld [vmem:[%s1091_s1 + $0xb8] sm:$0xff]  ;;  %v67_v21 = vld [vmem:[%s1091_s1 + $0x30] sm:$0xff] }
   0x6   :  { %681 = vmatprep.subr.bf16.mxu0 %v680_v8  ;;  %717 = vmatprep.subr.bf16.mxu1 %v680_v8  ;;  %v686_v19 = vpack.c.bf16 %v66_v16, %v65_v15  ;;  %v688_v20 = vpack.c.bf16 %v84_v18, %v83_v17  ;;  %v68_v22 = vld [vmem:[%s1091_s1 + $0x38] sm:$0xff]  ;;  %v85_v23 = vld [vmem:[%s1091_s1 + $0xc0] sm:$0xff]  ;;  %v86_v24 = vld [vmem:[%s1091_s1 + $0xc8] sm:$0xff] }
   0x7   :  { %v14_v25 = vld [vmem:[%s1092_s0 + $0x8] sm:$0xff]  ;;  %v690_v27 = vpack.c.bf16 %v68_v22, %v67_v21  ;;  %v692_v28 = vpack.c.bf16 %v86_v24, %v85_v23  ;;  %v69_v29 = vld [vmem:[%s1091_s1 + $0x40] sm:$0xff]  ;;  %v87_v31 = vld [vmem:[%s1091_s1 + $0xd0] sm:$0xff] }
   0x8   :  { %210 = vmatprep.mubr.f32.mxu0 %v14_v25  ;;  %v50_v26 = vld [vmem:[%s1092_s0 + $0x128] sm:$0xff]  ;;  %v88_v32 = vld [vmem:[%s1091_s1 + $0xd8] sm:$0xff]  ;;  %v71_v35 = vld [vmem:[%s1091_s1 + $0x50] sm:$0xff] }
   0x9   :  { %683 = vmatpush3.bf16.msra.mxu0 %v682_v13  ;;  %725 = vmatpush3.bf16.msra.mxu1 %v682_v13  ;;  %v70_v30 = vld [vmem:[%s1091_s1 + $0x48] sm:$0xff]  ;;  %v696_v34 = vpack.c.bf16 %v88_v32, %v87_v31  ;;  %v72_v36 = vld [vmem:[%s1091_s1 + $0x58] sm:$0xff]  ;;  %v89_v37 = vld [vmem:[%s1091_s1 + $0xe0] sm:$0xff] }
   0xa   :  { %685 = vmatprep.subr.bf16.mxu0 %v684_v14  ;;  %718 = vmatprep.subr.bf16.mxu1 %v684_v14  ;;  %v694_v33 = vpack.c.bf16 %v70_v30, %v69_v29  ;;  %v90_v38 = vld [vmem:[%s1091_s1 + $0xe8] sm:$0xff]  ;;  %v698_v39 = vpack.c.bf16 %v72_v36, %v71_v35  ;;  %v73_v41 = vld [vmem:[%s1091_s1 + $0x60] sm:$0xff]  ;;  %v91_v43 = vld [vmem:[%s1091_s1 + $0xf0] sm:$0xff] }
   0xb   :  { %270 = vmatprep.mubr.f32.mxu1 %v50_v26  ;;  %v700_v40 = vpack.c.bf16 %v90_v38, %v89_v37  ;;  %v74_v42 = vld [vmem:[%s1091_s1 + $0x68] sm:$0xff]  ;;  %v92_v44 = vld [vmem:[%s1091_s1 + $0xf8] sm:$0xff]  ;;  %v75_v47 = vld [vmem:[%s1091_s1 + $0x70] sm:$0xff]  ;;  %v733_v38 = vmov 0.0  }
   0xc   :  { %v702_v45 = vpack.c.bf16 %v74_v42, %v73_v41  ;;  %v704_v46 = vpack.c.bf16 %v92_v44, %v91_v43  ;;  %v76_v48 = vld [vmem:[%s1091_s1 + $0x78] sm:$0xff]  ;;  %v93_v49 = vld [vmem:[%s1091_s1 + $0x100] sm:$0xff]  ;;  %v94_v50 = vld [vmem:[%s1091_s1 + $0x108] sm:$0xff]  ;;  %456 = vst [vmem:[%s1093_s3] sm:$0x3] %v733_v38 }
   0xd   :  { %687 = vmatpush3.bf16.msra.mxu0 %v686_v19  ;;  %726 = vmatpush3.bf16.msra.mxu1 %v686_v19  ;;  %v706_v51 = vpack.c.bf16 %v76_v48, %v75_v47  ;;  %v708_v52 = vpack.c.bf16 %v94_v50, %v93_v49  ;;  %v95_v53 = vld [vmem:[%s1091_s1 + $0x110] sm:$0xff]  ;;  %v96_v54 = vld [vmem:[%s1091_s1 + $0x118] sm:$0xff]  ;;  %v13_v55 = vld [vmem:[%s1092_s0] sm:$0xff] }
   0xe   :  { %689 = vmatprep.subr.bf16.mxu0 %v688_v20  ;;  %719 = vmatprep.subr.bf16.mxu1 %v688_v20  ;;  %v49_v56 = vld [vmem:[%s1092_s0 + $0x120] sm:$0xff]  ;;  %v712_v59 = vpack.c.bf16 %v96_v54, %v95_v53  ;;  %v16_v60 = vld [vmem:[%s1092_s0 + $0x18] sm:$0xff]  ;;  %v19_v0 = vld [vmem:[%s1092_s0 + $0x30] sm:$0xff] }
   0xf   :  { %v17_v57 = vld [vmem:[%s1092_s0 + $0x20] sm:$0xff]  ;;  %v52_v61 = vld [vmem:[%s1092_s0 + $0x138] sm:$0xff]  ;;  %v55_v1 = vld [vmem:[%s1092_s0 + $0x150] sm:$0xff] }
  0x10   :  { %v53_v58 = vld [vmem:[%s1092_s0 + $0x140] sm:$0xff]  ;;  %v20_v62 = vld [vmem:[%s1092_s0 + $0x38] sm:$0xff]  ;;  %v23_v2 = vld [vmem:[%s1092_s0 + $0x50] sm:$0xff] }
  0x11   :  { %691 = vmatpush3.bf16.msra.mxu0 %v690_v27  ;;  %727 = vmatpush3.bf16.msra.mxu1 %v690_v27  ;;  %v56_v63 = vld [vmem:[%s1092_s0 + $0x158] sm:$0xff]  ;;  %v59_v3 = vld [vmem:[%s1092_s0 + $0x170] sm:$0xff]  ;;  %v22_v4 = vld [vmem:[%s1092_s0 + $0x48] sm:$0xff] }
  0x12   :  { %693 = vmatprep.subr.bf16.mxu0 %v692_v28  ;;  %720 = vmatprep.subr.bf16.mxu1 %v692_v28  ;;  %v58_v5 = vld [vmem:[%s1092_s0 + $0x168] sm:$0xff]  ;;  %v15_v7 = vld [vmem:[%s1092_s0 + $0x10] sm:$0xff]  ;;  %v25_v8 = vld [vmem:[%s1092_s0 + $0x60] sm:$0xff] }
  0x13   :  { %v26_v6 = vld [vmem:[%s1092_s0 + $0x68] sm:$0xff]  ;;  %v29_v10 = vld [vmem:[%s1092_s0 + $0x80] sm:$0xff]  ;;  %v28_v12 = vld [vmem:[%s1092_s0 + $0x78] sm:$0xff] }
  0x14   :  { %v18_v9 = vld [vmem:[%s1092_s0 + $0x28] sm:$0xff]  ;;  %v21_v11 = vld [vmem:[%s1092_s0 + $0x40] sm:$0xff]  ;;  %v24_v13 = vld [vmem:[%s1092_s0 + $0x58] sm:$0xff] }
  0x15   :  { %695 = vmatpush3.bf16.msra.mxu0 %v694_v33  ;;  %728 = vmatpush3.bf16.msra.mxu1 %v694_v33  ;;  %v32_v14 = vld [vmem:[%s1092_s0 + $0x98] sm:$0xff]  ;;  %v27_v15 = vld [vmem:[%s1092_s0 + $0x70] sm:$0xff]  ;;  %v30_v17 = vld [vmem:[%s1092_s0 + $0x88] sm:$0xff] }
  0x16   :  { %697 = vmatprep.subr.bf16.mxu0 %v696_v34  ;;  %721 = vmatprep.subr.bf16.mxu1 %v696_v34  ;;  %v31_v16 = vld [vmem:[%s1092_s0 + $0x90] sm:$0xff]  ;;  %v33_v19 = vld [vmem:[%s1092_s0 + $0xa0] sm:$0xff]  ;;  %v34_v20 = vld [vmem:[%s1092_s0 + $0xa8] sm:$0xff] }
  0x17   :  { %v35_v18 = vld [vmem:[%s1092_s0 + $0xb0] sm:$0xff]  ;;  %v36_v21 = vld [vmem:[%s1092_s0 + $0xb8] sm:$0xff]  ;;  %v38_v22 = vld [vmem:[%s1092_s0 + $0xc8] sm:$0xff] }
  0x18   :  { %v39_v23 = vld [vmem:[%s1092_s0 + $0xd0] sm:$0xff]  ;;  %v37_v24 = vld [vmem:[%s1092_s0 + $0xc0] sm:$0xff]  ;;  %v42_v25 = vld [vmem:[%s1092_s0 + $0xe8] sm:$0xff] }
  0x19   :  { %699 = vmatpush3.bf16.msra.mxu0 %v698_v39  ;;  %729 = vmatpush3.bf16.msra.mxu1 %v698_v39  ;;  %v41_v26 = vld [vmem:[%s1092_s0 + $0xe0] sm:$0xff]  ;;  %v40_v28 = vld [vmem:[%s1092_s0 + $0xd8] sm:$0xff]  ;;  %v51_v31 = vld [vmem:[%s1092_s0 + $0x130] sm:$0xff] }
  0x1a   :  { %701 = vmatprep.subr.bf16.mxu0 %v700_v40  ;;  %722 = vmatprep.subr.bf16.mxu1 %v700_v40  ;;  %v45_v27 = vld [vmem:[%s1092_s0 + $0x100] sm:$0xff]  ;;  %v48_v29 = vld [vmem:[%s1092_s0 + $0x118] sm:$0xff]  ;;  %v43_v32 = vld [vmem:[%s1092_s0 + $0xf0] sm:$0xff] }
  0x1b   :  { %v44_v30 = vld [vmem:[%s1092_s0 + $0xf8] sm:$0xff]  ;;  %v54_v33 = vld [vmem:[%s1092_s0 + $0x148] sm:$0xff]  ;;  %v47_v34 = vld [vmem:[%s1092_s0 + $0x110] sm:$0xff] }
  0x1c   :  { %v57_v35 = vld [vmem:[%s1092_s0 + $0x160] sm:$0xff]  ;;  %v46_v36 = vld [vmem:[%s1092_s0 + $0x108] sm:$0xff]  ;;  %v60_v37 = vld [vmem:[%s1092_s0 + $0x178] sm:$0xff] }
  0x1d   :  { %703 = vmatpush3.bf16.msra.mxu0 %v702_v45  ;;  %730 = vmatpush3.bf16.msra.mxu1 %v702_v45 }
  0x1e   :  { %705 = vmatprep.subr.bf16.mxu0 %v704_v46  ;;  %723 = vmatprep.subr.bf16.mxu1 %v704_v46 }
  0x21   :  { %707 = vmatpush3.bf16.msra.mxu0 %v706_v51  ;;  %731 = vmatpush3.bf16.msra.mxu1 %v706_v51 }
  0x22   :  { %709 = vmatprep.subr.bf16.mxu1 %v708_v52 }
  0x24   :  { %211 = vmatmul.mubr.f32.vlgmr.msra.gmra.mrb[0].mxu0 %v13_v55  ;;  %271 = vmatmul.mubr.f32.vlgmr.msra.gmra.mrb[0].mxu1 %v49_v56 }
  0x25   :  { %215 = vmatprep.mubr.f32.mxu0 %v17_v57  ;;  %275 = vmatprep.mubr.f32.mxu1 %v53_v58 }
  0x26   :  { %711 = vmatpush3.bf16.msra.mxu1 %v708_v52 }
  0x27   :  { %713 = vmatprep.subr.bf16.mxu1 %v712_v59 }
  0x28   :  { %216 = vmatmul.mubr.f32.gmra.mrb[2].mxu0 %v16_v60  ;;  %276 = vmatmul.mubr.f32.gmra.mrb[2].mxu1 %v52_v61 }
  0x29   :  { %220 = vmatprep.mubr.f32.mxu0 %v20_v62  ;;  %280 = vmatprep.mubr.f32.mxu1 %v56_v63 }
  0x2a   :  { %715 = vmatpush3.bf16.msra.mxu1 %v712_v59 }
  0x2c   :  { %221 = vmatmul.mubr.f32.gmra.mrb[4].mxu0 %v19_v0  ;;  %281 = vmatmul.mubr.f32.gmra.mrb[4].mxu1 %v55_v1 }
  0x2d   :  { %225 = vmatprep.mubr.f32.mxu0 %v23_v2  ;;  %285 = vmatprep.mubr.f32.mxu1 %v59_v3 }
  0x30   :  { %226 = vmatmul.mubr.f32.gmra.mrb[6].mxu0 %v22_v4  ;;  %286 = vmatmul.mubr.f32.gmra.mrb[6].mxu1 %v58_v5 }
  0x31   :  { %230 = vmatprep.mubr.f32.mxu0 %v26_v6  ;;  %652 = vmatprep.mubr.msk.f32.mxu1 %vm97_vm0, %v15_v7 }
  0x34   :  { %231 = vmatmul.mubr.f32.gmra.mrb[8].mxu0 %v25_v8  ;;  %653 = vmatmul.mubr.msk.f32.vlgmr.msra.gmra.mrb[8].mxu1 %vm97_vm0, %v18_v9 }
  0x35   :  { %235 = vmatprep.mubr.f32.mxu0 %v29_v10  ;;  %655 = vmatprep.mubr.msk.f32.mxu1 %vm97_vm0, %v21_v11 }
  0x38   :  { %236 = vmatmul.mubr.f32.gmra.mrb[10].mxu0 %v28_v12  ;;  %656 = vmatmul.mubr.msk.f32.gmra.mrb[10].mxu1 %vm97_vm0, %v24_v13 }
  0x39   :  { %240 = vmatprep.mubr.f32.mxu0 %v32_v14  ;;  %658 = vmatprep.mubr.msk.f32.mxu1 %vm97_vm0, %v27_v15 }
  0x3c   :  { %241 = vmatmul.mubr.f32.gmra.mrb[12].mxu0 %v31_v16  ;;  %659 = vmatmul.mubr.msk.f32.gmra.mrb[12].mxu1 %vm97_vm0, %v30_v17 }
  0x3d   :  { %245 = vmatprep.mubr.f32.mxu0 %v35_v18  ;;  %661 = vmatprep.mubr.msk.f32.mxu1 %vm97_vm0, %v33_v19 }
  0x40   :  { %246 = vmatmul.mubr.f32.gmra.mrb[14].mxu0 %v34_v20  ;;  %662 = vmatmul.mubr.msk.f32.gmra.mrb[14].mxu1 %vm97_vm0, %v36_v21 }
  0x41   :  { %250 = vmatprep.mubr.f32.mxu0 %v38_v22  ;;  %664 = vmatprep.mubr.msk.f32.mxu1 %vm97_vm0, %v39_v23 }
  0x44   :  { %251 = vmatmul.mubr.f32.gmra.mrb[16].mxu0 %v37_v24  ;;  %665 = vmatmul.mubr.msk.f32.gmra.mrb[16].mxu1 %vm97_vm0, %v42_v25 }
  0x45   :  { %255 = vmatprep.mubr.f32.mxu0 %v41_v26  ;;  %667 = vmatprep.mubr.msk.f32.mxu1 %vm97_vm0, %v45_v27 }
  0x48   :  { %256 = vmatmul.mubr.f32.gmra.mrb[18].mxu0 %v40_v28  ;;  %668 = vmatmul.mubr.msk.f32.gmra.mrb[18].mxu1 %vm97_vm0, %v48_v29 }
  0x49   :  { %260 = vmatprep.mubr.f32.mxu0 %v44_v30  ;;  %670 = vmatprep.mubr.msk.f32.mxu1 %vm97_vm0, %v51_v31 }
  0x4c   :  { %261 = vmatmul.mubr.f32.gmra.mrb[20].mxu0 %v43_v32  ;;  %671 = vmatmul.mubr.msk.f32.gmra.mrb[20].mxu1 %vm97_vm0, %v54_v33 }
  0x4d   :  { %265 = vmatprep.mubr.f32.mxu0 %v47_v34  ;;  %673 = vmatprep.mubr.msk.f32.mxu1 %vm97_vm0, %v57_v35 }
  0x50   :  { %266 = vmatmul.mubr.f32.gmra.mrb[22].mxu0 %v46_v36  ;;  %674 = vmatmul.mubr.msk.f32.gmra.mrb[22].mxu1 %vm97_vm0, %v60_v37 }
  0xf7   :  { %v576_v39 = vpop.f32.mrb[0].mxu0  ;;  %v612_v40 = vpop.f32.mrb[0].mxu1 }
  0xf8   :  { %v577_v41 = vpop.f32.mrb[1].mxu0  ;;  %v613_v42 = vpop.f32.mrb[1].mxu1 }
  0xf9   :  { %v578_v43 = vadd.f32 %v577_v41, %v576_v39  ;;  %v1025_v44 = vadd.f32 %v613_v42, %v612_v40 }
  0xfb   :  { %v579_v45 = vpop.f32.mrb[2].mxu0  ;;  %v615_v46 = vpop.f32.mrb[2].mxu1 }
  0xfc   :  { %v580_v47 = vpop.f32.mrb[3].mxu0  ;;  %v616_v48 = vpop.f32.mrb[3].mxu1 }
  0xfd   :  { %v581_v49 = vadd.f32 %v580_v47, %v579_v45  ;;  %v1027_v50 = vadd.f32 %v616_v48, %v615_v46 }
  0xff   :  { %v582_v51 = vpop.f32.mrb[4].mxu0  ;;  %v618_v52 = vpop.f32.mrb[4].mxu1 }
 0x100   :  { %v583_v53 = vpop.f32.mrb[5].mxu0  ;;  %v619_v54 = vpop.f32.mrb[5].mxu1 }
 0x101   :  { %v584_v55 = vadd.f32 %v583_v53, %v582_v51  ;;  %v1029_v56 = vadd.f32 %v619_v54, %v618_v52 }
 0x103   :  { %v585_v57 = vpop.f32.mrb[6].mxu0  ;;  %v621_v58 = vpop.f32.mrb[6].mxu1 }
 0x104   :  { %v586_v59 = vpop.f32.mrb[7].mxu0  ;;  %v622_v60 = vpop.f32.mrb[7].mxu1 }
 0x105   :  { %v587_v61 = vadd.f32 %v586_v59, %v585_v57  ;;  %v1031_v62 = vadd.f32 %v622_v60, %v621_v58 }
 0x107   :  { %v588_v63 = vpop.f32.mrb[8].mxu0  ;;  %v654_v0 = vpop.f32.mrb[8].mxu1 }
 0x108   :  { %v363_v1 = vadd.f32 %v654_v0, %v581_v49  ;;  %v589_v2 = vpop.f32.mrb[9].mxu0  ;;  %v357_v3 = vpop.f32.mrb[9].mxu1 }
 0x109   :  { %v590_v4 = vadd.f32 %v589_v2, %v588_v63  ;;  %v358_v5 = vadd.f32 %v578_v43, %v357_v3 }
 0x10a   :  { %437 = vst [vmem:[%s1094_s2 + $0x8] sm:$0xff] %v363_v1  ;;  %v479_v6 = vmul.f32 %v363_v1, %v363_v1 }
 0x10b   :  { %436 = vst [vmem:[%s1094_s2] sm:$0xff] %v358_v5  ;;  %v457_v7 = vadd.f32 %v363_v1, %v358_v5  ;;  %v478_v8 = vmul.f32 %v358_v5, %v358_v5  ;;  %v591_v9 = vpop.f32.mrb[10].mxu0  ;;  %v657_v10 = vpop.f32.mrb[10].mxu1 }
 0x10c   :  { %v373_v11 = vadd.f32 %v657_v10, %v587_v61  ;;  %v592_v12 = vpop.f32.mrb[11].mxu0  ;;  %v367_v13 = vpop.f32.mrb[11].mxu1 }
 0x10d   :  { %v494_v14 = vadd.f32 %v479_v6, %v478_v8  ;;  %v593_v15 = vadd.f32 %v592_v12, %v591_v9  ;;  %v368_v16 = vadd.f32 %v584_v55, %v367_v13 }
 0x10e   :  { %439 = vst [vmem:[%s1094_s2 + $0x18] sm:$0xff] %v373_v11  ;;  %v481_v21 = vmul.f32 %v373_v11, %v373_v11 }
 0x10f   :  { %438 = vst [vmem:[%s1094_s2 + $0x10] sm:$0xff] %v368_v16  ;;  %v458_v17 = vadd.f32 %v457_v7, %v368_v16  ;;  %v480_v18 = vmul.f32 %v368_v16, %v368_v16  ;;  %v594_v19 = vpop.f32.mrb[12].mxu0  ;;  %v660_v20 = vpop.f32.mrb[12].mxu1 }
 0x110   :  { %v383_v22 = vadd.f32 %v660_v20, %v593_v15  ;;  %v595_v23 = vpop.f32.mrb[13].mxu0  ;;  %v377_v24 = vpop.f32.mrb[13].mxu1 }
 0x111   :  { %v495_v25 = vadd.f32 %v494_v14, %v480_v18  ;;  %v596_v26 = vadd.f32 %v595_v23, %v594_v19  ;;  %v378_v27 = vadd.f32 %v590_v4, %v377_v24  ;;  %v459_v28 = vadd.f32 %v458_v17, %v373_v11 }
 0x112   :  { %441 = vst [vmem:[%s1094_s2 + $0x28] sm:$0xff] %v383_v22  ;;  %v483_v34 = vmul.f32 %v383_v22, %v383_v22 }
 0x113   :  { %440 = vst [vmem:[%s1094_s2 + $0x20] sm:$0xff] %v378_v27  ;;  %v460_v29 = vadd.f32 %v459_v28, %v378_v27  ;;  %v482_v30 = vmul.f32 %v378_v27, %v378_v27  ;;  %v496_v31 = vadd.f32 %v495_v25, %v481_v21  ;;  %v597_v32 = vpop.f32.mrb[14].mxu0  ;;  %v663_v33 = vpop.f32.mrb[14].mxu1 }
 0x114   :  { %v598_v35 = vpop.f32.mrb[15].mxu0  ;;  %v387_v36 = vpop.f32.mrb[15].mxu1 }
 0x115   :  { %v497_v37 = vadd.f32 %v496_v31, %v482_v30  ;;  %v599_v38 = vadd.f32 %v598_v35, %v597_v32  ;;  %v388_v39 = vadd.f32 %v596_v26, %v387_v36  ;;  %v461_v40 = vadd.f32 %v460_v29, %v383_v22 }
 0x117   :  { %v393_v41 = vadd.f32 %v663_v33, %v599_v38  ;;  %442 = vst [vmem:[%s1094_s2 + $0x30] sm:$0xff] %v388_v39  ;;  %v462_v42 = vadd.f32 %v461_v40, %v388_v39  ;;  %v484_v43 = vmul.f32 %v388_v39, %v388_v39  ;;  %v498_v45 = vadd.f32 %v497_v37, %v483_v34  ;;  %v600_v46 = vpop.f32.mrb[16].mxu0  ;;  %v666_v47 = vpop.f32.mrb[16].mxu1 }
 0x118   :  { %v601_v48 = vpop.f32.mrb[17].mxu0  ;;  %v397_v49 = vpop.f32.mrb[17].mxu1 }
 0x119   :  { %443 = vst [vmem:[%s1094_s2 + $0x38] sm:$0xff] %v393_v41  ;;  %v485_v51 = vmul.f32 %v393_v41, %v393_v41  ;;  %v499_v52 = vadd.f32 %v498_v45, %v484_v43  ;;  %v602_v53 = vadd.f32 %v601_v48, %v600_v46  ;;  %v463_v54 = vadd.f32 %v462_v42, %v393_v41 }
 0x11b   :  { %v398_v55 = vadd.f32 %v602_v53, %v397_v49  ;;  %v500_v57 = vadd.f32 %v499_v52, %v485_v51  ;;  %v603_v58 = vpop.f32.mrb[18].mxu0  ;;  %v669_v59 = vpop.f32.mrb[18].mxu1  ;;  %v517_v51 = vld [vmem:[%s1093_s3] sm:$0x3] }
 0x11c   :  { %v604_v60 = vpop.f32.mrb[19].mxu0  ;;  %v407_v61 = vpop.f32.mrb[19].mxu1 }
 0x11d   :  { %444 = vst [vmem:[%s1094_s2 + $0x40] sm:$0xff] %v398_v55  ;;  %v464_v63 = vadd.f32 %v463_v54, %v398_v55  ;;  %v486_v0 = vmul.f32 %v398_v55, %v398_v55  ;;  %v605_v1 = vadd.f32 %v604_v60, %v603_v58 }
 0x11f   :  { %v501_v2 = vadd.f32 %v500_v57, %v486_v0  ;;  %v403_v3 = vadd.f32 %v666_v47, %v605_v1  ;;  %v606_v4 = vpop.f32.mrb[20].mxu0  ;;  %v672_v5 = vpop.f32.mrb[20].mxu1 }
 0x120   :  { %v423_v6 = vadd.f32 %v672_v5, %v1027_v50  ;;  %v607_v7 = vpop.f32.mrb[21].mxu0  ;;  %v417_v8 = vpop.f32.mrb[21].mxu1 }
 0x121   :  { %445 = vst [vmem:[%s1094_s2 + $0x48] sm:$0xff] %v403_v3  ;;  %v465_v9 = vadd.f32 %v464_v63, %v403_v3  ;;  %v487_v10 = vmul.f32 %v403_v3, %v403_v3  ;;  %v608_v11 = vadd.f32 %v607_v7, %v606_v4  ;;  %v418_v12 = vadd.f32 %v1025_v44, %v417_v8 }
 0x122   :  { %449 = vst [vmem:[%s1094_s2 + $0x68] sm:$0xff] %v423_v6 }
 0x123   :  { %v502_v13 = vadd.f32 %v501_v2, %v487_v10  ;;  %v408_v14 = vadd.f32 %v608_v11, %v407_v61  ;;  %448 = vst [vmem:[%s1094_s2 + $0x60] sm:$0xff] %v418_v12  ;;  %v609_v50 = vpop.f32.mrb[22].mxu0  ;;  %v675_v15 = vpop.f32.mrb[22].mxu1  ;;  %v490_v25 = vmul.f32 %v418_v12, %v418_v12 }
 0x124   :  { %v433_v16 = vadd.f32 %v675_v15, %v1031_v62  ;;  %v610_v17 = vpop.f32.mrb[23].mxu0  ;;  %v427_v18 = vpop.f32.mrb[23].mxu1 }
 0x125   :  { %446 = vst [vmem:[%s1094_s2 + $0x50] sm:$0xff] %v408_v14  ;;  %v466_v44 = vadd.f32 %v465_v9, %v408_v14  ;;  %v488_v19 = vmul.f32 %v408_v14, %v408_v14  ;;  %v611_v20 = vadd.f32 %v610_v17, %v609_v50  ;;  %v428_v21 = vadd.f32 %v1029_v56, %v427_v18 }
 0x126   :  { %451 = vst [vmem:[%s1094_s2 + $0x78] sm:$0xff] %v433_v16  ;;  %v491_v56 = vmul.f32 %v423_v6, %v423_v6  ;;  %v493_v33 = vmul.f32 %v433_v16, %v433_v16 }
 0x127   :  { %v503_v22 = vadd.f32 %v502_v13, %v488_v19  ;;  %v413_v23 = vadd.f32 %v669_v59, %v611_v20  ;;  %450 = vst [vmem:[%s1094_s2 + $0x70] sm:$0xff] %v428_v21  ;;  %v492_v31 = vmul.f32 %v428_v21, %v428_v21 }
 0x129   :  { %447 = vst [vmem:[%s1094_s2 + $0x58] sm:$0xff] %v413_v23  ;;  %v467_v62 = vadd.f32 %v466_v44, %v413_v23  ;;  %v489_v24 = vmul.f32 %v413_v23, %v413_v23 }
 0x12b   :  { %v504_v26 = vadd.f32 %v503_v22, %v489_v24  ;;  %v468_v27 = vadd.f32 %v467_v62, %v418_v12 }
 0x12d   :  { %v469_v28 = vadd.f32 %v468_v27, %v423_v6  ;;  %v505_v29 = vadd.f32 %v504_v26, %v490_v25 }
 0x12f   :  { %v470_v30 = vadd.f32 %v469_v28, %v428_v21  ;;  %v506_v32 = vadd.f32 %v505_v29, %v491_v56 }
 0x131   :  { %v471_v34 = vadd.f32 %v470_v30, %v433_v16  ;;  %v507_v35 = vadd.f32 %v506_v32, %v492_v31 }
 0x133   :  { %v472_v36 = vrot.slane %v471_v34, 4  ;;  %v508_v37 = vadd.f32 %v507_v35, %v493_v33 }
 0x135   :  { %v473_v38 = vadd.f32 %v472_v36, %v471_v34  ;;  %v509_v39 = vrot.slane %v508_v37, 4 }
 0x137   :  { %v474_v40 = vrot.slane %v473_v38, 2  ;;  %v510_v41 = vadd.f32 %v509_v39, %v508_v37 }
 0x139   :  { %v475_v42 = vadd.f32 %v474_v40, %v473_v38  ;;  %v511_v43 = vrot.slane %v510_v41, 2 }
 0x13b   :  { %v476_v45 = vrot.slane %v475_v42, 1  ;;  %v512_v46 = vadd.f32 %v511_v43, %v510_v41 }
 0x13d   :  { %v513_v47 = vrot.slane %v512_v46, 1  ;;  %v477_v48 = vadd.f32 %v476_v45, %v475_v42 }
 0x13f   :  { %v514_v49 = vadd.f32 %v513_v47, %v512_v46 }
 0x141   :  { %v516_v52 = vsel %vm515_vm1, %v477_v48, %v514_v49 }
 0x142   :  { %v518_v53 = vadd.f32 %v517_v51, %v516_v52 }
 0x144   :  { %519 = vst [vmem:[%s1093_s3] sm:$0x3] %v518_v53 }

// kernel: generator_forward.16
= control target key start
LH: loop header
LB: loop body
LE: loop exit
PB: predicated region body
PF: predicated region fallthrough
CT: control target
= control target key end

     0   :  { %v51_v8 = vlaneseq  ;;  %s370_s1 = inlined_call_operand.vmem [shape: f32[2,128], index: 1, kind: input, shape index: {}]   ;;  %s371_s2 = inlined_call_operand.vmem [shape: f32[1,128], index: 2, kind: input, shape index: {}]   ;;  %s372_s0 = inlined_call_operand.vmem [shape: f32[128,128], index: 0, kind: input, shape index: {}]   ;;  %s373_s3 = inlined_call_operand.vmem [shape: f32[1,128], index: 3, kind: input, shape index: {}]   ;;  %s374_s4 = inlined_call_operand.vmem [shape: f32[1,128], index: 4, kind: input, shape index: {}]   ;;  %s375_s5 = inlined_call_operand.vmem [shape: f32[128,128], index: 5, kind: output, shape index: {}]  }
   0x1   :  { %v20_v0 = vld [vmem:[%s370_s1] sm:$0x1]  ;;  %v22_v1 = vld [vmem:[%s370_s1 + $0x1] sm:$0x1]  ;;  %v35_v16 = vld [vmem:[%s372_s0 + $0x8] sm:$0xff] }
   0x2   :  { %v21_v2 = vmul.f32 0.0078125, %v20_v0  ;;  %v23_v3 = vmul.f32 0.0078125, %v22_v1  ;;  %v52_v9 = vshrl.u32 %v51_v8, 7  ;;  %v27_v10 = vld [vmem:[%s371_s2] sm:$0x1]  ;;  %v36_v17 = vld [vmem:[%s372_s0 + $0x10] sm:$0xff] }
   0x3   :  { %v31_v14 = vld [vmem:[%s373_s3] sm:$0x1]  ;;  %v37_v18 = vld [vmem:[%s372_s0 + $0x18] sm:$0xff]  ;;  %v39_v22 = vld [vmem:[%s372_s0 + $0x28] sm:$0xff] }
   0x4   :  { %v24_v4 = vmul.f32 %v21_v2, %v21_v2  ;;  %v53_v11 = vsub.s32 0, %v52_v9  ;;  %v34_v15 = vld [vmem:[%s372_s0] sm:$0xff]  ;;  %v40_v23 = vld [vmem:[%s372_s0 + $0x30] sm:$0xff]  ;;  %v41_v24 = vld [vmem:[%s372_s0 + $0x38] sm:$0xff] }
   0x5   :  { %v38_v19 = vld [vmem:[%s372_s0 + $0x20] sm:$0xff]  ;;  %v43_v26 = vld [vmem:[%s372_s0 + $0x48] sm:$0xff]  ;;  %v44_v27 = vld [vmem:[%s372_s0 + $0x50] sm:$0xff] }
   0x6   :  { %v25_v5 = vsub.f32 %v23_v3, %v24_v4  ;;  %v42_v25 = vld [vmem:[%s372_s0 + $0x40] sm:$0xff]  ;;  %v45_v32 = vld [vmem:[%s372_s0 + $0x58] sm:$0xff]  ;;  %v47_v34 = vld [vmem:[%s372_s0 + $0x68] sm:$0xff] }
   0x7   :  { %v46_v33 = vld [vmem:[%s372_s0 + $0x60] sm:$0xff] }
   0x8   :  { %v26_v6 = vmax.f32 %v25_v5, 0.0  ;;  %v273_v43 = vld [vmem:[%s374_s4] ss:$0 sm:$0xff] }
   0xa   :  { %v28_v7 = vadd.f32 1e-05, %v26_v6 }
   0xc   :  { %170 = vrsqrt.f32 %v28_v7 }
  0x16   :  { %v171_v12 = vpop.eup %170 }
  0x17   :  { %v30_v13 = vmul.f32 %v171_v12, %v27_v10 }
  0x19   :  { %v32_v20 = vmul.f32 %v30_v13, %v21_v2  ;;  %v229_v21 = vrot.slane %v30_v13, %v53_v11 }
  0x1b   :  { %v33_v28 = vsub.f32 %v31_v14, %v32_v20  ;;  %v56_v29 = vmul.f32 %v229_v21, %v34_v15  ;;  %v57_v30 = vmul.f32 %v229_v21, %v35_v16  ;;  %v58_v31 = vmul.f32 %v229_v21, %v36_v17  ;;  %v48_v14 = vld [vmem:[%s372_s0 + $0x70] sm:$0xff]  ;;  %v49_v17 = vld [vmem:[%s372_s0 + $0x78] sm:$0xff] }
  0x1c   :  { %v59_v35 = vmul.f32 %v229_v21, %v37_v18  ;;  %v60_v36 = vmul.f32 %v229_v21, %v38_v19  ;;  %v61_v37 = vmul.f32 %v229_v21, %v39_v22  ;;  %v62_v38 = vmul.f32 %v229_v21, %v40_v23 }
  0x1d   :  { %v265_v39 = vrot.slane %v33_v28, %v53_v11  ;;  %v63_v40 = vmul.f32 %v229_v21, %v41_v24  ;;  %v64_v41 = vmul.f32 %v229_v21, %v42_v25  ;;  %v65_v42 = vmul.f32 %v229_v21, %v43_v26 }
  0x1e   :  { %v66_v44 = vmul.f32 %v229_v21, %v44_v27  ;;  %v67_v45 = vmul.f32 %v229_v21, %v45_v32  ;;  %v68_v46 = vmul.f32 %v229_v21, %v46_v33  ;;  %v279_v47 = vmul.f32 %v229_v21, %v47_v34 }
  0x1f   :  { %v78_v48 = vadd.f32 %v265_v39, %v56_v29  ;;  %v79_v49 = vadd.f32 %v265_v39, %v57_v30  ;;  %v80_v50 = vadd.f32 %v265_v39, %v58_v31  ;;  %v81_v51 = vadd.f32 %v265_v39, %v59_v35 }
  0x20   :  { %v82_v52 = vadd.f32 %v265_v39, %v60_v36  ;;  %v83_v53 = vadd.f32 %v265_v39, %v61_v37  ;;  %v84_v54 = vadd.f32 %v265_v39, %v62_v38  ;;  %v85_v55 = vadd.f32 %v265_v39, %v63_v40 }
  0x21   :  { %vm94_vm0 = vcmp.gt.f32.partialorder %v78_v48, 0.0  ;;  %v117_v56 = vmul.f32 %v273_v43, %v78_v48  ;;  %vm95_vm1 = vcmp.gt.f32.partialorder %v79_v49, 0.0  ;;  %v118_v57 = vmul.f32 %v273_v43, %v79_v49 }
  0x22   :  { %vm96_vm2 = vcmp.gt.f32.partialorder %v80_v50, 0.0  ;;  %v119_v58 = vmul.f32 %v273_v43, %v80_v50  ;;  %vm97_vm3 = vcmp.gt.f32.partialorder %v81_v51, 0.0  ;;  %v120_v59 = vmul.f32 %v273_v43, %v81_v51 }
  0x23   :  { %v133_v60 = vsel %vm94_vm0, %v78_v48, %v117_v56  ;;  %v134_v61 = vsel %vm95_vm1, %v79_v49, %v118_v57  ;;  %vm98_vm4 = vcmp.gt.f32.partialorder %v82_v52, 0.0  ;;  %v121_v62 = vmul.f32 %v273_v43, %v82_v52 }
  0x24   :  { %149 = vst [vmem:[%s375_s5] sm:$0xff] %v133_v60  ;;  %150 = vst [vmem:[%s375_s5 + $0x8] sm:$0xff] %v134_v61  ;;  %v135_v63 = vsel %vm96_vm2, %v80_v50, %v119_v58  ;;  %v136_v0 = vsel %vm97_vm3, %v81_v51, %v120_v59  ;;  %vm99_vm5 = vcmp.gt.f32.partialorder %v83_v53, 0.0  ;;  %v122_v1 = vmul.f32 %v273_v43, %v83_v53 }
  0x25   :  { %151 = vst [vmem:[%s375_s5 + $0x10] sm:$0xff] %v135_v63  ;;  %152 = vst [vmem:[%s375_s5 + $0x18] sm:$0xff] %v136_v0  ;;  %v137_v2 = vsel %vm98_vm4, %v82_v52, %v121_v62  ;;  %vm100_vm6 = vcmp.gt.f32.partialorder %v84_v54, 0.0  ;;  %v123_v3 = vmul.f32 %v273_v43, %v84_v54  ;;  %vm101_vm7 = vcmp.gt.f32.partialorder %v85_v55, 0.0 }
  0x26   :  { %153 = vst [vmem:[%s375_s5 + $0x20] sm:$0xff] %v137_v2  ;;  %v138_v4 = vsel %vm99_vm5, %v83_v53, %v122_v1  ;;  %v124_v5 = vmul.f32 %v273_v43, %v85_v55  ;;  %v86_v6 = vadd.f32 %v265_v39, %v64_v41  ;;  %v87_v7 = vadd.f32 %v265_v39, %v65_v42 }
  0x27   :  { %154 = vst [vmem:[%s375_s5 + $0x28] sm:$0xff] %v138_v4  ;;  %v139_v8 = vsel %vm100_vm6, %v84_v54, %v123_v3  ;;  %v88_v9 = vadd.f32 %v265_v39, %v66_v44  ;;  %v89_v10 = vadd.f32 %v265_v39, %v67_v45  ;;  %v90_v11 = vadd.f32 %v265_v39, %v68_v46 }
  0x28   :  { %155 = vst [vmem:[%s375_s5 + $0x30] sm:$0xff] %v139_v8  ;;  %v140_v12 = vsel %vm101_vm7, %v85_v55, %v124_v5  ;;  %vm102_vm8 = vcmp.gt.f32.partialorder %v86_v6, 0.0  ;;  %v125_v13 = vmul.f32 %v273_v43, %v86_v6  ;;  %vm103_vm9 = vcmp.gt.f32.partialorder %v87_v7, 0.0 }
  0x29   :  { %156 = vst [vmem:[%s375_s5 + $0x38] sm:$0xff] %v140_v12  ;;  %v126_v15 = vmul.f32 %v273_v43, %v87_v7  ;;  %vm104_vm10 = vcmp.gt.f32.partialorder %v88_v9, 0.0  ;;  %v127_v16 = vmul.f32 %v273_v43, %v88_v9  ;;  %vm105_vm11 = vcmp.gt.f32.partialorder %v89_v10, 0.0 }
  0x2a   :  { %v141_v18 = vsel %vm102_vm8, %v86_v6, %v125_v13  ;;  %v128_v19 = vmul.f32 %v273_v43, %v89_v10  ;;  %vm106_vm12 = vcmp.gt.f32.partialorder %v90_v11, 0.0  ;;  %v129_v20 = vmul.f32 %v273_v43, %v90_v11 }
  0x2b   :  { %157 = vst [vmem:[%s375_s5 + $0x40] sm:$0xff] %v141_v18  ;;  %v142_v22 = vsel %vm103_vm9, %v87_v7, %v126_v15  ;;  %v143_v23 = vsel %vm104_vm10, %v88_v9, %v127_v16  ;;  %v91_v24 = vadd.f32 %v265_v39, %v279_v47  ;;  %v70_v25 = vmul.f32 %v229_v21, %v48_v14 }
  0x2c   :  { %158 = vst [vmem:[%s375_s5 + $0x48] sm:$0xff] %v142_v22  ;;  %159 = vst [vmem:[%s375_s5 + $0x50] sm:$0xff] %v143_v23  ;;  %v144_v26 = vsel %vm105_vm11, %v89_v10, %v128_v19  ;;  %v145_v27 = vsel %vm106_vm12, %v90_v11, %v129_v20  ;;  %v71_v28 = vmul.f32 %v229_v21, %v49_v17 }
  0x2d   :  { %160 = vst [vmem:[%s375_s5 + $0x58] sm:$0xff] %v144_v26  ;;  %161 = vst [vmem:[%s375_s5 + $0x60] sm:$0xff] %v145_v27  ;;  %vm107_vm13 = vcmp.gt.f32.partialorder %v91_v24, 0.0  ;;  %v130_v29 = vmul.f32 %v273_v43, %v91_v24  ;;  %v92_v30 = vadd.f32 %v265_v39, %v70_v25 }
  0x2e   :  { %v93_v31 = vadd.f32 %v265_v39, %v71_v28 }
  0x2f   :  { %v146_v32 = vsel %vm107_vm13, %v91_v24, %v130_v29  ;;  %vm108_vm14 = vcmp.gt.f32.partialorder %v92_v30, 0.0  ;;  %v131_v33 = vmul.f32 %v273_v43, %v92_v30 }
  0x30   :  { %162 = vst [vmem:[%s375_s5 + $0x68] sm:$0xff] %v146_v32  ;;  %vm109_vm15 = vcmp.gt.f32.partialorder %v93_v31, 0.0  ;;  %v132_v21 = vmul.f32 %v273_v43, %v93_v31 }
  0x31   :  { %v147_v34 = vsel %vm108_vm14, %v92_v30, %v131_v33 }
  0x32   :  { %163 = vst [vmem:[%s375_s5 + $0x70] sm:$0xff] %v147_v34  ;;  %v148_v35 = vsel %vm109_vm15, %v93_v31, %v132_v21 }
  0x33   :  { %164 = vst [vmem:[%s375_s5 + $0x78] sm:$0xff] %v148_v35 }

// kernel: generator_forward.14
= control target key start
LH: loop header
LB: loop body
LE: loop exit
PB: predicated region body
PF: predicated region fallthrough
CT: control target
= control target key end

     0   :  { %v458_v0 = vmov 0.0|0.0   ;;  %vm87_vm0 = vcmask 941056   ;;  %v459_v48 = vmov 0.0   ;;  %vm136_vm1 = vcmask 1042432   ;;  %s810_s1 = inlined_call_operand.vmem [shape: f32[243,128], index: 1, kind: input, shape index: {}]   ;;  %s811_s0 = inlined_call_operand.vmem [shape: f32[128,243], index: 0, kind: input, shape index: {}]   ;;  %s812_s2 = inlined_call_operand.vmem [shape: f32[1,128], index: 2, kind: input, shape index: {}]   ;;  %s813_s3 = inlined_call_operand.vmem [shape: f32[1,128], index: 3, kind: input, shape index: {}]   ;;  %s814_s4 = inlined_call_operand.vmem [shape: f32[128,128], index: 4, kind: output, shape index: {}]  }
   0x1   :  { %379 = vmatprep.subr.bf16.mxu0 %v458_v0  ;;  %424 = vmatprep.subr.bf16.mxu1 %v458_v0  ;;  %v49_v1 = vld [vmem:[%s810_s1] sm:$0xff]  ;;  %v50_v2 = vld [vmem:[%s810_s1 + $0x8] sm:$0xff]  ;;  %v51_v3 = vld [vmem:[%s810_s1 + $0x10] sm:$0xff] }
   0x2   :  { %v380_v4 = vpack.c.bf16 %v50_v2, %v49_v1  ;;  %v52_v5 = vld [vmem:[%s810_s1 + $0x18] sm:$0xff]  ;;  %v53_v7 = vld [vmem:[%s810_s1 + $0x20] sm:$0xff]  ;;  %v54_v8 = vld [vmem:[%s810_s1 + $0x28] sm:$0xff] }
   0x3   :  { %v383_v6 = vpack.c.bf16 %v52_v5, %v51_v3  ;;  %v386_v9 = vpack.c.bf16 %v54_v8, %v53_v7  ;;  %v55_v10 = vld [vmem:[%s810_s1 + $0x30] sm:$0xff]  ;;  %v56_v11 = vld [vmem:[%s810_s1 + $0x38] sm:$0xff]  ;;  %v18_v12 = vld [vmem:[%s811_s0 + $0x8] sm:$0xff] }
   0x4   :  { %381 = vmatpush1.bf16.msra.mxu0 %v380_v4  ;;  %440 = vmatpush1.bf16.msra.mxu1 %v380_v4  ;;  %v34_v13 = vld [vmem:[%s811_s0 + $0x88] sm:$0xff]  ;;  %v389_v14 = vpack.c.bf16 %v56_v11, %v55_v10  ;;  %v57_v15 = vld [vmem:[%s810_s1 + $0x40] sm:$0xff]  ;;  %v59_v18 = vld [vmem:[%s810_s1 + $0x50] sm:$0xff] }
   0x5   :  { %382 = vmatprep.subr.bf16.mxu0 %v458_v0  ;;  %425 = vmatprep.subr.bf16.mxu1 %v458_v0  ;;  %v58_v16 = vld [vmem:[%s810_s1 + $0x48] sm:$0xff]  ;;  %v60_v19 = vld [vmem:[%s810_s1 + $0x58] sm:$0xff]  ;;  %v61_v21 = vld [vmem:[%s810_s1 + $0x60] sm:$0xff] }
   0x6   :  { %362 = vmatprep.mubr.msk.f32.mxu0 %vm87_vm0, %v18_v12  ;;  %370 = vmatprep.mubr.msk.f32.mxu1 %vm87_vm0, %v34_v13  ;;  %v392_v17 = vpack.c.bf16 %v58_v16, %v57_v15  ;;  %v395_v20 = vpack.c.bf16 %v60_v19, %v59_v18  ;;  %v62_v22 = vld [vmem:[%s810_s1 + $0x68] sm:$0xff]  ;;  %v63_v24 = vld [vmem:[%s810_s1 + $0x70] sm:$0xff]  ;;  %v64_v25 = vld [vmem:[%s810_s1 + $0x78] sm:$0xff] }
   0x7   :  { %v398_v23 = vpack.c.bf16 %v62_v22, %v61_v21  ;;  %v401_v26 = vpack.c.bf16 %v64_v25, %v63_v24  ;;  %v65_v27 = vld [vmem:[%s810_s1 + $0x80] sm:$0xff]  ;;  %v66_v28 = vld [vmem:[%s810_s1 + $0x88] sm:$0xff]  ;;  %v67_v30 = vld [vmem:[%s810_s1 + $0x90] sm:$0xff] }
   0x8   :  { %384 = vmatpush1.bf16.msra.mxu0 %v383_v6  ;;  %441 = vmatpush1.bf16.msra.mxu1 %v383_v6  ;;  %v404_v29 = vpack.c.bf16 %v66_v28, %v65_v27  ;;  %v68_v31 = vld [vmem:[%s810_s1 + $0x98] sm:$0xff]  ;;  %v69_v33 = vld [vmem:[%s810_s1 + $0xa0] sm:$0xff]  ;;  %v70_v34 = vld [vmem:[%s810_s1 + $0xa8] sm:$0xff] }
   0x9   :  { %385 = vmatprep.subr.bf16.mxu0 %v458_v0  ;;  %426 = vmatprep.subr.bf16.mxu1 %v458_v0  ;;  %v407_v32 = vpack.c.bf16 %v68_v31, %v67_v30  ;;  %v410_v35 = vpack.c.bf16 %v70_v34, %v69_v33  ;;  %v71_v36 = vld [vmem:[%s810_s1 + $0xb0] sm:$0xff]  ;;  %v72_v37 = vld [vmem:[%s810_s1 + $0xb8] sm:$0xff]  ;;  %v73_v39 = vld [vmem:[%s810_s1 + $0xc0] sm:$0xff] }
   0xa   :  { %v413_v38 = vpack.c.bf16 %v72_v37, %v71_v36  ;;  %v74_v40 = vld [vmem:[%s810_s1 + $0xc8] sm:$0xff]  ;;  %v75_v42 = vld [vmem:[%s810_s1 + $0xd0] sm:$0xff]  ;;  %v76_v43 = vld [vmem:[%s810_s1 + $0xd8] sm:$0xff] }
   0xb   :  { %v416_v41 = vpack.c.bf16 %v74_v40, %v73_v39  ;;  %v419_v44 = vpack.c.bf16 %v76_v43, %v75_v42  ;;  %v77_v45 = vld [vmem:[%s810_s1 + $0xe0] sm:$0xff]  ;;  %v78_v46 = vld [vmem:[%s810_s1 + $0xe8] sm:$0xff]  ;;  %v79_v49 = vld [vmem:[%s810_s1 + $0xf0] sm:$0x7] }
   0xc   :  { %387 = vmatpush1.bf16.msra.mxu0 %v386_v9  ;;  %442 = vmatpush1.bf16.msra.mxu1 %v386_v9  ;;  %v422_v47 = vpack.c.bf16 %v78_v46, %v77_v45  ;;  %v17_v50 = vld [vmem:[%s811_s0] sm:$0xff]  ;;  %v20_v52 = vld [vmem:[%s811_s0 + $0x18] sm:$0xff]  ;;  %v19_v54 = vld [vmem:[%s811_s0 + $0x10] sm:$0xff] }
   0xd   :  { %388 = vmatprep.subr.bf16.mxu0 %v458_v0  ;;  %427 = vmatprep.subr.bf16.mxu1 %v458_v0  ;;  %v33_v51 = vld [vmem:[%s811_s0 + $0x80] sm:$0xff]  ;;  %v36_v53 = vld [vmem:[%s811_s0 + $0x98] sm:$0xff]  ;;  %v35_v55 = vld [vmem:[%s811_s0 + $0x90] sm:$0xff] }
   0xe   :  { %v22_v56 = vld [vmem:[%s811_s0 + $0x28] sm:$0xff]  ;;  %v21_v58 = vld [vmem:[%s811_s0 + $0x20] sm:$0xff]  ;;  %v24_v60 = vld [vmem:[%s811_s0 + $0x38] sm:$0xff] }
   0xf   :  { %v38_v57 = vld [vmem:[%s811_s0 + $0xa8] sm:$0xff]  ;;  %v37_v59 = vld [vmem:[%s811_s0 + $0xa0] sm:$0xff]  ;;  %v40_v61 = vld [vmem:[%s811_s0 + $0xb8] sm:$0xff] }
  0x10   :  { %390 = vmatpush1.bf16.msra.mxu0 %v389_v14  ;;  %443 = vmatpush1.bf16.msra.mxu1 %v389_v14  ;;  %v23_v62 = vld [vmem:[%s811_s0 + $0x30] sm:$0xff]  ;;  %v42_v1 = vld [vmem:[%s811_s0 + $0xc8] sm:$0xff]  ;;  %v25_v2 = vld [vmem:[%s811_s0 + $0x40] sm:$0xff] }
  0x11   :  { %391 = vmatprep.subr.bf16.mxu0 %v458_v0  ;;  %428 = vmatprep.subr.bf16.mxu1 %v458_v0  ;;  %v39_v63 = vld [vmem:[%s811_s0 + $0xb0] sm:$0xff]  ;;  %v41_v3 = vld [vmem:[%s811_s0 + $0xc0] sm:$0xff]  ;;  %v28_v4 = vld [vmem:[%s811_s0 + $0x58] sm:$0xff] }
  0x12   :  { %v44_v5 = vld [vmem:[%s811_s0 + $0xd8] sm:$0xff]  ;;  %v27_v6 = vld [vmem:[%s811_s0 + $0x50] sm:$0xff]  ;;  %v30_v8 = vld [vmem:[%s811_s0 + $0x68] sm:$0xff] }
  0x13   :  { %v43_v7 = vld [vmem:[%s811_s0 + $0xd0] sm:$0xff]  ;;  %v46_v9 = vld [vmem:[%s811_s0 + $0xe8] sm:$0xff]  ;;  %v29_v10 = vld [vmem:[%s811_s0 + $0x60] sm:$0xff] }
  0x14   :  { %393 = vmatpush1.bf16.msra.mxu0 %v392_v17  ;;  %444 = vmatpush1.bf16.msra.mxu1 %v392_v17  ;;  %v45_v11 = vld [vmem:[%s811_s0 + $0xe0] sm:$0xff]  ;;  %v32_v12 = vld [vmem:[%s811_s0 + $0x78] sm:$0xff]  ;;  %v31_v14 = vld [vmem:[%s811_s0 + $0x70] sm:$0xff] }
  0x15   :  { %394 = vmatprep.subr.bf16.mxu0 %v458_v0  ;;  %429 = vmatprep.subr.bf16.mxu1 %v458_v0  ;;  %v48_v13 = vld [vmem:[%s811_s0 + $0xf8] sm:$0xff]  ;;  %v47_v15 = vld [vmem:[%s811_s0 + $0xf0] sm:$0xff]  ;;  %v723_v16 = vld [vmem:[%s812_s2] ss:$0 sm:$0xff] }
  0x16   :  { %v728_v18 = vld [vmem:[%s813_s3] ss:$0 sm:$0xff] }
  0x18   :  { %396 = vmatpush1.bf16.msra.mxu0 %v395_v20  ;;  %445 = vmatpush1.bf16.msra.mxu1 %v395_v20 }
  0x19   :  { %397 = vmatprep.subr.bf16.mxu0 %v458_v0  ;;  %430 = vmatprep.subr.bf16.mxu1 %v458_v0 }
  0x1c   :  { %399 = vmatpush1.bf16.msra.mxu0 %v398_v23  ;;  %446 = vmatpush1.bf16.msra.mxu1 %v398_v23 }
  0x1d   :  { %400 = vmatprep.subr.bf16.mxu0 %v458_v0  ;;  %431 = vmatprep.subr.bf16.mxu1 %v458_v0 }
  0x20   :  { %402 = vmatpush1.bf16.msra.mxu0 %v401_v26  ;;  %447 = vmatpush1.bf16.msra.mxu1 %v401_v26 }
  0x21   :  { %403 = vmatprep.subr.bf16.mxu0 %v458_v0  ;;  %432 = vmatprep.subr.bf16.mxu1 %v458_v0 }
  0x24   :  { %405 = vmatpush1.bf16.msra.mxu0 %v404_v29  ;;  %448 = vmatpush1.bf16.msra.mxu1 %v404_v29 }
  0x25   :  { %406 = vmatprep.subr.bf16.mxu0 %v458_v0  ;;  %433 = vmatprep.subr.bf16.mxu1 %v458_v0 }
  0x28   :  { %408 = vmatpush1.bf16.msra.mxu0 %v407_v32  ;;  %449 = vmatpush1.bf16.msra.mxu1 %v407_v32 }
  0x29   :  { %409 = vmatprep.subr.bf16.mxu0 %v458_v0  ;;  %434 = vmatprep.subr.bf16.mxu1 %v458_v0 }
  0x2c   :  { %411 = vmatpush1.bf16.msra.mxu0 %v410_v35  ;;  %450 = vmatpush1.bf16.msra.mxu1 %v410_v35 }
  0x2d   :  { %412 = vmatprep.subr.bf16.mxu0 %v458_v0  ;;  %435 = vmatprep.subr.bf16.mxu1 %v458_v0 }
  0x30   :  { %414 = vmatpush1.bf16.msra.mxu0 %v413_v38  ;;  %451 = vmatpush1.bf16.msra.mxu1 %v413_v38 }
  0x31   :  { %415 = vmatprep.subr.bf16.mxu0 %v458_v0  ;;  %436 = vmatprep.subr.bf16.mxu1 %v458_v0 }
  0x34   :  { %417 = vmatpush1.bf16.msra.mxu0 %v416_v41  ;;  %452 = vmatpush1.bf16.msra.mxu1 %v416_v41 }
  0x35   :  { %418 = vmatprep.subr.bf16.mxu0 %v458_v0  ;;  %437 = vmatprep.subr.bf16.mxu1 %v458_v0 }
  0x38   :  { %420 = vmatpush1.bf16.msra.mxu0 %v419_v44  ;;  %453 = vmatpush1.bf16.msra.mxu1 %v419_v44 }
  0x39   :  { %421 = vmatprep.subr.bf16.mxu0 %v458_v0  ;;  %438 = vmatprep.subr.bf16.mxu1 %v458_v0  ;;  %v26_v0 = vld [vmem:[%s811_s0 + $0x48] sm:$0xff] }
  0x3c   :  { %423 = vmatpush1.bf16.msra.mxu0 %v422_v47  ;;  %454 = vmatpush1.bf16.msra.mxu1 %v422_v47 }
  0x3d   :  { %200 = vmatprep.subr.mxu0 %v459_v48  ;;  %439 = vmatprep.subr.mxu1 %v459_v48 }
  0x40   :  { %361 = vmatpush1.msk.msra.mxu0 %vm136_vm1, %v79_v49  ;;  %455 = vmatpush1.msk.msra.mxu1 %vm136_vm1, %v79_v49 }
  0x41   :  { %205 = vmatmul.mubr.f32.vlgmr.msra.gmra.mrb[0].mxu0 %v17_v50  ;;  %245 = vmatmul.mubr.f32.vlgmr.msra.gmra.mrb[0].mxu1 %v33_v51 }
  0x42   :  { %363 = vmatprep.mubr.msk.f32.mxu0 %vm87_vm0, %v20_v52  ;;  %371 = vmatprep.mubr.msk.f32.mxu1 %vm87_vm0, %v36_v53 }
  0x45   :  { %210 = vmatmul.mubr.f32.gmra.mrb[2].mxu0 %v19_v54  ;;  %250 = vmatmul.mubr.f32.gmra.mrb[2].mxu1 %v35_v55 }
  0x46   :  { %364 = vmatprep.mubr.msk.f32.mxu0 %vm87_vm0, %v22_v56  ;;  %372 = vmatprep.mubr.msk.f32.mxu1 %vm87_vm0, %v38_v57 }
  0x49   :  { %215 = vmatmul.mubr.f32.gmra.mrb[4].mxu0 %v21_v58  ;;  %255 = vmatmul.mubr.f32.gmra.mrb[4].mxu1 %v37_v59 }
  0x4a   :  { %365 = vmatprep.mubr.msk.f32.mxu0 %vm87_vm0, %v24_v60  ;;  %373 = vmatprep.mubr.msk.f32.mxu1 %vm87_vm0, %v40_v61 }
  0x4d   :  { %220 = vmatmul.mubr.f32.gmra.mrb[6].mxu0 %v23_v62  ;;  %260 = vmatmul.mubr.f32.gmra.mrb[6].mxu1 %v39_v63 }
  0x4e   :  { %366 = vmatprep.mubr.msk.f32.mxu0 %vm87_vm0, %v26_v0  ;;  %374 = vmatprep.mubr.msk.f32.mxu1 %vm87_vm0, %v42_v1 }
  0x51   :  { %225 = vmatmul.mubr.f32.gmra.mrb[8].mxu0 %v25_v2  ;;  %265 = vmatmul.mubr.f32.gmra.mrb[8].mxu1 %v41_v3 }
  0x52   :  { %367 = vmatprep.mubr.msk.f32.mxu0 %vm87_vm0, %v28_v4  ;;  %375 = vmatprep.mubr.msk.f32.mxu1 %vm87_vm0, %v44_v5 }
  0x55   :  { %230 = vmatmul.mubr.f32.gmra.mrb[10].mxu0 %v27_v6  ;;  %270 = vmatmul.mubr.f32.gmra.mrb[10].mxu1 %v43_v7 }
  0x56   :  { %368 = vmatprep.mubr.msk.f32.mxu0 %vm87_vm0, %v30_v8  ;;  %376 = vmatprep.mubr.msk.f32.mxu1 %vm87_vm0, %v46_v9 }
  0x59   :  { %235 = vmatmul.mubr.f32.gmra.mrb[12].mxu0 %v29_v10  ;;  %275 = vmatmul.mubr.f32.gmra.mrb[12].mxu1 %v45_v11 }
  0x5a   :  { %369 = vmatprep.mubr.msk.f32.mxu0 %vm87_vm0, %v32_v12  ;;  %377 = vmatprep.mubr.msk.f32.mxu1 %vm87_vm0, %v48_v13 }
  0x5d   :  { %240 = vmatmul.mubr.f32.gmra.mrb[14].mxu0 %v31_v14  ;;  %280 = vmatmul.mubr.f32.gmra.mrb[14].mxu1 %v47_v15 }
 0x114   :  { %v206_v17 = vpop.f32.mrb[0].mxu0  ;;  %v246_v19 = vpop.f32.mrb[0].mxu1 }
 0x115   :  { %v207_v20 = vadd.f32 %v723_v16, %v206_v17  ;;  %v247_v21 = vadd.f32 %v723_v16, %v246_v19  ;;  %v208_v22 = vpop.f32.mrb[1].mxu0  ;;  %v248_v23 = vpop.f32.mrb[1].mxu1 }
 0x117   :  { %vm285_vm2 = vcmp.gt.f32.partialorder %v207_v20, 0.0  ;;  %v308_v24 = vmul.f32 %v728_v18, %v207_v20  ;;  %vm293_vm3 = vcmp.gt.f32.partialorder %v247_v21, 0.0  ;;  %v316_v25 = vmul.f32 %v728_v18, %v247_v21 }
 0x118   :  { %v211_v26 = vpop.f32.mrb[2].mxu0  ;;  %v251_v27 = vpop.f32.mrb[2].mxu1 }
 0x119   :  { %v324_v28 = vsel %vm285_vm2, %v207_v20, %v308_v24  ;;  %v332_v29 = vsel %vm293_vm3, %v247_v21, %v316_v25  ;;  %v212_v30 = vadd.f32 %v723_v16, %v211_v26  ;;  %v252_v31 = vadd.f32 %v723_v16, %v251_v27  ;;  %v213_v32 = vpop.f32.mrb[3].mxu0  ;;  %v253_v33 = vpop.f32.mrb[3].mxu1 }
 0x11a   :  { %340 = vst [vmem:[%s814_s4] sm:$0xff] %v324_v28  ;;  %348 = vst [vmem:[%s814_s4 + $0x40] sm:$0xff] %v332_v29 }
 0x11b   :  { %vm286_vm4 = vcmp.gt.f32.partialorder %v212_v30, 0.0  ;;  %v309_v34 = vmul.f32 %v728_v18, %v212_v30  ;;  %vm294_vm5 = vcmp.gt.f32.partialorder %v252_v31, 0.0  ;;  %v317_v35 = vmul.f32 %v728_v18, %v252_v31 }
 0x11c   :  { %v216_v36 = vpop.f32.mrb[4].mxu0  ;;  %v256_v37 = vpop.f32.mrb[4].mxu1 }
 0x11d   :  { %v325_v38 = vsel %vm286_vm4, %v212_v30, %v309_v34  ;;  %v333_v39 = vsel %vm294_vm5, %v252_v31, %v317_v35  ;;  %v217_v40 = vadd.f32 %v723_v16, %v216_v36  ;;  %v257_v41 = vadd.f32 %v723_v16, %v256_v37  ;;  %v218_v42 = vpop.f32.mrb[5].mxu0  ;;  %v258_v43 = vpop.f32.mrb[5].mxu1 }
 0x11e   :  { %341 = vst [vmem:[%s814_s4 + $0x8] sm:$0xff] %v325_v38  ;;  %349 = vst [vmem:[%s814_s4 + $0x48] sm:$0xff] %v333_v39 }
 0x11f   :  { %vm287_vm6 = vcmp.gt.f32.partialorder %v217_v40, 0.0  ;;  %v310_v44 = vmul.f32 %v728_v18, %v217_v40  ;;  %vm295_vm7 = vcmp.gt.f32.partialorder %v257_v41, 0.0  ;;  %v318_v45 = vmul.f32 %v728_v18, %v257_v41 }
 0x120   :  { %v221_v46 = vpop.f32.mrb[6].mxu0  ;;  %v261_v47 = vpop.f32.mrb[6].mxu1 }
 0x121   :  { %v326_v48 = vsel %vm287_vm6, %v217_v40, %v310_v44  ;;  %v334_v49 = vsel %vm295_vm7, %v257_v41, %v318_v45  ;;  %v222_v50 = vadd.f32 %v723_v16, %v221_v46  ;;  %v262_v51 = vadd.f32 %v723_v16, %v261_v47  ;;  %v223_v52 = vpop.f32.mrb[7].mxu0  ;;  %v263_v53 = vpop.f32.mrb[7].mxu1 }
 0x122   :  { %342 = vst [vmem:[%s814_s4 + $0x10] sm:$0xff] %v326_v48  ;;  %350 = vst [vmem:[%s814_s4 + $0x50] sm:$0xff] %v334_v49 }
 0x123   :  { %vm288_vm8 = vcmp.gt.f32.partialorder %v222_v50, 0.0  ;;  %v311_v54 = vmul.f32 %v728_v18, %v222_v50  ;;  %vm296_vm9 = vcmp.gt.f32.partialorder %v262_v51, 0.0  ;;  %v319_v55 = vmul.f32 %v728_v18, %v262_v51 }
 0x124   :  { %v226_v56 = vpop.f32.mrb[8].mxu0  ;;  %v266_v57 = vpop.f32.mrb[8].mxu1 }
 0x125   :  { %v327_v58 = vsel %vm288_vm8, %v222_v50, %v311_v54  ;;  %v335_v59 = vsel %vm296_vm9, %v262_v51, %v319_v55  ;;  %v227_v60 = vadd.f32 %v723_v16, %v226_v56  ;;  %v267_v61 = vadd.f32 %v723_v16, %v266_v57  ;;  %v228_v62 = vpop.f32.mrb[9].mxu0  ;;  %v268_v63 = vpop.f32.mrb[9].mxu1 }
 0x126   :  { %343 = vst [vmem:[%s814_s4 + $0x18] sm:$0xff] %v327_v58  ;;  %351 = vst [vmem:[%s814_s4 + $0x58] sm:$0xff] %v335_v59 }
 0x127   :  { %vm289_vm10 = vcmp.gt.f32.partialorder %v227_v60, 0.0  ;;  %v312_v0 = vmul.f32 %v728_v18, %v227_v60  ;;  %vm297_vm11 = vcmp.gt.f32.partialorder %v267_v61, 0.0  ;;  %v320_v1 = vmul.f32 %v728_v18, %v267_v61 }
 0x128   :  { %v231_v2 = vpop.f32.mrb[10].mxu0  ;;  %v271_v3 = vpop.f32.mrb[10].mxu1 }
 0x129   :  { %v328_v4 = vsel %vm289_vm10, %v227_v60, %v312_v0  ;;  %v336_v5 = vsel %vm297_vm11, %v267_v61, %v320_v1  ;;  %v232_v6 = vadd.f32 %v723_v16, %v231_v2  ;;  %v272_v7 = vadd.f32 %v723_v16, %v271_v3  ;;  %v233_v8 = vpop.f32.mrb[11].mxu0  ;;  %v273_v9 = vpop.f32.mrb[11].mxu1 }
 0x12a   :  { %344 = vst [vmem:[%s814_s4 + $0x20] sm:$0xff] %v328_v4  ;;  %352 = vst [vmem:[%s814_s4 + $0x60] sm:$0xff] %v336_v5 }
 0x12b   :  { %vm290_vm12 = vcmp.gt.f32.partialorder %v232_v6, 0.0  ;;  %v313_v10 = vmul.f32 %v728_v18, %v232_v6  ;;  %vm298_vm13 = vcmp.gt.f32.partialorder %v272_v7, 0.0  ;;  %v321_v11 = vmul.f32 %v728_v18, %v272_v7 }
 0x12c   :  { %v236_v12 = vpop.f32.mrb[12].mxu0  ;;  %v276_v13 = vpop.f32.mrb[12].mxu1 }
 0x12d   :  { %v329_v14 = vsel %vm290_vm12, %v232_v6, %v313_v10  ;;  %v337_v15 = vsel %vm298_vm13, %v272_v7, %v321_v11  ;;  %v237_v17 = vadd.f32 %v723_v16, %v236_v12  ;;  %v277_v19 = vadd.f32 %v723_v16, %v276_v13  ;;  %v238_v20 = vpop.f32.mrb[13].mxu0  ;;  %v278_v21 = vpop.f32.mrb[13].mxu1 }
 0x12e   :  { %345 = vst [vmem:[%s814_s4 + $0x28] sm:$0xff] %v329_v14  ;;  %353 = vst [vmem:[%s814_s4 + $0x68] sm:$0xff] %v337_v15 }
 0x12f   :  { %vm291_vm14 = vcmp.gt.f32.partialorder %v237_v17, 0.0  ;;  %v314_v22 = vmul.f32 %v728_v18, %v237_v17  ;;  %vm299_vm15 = vcmp.gt.f32.partialorder %v277_v19, 0.0  ;;  %v322_v23 = vmul.f32 %v728_v18, %v277_v19 }
 0x130   :  { %v241_v24 = vpop.f32.mrb[14].mxu0  ;;  %v281_v25 = vpop.f32.mrb[14].mxu1 }
 0x131   :  { %v330_v26 = vsel %vm291_vm14, %v237_v17, %v314_v22  ;;  %v338_v27 = vsel %vm299_vm15, %v277_v19, %v322_v23  ;;  %v242_v28 = vadd.f32 %v723_v16, %v241_v24  ;;  %v282_v29 = vadd.f32 %v723_v16, %v281_v25  ;;  %v243_v30 = vpop.f32.mrb[15].mxu0  ;;  %v283_v31 = vpop.f32.mrb[15].mxu1 }
 0x132   :  { %346 = vst [vmem:[%s814_s4 + $0x30] sm:$0xff] %v330_v26  ;;  %354 = vst [vmem:[%s814_s4 + $0x70] sm:$0xff] %v338_v27 }
 0x133   :  { %vm292_vm0 = vcmp.gt.f32.partialorder %v242_v28, 0.0  ;;  %v315_v32 = vmul.f32 %v728_v18, %v242_v28  ;;  %vm300_vm1 = vcmp.gt.f32.partialorder %v282_v29, 0.0  ;;  %v323_v33 = vmul.f32 %v728_v18, %v282_v29 }
 0x135   :  { %v331_v34 = vsel %vm292_vm0, %v242_v28, %v315_v32  ;;  %v339_v35 = vsel %vm300_vm1, %v282_v29, %v323_v33 }
 0x136   :  { %347 = vst [vmem:[%s814_s4 + $0x38] sm:$0xff] %v331_v34  ;;  %355 = vst [vmem:[%s814_s4 + $0x78] sm:$0xff] %v339_v35 }

// kernel: generator_forward.18
= control target key start
LH: loop header
LB: loop body
LE: loop exit
PB: predicated region body
PF: predicated region fallthrough
CT: control target
= control target key end

     0   :  { %v54_v8 = vlaneseq  ;;  %s378_s1 = inlined_call_operand.vmem [shape: f32[2,128], index: 1, kind: input, shape index: {}]   ;;  %s379_s4 = inlined_call_operand.vmem [shape: f32[1,128], index: 4, kind: input, shape index: {}]   ;;  %s380_s2 = inlined_call_operand.vmem [shape: f32[1,128], index: 2, kind: input, shape index: {}]   ;;  %s381_s0 = inlined_call_operand.vmem [shape: f32[128,128], index: 0, kind: input, shape index: {}]   ;;  %s382_s3 = inlined_call_operand.vmem [shape: f32[1,128], index: 3, kind: input, shape index: {}]   ;;  %s383_s5 = inlined_call_operand.vmem [shape: f32[128,128], index: 5, kind: input, shape index: {}]   ;;  %s384_s6 = inlined_call_operand.vmem [shape: f32[128,128], index: 6, kind: output, shape index: {}]  }
   0x1   :  { %v23_v0 = vld [vmem:[%s378_s1] sm:$0x1]  ;;  %v25_v1 = vld [vmem:[%s378_s1 + $0x1] sm:$0x1]  ;;  %v38_v16 = vld [vmem:[%s381_s0 + $0x8] sm:$0xff] }
   0x2   :  { %v24_v2 = vmul.f32 0.0078125, %v23_v0  ;;  %v26_v3 = vmul.f32 0.0078125, %v25_v1  ;;  %v55_v9 = vshrl.u32 %v54_v8, 7  ;;  %v30_v10 = vld [vmem:[%s380_s2] sm:$0x1]  ;;  %v39_v17 = vld [vmem:[%s381_s0 + $0x10] sm:$0xff] }
   0x3   :  { %v34_v14 = vld [vmem:[%s382_s3] sm:$0x1]  ;;  %v40_v18 = vld [vmem:[%s381_s0 + $0x18] sm:$0xff]  ;;  %v42_v22 = vld [vmem:[%s381_s0 + $0x28] sm:$0xff] }
   0x4   :  { %v27_v4 = vmul.f32 %v24_v2, %v24_v2  ;;  %v56_v11 = vsub.s32 0, %v55_v9  ;;  %v37_v15 = vld [vmem:[%s381_s0] sm:$0xff]  ;;  %v43_v23 = vld [vmem:[%s381_s0 + $0x30] sm:$0xff]  ;;  %v44_v24 = vld [vmem:[%s381_s0 + $0x38] sm:$0xff] }
   0x5   :  { %v41_v19 = vld [vmem:[%s381_s0 + $0x20] sm:$0xff]  ;;  %v46_v26 = vld [vmem:[%s381_s0 + $0x48] sm:$0xff]  ;;  %v47_v27 = vld [vmem:[%s381_s0 + $0x50] sm:$0xff] }
   0x6   :  { %v28_v5 = vsub.f32 %v26_v3, %v27_v4  ;;  %v45_v25 = vld [vmem:[%s381_s0 + $0x40] sm:$0xff]  ;;  %v48_v32 = vld [vmem:[%s381_s0 + $0x58] sm:$0xff]  ;;  %v50_v34 = vld [vmem:[%s381_s0 + $0x68] sm:$0xff] }
   0x7   :  { %v49_v33 = vld [vmem:[%s381_s0 + $0x60] sm:$0xff]  ;;  %v98_v41 = vld [vmem:[%s383_s5 + $0x8] sm:$0xff]  ;;  %v99_v45 = vld [vmem:[%s383_s5 + $0x10] sm:$0xff] }
   0x8   :  { %v29_v6 = vmax.f32 %v28_v5, 0.0  ;;  %v97_v40 = vld [vmem:[%s383_s5] sm:$0xff]  ;;  %v100_v46 = vld [vmem:[%s383_s5 + $0x18] sm:$0xff]  ;;  %v102_v56 = vld [vmem:[%s383_s5 + $0x28] sm:$0xff] }
   0x9   :  { %v101_v47 = vld [vmem:[%s383_s5 + $0x20] sm:$0xff]  ;;  %v103_v57 = vld [vmem:[%s383_s5 + $0x30] sm:$0xff]  ;;  %v104_v58 = vld [vmem:[%s383_s5 + $0x38] sm:$0xff] }
   0xa   :  { %v31_v7 = vadd.f32 1e-05, %v29_v6  ;;  %v105_v3 = vld [vmem:[%s383_s5 + $0x40] sm:$0xff]  ;;  %v51_v4 = vld [vmem:[%s381_s0 + $0x70] sm:$0xff]  ;;  %v52_v5 = vld [vmem:[%s381_s0 + $0x78] sm:$0xff] }
   0xc   :  { %149 = vrsqrt.f32 %v31_v7 }
  0x16   :  { %v150_v12 = vpop.eup %149 }
  0x17   :  { %v33_v13 = vmul.f32 %v150_v12, %v30_v10  ;;  %v106_v10 = vld [vmem:[%s383_s5 + $0x48] sm:$0xff]  ;;  %v108_v12 = vld [vmem:[%s383_s5 + $0x58] sm:$0xff] }
  0x19   :  { %v35_v20 = vmul.f32 %v33_v13, %v24_v2  ;;  %v213_v21 = vrot.slane %v33_v13, %v56_v11 }
  0x1b   :  { %v36_v28 = vsub.f32 %v34_v14, %v35_v20  ;;  %v59_v29 = vmul.f32 %v213_v21, %v37_v15  ;;  %v60_v30 = vmul.f32 %v213_v21, %v38_v16  ;;  %v61_v31 = vmul.f32 %v213_v21, %v39_v17  ;;  %v109_v17 = vld [vmem:[%s383_s5 + $0x60] sm:$0xff] }
  0x1c   :  { %v62_v35 = vmul.f32 %v213_v21, %v40_v18  ;;  %v63_v36 = vmul.f32 %v213_v21, %v41_v19  ;;  %v64_v37 = vmul.f32 %v213_v21, %v42_v22  ;;  %v65_v38 = vmul.f32 %v213_v21, %v43_v23  ;;  %v110_v18 = vld [vmem:[%s383_s5 + $0x68] sm:$0xff] }
  0x1d   :  { %v249_v39 = vrot.slane %v36_v28, %v56_v11  ;;  %v66_v42 = vmul.f32 %v213_v21, %v44_v24  ;;  %v67_v43 = vmul.f32 %v213_v21, %v45_v25  ;;  %v68_v44 = vmul.f32 %v213_v21, %v46_v26  ;;  %v107_v11 = vld [vmem:[%s383_s5 + $0x50] sm:$0xff] }
  0x1e   :  { %v69_v48 = vmul.f32 %v213_v21, %v47_v27  ;;  %v70_v49 = vmul.f32 %v213_v21, %v48_v32  ;;  %v71_v50 = vmul.f32 %v213_v21, %v49_v33  ;;  %v72_v51 = vmul.f32 %v213_v21, %v50_v34  ;;  %v111_v28 = vld [vmem:[%s383_s5 + $0x70] sm:$0xff] }
  0x1f   :  { %v81_v52 = vadd.f32 %v249_v39, %v59_v29  ;;  %v82_v53 = vadd.f32 %v249_v39, %v60_v30  ;;  %v83_v54 = vadd.f32 %v249_v39, %v61_v31  ;;  %v84_v55 = vadd.f32 %v249_v39, %v62_v35  ;;  %v112_v29 = vld [vmem:[%s383_s5 + $0x78] sm:$0xff] }
  0x20   :  { %v85_v59 = vadd.f32 %v249_v39, %v63_v36  ;;  %v86_v60 = vadd.f32 %v249_v39, %v64_v37  ;;  %v87_v61 = vadd.f32 %v249_v39, %v65_v38  ;;  %v88_v62 = vadd.f32 %v249_v39, %v66_v42 }
  0x21   :  { %v113_v63 = vadd.f32 %v97_v40, %v81_v52  ;;  %v114_v0 = vadd.f32 %v98_v41, %v82_v53  ;;  %v115_v1 = vadd.f32 %v99_v45, %v83_v54  ;;  %v116_v2 = vadd.f32 %v100_v46, %v84_v55 }
  0x22   :  { %v117_v6 = vadd.f32 %v101_v47, %v85_v59  ;;  %v118_v7 = vadd.f32 %v102_v56, %v86_v60  ;;  %v119_v8 = vadd.f32 %v103_v57, %v87_v61  ;;  %v120_v9 = vadd.f32 %v104_v58, %v88_v62 }
  0x23   :  { %129 = vst [vmem:[%s384_s6] sm:$0xff] %v113_v63  ;;  %130 = vst [vmem:[%s384_s6 + $0x8] sm:$0xff] %v114_v0  ;;  %v89_v13 = vadd.f32 %v249_v39, %v67_v43  ;;  %v90_v14 = vadd.f32 %v249_v39, %v68_v44  ;;  %v91_v15 = vadd.f32 %v249_v39, %v69_v48 }
  0x24   :  { %131 = vst [vmem:[%s384_s6 + $0x10] sm:$0xff] %v115_v1  ;;  %132 = vst [vmem:[%s384_s6 + $0x18] sm:$0xff] %v116_v2  ;;  %v92_v16 = vadd.f32 %v249_v39, %v70_v49  ;;  %v93_v19 = vadd.f32 %v249_v39, %v71_v50  ;;  %v94_v20 = vadd.f32 %v249_v39, %v72_v51 }
  0x25   :  { %133 = vst [vmem:[%s384_s6 + $0x20] sm:$0xff] %v117_v6  ;;  %134 = vst [vmem:[%s384_s6 + $0x28] sm:$0xff] %v118_v7  ;;  %v73_v22 = vmul.f32 %v213_v21, %v51_v4  ;;  %v74_v23 = vmul.f32 %v213_v21, %v52_v5  ;;  %v121_v24 = vadd.f32 %v105_v3, %v89_v13 }
  0x26   :  { %135 = vst [vmem:[%s384_s6 + $0x30] sm:$0xff] %v119_v8  ;;  %136 = vst [vmem:[%s384_s6 + $0x38] sm:$0xff] %v120_v9  ;;  %v122_v25 = vadd.f32 %v106_v10, %v90_v14  ;;  %v123_v26 = vadd.f32 %v107_v11, %v91_v15  ;;  %v124_v27 = vadd.f32 %v108_v12, %v92_v16 }
  0x27   :  { %v125_v30 = vadd.f32 %v109_v17, %v93_v19  ;;  %v126_v31 = vadd.f32 %v110_v18, %v94_v20  ;;  %v95_v32 = vadd.f32 %v249_v39, %v73_v22  ;;  %v96_v33 = vadd.f32 %v249_v39, %v74_v23  ;;  %137 = vst [vmem:[%s384_s6 + $0x40] sm:$0xff] %v121_v24 }
  0x28   :  { %138 = vst [vmem:[%s384_s6 + $0x48] sm:$0xff] %v122_v25  ;;  %139 = vst [vmem:[%s384_s6 + $0x50] sm:$0xff] %v123_v26 }
  0x29   :  { %140 = vst [vmem:[%s384_s6 + $0x58] sm:$0xff] %v124_v27  ;;  %141 = vst [vmem:[%s384_s6 + $0x60] sm:$0xff] %v125_v30  ;;  %v127_v21 = vadd.f32 %v111_v28, %v95_v32  ;;  %v128_v34 = vadd.f32 %v112_v29, %v96_v33 }
  0x2a   :  { %142 = vst [vmem:[%s384_s6 + $0x68] sm:$0xff] %v126_v31 }
  0x2b   :  { %143 = vst [vmem:[%s384_s6 + $0x70] sm:$0xff] %v127_v21  ;;  %144 = vst [vmem:[%s384_s6 + $0x78] sm:$0xff] %v128_v34 }

// kernel: generator_forward.25
= control target key start
LH: loop header
LB: loop body
LE: loop exit
PB: predicated region body
PF: predicated region fallthrough
CT: control target
= control target key end

     0   :  { %vm108_vm0 = vcmask 261120   ;;  %s1123_s1 = inlined_call_operand.vmem [shape: f32[288,128], index: 1, kind: input, shape index: {}]   ;;  %s1124_s0 = inlined_call_operand.vmem [shape: f32[128,288], index: 0, kind: input, shape index: {}]   ;;  %s1125_s2 = inlined_call_operand.vmem [shape: f32[1,128], index: 2, kind: input, shape index: {}]   ;;  %s1126_s3 = inlined_call_operand.vmem [shape: f32[1,128], index: 3, kind: input, shape index: {}]   ;;  %s1127_s4 = inlined_call_operand.vmem [shape: f32[128,128], index: 4, kind: output, shape index: {}]  }
   0x1   :  { %v81_v0 = vld [vmem:[%s1123_s1 + $0x80] sm:$0xff]  ;;  %v82_v1 = vld [vmem:[%s1123_s1 + $0x88] sm:$0xff]  ;;  %v83_v5 = vld [vmem:[%s1123_s1 + $0x90] sm:$0xff] }
   0x2   :  { %v65_v2 = vld [vmem:[%s1123_s1] sm:$0xff]  ;;  %v672_v3 = vpack.c.bf16 %v82_v1, %v81_v0  ;;  %v66_v4 = vld [vmem:[%s1123_s1 + $0x8] sm:$0xff]  ;;  %v84_v6 = vld [vmem:[%s1123_s1 + $0x98] sm:$0xff] }
   0x3   :  { %v674_v7 = vpack.c.bf16 %v66_v4, %v65_v2  ;;  %v676_v8 = vpack.c.bf16 %v84_v6, %v83_v5  ;;  %v67_v9 = vld [vmem:[%s1123_s1 + $0x10] sm:$0xff]  ;;  %v68_v10 = vld [vmem:[%s1123_s1 + $0x18] sm:$0xff]  ;;  %v85_v11 = vld [vmem:[%s1123_s1 + $0xa0] sm:$0xff] }
   0x4   :  { %673 = vmatprep.subr.bf16.mxu0 %v672_v3  ;;  %712 = vmatprep.subr.bf16.mxu1 %v672_v3  ;;  %v86_v12 = vld [vmem:[%s1123_s1 + $0xa8] sm:$0xff]  ;;  %v678_v13 = vpack.c.bf16 %v68_v10, %v67_v9  ;;  %v69_v15 = vld [vmem:[%s1123_s1 + $0x20] sm:$0xff]  ;;  %v87_v17 = vld [vmem:[%s1123_s1 + $0xb0] sm:$0xff] }
   0x5   :  { %675 = vmatpush3.bf16.msra.mxu0 %v674_v7  ;;  %720 = vmatpush3.bf16.msra.mxu1 %v674_v7  ;;  %v680_v14 = vpack.c.bf16 %v86_v12, %v85_v11  ;;  %v70_v16 = vld [vmem:[%s1123_s1 + $0x28] sm:$0xff]  ;;  %v88_v18 = vld [vmem:[%s1123_s1 + $0xb8] sm:$0xff]  ;;  %v71_v21 = vld [vmem:[%s1123_s1 + $0x30] sm:$0xff] }
   0x6   :  { %677 = vmatprep.subr.bf16.mxu0 %v676_v8  ;;  %713 = vmatprep.subr.bf16.mxu1 %v676_v8  ;;  %v682_v19 = vpack.c.bf16 %v70_v16, %v69_v15  ;;  %v684_v20 = vpack.c.bf16 %v88_v18, %v87_v17  ;;  %v72_v22 = vld [vmem:[%s1123_s1 + $0x38] sm:$0xff]  ;;  %v89_v23 = vld [vmem:[%s1123_s1 + $0xc0] sm:$0xff]  ;;  %v90_v24 = vld [vmem:[%s1123_s1 + $0xc8] sm:$0xff] }
   0x7   :  { %v18_v25 = vld [vmem:[%s1124_s0 + $0x8] sm:$0xff]  ;;  %v686_v27 = vpack.c.bf16 %v72_v22, %v71_v21  ;;  %v688_v28 = vpack.c.bf16 %v90_v24, %v89_v23  ;;  %v73_v29 = vld [vmem:[%s1123_s1 + $0x40] sm:$0xff]  ;;  %v91_v31 = vld [vmem:[%s1123_s1 + $0xd0] sm:$0xff] }
   0x8   :  { %221 = vmatprep.mubr.f32.mxu0 %v18_v25  ;;  %v54_v26 = vld [vmem:[%s1124_s0 + $0x128] sm:$0xff]  ;;  %v92_v32 = vld [vmem:[%s1123_s1 + $0xd8] sm:$0xff]  ;;  %v75_v35 = vld [vmem:[%s1123_s1 + $0x50] sm:$0xff] }
   0x9   :  { %679 = vmatpush3.bf16.msra.mxu0 %v678_v13  ;;  %721 = vmatpush3.bf16.msra.mxu1 %v678_v13  ;;  %v74_v30 = vld [vmem:[%s1123_s1 + $0x48] sm:$0xff]  ;;  %v692_v34 = vpack.c.bf16 %v92_v32, %v91_v31  ;;  %v76_v36 = vld [vmem:[%s1123_s1 + $0x58] sm:$0xff]  ;;  %v93_v37 = vld [vmem:[%s1123_s1 + $0xe0] sm:$0xff] }
   0xa   :  { %681 = vmatprep.subr.bf16.mxu0 %v680_v14  ;;  %714 = vmatprep.subr.bf16.mxu1 %v680_v14  ;;  %v690_v33 = vpack.c.bf16 %v74_v30, %v73_v29  ;;  %v94_v38 = vld [vmem:[%s1123_s1 + $0xe8] sm:$0xff]  ;;  %v694_v39 = vpack.c.bf16 %v76_v36, %v75_v35  ;;  %v77_v41 = vld [vmem:[%s1123_s1 + $0x60] sm:$0xff]  ;;  %v95_v43 = vld [vmem:[%s1123_s1 + $0xf0] sm:$0xff] }
   0xb   :  { %281 = vmatprep.mubr.f32.mxu1 %v54_v26  ;;  %v696_v40 = vpack.c.bf16 %v94_v38, %v93_v37  ;;  %v78_v42 = vld [vmem:[%s1123_s1 + $0x68] sm:$0xff]  ;;  %v96_v44 = vld [vmem:[%s1123_s1 + $0xf8] sm:$0xff]  ;;  %v79_v47 = vld [vmem:[%s1123_s1 + $0x70] sm:$0xff] }
   0xc   :  { %v698_v45 = vpack.c.bf16 %v78_v42, %v77_v41  ;;  %v700_v46 = vpack.c.bf16 %v96_v44, %v95_v43  ;;  %v80_v48 = vld [vmem:[%s1123_s1 + $0x78] sm:$0xff]  ;;  %v97_v49 = vld [vmem:[%s1123_s1 + $0x100] sm:$0xff]  ;;  %v98_v50 = vld [vmem:[%s1123_s1 + $0x108] sm:$0xff] }
   0xd   :  { %683 = vmatpush3.bf16.msra.mxu0 %v682_v19  ;;  %722 = vmatpush3.bf16.msra.mxu1 %v682_v19  ;;  %v702_v51 = vpack.c.bf16 %v80_v48, %v79_v47  ;;  %v704_v52 = vpack.c.bf16 %v98_v50, %v97_v49  ;;  %v99_v53 = vld [vmem:[%s1123_s1 + $0x110] sm:$0xff]  ;;  %v100_v54 = vld [vmem:[%s1123_s1 + $0x118] sm:$0xff]  ;;  %v17_v55 = vld [vmem:[%s1124_s0] sm:$0xff] }
   0xe   :  { %685 = vmatprep.subr.bf16.mxu0 %v684_v20  ;;  %715 = vmatprep.subr.bf16.mxu1 %v684_v20  ;;  %v53_v56 = vld [vmem:[%s1124_s0 + $0x120] sm:$0xff]  ;;  %v708_v59 = vpack.c.bf16 %v100_v54, %v99_v53  ;;  %v20_v60 = vld [vmem:[%s1124_s0 + $0x18] sm:$0xff]  ;;  %v23_v0 = vld [vmem:[%s1124_s0 + $0x30] sm:$0xff] }
   0xf   :  { %v21_v57 = vld [vmem:[%s1124_s0 + $0x20] sm:$0xff]  ;;  %v56_v61 = vld [vmem:[%s1124_s0 + $0x138] sm:$0xff]  ;;  %v59_v1 = vld [vmem:[%s1124_s0 + $0x150] sm:$0xff] }
  0x10   :  { %v57_v58 = vld [vmem:[%s1124_s0 + $0x140] sm:$0xff]  ;;  %v24_v62 = vld [vmem:[%s1124_s0 + $0x38] sm:$0xff]  ;;  %v27_v2 = vld [vmem:[%s1124_s0 + $0x50] sm:$0xff] }
  0x11   :  { %687 = vmatpush3.bf16.msra.mxu0 %v686_v27  ;;  %723 = vmatpush3.bf16.msra.mxu1 %v686_v27  ;;  %v60_v63 = vld [vmem:[%s1124_s0 + $0x158] sm:$0xff]  ;;  %v63_v3 = vld [vmem:[%s1124_s0 + $0x170] sm:$0xff]  ;;  %v26_v4 = vld [vmem:[%s1124_s0 + $0x48] sm:$0xff] }
  0x12   :  { %689 = vmatprep.subr.bf16.mxu0 %v688_v28  ;;  %716 = vmatprep.subr.bf16.mxu1 %v688_v28  ;;  %v62_v5 = vld [vmem:[%s1124_s0 + $0x168] sm:$0xff]  ;;  %v19_v7 = vld [vmem:[%s1124_s0 + $0x10] sm:$0xff]  ;;  %v29_v8 = vld [vmem:[%s1124_s0 + $0x60] sm:$0xff] }
  0x13   :  { %v30_v6 = vld [vmem:[%s1124_s0 + $0x68] sm:$0xff]  ;;  %v33_v10 = vld [vmem:[%s1124_s0 + $0x80] sm:$0xff]  ;;  %v32_v12 = vld [vmem:[%s1124_s0 + $0x78] sm:$0xff] }
  0x14   :  { %v22_v9 = vld [vmem:[%s1124_s0 + $0x28] sm:$0xff]  ;;  %v25_v11 = vld [vmem:[%s1124_s0 + $0x40] sm:$0xff]  ;;  %v28_v13 = vld [vmem:[%s1124_s0 + $0x58] sm:$0xff] }
  0x15   :  { %691 = vmatpush3.bf16.msra.mxu0 %v690_v33  ;;  %724 = vmatpush3.bf16.msra.mxu1 %v690_v33  ;;  %v36_v14 = vld [vmem:[%s1124_s0 + $0x98] sm:$0xff]  ;;  %v31_v15 = vld [vmem:[%s1124_s0 + $0x70] sm:$0xff]  ;;  %v34_v17 = vld [vmem:[%s1124_s0 + $0x88] sm:$0xff] }
  0x16   :  { %693 = vmatprep.subr.bf16.mxu0 %v692_v34  ;;  %717 = vmatprep.subr.bf16.mxu1 %v692_v34  ;;  %v35_v16 = vld [vmem:[%s1124_s0 + $0x90] sm:$0xff]  ;;  %v37_v19 = vld [vmem:[%s1124_s0 + $0xa0] sm:$0xff]  ;;  %v38_v20 = vld [vmem:[%s1124_s0 + $0xa8] sm:$0xff] }
  0x17   :  { %v39_v18 = vld [vmem:[%s1124_s0 + $0xb0] sm:$0xff]  ;;  %v40_v21 = vld [vmem:[%s1124_s0 + $0xb8] sm:$0xff]  ;;  %v42_v22 = vld [vmem:[%s1124_s0 + $0xc8] sm:$0xff] }
  0x18   :  { %v43_v23 = vld [vmem:[%s1124_s0 + $0xd0] sm:$0xff]  ;;  %v41_v24 = vld [vmem:[%s1124_s0 + $0xc0] sm:$0xff]  ;;  %v46_v25 = vld [vmem:[%s1124_s0 + $0xe8] sm:$0xff] }
  0x19   :  { %695 = vmatpush3.bf16.msra.mxu0 %v694_v39  ;;  %725 = vmatpush3.bf16.msra.mxu1 %v694_v39  ;;  %v45_v26 = vld [vmem:[%s1124_s0 + $0xe0] sm:$0xff]  ;;  %v44_v28 = vld [vmem:[%s1124_s0 + $0xd8] sm:$0xff]  ;;  %v55_v31 = vld [vmem:[%s1124_s0 + $0x130] sm:$0xff] }
  0x1a   :  { %697 = vmatprep.subr.bf16.mxu0 %v696_v40  ;;  %718 = vmatprep.subr.bf16.mxu1 %v696_v40  ;;  %v49_v27 = vld [vmem:[%s1124_s0 + $0x100] sm:$0xff]  ;;  %v52_v29 = vld [vmem:[%s1124_s0 + $0x118] sm:$0xff]  ;;  %v47_v32 = vld [vmem:[%s1124_s0 + $0xf0] sm:$0xff] }
  0x1b   :  { %v48_v30 = vld [vmem:[%s1124_s0 + $0xf8] sm:$0xff]  ;;  %v58_v33 = vld [vmem:[%s1124_s0 + $0x148] sm:$0xff]  ;;  %v51_v34 = vld [vmem:[%s1124_s0 + $0x110] sm:$0xff] }
  0x1c   :  { %v61_v35 = vld [vmem:[%s1124_s0 + $0x160] sm:$0xff]  ;;  %v50_v36 = vld [vmem:[%s1124_s0 + $0x108] sm:$0xff]  ;;  %v64_v37 = vld [vmem:[%s1124_s0 + $0x178] sm:$0xff] }
  0x1d   :  { %699 = vmatpush3.bf16.msra.mxu0 %v698_v45  ;;  %726 = vmatpush3.bf16.msra.mxu1 %v698_v45 }
  0x1e   :  { %701 = vmatprep.subr.bf16.mxu0 %v700_v46  ;;  %719 = vmatprep.subr.bf16.mxu1 %v700_v46 }
  0x21   :  { %703 = vmatpush3.bf16.msra.mxu0 %v702_v51  ;;  %727 = vmatpush3.bf16.msra.mxu1 %v702_v51 }
  0x22   :  { %705 = vmatprep.subr.bf16.mxu1 %v704_v52 }
  0x24   :  { %222 = vmatmul.mubr.f32.vlgmr.msra.gmra.mrb[0].mxu0 %v17_v55  ;;  %282 = vmatmul.mubr.f32.vlgmr.msra.gmra.mrb[0].mxu1 %v53_v56 }
  0x25   :  { %226 = vmatprep.mubr.f32.mxu0 %v21_v57  ;;  %286 = vmatprep.mubr.f32.mxu1 %v57_v58 }
  0x26   :  { %707 = vmatpush3.bf16.msra.mxu1 %v704_v52 }
  0x27   :  { %709 = vmatprep.subr.bf16.mxu1 %v708_v59 }
  0x28   :  { %227 = vmatmul.mubr.f32.gmra.mrb[2].mxu0 %v20_v60  ;;  %287 = vmatmul.mubr.f32.gmra.mrb[2].mxu1 %v56_v61  ;;  %v1030_v60 = vld [vmem:[%s1125_s2] ss:$0 sm:$0xff] }
  0x29   :  { %231 = vmatprep.mubr.f32.mxu0 %v24_v62  ;;  %291 = vmatprep.mubr.f32.mxu1 %v60_v63 }
  0x2a   :  { %711 = vmatpush3.bf16.msra.mxu1 %v708_v59 }
  0x2c   :  { %232 = vmatmul.mubr.f32.gmra.mrb[4].mxu0 %v23_v0  ;;  %292 = vmatmul.mubr.f32.gmra.mrb[4].mxu1 %v59_v1 }
  0x2d   :  { %236 = vmatprep.mubr.f32.mxu0 %v27_v2  ;;  %296 = vmatprep.mubr.f32.mxu1 %v63_v3  ;;  %v1038_v2 = vld [vmem:[%s1126_s3] ss:$0 sm:$0xff] }
  0x30   :  { %237 = vmatmul.mubr.f32.gmra.mrb[6].mxu0 %v26_v4  ;;  %297 = vmatmul.mubr.f32.gmra.mrb[6].mxu1 %v62_v5 }
  0x31   :  { %241 = vmatprep.mubr.f32.mxu0 %v30_v6  ;;  %648 = vmatprep.mubr.msk.f32.mxu1 %vm108_vm0, %v19_v7 }
  0x34   :  { %242 = vmatmul.mubr.f32.gmra.mrb[8].mxu0 %v29_v8  ;;  %649 = vmatmul.mubr.msk.f32.vlgmr.msra.gmra.mrb[8].mxu1 %vm108_vm0, %v22_v9 }
  0x35   :  { %246 = vmatprep.mubr.f32.mxu0 %v33_v10  ;;  %651 = vmatprep.mubr.msk.f32.mxu1 %vm108_vm0, %v25_v11 }
  0x38   :  { %247 = vmatmul.mubr.f32.gmra.mrb[10].mxu0 %v32_v12  ;;  %652 = vmatmul.mubr.msk.f32.gmra.mrb[10].mxu1 %vm108_vm0, %v28_v13 }
  0x39   :  { %251 = vmatprep.mubr.f32.mxu0 %v36_v14  ;;  %654 = vmatprep.mubr.msk.f32.mxu1 %vm108_vm0, %v31_v15 }
  0x3c   :  { %252 = vmatmul.mubr.f32.gmra.mrb[12].mxu0 %v35_v16  ;;  %655 = vmatmul.mubr.msk.f32.gmra.mrb[12].mxu1 %vm108_vm0, %v34_v17 }
  0x3d   :  { %256 = vmatprep.mubr.f32.mxu0 %v39_v18  ;;  %657 = vmatprep.mubr.msk.f32.mxu1 %vm108_vm0, %v37_v19 }
  0x40   :  { %257 = vmatmul.mubr.f32.gmra.mrb[14].mxu0 %v38_v20  ;;  %658 = vmatmul.mubr.msk.f32.gmra.mrb[14].mxu1 %vm108_vm0, %v40_v21 }
  0x41   :  { %261 = vmatprep.mubr.f32.mxu0 %v42_v22  ;;  %660 = vmatprep.mubr.msk.f32.mxu1 %vm108_vm0, %v43_v23 }
  0x44   :  { %262 = vmatmul.mubr.f32.gmra.mrb[16].mxu0 %v41_v24  ;;  %661 = vmatmul.mubr.msk.f32.gmra.mrb[16].mxu1 %vm108_vm0, %v46_v25 }
  0x45   :  { %266 = vmatprep.mubr.f32.mxu0 %v45_v26  ;;  %663 = vmatprep.mubr.msk.f32.mxu1 %vm108_vm0, %v49_v27 }
  0x48   :  { %267 = vmatmul.mubr.f32.gmra.mrb[18].mxu0 %v44_v28  ;;  %664 = vmatmul.mubr.msk.f32.gmra.mrb[18].mxu1 %vm108_vm0, %v52_v29 }
  0x49   :  { %271 = vmatprep.mubr.f32.mxu0 %v48_v30  ;;  %666 = vmatprep.mubr.msk.f32.mxu1 %vm108_vm0, %v55_v31 }
  0x4c   :  { %272 = vmatmul.mubr.f32.gmra.mrb[20].mxu0 %v47_v32  ;;  %667 = vmatmul.mubr.msk.f32.gmra.mrb[20].mxu1 %vm108_vm0, %v58_v33 }
  0x4d   :  { %276 = vmatprep.mubr.f32.mxu0 %v51_v34  ;;  %669 = vmatprep.mubr.msk.f32.mxu1 %vm108_vm0, %v61_v35 }
  0x50   :  { %277 = vmatmul.mubr.f32.gmra.mrb[22].mxu0 %v50_v36  ;;  %670 = vmatmul.mubr.msk.f32.gmra.mrb[22].mxu1 %vm108_vm0, %v64_v37 }
  0xf7   :  { %v572_v38 = vpop.f32.mrb[0].mxu0  ;;  %v608_v39 = vpop.f32.mrb[0].mxu1 }
  0xf8   :  { %v573_v40 = vpop.f32.mrb[1].mxu0  ;;  %v609_v41 = vpop.f32.mrb[1].mxu1 }
  0xf9   :  { %v574_v42 = vadd.f32 %v573_v40, %v572_v38  ;;  %v1021_v43 = vadd.f32 %v609_v41, %v608_v39 }
  0xfb   :  { %v575_v44 = vpop.f32.mrb[2].mxu0  ;;  %v611_v45 = vpop.f32.mrb[2].mxu1  ;;  %v224_v3 = vadd.f32 %v574_v42, %v1030_v60 }
  0xfc   :  { %v576_v46 = vpop.f32.mrb[3].mxu0  ;;  %v612_v47 = vpop.f32.mrb[3].mxu1 }
  0xfd   :  { %v577_v48 = vadd.f32 %v576_v46, %v575_v44  ;;  %v1023_v49 = vadd.f32 %v612_v47, %v611_v45 }
  0xff   :  { %v578_v50 = vpop.f32.mrb[4].mxu0  ;;  %v614_v51 = vpop.f32.mrb[4].mxu1  ;;  %v229_v63 = vadd.f32 %v577_v48, %v1030_v60 }
 0x100   :  { %v579_v52 = vpop.f32.mrb[5].mxu0  ;;  %v615_v53 = vpop.f32.mrb[5].mxu1 }
 0x101   :  { %v580_v54 = vadd.f32 %v579_v52, %v578_v50  ;;  %v1025_v55 = vadd.f32 %v615_v53, %v614_v51 }
 0x103   :  { %v581_v56 = vpop.f32.mrb[6].mxu0  ;;  %v617_v57 = vpop.f32.mrb[6].mxu1  ;;  %v234_v14 = vadd.f32 %v580_v54, %v1030_v60 }
 0x104   :  { %v582_v58 = vpop.f32.mrb[7].mxu0  ;;  %v618_v59 = vpop.f32.mrb[7].mxu1 }
 0x105   :  { %v583_v61 = vadd.f32 %v582_v58, %v581_v56  ;;  %v1032_v62 = vadd.f32 %v618_v59, %v617_v57 }
 0x107   :  { %v584_v0 = vpop.f32.mrb[8].mxu0  ;;  %v650_v1 = vpop.f32.mrb[8].mxu1  ;;  %v239_v10 = vadd.f32 %v583_v61, %v1030_v60 }
 0x108   :  { %v374_v4 = vadd.f32 %v650_v1, %v229_v63  ;;  %v585_v5 = vpop.f32.mrb[9].mxu0  ;;  %v368_v6 = vpop.f32.mrb[9].mxu1 }
 0x109   :  { %v586_v7 = vadd.f32 %v585_v5, %v584_v0  ;;  %v369_v8 = vadd.f32 %v368_v6, %v224_v3  ;;  %v289_v6 = vadd.f32 %v1023_v49, %v1030_v60 }
 0x10a   :  { %vm448_vm1 = vcmp.gt.f32.partialorder %v374_v4, 0.0  ;;  %v471_v9 = vmul.f32 %v1038_v2, %v374_v4 }
 0x10b   :  { %vm447_vm2 = vcmp.gt.f32.partialorder %v369_v8, 0.0  ;;  %v470_v11 = vmul.f32 %v1038_v2, %v369_v8  ;;  %v587_v12 = vpop.f32.mrb[10].mxu0  ;;  %v653_v13 = vpop.f32.mrb[10].mxu1  ;;  %v244_v27 = vadd.f32 %v586_v7, %v1030_v60 }
 0x10c   :  { %v487_v15 = vsel %vm448_vm1, %v374_v4, %v471_v9  ;;  %v384_v16 = vadd.f32 %v653_v13, %v239_v10  ;;  %v588_v17 = vpop.f32.mrb[11].mxu0  ;;  %v378_v18 = vpop.f32.mrb[11].mxu1 }
 0x10d   :  { %503 = vst [vmem:[%s1127_s4 + $0x8] sm:$0xff] %v487_v15  ;;  %v486_v19 = vsel %vm447_vm2, %v369_v8, %v470_v11  ;;  %v589_v20 = vadd.f32 %v588_v17, %v587_v12  ;;  %v379_v21 = vadd.f32 %v378_v18, %v234_v14  ;;  %v284_v11 = vadd.f32 %v1021_v43, %v1030_v60 }
 0x10e   :  { %502 = vst [vmem:[%s1127_s4] sm:$0xff] %v486_v19  ;;  %vm450_vm3 = vcmp.gt.f32.partialorder %v384_v16, 0.0  ;;  %v473_v22 = vmul.f32 %v1038_v2, %v384_v16  ;;  %v299_v19 = vadd.f32 %v1032_v62, %v1030_v60  ;;  %v294_v43 = vadd.f32 %v1025_v55, %v1030_v60 }
 0x10f   :  { %vm449_vm4 = vcmp.gt.f32.partialorder %v379_v21, 0.0  ;;  %v472_v23 = vmul.f32 %v1038_v2, %v379_v21  ;;  %v590_v24 = vpop.f32.mrb[12].mxu0  ;;  %v249_v25 = vadd.f32 %v589_v20, %v1030_v60  ;;  %v656_v26 = vpop.f32.mrb[12].mxu1 }
 0x110   :  { %v489_v28 = vsel %vm450_vm3, %v384_v16, %v473_v22  ;;  %v591_v29 = vpop.f32.mrb[13].mxu0  ;;  %v388_v30 = vpop.f32.mrb[13].mxu1 }
 0x111   :  { %505 = vst [vmem:[%s1127_s4 + $0x18] sm:$0xff] %v489_v28  ;;  %v488_v31 = vsel %vm449_vm4, %v379_v21, %v472_v23  ;;  %v394_v32 = vadd.f32 %v656_v26, %v249_v25  ;;  %v592_v33 = vadd.f32 %v591_v29, %v590_v24  ;;  %v389_v34 = vadd.f32 %v388_v30, %v244_v27 }
 0x112   :  { %504 = vst [vmem:[%s1127_s4 + $0x10] sm:$0xff] %v488_v31 }
 0x113   :  { %vm452_vm5 = vcmp.gt.f32.partialorder %v394_v32, 0.0  ;;  %v475_v35 = vmul.f32 %v1038_v2, %v394_v32  ;;  %vm451_vm6 = vcmp.gt.f32.partialorder %v389_v34, 0.0  ;;  %v474_v36 = vmul.f32 %v1038_v2, %v389_v34  ;;  %v593_v37 = vpop.f32.mrb[14].mxu0  ;;  %v659_v38 = vpop.f32.mrb[14].mxu1 }
 0x114   :  { %v594_v39 = vpop.f32.mrb[15].mxu0  ;;  %v254_v40 = vadd.f32 %v592_v33, %v1030_v60  ;;  %v398_v41 = vpop.f32.mrb[15].mxu1 }
 0x115   :  { %v491_v42 = vsel %vm452_vm5, %v394_v32, %v475_v35  ;;  %v490_v44 = vsel %vm451_vm6, %v389_v34, %v474_v36  ;;  %v595_v45 = vadd.f32 %v594_v39, %v593_v37 }
 0x116   :  { %507 = vst [vmem:[%s1127_s4 + $0x28] sm:$0xff] %v491_v42  ;;  %506 = vst [vmem:[%s1127_s4 + $0x20] sm:$0xff] %v490_v44  ;;  %v399_v46 = vadd.f32 %v398_v41, %v254_v40 }
 0x117   :  { %v259_v47 = vadd.f32 %v595_v45, %v1030_v60  ;;  %v596_v48 = vpop.f32.mrb[16].mxu0  ;;  %v662_v50 = vpop.f32.mrb[16].mxu1 }
 0x118   :  { %vm453_vm7 = vcmp.gt.f32.partialorder %v399_v46, 0.0  ;;  %v476_v51 = vmul.f32 %v1038_v2, %v399_v46  ;;  %v597_v52 = vpop.f32.mrb[17].mxu0  ;;  %v408_v53 = vpop.f32.mrb[17].mxu1 }
 0x119   :  { %v404_v54 = vadd.f32 %v659_v38, %v259_v47  ;;  %v598_v56 = vadd.f32 %v597_v52, %v596_v48 }
 0x11a   :  { %v492_v57 = vsel %vm453_vm7, %v399_v46, %v476_v51 }
 0x11b   :  { %vm454_vm8 = vcmp.gt.f32.partialorder %v404_v54, 0.0  ;;  %v477_v58 = vmul.f32 %v1038_v2, %v404_v54  ;;  %508 = vst [vmem:[%s1127_s4 + $0x30] sm:$0xff] %v492_v57  ;;  %v599_v59 = vpop.f32.mrb[18].mxu0  ;;  %v264_v61 = vadd.f32 %v598_v56, %v1030_v60  ;;  %v665_v63 = vpop.f32.mrb[18].mxu1 }
 0x11c   :  { %v600_v0 = vpop.f32.mrb[19].mxu0  ;;  %v418_v1 = vpop.f32.mrb[19].mxu1 }
 0x11d   :  { %v493_v3 = vsel %vm454_vm8, %v404_v54, %v477_v58  ;;  %v409_v4 = vadd.f32 %v408_v53, %v264_v61  ;;  %v601_v5 = vadd.f32 %v600_v0, %v599_v59 }
 0x11e   :  { %509 = vst [vmem:[%s1127_s4 + $0x38] sm:$0xff] %v493_v3 }
 0x11f   :  { %vm455_vm9 = vcmp.gt.f32.partialorder %v409_v4, 0.0  ;;  %v478_v7 = vmul.f32 %v1038_v2, %v409_v4  ;;  %v269_v8 = vadd.f32 %v601_v5, %v1030_v60  ;;  %v602_v9 = vpop.f32.mrb[20].mxu0  ;;  %v668_v10 = vpop.f32.mrb[20].mxu1 }
 0x120   :  { %v434_v12 = vadd.f32 %v668_v10, %v289_v6  ;;  %v603_v13 = vpop.f32.mrb[21].mxu0  ;;  %v428_v14 = vpop.f32.mrb[21].mxu1 }
 0x121   :  { %v494_v15 = vsel %vm455_vm9, %v409_v4, %v478_v7  ;;  %v414_v16 = vadd.f32 %v662_v50, %v269_v8  ;;  %v604_v17 = vadd.f32 %v603_v13, %v602_v9  ;;  %v429_v18 = vadd.f32 %v428_v14, %v284_v11 }
 0x122   :  { %510 = vst [vmem:[%s1127_s4 + $0x40] sm:$0xff] %v494_v15  ;;  %vm460_vm10 = vcmp.gt.f32.partialorder %v434_v12, 0.0  ;;  %v483_v49 = vmul.f32 %v1038_v2, %v434_v12 }
 0x123   :  { %vm456_vm11 = vcmp.gt.f32.partialorder %v414_v16, 0.0  ;;  %v479_v20 = vmul.f32 %v1038_v2, %v414_v16  ;;  %v274_v21 = vadd.f32 %v604_v17, %v1030_v60  ;;  %vm459_vm12 = vcmp.gt.f32.partialorder %v429_v18, 0.0  ;;  %v605_v22 = vpop.f32.mrb[22].mxu0  ;;  %v671_v23 = vpop.f32.mrb[22].mxu1 }
 0x124   :  { %v499_v24 = vsel %vm460_vm10, %v434_v12, %v483_v49  ;;  %v482_v25 = vmul.f32 %v1038_v2, %v429_v18  ;;  %v444_v26 = vadd.f32 %v671_v23, %v299_v19  ;;  %v606_v27 = vpop.f32.mrb[23].mxu0  ;;  %v438_v28 = vpop.f32.mrb[23].mxu1 }
 0x125   :  { %v495_v29 = vsel %vm456_vm11, %v414_v16, %v479_v20  ;;  %515 = vst [vmem:[%s1127_s4 + $0x68] sm:$0xff] %v499_v24  ;;  %v419_v55 = vadd.f32 %v418_v1, %v274_v21  ;;  %v607_v62 = vadd.f32 %v606_v27, %v605_v22  ;;  %v439_v30 = vadd.f32 %v438_v28, %v294_v43 }
 0x126   :  { %511 = vst [vmem:[%s1127_s4 + $0x48] sm:$0xff] %v495_v29  ;;  %v498_v31 = vsel %vm459_vm12, %v429_v18, %v482_v25  ;;  %vm462_vm13 = vcmp.gt.f32.partialorder %v444_v26, 0.0  ;;  %v485_v32 = vmul.f32 %v1038_v2, %v444_v26 }
 0x127   :  { %vm457_vm14 = vcmp.gt.f32.partialorder %v419_v55, 0.0  ;;  %v480_v33 = vmul.f32 %v1038_v2, %v419_v55  ;;  %514 = vst [vmem:[%s1127_s4 + $0x60] sm:$0xff] %v498_v31  ;;  %v279_v34 = vadd.f32 %v607_v62, %v1030_v60  ;;  %vm461_vm15 = vcmp.gt.f32.partialorder %v439_v30, 0.0 }
 0x128   :  { %v501_v35 = vsel %vm462_vm13, %v444_v26, %v485_v32  ;;  %v484_v36 = vmul.f32 %v1038_v2, %v439_v30 }
 0x129   :  { %v496_v37 = vsel %vm457_vm14, %v419_v55, %v480_v33  ;;  %517 = vst [vmem:[%s1127_s4 + $0x78] sm:$0xff] %v501_v35  ;;  %v424_v38 = vadd.f32 %v665_v63, %v279_v34 }
 0x12a   :  { %512 = vst [vmem:[%s1127_s4 + $0x50] sm:$0xff] %v496_v37  ;;  %v500_v39 = vsel %vm461_vm15, %v439_v30, %v484_v36 }
 0x12b   :  { %vm458_vm0 = vcmp.gt.f32.partialorder %v424_v38, 0.0  ;;  %v481_v40 = vmul.f32 %v1038_v2, %v424_v38  ;;  %516 = vst [vmem:[%s1127_s4 + $0x70] sm:$0xff] %v500_v39 }
 0x12d   :  { %v497_v60 = vsel %vm458_vm0, %v424_v38, %v481_v40 }
 0x12e   :  { %513 = vst [vmem:[%s1127_s4 + $0x58] sm:$0xff] %v497_v60 }

// kernel: generator_forward.26
= control target key start
LH: loop header
LB: loop body
LE: loop exit
PB: predicated region body
PF: predicated region fallthrough
CT: control target
= control target key end

     0   :  { %v1809_v0 = vmov 0.0|0.0   ;;  %vm252_vm0 = vcmask 261120   ;;  %s3083_s1 = inlined_call_operand.vmem [shape: f32[288,128], index: 1, kind: input, shape index: {}]   ;;  %s3084_s0 = inlined_call_operand.vmem [shape: f32[512,288], index: 0, kind: input, shape index: {}]   ;;  %s3085_s2 = inlined_call_operand.vmem [shape: f32[1,128], index: 2, kind: input, shape index: {}]   ;;  %s3086_s3 = inlined_call_operand.vmem [shape: f32[1,128], index: 3, kind: input, shape index: {}]   ;;  %s3087_s4 = inlined_call_operand.vmem [shape: f32[512,128], index: 4, kind: output, shape index: {}]  }
   0x1   :  { %1720 = vmatprep.subr.bf16.mxu0 %v1809_v0  ;;  %1776 = vmatprep.subr.bf16.mxu1 %v1809_v0  ;;  %v209_v1 = vld [vmem:[%s3083_s1] sm:$0xff]  ;;  %v210_v2 = vld [vmem:[%s3083_s1 + $0x8] sm:$0xff]  ;;  %v211_v3 = vld [vmem:[%s3083_s1 + $0x10] sm:$0xff] }
   0x2   :  { %v1721_v4 = vpack.c.bf16 %v210_v2, %v209_v1  ;;  %v212_v5 = vld [vmem:[%s3083_s1 + $0x18] sm:$0xff]  ;;  %v213_v7 = vld [vmem:[%s3083_s1 + $0x20] sm:$0xff]  ;;  %v214_v8 = vld [vmem:[%s3083_s1 + $0x28] sm:$0xff] }
   0x3   :  { %v1724_v6 = vpack.c.bf16 %v212_v5, %v211_v3  ;;  %v1727_v9 = vpack.c.bf16 %v214_v8, %v213_v7  ;;  %v215_v10 = vld [vmem:[%s3083_s1 + $0x30] sm:$0xff]  ;;  %v216_v11 = vld [vmem:[%s3083_s1 + $0x38] sm:$0xff]  ;;  %v18_v12 = vld [vmem:[%s3084_s0 + $0x8] sm:$0xff] }
   0x4   :  { %1722 = vmatpush1.bf16.msra.mxu0 %v1721_v4  ;;  %1792 = vmatpush1.bf16.msra.mxu1 %v1721_v4  ;;  %v1730_v13 = vpack.c.bf16 %v216_v11, %v215_v10  ;;  %v162_v14 = vld [vmem:[%s3084_s0 + $0x488] sm:$0xff]  ;;  %v217_v15 = vld [vmem:[%s3083_s1 + $0x40] sm:$0xff]  ;;  %v219_v18 = vld [vmem:[%s3083_s1 + $0x50] sm:$0xff] }
   0x5   :  { %1723 = vmatprep.subr.bf16.mxu0 %v1809_v0  ;;  %1777 = vmatprep.subr.bf16.mxu1 %v1809_v0  ;;  %v218_v16 = vld [vmem:[%s3083_s1 + $0x48] sm:$0xff]  ;;  %v220_v19 = vld [vmem:[%s3083_s1 + $0x58] sm:$0xff]  ;;  %v221_v21 = vld [vmem:[%s3083_s1 + $0x60] sm:$0xff] }
   0x6   :  { %509 = vmatprep.mubr.f32.mxu0 %v18_v12  ;;  %749 = vmatprep.mubr.f32.mxu1 %v162_v14  ;;  %v1733_v17 = vpack.c.bf16 %v218_v16, %v217_v15  ;;  %v1736_v20 = vpack.c.bf16 %v220_v19, %v219_v18  ;;  %v222_v22 = vld [vmem:[%s3083_s1 + $0x68] sm:$0xff]  ;;  %v223_v24 = vld [vmem:[%s3083_s1 + $0x70] sm:$0xff]  ;;  %v224_v25 = vld [vmem:[%s3083_s1 + $0x78] sm:$0xff] }
   0x7   :  { %v1739_v23 = vpack.c.bf16 %v222_v22, %v221_v21  ;;  %v1742_v26 = vpack.c.bf16 %v224_v25, %v223_v24  ;;  %v225_v27 = vld [vmem:[%s3083_s1 + $0x80] sm:$0xff]  ;;  %v226_v28 = vld [vmem:[%s3083_s1 + $0x88] sm:$0xff]  ;;  %v227_v30 = vld [vmem:[%s3083_s1 + $0x90] sm:$0xff] }
   0x8   :  { %1725 = vmatpush1.bf16.msra.mxu0 %v1724_v6  ;;  %1793 = vmatpush1.bf16.msra.mxu1 %v1724_v6  ;;  %v1745_v29 = vpack.c.bf16 %v226_v28, %v225_v27  ;;  %v228_v31 = vld [vmem:[%s3083_s1 + $0x98] sm:$0xff]  ;;  %v229_v33 = vld [vmem:[%s3083_s1 + $0xa0] sm:$0xff]  ;;  %v230_v34 = vld [vmem:[%s3083_s1 + $0xa8] sm:$0xff] }
   0x9   :  { %1726 = vmatprep.subr.bf16.mxu0 %v1809_v0  ;;  %1778 = vmatprep.subr.bf16.mxu1 %v1809_v0  ;;  %v1748_v32 = vpack.c.bf16 %v228_v31, %v227_v30  ;;  %v1751_v35 = vpack.c.bf16 %v230_v34, %v229_v33  ;;  %v231_v36 = vld [vmem:[%s3083_s1 + $0xb0] sm:$0xff]  ;;  %v232_v37 = vld [vmem:[%s3083_s1 + $0xb8] sm:$0xff]  ;;  %v233_v39 = vld [vmem:[%s3083_s1 + $0xc0] sm:$0xff] }
   0xa   :  { %v1754_v38 = vpack.c.bf16 %v232_v37, %v231_v36  ;;  %v234_v40 = vld [vmem:[%s3083_s1 + $0xc8] sm:$0xff]  ;;  %v235_v42 = vld [vmem:[%s3083_s1 + $0xd0] sm:$0xff]  ;;  %v236_v43 = vld [vmem:[%s3083_s1 + $0xd8] sm:$0xff] }
   0xb   :  { %v1757_v41 = vpack.c.bf16 %v234_v40, %v233_v39  ;;  %v1760_v44 = vpack.c.bf16 %v236_v43, %v235_v42  ;;  %v237_v45 = vld [vmem:[%s3083_s1 + $0xe0] sm:$0xff]  ;;  %v238_v46 = vld [vmem:[%s3083_s1 + $0xe8] sm:$0xff]  ;;  %v239_v48 = vld [vmem:[%s3083_s1 + $0xf0] sm:$0xff] }
   0xc   :  { %1728 = vmatpush1.bf16.msra.mxu0 %v1727_v9  ;;  %1794 = vmatpush1.bf16.msra.mxu1 %v1727_v9  ;;  %v1763_v47 = vpack.c.bf16 %v238_v46, %v237_v45  ;;  %v240_v49 = vld [vmem:[%s3083_s1 + $0xf8] sm:$0xff]  ;;  %v241_v50 = vld [vmem:[%s3083_s1 + $0x100] sm:$0xff]  ;;  %v242_v51 = vld [vmem:[%s3083_s1 + $0x108] sm:$0xff] }
   0xd   :  { %1729 = vmatprep.subr.bf16.mxu0 %v1809_v0  ;;  %1779 = vmatprep.subr.bf16.mxu1 %v1809_v0  ;;  %v1766_v52 = vpack.c.bf16 %v240_v49, %v239_v48  ;;  %v1768_v53 = vpack.c.bf16 %v242_v51, %v241_v50  ;;  %v243_v54 = vld [vmem:[%s3083_s1 + $0x110] sm:$0xff]  ;;  %v244_v55 = vld [vmem:[%s3083_s1 + $0x118] sm:$0xff]  ;;  %v17_v56 = vld [vmem:[%s3084_s0] sm:$0xff] }
   0xe   :  { %v161_v57 = vld [vmem:[%s3084_s0 + $0x480] sm:$0xff]  ;;  %v1772_v59 = vpack.c.bf16 %v244_v55, %v243_v54  ;;  %v20_v61 = vld [vmem:[%s3084_s0 + $0x18] sm:$0xff]  ;;  %v23_v1 = vld [vmem:[%s3084_s0 + $0x30] sm:$0xff] }
   0xf   :  { %v21_v58 = vld [vmem:[%s3084_s0 + $0x20] sm:$0xff]  ;;  %v164_v62 = vld [vmem:[%s3084_s0 + $0x498] sm:$0xff]  ;;  %v167_v2 = vld [vmem:[%s3084_s0 + $0x4b0] sm:$0xff] }
  0x10   :  { %1731 = vmatpush1.bf16.msra.mxu0 %v1730_v13  ;;  %1795 = vmatpush1.bf16.msra.mxu1 %v1730_v13  ;;  %v165_v60 = vld [vmem:[%s3084_s0 + $0x4a0] sm:$0xff]  ;;  %v24_v63 = vld [vmem:[%s3084_s0 + $0x38] sm:$0xff]  ;;  %v27_v3 = vld [vmem:[%s3084_s0 + $0x50] sm:$0xff] }
  0x11   :  { %1732 = vmatprep.subr.bf16.mxu0 %v1809_v0  ;;  %1780 = vmatprep.subr.bf16.mxu1 %v1809_v0  ;;  %v171_v4 = vld [vmem:[%s3084_s0 + $0x4d0] sm:$0xff]  ;;  %v26_v5 = vld [vmem:[%s3084_s0 + $0x48] sm:$0xff]  ;;  %v29_v9 = vld [vmem:[%s3084_s0 + $0x60] sm:$0xff] }
  0x12   :  { %v170_v6 = vld [vmem:[%s3084_s0 + $0x4c8] sm:$0xff]  ;;  %v173_v10 = vld [vmem:[%s3084_s0 + $0x4e0] sm:$0xff]  ;;  %v32_v13 = vld [vmem:[%s3084_s0 + $0x78] sm:$0xff] }
  0x13   :  { %v30_v7 = vld [vmem:[%s3084_s0 + $0x68] sm:$0xff]  ;;  %v33_v11 = vld [vmem:[%s3084_s0 + $0x80] sm:$0xff]  ;;  %v176_v14 = vld [vmem:[%s3084_s0 + $0x4f8] sm:$0xff] }
  0x14   :  { %1734 = vmatpush1.bf16.msra.mxu0 %v1733_v17  ;;  %1796 = vmatpush1.bf16.msra.mxu1 %v1733_v17  ;;  %v174_v8 = vld [vmem:[%s3084_s0 + $0x4e8] sm:$0xff]  ;;  %v177_v12 = vld [vmem:[%s3084_s0 + $0x500] sm:$0xff]  ;;  %v36_v15 = vld [vmem:[%s3084_s0 + $0x98] sm:$0xff] }
  0x15   :  { %1735 = vmatprep.subr.bf16.mxu0 %v1809_v0  ;;  %1781 = vmatprep.subr.bf16.mxu1 %v1809_v0  ;;  %v180_v16 = vld [vmem:[%s3084_s0 + $0x518] sm:$0xff]  ;;  %v35_v17 = vld [vmem:[%s3084_s0 + $0x90] sm:$0xff]  ;;  %v38_v21 = vld [vmem:[%s3084_s0 + $0xa8] sm:$0xff] }
  0x16   :  { %v179_v18 = vld [vmem:[%s3084_s0 + $0x510] sm:$0xff]  ;;  %v182_v22 = vld [vmem:[%s3084_s0 + $0x528] sm:$0xff]  ;;  %v41_v25 = vld [vmem:[%s3084_s0 + $0xc0] sm:$0xff] }
  0x17   :  { %v39_v19 = vld [vmem:[%s3084_s0 + $0xb0] sm:$0xff]  ;;  %v186_v24 = vld [vmem:[%s3084_s0 + $0x548] sm:$0xff]  ;;  %v45_v27 = vld [vmem:[%s3084_s0 + $0xe0] sm:$0xff] }
  0x18   :  { %1737 = vmatpush1.bf16.msra.mxu0 %v1736_v20  ;;  %1797 = vmatpush1.bf16.msra.mxu1 %v1736_v20  ;;  %v183_v20 = vld [vmem:[%s3084_s0 + $0x530] sm:$0xff]  ;;  %v189_v28 = vld [vmem:[%s3084_s0 + $0x560] sm:$0xff]  ;;  %v188_v30 = vld [vmem:[%s3084_s0 + $0x558] sm:$0xff] }
  0x19   :  { %1738 = vmatprep.subr.bf16.mxu0 %v1809_v0  ;;  %1782 = vmatprep.subr.bf16.mxu1 %v1809_v0  ;;  %v48_v31 = vld [vmem:[%s3084_s0 + $0xf8] sm:$0xff]  ;;  %v47_v33 = vld [vmem:[%s3084_s0 + $0xf0] sm:$0xff]  ;;  %v50_v37 = vld [vmem:[%s3084_s0 + $0x108] sm:$0xff] }
  0x1a   :  { %v191_v34 = vld [vmem:[%s3084_s0 + $0x570] sm:$0xff]  ;;  %v54_v39 = vld [vmem:[%s3084_s0 + $0x128] sm:$0xff]  ;;  %v197_v42 = vld [vmem:[%s3084_s0 + $0x5a0] sm:$0xff] }
  0x1b   :  { %v195_v36 = vld [vmem:[%s3084_s0 + $0x590] sm:$0xff]  ;;  %v198_v40 = vld [vmem:[%s3084_s0 + $0x5a8] sm:$0xff]  ;;  %v57_v43 = vld [vmem:[%s3084_s0 + $0x140] sm:$0xff] }
  0x1c   :  { %1740 = vmatpush1.bf16.msra.mxu0 %v1739_v23  ;;  %1798 = vmatpush1.bf16.msra.mxu1 %v1739_v23  ;;  %v42_v23 = vld [vmem:[%s3084_s0 + $0xc8] sm:$0xff]  ;;  %v56_v45 = vld [vmem:[%s3084_s0 + $0x138] sm:$0xff]  ;;  %v59_v49 = vld [vmem:[%s3084_s0 + $0x150] sm:$0xff] }
  0x1d   :  { %1741 = vmatprep.subr.bf16.mxu0 %v1809_v0  ;;  %1783 = vmatprep.subr.bf16.mxu1 %v1809_v0  ;;  %v200_v46 = vld [vmem:[%s3084_s0 + $0x5b8] sm:$0xff]  ;;  %v203_v50 = vld [vmem:[%s3084_s0 + $0x5d0] sm:$0xff]  ;;  %v206_v54 = vld [vmem:[%s3084_s0 + $0x5e8] sm:$0xff] }
  0x1e   :  { %v204_v48 = vld [vmem:[%s3084_s0 + $0x5d8] sm:$0xff]  ;;  %v63_v51 = vld [vmem:[%s3084_s0 + $0x170] sm:$0xff]  ;;  %v66_v55 = vld [vmem:[%s3084_s0 + $0x188] sm:$0xff] }
  0x20   :  { %1743 = vmatpush1.bf16.msra.mxu0 %v1742_v26  ;;  %1799 = vmatpush1.bf16.msra.mxu1 %v1742_v26  ;;  %v185_v26 = vld [vmem:[%s3084_s0 + $0x540] sm:$0xff] }
  0x21   :  { %1744 = vmatprep.subr.bf16.mxu0 %v1809_v0  ;;  %1784 = vmatprep.subr.bf16.mxu1 %v1809_v0 }
  0x24   :  { %1746 = vmatpush1.bf16.msra.mxu0 %v1745_v29  ;;  %1800 = vmatpush1.bf16.msra.mxu1 %v1745_v29  ;;  %v44_v29 = vld [vmem:[%s3084_s0 + $0xd8] sm:$0xff] }
  0x25   :  { %1747 = vmatprep.subr.bf16.mxu0 %v1809_v0  ;;  %1785 = vmatprep.subr.bf16.mxu1 %v1809_v0 }
  0x28   :  { %1749 = vmatpush1.bf16.msra.mxu0 %v1748_v32  ;;  %1801 = vmatpush1.bf16.msra.mxu1 %v1748_v32  ;;  %v192_v32 = vld [vmem:[%s3084_s0 + $0x578] sm:$0xff] }
  0x29   :  { %1750 = vmatprep.subr.bf16.mxu0 %v1809_v0  ;;  %1786 = vmatprep.subr.bf16.mxu1 %v1809_v0 }
  0x2c   :  { %1752 = vmatpush1.bf16.msra.mxu0 %v1751_v35  ;;  %1802 = vmatpush1.bf16.msra.mxu1 %v1751_v35  ;;  %v51_v35 = vld [vmem:[%s3084_s0 + $0x110] sm:$0xff] }
  0x2d   :  { %1753 = vmatprep.subr.bf16.mxu0 %v1809_v0  ;;  %1787 = vmatprep.subr.bf16.mxu1 %v1809_v0 }
  0x30   :  { %1755 = vmatpush1.bf16.msra.mxu0 %v1754_v38  ;;  %1803 = vmatpush1.bf16.msra.mxu1 %v1754_v38  ;;  %v194_v38 = vld [vmem:[%s3084_s0 + $0x588] sm:$0xff] }
  0x31   :  { %1756 = vmatprep.subr.bf16.mxu0 %v1809_v0  ;;  %1788 = vmatprep.subr.bf16.mxu1 %v1809_v0 }
  0x34   :  { %1758 = vmatpush1.bf16.msra.mxu0 %v1757_v41  ;;  %1804 = vmatpush1.bf16.msra.mxu1 %v1757_v41  ;;  %v53_v41 = vld [vmem:[%s3084_s0 + $0x120] sm:$0xff] }
  0x35   :  { %1759 = vmatprep.subr.bf16.mxu0 %v1809_v0  ;;  %1789 = vmatprep.subr.bf16.mxu1 %v1809_v0 }
  0x38   :  { %1761 = vmatpush1.bf16.msra.mxu0 %v1760_v44  ;;  %1805 = vmatpush1.bf16.msra.mxu1 %v1760_v44  ;;  %v201_v44 = vld [vmem:[%s3084_s0 + $0x5c0] sm:$0xff] }
  0x39   :  { %1762 = vmatprep.subr.bf16.mxu0 %v1809_v0  ;;  %1790 = vmatprep.subr.bf16.mxu1 %v1809_v0 }
  0x3c   :  { %1764 = vmatpush1.bf16.msra.mxu0 %v1763_v47  ;;  %1806 = vmatpush1.bf16.msra.mxu1 %v1763_v47  ;;  %v60_v47 = vld [vmem:[%s3084_s0 + $0x158] sm:$0xff] }
  0x3d   :  { %1765 = vmatprep.subr.bf16.mxu0 %v1809_v0  ;;  %1791 = vmatprep.subr.bf16.mxu1 %v1809_v0  ;;  %v168_v0 = vld [vmem:[%s3084_s0 + $0x4b8] sm:$0xff] }
  0x40   :  { %1767 = vmatpush1.bf16.msra.mxu0 %v1766_v52  ;;  %1807 = vmatpush1.bf16.msra.mxu1 %v1766_v52  ;;  %v207_v52 = vld [vmem:[%s3084_s0 + $0x5f0] sm:$0xff] }
  0x41   :  { %1769 = vmatprep.subr.bf16.mxu1 %v1768_v53 }
  0x43   :  { %510 = vmatmul.mubr.f32.vlgmr.msra.gmra.mrb[0].mxu0 %v17_v56  ;;  %750 = vmatmul.mubr.f32.vlgmr.msra.gmra.mrb[0].mxu1 %v161_v57  ;;  %v19_v56 = vld [vmem:[%s3084_s0 + $0x10] sm:$0xff]  ;;  %v65_v57 = vld [vmem:[%s3084_s0 + $0x180] sm:$0xff] }
  0x44   :  { %1771 = vmatpush3.bf16.msra.mxu1 %v1768_v53  ;;  %514 = vmatprep.mubr.f32.mxu0 %v21_v58  ;;  %v62_v53 = vld [vmem:[%s3084_s0 + $0x168] sm:$0xff] }
  0x45   :  { %754 = vmatprep.mubr.f32.mxu1 %v165_v60  ;;  %1773 = vmatprep.subr.bf16.mxu1 %v1772_v59  ;;  %v22_v58 = vld [vmem:[%s3084_s0 + $0x28] sm:$0xff]  ;;  %v25_v60 = vld [vmem:[%s3084_s0 + $0x40] sm:$0xff] }
  0x47   :  { %515 = vmatmul.mubr.f32.gmra.mrb[2].mxu0 %v20_v61  ;;  %755 = vmatmul.mubr.f32.gmra.mrb[2].mxu1 %v164_v62  ;;  %v68_v61 = vld [vmem:[%s3084_s0 + $0x198] sm:$0xff] }
  0x48   :  { %519 = vmatprep.mubr.f32.mxu0 %v24_v63  ;;  %759 = vmatprep.mubr.f32.mxu1 %v168_v0  ;;  %v28_v62 = vld [vmem:[%s3084_s0 + $0x58] sm:$0xff]  ;;  %v31_v0 = vld [vmem:[%s3084_s0 + $0x70] sm:$0xff] }
  0x49   :  { %1775 = vmatpush3.bf16.msra.mxu1 %v1772_v59  ;;  %v69_v59 = vld [vmem:[%s3084_s0 + $0x1a0] sm:$0xff]  ;;  %v72_v63 = vld [vmem:[%s3084_s0 + $0x1b8] sm:$0xff] }
  0x4b   :  { %520 = vmatmul.mubr.f32.gmra.mrb[4].mxu0 %v23_v1  ;;  %760 = vmatmul.mubr.f32.gmra.mrb[4].mxu1 %v167_v2  ;;  %v71_v1 = vld [vmem:[%s3084_s0 + $0x1b0] sm:$0xff]  ;;  %v34_v2 = vld [vmem:[%s3084_s0 + $0x88] sm:$0xff] }
  0x4c   :  { %524 = vmatprep.mubr.f32.mxu0 %v27_v3  ;;  %764 = vmatprep.mubr.f32.mxu1 %v171_v4  ;;  %v75_v3 = vld [vmem:[%s3084_s0 + $0x1d0] sm:$0xff]  ;;  %v37_v4 = vld [vmem:[%s3084_s0 + $0xa0] sm:$0xff] }
  0x4f   :  { %525 = vmatmul.mubr.f32.gmra.mrb[6].mxu0 %v26_v5  ;;  %765 = vmatmul.mubr.f32.gmra.mrb[6].mxu1 %v170_v6  ;;  %v74_v5 = vld [vmem:[%s3084_s0 + $0x1c8] sm:$0xff]  ;;  %v40_v6 = vld [vmem:[%s3084_s0 + $0xb8] sm:$0xff] }
  0x50   :  { %529 = vmatprep.mubr.f32.mxu0 %v30_v7  ;;  %769 = vmatprep.mubr.f32.mxu1 %v174_v8  ;;  %v78_v7 = vld [vmem:[%s3084_s0 + $0x1e8] sm:$0xff]  ;;  %v43_v8 = vld [vmem:[%s3084_s0 + $0xd0] sm:$0xff] }
  0x53   :  { %530 = vmatmul.mubr.f32.gmra.mrb[8].mxu0 %v29_v9  ;;  %770 = vmatmul.mubr.f32.gmra.mrb[8].mxu1 %v173_v10  ;;  %v77_v9 = vld [vmem:[%s3084_s0 + $0x1e0] sm:$0xff]  ;;  %v46_v10 = vld [vmem:[%s3084_s0 + $0xe8] sm:$0xff] }
  0x54   :  { %534 = vmatprep.mubr.f32.mxu0 %v33_v11  ;;  %774 = vmatprep.mubr.f32.mxu1 %v177_v12  ;;  %v81_v11 = vld [vmem:[%s3084_s0 + $0x200] sm:$0xff] }
  0x55   :  { %v49_v12 = vld [vmem:[%s3084_s0 + $0x100] sm:$0xff] }
  0x57   :  { %535 = vmatmul.mubr.f32.gmra.mrb[10].mxu0 %v32_v13  ;;  %775 = vmatmul.mubr.f32.gmra.mrb[10].mxu1 %v176_v14  ;;  %v80_v13 = vld [vmem:[%s3084_s0 + $0x1f8] sm:$0xff] }
  0x58   :  { %539 = vmatprep.mubr.f32.mxu0 %v36_v15  ;;  %779 = vmatprep.mubr.f32.mxu1 %v180_v16  ;;  %v52_v14 = vld [vmem:[%s3084_s0 + $0x118] sm:$0xff]  ;;  %v55_v16 = vld [vmem:[%s3084_s0 + $0x130] sm:$0xff] }
  0x59   :  { %v84_v15 = vld [vmem:[%s3084_s0 + $0x218] sm:$0xff] }
  0x5b   :  { %540 = vmatmul.mubr.f32.gmra.mrb[12].mxu0 %v35_v17  ;;  %780 = vmatmul.mubr.f32.gmra.mrb[12].mxu1 %v179_v18  ;;  %v83_v17 = vld [vmem:[%s3084_s0 + $0x210] sm:$0xff]  ;;  %v58_v18 = vld [vmem:[%s3084_s0 + $0x148] sm:$0xff] }
  0x5c   :  { %544 = vmatprep.mubr.f32.mxu0 %v39_v19  ;;  %784 = vmatprep.mubr.f32.mxu1 %v183_v20  ;;  %v87_v19 = vld [vmem:[%s3084_s0 + $0x230] sm:$0xff]  ;;  %v61_v20 = vld [vmem:[%s3084_s0 + $0x160] sm:$0xff] }
  0x5f   :  { %545 = vmatmul.mubr.f32.gmra.mrb[14].mxu0 %v38_v21  ;;  %785 = vmatmul.mubr.f32.gmra.mrb[14].mxu1 %v182_v22  ;;  %v86_v21 = vld [vmem:[%s3084_s0 + $0x228] sm:$0xff]  ;;  %v64_v22 = vld [vmem:[%s3084_s0 + $0x178] sm:$0xff] }
  0x60   :  { %549 = vmatprep.mubr.f32.mxu0 %v42_v23  ;;  %789 = vmatprep.mubr.f32.mxu1 %v186_v24  ;;  %v90_v23 = vld [vmem:[%s3084_s0 + $0x248] sm:$0xff]  ;;  %v67_v24 = vld [vmem:[%s3084_s0 + $0x190] sm:$0xff] }
  0x63   :  { %550 = vmatmul.mubr.f32.gmra.mrb[16].mxu0 %v41_v25  ;;  %790 = vmatmul.mubr.f32.gmra.mrb[16].mxu1 %v185_v26  ;;  %v89_v25 = vld [vmem:[%s3084_s0 + $0x240] sm:$0xff]  ;;  %v70_v26 = vld [vmem:[%s3084_s0 + $0x1a8] sm:$0xff] }
  0x64   :  { %554 = vmatprep.mubr.f32.mxu0 %v45_v27  ;;  %794 = vmatprep.mubr.f32.mxu1 %v189_v28  ;;  %v93_v27 = vld [vmem:[%s3084_s0 + $0x260] sm:$0xff] }
  0x65   :  { %v73_v28 = vld [vmem:[%s3084_s0 + $0x1c0] sm:$0xff] }
  0x67   :  { %555 = vmatmul.mubr.f32.gmra.mrb[18].mxu0 %v44_v29  ;;  %795 = vmatmul.mubr.f32.gmra.mrb[18].mxu1 %v188_v30  ;;  %v92_v29 = vld [vmem:[%s3084_s0 + $0x258] sm:$0xff] }
  0x68   :  { %559 = vmatprep.mubr.f32.mxu0 %v48_v31  ;;  %799 = vmatprep.mubr.f32.mxu1 %v192_v32  ;;  %v76_v30 = vld [vmem:[%s3084_s0 + $0x1d8] sm:$0xff]  ;;  %v79_v32 = vld [vmem:[%s3084_s0 + $0x1f0] sm:$0xff] }
  0x69   :  { %v96_v31 = vld [vmem:[%s3084_s0 + $0x278] sm:$0xff] }
  0x6b   :  { %560 = vmatmul.mubr.f32.gmra.mrb[20].mxu0 %v47_v33  ;;  %800 = vmatmul.mubr.f32.gmra.mrb[20].mxu1 %v191_v34  ;;  %v95_v33 = vld [vmem:[%s3084_s0 + $0x270] sm:$0xff]  ;;  %v82_v34 = vld [vmem:[%s3084_s0 + $0x208] sm:$0xff] }
  0x6c   :  { %564 = vmatprep.mubr.f32.mxu0 %v51_v35  ;;  %804 = vmatprep.mubr.f32.mxu1 %v195_v36  ;;  %v99_v35 = vld [vmem:[%s3084_s0 + $0x290] sm:$0xff]  ;;  %v85_v36 = vld [vmem:[%s3084_s0 + $0x220] sm:$0xff] }
  0x6f   :  { %565 = vmatmul.mubr.f32.gmra.mrb[22].mxu0 %v50_v37  ;;  %805 = vmatmul.mubr.f32.gmra.mrb[22].mxu1 %v194_v38  ;;  %v98_v37 = vld [vmem:[%s3084_s0 + $0x288] sm:$0xff]  ;;  %v88_v38 = vld [vmem:[%s3084_s0 + $0x238] sm:$0xff] }
  0x70   :  { %569 = vmatprep.mubr.f32.mxu0 %v54_v39  ;;  %809 = vmatprep.mubr.f32.mxu1 %v198_v40  ;;  %v102_v39 = vld [vmem:[%s3084_s0 + $0x2a8] sm:$0xff]  ;;  %v91_v40 = vld [vmem:[%s3084_s0 + $0x250] sm:$0xff] }
  0x73   :  { %570 = vmatmul.mubr.f32.gmra.mrb[24].mxu0 %v53_v41  ;;  %810 = vmatmul.mubr.f32.gmra.mrb[24].mxu1 %v197_v42  ;;  %v101_v41 = vld [vmem:[%s3084_s0 + $0x2a0] sm:$0xff]  ;;  %v94_v42 = vld [vmem:[%s3084_s0 + $0x268] sm:$0xff] }
  0x74   :  { %574 = vmatprep.mubr.f32.mxu0 %v57_v43  ;;  %814 = vmatprep.mubr.f32.mxu1 %v201_v44  ;;  %v105_v43 = vld [vmem:[%s3084_s0 + $0x2c0] sm:$0xff] }
  0x75   :  { %v97_v44 = vld [vmem:[%s3084_s0 + $0x280] sm:$0xff] }
  0x77   :  { %575 = vmatmul.mubr.f32.gmra.mrb[26].mxu0 %v56_v45  ;;  %815 = vmatmul.mubr.f32.gmra.mrb[26].mxu1 %v200_v46  ;;  %v104_v45 = vld [vmem:[%s3084_s0 + $0x2b8] sm:$0xff] }
  0x78   :  { %579 = vmatprep.mubr.f32.mxu0 %v60_v47  ;;  %819 = vmatprep.mubr.f32.mxu1 %v204_v48  ;;  %v100_v46 = vld [vmem:[%s3084_s0 + $0x298] sm:$0xff]  ;;  %v103_v48 = vld [vmem:[%s3084_s0 + $0x2b0] sm:$0xff] }
  0x79   :  { %v108_v47 = vld [vmem:[%s3084_s0 + $0x2d8] sm:$0xff] }
  0x7b   :  { %580 = vmatmul.mubr.f32.gmra.mrb[28].mxu0 %v59_v49  ;;  %820 = vmatmul.mubr.f32.gmra.mrb[28].mxu1 %v203_v50  ;;  %v107_v49 = vld [vmem:[%s3084_s0 + $0x2d0] sm:$0xff]  ;;  %v106_v50 = vld [vmem:[%s3084_s0 + $0x2c8] sm:$0xff] }
  0x7c   :  { %584 = vmatprep.mubr.f32.mxu0 %v63_v51  ;;  %824 = vmatprep.mubr.f32.mxu1 %v207_v52  ;;  %v111_v51 = vld [vmem:[%s3084_s0 + $0x2f0] sm:$0xff]  ;;  %v109_v52 = vld [vmem:[%s3084_s0 + $0x2e0] sm:$0xff] }
  0x7f   :  { %585 = vmatmul.mubr.f32.gmra.mrb[30].mxu0 %v62_v53  ;;  %825 = vmatmul.mubr.f32.gmra.mrb[30].mxu1 %v206_v54  ;;  %v110_v53 = vld [vmem:[%s3084_s0 + $0x2e8] sm:$0xff]  ;;  %v112_v54 = vld [vmem:[%s3084_s0 + $0x2f8] sm:$0xff] }
  0x80   :  { %589 = vmatprep.mubr.f32.mxu0 %v66_v55  ;;  %1624 = vmatprep.mubr.msk.f32.mxu1 %vm252_vm0, %v19_v56  ;;  %v114_v55 = vld [vmem:[%s3084_s0 + $0x308] sm:$0xff]  ;;  %v115_v56 = vld [vmem:[%s3084_s0 + $0x310] sm:$0xff] }
  0x83   :  { %590 = vmatmul.mubr.f32.gmra.mrb[32].mxu0 %v65_v57  ;;  %1625 = vmatmul.mubr.msk.f32.vlgmr.msra.gmra.mrb[32].mxu1 %vm252_vm0, %v22_v58  ;;  %v113_v57 = vld [vmem:[%s3084_s0 + $0x300] sm:$0xff]  ;;  %v118_v58 = vld [vmem:[%s3084_s0 + $0x328] sm:$0xff] }
  0x84   :  { %594 = vmatprep.mubr.f32.mxu0 %v69_v59  ;;  %1627 = vmatprep.mubr.msk.f32.mxu1 %vm252_vm0, %v25_v60  ;;  %v117_v59 = vld [vmem:[%s3084_s0 + $0x320] sm:$0xff] }
  0x85   :  { %v121_v60 = vld [vmem:[%s3084_s0 + $0x340] sm:$0xff] }
  0x87   :  { %595 = vmatmul.mubr.f32.gmra.mrb[34].mxu0 %v68_v61  ;;  %1628 = vmatmul.mubr.msk.f32.gmra.mrb[34].mxu1 %vm252_vm0, %v28_v62  ;;  %v116_v61 = vld [vmem:[%s3084_s0 + $0x318] sm:$0xff] }
  0x88   :  { %599 = vmatprep.mubr.f32.mxu0 %v72_v63  ;;  %1630 = vmatprep.mubr.msk.f32.mxu1 %vm252_vm0, %v31_v0  ;;  %v124_v62 = vld [vmem:[%s3084_s0 + $0x358] sm:$0xff]  ;;  %v127_v0 = vld [vmem:[%s3084_s0 + $0x370] sm:$0xff] }
  0x89   :  { %v120_v63 = vld [vmem:[%s3084_s0 + $0x338] sm:$0xff] }
  0x8b   :  { %600 = vmatmul.mubr.f32.gmra.mrb[36].mxu0 %v71_v1  ;;  %1631 = vmatmul.mubr.msk.f32.gmra.mrb[36].mxu1 %vm252_vm0, %v34_v2  ;;  %v119_v1 = vld [vmem:[%s3084_s0 + $0x330] sm:$0xff]  ;;  %v130_v2 = vld [vmem:[%s3084_s0 + $0x388] sm:$0xff] }
  0x8c   :  { %604 = vmatprep.mubr.f32.mxu0 %v75_v3  ;;  %1633 = vmatprep.mubr.msk.f32.mxu1 %vm252_vm0, %v37_v4  ;;  %v123_v3 = vld [vmem:[%s3084_s0 + $0x350] sm:$0xff]  ;;  %v133_v4 = vld [vmem:[%s3084_s0 + $0x3a0] sm:$0xff] }
  0x8f   :  { %605 = vmatmul.mubr.f32.gmra.mrb[38].mxu0 %v74_v5  ;;  %1634 = vmatmul.mubr.msk.f32.gmra.mrb[38].mxu1 %vm252_vm0, %v40_v6  ;;  %v122_v5 = vld [vmem:[%s3084_s0 + $0x348] sm:$0xff]  ;;  %v136_v6 = vld [vmem:[%s3084_s0 + $0x3b8] sm:$0xff] }
  0x90   :  { %609 = vmatprep.mubr.f32.mxu0 %v78_v7  ;;  %1636 = vmatprep.mubr.msk.f32.mxu1 %vm252_vm0, %v43_v8  ;;  %v126_v7 = vld [vmem:[%s3084_s0 + $0x368] sm:$0xff]  ;;  %v139_v8 = vld [vmem:[%s3084_s0 + $0x3d0] sm:$0xff] }
  0x93   :  { %610 = vmatmul.mubr.f32.gmra.mrb[40].mxu0 %v77_v9  ;;  %1637 = vmatmul.mubr.msk.f32.gmra.mrb[40].mxu1 %vm252_vm0, %v46_v10  ;;  %v125_v9 = vld [vmem:[%s3084_s0 + $0x360] sm:$0xff]  ;;  %v142_v10 = vld [vmem:[%s3084_s0 + $0x3e8] sm:$0xff] }
  0x94   :  { %614 = vmatprep.mubr.f32.mxu0 %v81_v11  ;;  %1639 = vmatprep.mubr.msk.f32.mxu1 %vm252_vm0, %v49_v12  ;;  %v129_v11 = vld [vmem:[%s3084_s0 + $0x380] sm:$0xff] }
  0x95   :  { %v145_v12 = vld [vmem:[%s3084_s0 + $0x400] sm:$0xff] }
  0x97   :  { %615 = vmatmul.mubr.f32.gmra.mrb[42].mxu0 %v80_v13  ;;  %1640 = vmatmul.mubr.msk.f32.gmra.mrb[42].mxu1 %vm252_vm0, %v52_v14  ;;  %v128_v13 = vld [vmem:[%s3084_s0 + $0x378] sm:$0xff] }
  0x98   :  { %619 = vmatprep.mubr.f32.mxu0 %v84_v15  ;;  %1642 = vmatprep.mubr.msk.f32.mxu1 %vm252_vm0, %v55_v16  ;;  %v148_v14 = vld [vmem:[%s3084_s0 + $0x418] sm:$0xff]  ;;  %v151_v16 = vld [vmem:[%s3084_s0 + $0x430] sm:$0xff] }
  0x99   :  { %v132_v15 = vld [vmem:[%s3084_s0 + $0x398] sm:$0xff] }
  0x9b   :  { %620 = vmatmul.mubr.f32.gmra.mrb[44].mxu0 %v83_v17  ;;  %1643 = vmatmul.mubr.msk.f32.gmra.mrb[44].mxu1 %vm252_vm0, %v58_v18  ;;  %v131_v17 = vld [vmem:[%s3084_s0 + $0x390] sm:$0xff]  ;;  %v154_v18 = vld [vmem:[%s3084_s0 + $0x448] sm:$0xff] }
  0x9c   :  { %624 = vmatprep.mubr.f32.mxu0 %v87_v19  ;;  %1645 = vmatprep.mubr.msk.f32.mxu1 %vm252_vm0, %v61_v20  ;;  %v135_v19 = vld [vmem:[%s3084_s0 + $0x3b0] sm:$0xff]  ;;  %v157_v20 = vld [vmem:[%s3084_s0 + $0x460] sm:$0xff] }
  0x9f   :  { %625 = vmatmul.mubr.f32.gmra.mrb[46].mxu0 %v86_v21  ;;  %1646 = vmatmul.mubr.msk.f32.gmra.mrb[46].mxu1 %vm252_vm0, %v64_v22  ;;  %v134_v21 = vld [vmem:[%s3084_s0 + $0x3a8] sm:$0xff]  ;;  %v160_v22 = vld [vmem:[%s3084_s0 + $0x478] sm:$0xff] }
  0xa0   :  { %629 = vmatprep.mubr.f32.mxu0 %v90_v23  ;;  %1648 = vmatprep.mubr.msk.f32.mxu1 %vm252_vm0, %v67_v24  ;;  %v138_v23 = vld [vmem:[%s3084_s0 + $0x3c8] sm:$0xff]  ;;  %v163_v24 = vld [vmem:[%s3084_s0 + $0x490] sm:$0xff] }
  0xa3   :  { %630 = vmatmul.mubr.f32.gmra.mrb[48].mxu0 %v89_v25  ;;  %1649 = vmatmul.mubr.msk.f32.gmra.mrb[48].mxu1 %vm252_vm0, %v70_v26  ;;  %v137_v25 = vld [vmem:[%s3084_s0 + $0x3c0] sm:$0xff]  ;;  %v166_v26 = vld [vmem:[%s3084_s0 + $0x4a8] sm:$0xff] }
  0xa4   :  { %634 = vmatprep.mubr.f32.mxu0 %v93_v27  ;;  %1651 = vmatprep.mubr.msk.f32.mxu1 %vm252_vm0, %v73_v28  ;;  %v141_v27 = vld [vmem:[%s3084_s0 + $0x3e0] sm:$0xff] }
  0xa5   :  { %v169_v28 = vld [vmem:[%s3084_s0 + $0x4c0] sm:$0xff] }
  0xa7   :  { %635 = vmatmul.mubr.f32.gmra.mrb[50].mxu0 %v92_v29  ;;  %1652 = vmatmul.mubr.msk.f32.gmra.mrb[50].mxu1 %vm252_vm0, %v76_v30  ;;  %v140_v29 = vld [vmem:[%s3084_s0 + $0x3d8] sm:$0xff] }
  0xa8   :  { %639 = vmatprep.mubr.f32.mxu0 %v96_v31  ;;  %1654 = vmatprep.mubr.msk.f32.mxu1 %vm252_vm0, %v79_v32  ;;  %v172_v30 = vld [vmem:[%s3084_s0 + $0x4d8] sm:$0xff]  ;;  %v175_v32 = vld [vmem:[%s3084_s0 + $0x4f0] sm:$0xff] }
  0xa9   :  { %v144_v31 = vld [vmem:[%s3084_s0 + $0x3f8] sm:$0xff] }
  0xab   :  { %640 = vmatmul.mubr.f32.gmra.mrb[52].mxu0 %v95_v33  ;;  %1655 = vmatmul.mubr.msk.f32.gmra.mrb[52].mxu1 %vm252_vm0, %v82_v34  ;;  %v143_v33 = vld [vmem:[%s3084_s0 + $0x3f0] sm:$0xff]  ;;  %v178_v34 = vld [vmem:[%s3084_s0 + $0x508] sm:$0xff] }
  0xac   :  { %644 = vmatprep.mubr.f32.mxu0 %v99_v35  ;;  %1657 = vmatprep.mubr.msk.f32.mxu1 %vm252_vm0, %v85_v36  ;;  %v147_v35 = vld [vmem:[%s3084_s0 + $0x410] sm:$0xff]  ;;  %v181_v36 = vld [vmem:[%s3084_s0 + $0x520] sm:$0xff] }
  0xaf   :  { %645 = vmatmul.mubr.f32.gmra.mrb[54].mxu0 %v98_v37  ;;  %1658 = vmatmul.mubr.msk.f32.gmra.mrb[54].mxu1 %vm252_vm0, %v88_v38  ;;  %v146_v37 = vld [vmem:[%s3084_s0 + $0x408] sm:$0xff]  ;;  %v184_v38 = vld [vmem:[%s3084_s0 + $0x538] sm:$0xff] }
  0xb0   :  { %649 = vmatprep.mubr.f32.mxu0 %v102_v39  ;;  %1660 = vmatprep.mubr.msk.f32.mxu1 %vm252_vm0, %v91_v40  ;;  %v150_v39 = vld [vmem:[%s3084_s0 + $0x428] sm:$0xff]  ;;  %v187_v40 = vld [vmem:[%s3084_s0 + $0x550] sm:$0xff] }
  0xb3   :  { %650 = vmatmul.mubr.f32.gmra.mrb[56].mxu0 %v101_v41  ;;  %1661 = vmatmul.mubr.msk.f32.gmra.mrb[56].mxu1 %vm252_vm0, %v94_v42  ;;  %v149_v41 = vld [vmem:[%s3084_s0 + $0x420] sm:$0xff]  ;;  %v190_v42 = vld [vmem:[%s3084_s0 + $0x568] sm:$0xff] }
  0xb4   :  { %654 = vmatprep.mubr.f32.mxu0 %v105_v43  ;;  %1663 = vmatprep.mubr.msk.f32.mxu1 %vm252_vm0, %v97_v44  ;;  %v153_v43 = vld [vmem:[%s3084_s0 + $0x440] sm:$0xff] }
  0xb5   :  { %v193_v44 = vld [vmem:[%s3084_s0 + $0x580] sm:$0xff] }
  0xb7   :  { %655 = vmatmul.mubr.f32.gmra.mrb[58].mxu0 %v104_v45  ;;  %1664 = vmatmul.mubr.msk.f32.gmra.mrb[58].mxu1 %vm252_vm0, %v100_v46  ;;  %v152_v45 = vld [vmem:[%s3084_s0 + $0x438] sm:$0xff] }
  0xb8   :  { %659 = vmatprep.mubr.f32.mxu0 %v108_v47  ;;  %1666 = vmatprep.mubr.msk.f32.mxu1 %vm252_vm0, %v103_v48  ;;  %v196_v46 = vld [vmem:[%s3084_s0 + $0x598] sm:$0xff]  ;;  %v199_v48 = vld [vmem:[%s3084_s0 + $0x5b0] sm:$0xff] }
  0xb9   :  { %v156_v47 = vld [vmem:[%s3084_s0 + $0x458] sm:$0xff] }
  0xbb   :  { %660 = vmatmul.mubr.f32.gmra.mrb[60].mxu0 %v107_v49  ;;  %1667 = vmatmul.mubr.msk.f32.gmra.mrb[60].mxu1 %vm252_vm0, %v106_v50  ;;  %v155_v49 = vld [vmem:[%s3084_s0 + $0x450] sm:$0xff]  ;;  %v202_v50 = vld [vmem:[%s3084_s0 + $0x5c8] sm:$0xff] }
  0xbc   :  { %664 = vmatprep.mubr.f32.mxu0 %v111_v51  ;;  %1669 = vmatprep.mubr.msk.f32.mxu1 %vm252_vm0, %v109_v52  ;;  %v159_v51 = vld [vmem:[%s3084_s0 + $0x470] sm:$0xff]  ;;  %v205_v52 = vld [vmem:[%s3084_s0 + $0x5e0] sm:$0xff] }
  0xbf   :  { %665 = vmatmul.mubr.f32.gmra.mrb[62].mxu0 %v110_v53  ;;  %1670 = vmatmul.mubr.msk.f32.gmra.mrb[62].mxu1 %vm252_vm0, %v112_v54  ;;  %v158_v53 = vld [vmem:[%s3084_s0 + $0x468] sm:$0xff]  ;;  %v208_v54 = vld [vmem:[%s3084_s0 + $0x5f8] sm:$0xff] }
  0xc0   :  { %669 = vmatprep.mubr.f32.mxu0 %v114_v55  ;;  %1672 = vmatprep.mubr.msk.f32.mxu1 %vm252_vm0, %v115_v56 }
  0xc3   :  { %670 = vmatmul.mubr.f32.gmra.mrb[64].mxu0 %v113_v57  ;;  %1673 = vmatmul.mubr.msk.f32.gmra.mrb[64].mxu1 %vm252_vm0, %v118_v58 }
  0xc4   :  { %674 = vmatprep.mubr.f32.mxu0 %v117_v59  ;;  %1675 = vmatprep.mubr.msk.f32.mxu1 %vm252_vm0, %v121_v60 }
  0xc7   :  { %675 = vmatmul.mubr.f32.gmra.mrb[66].mxu0 %v116_v61  ;;  %1676 = vmatmul.mubr.msk.f32.gmra.mrb[66].mxu1 %vm252_vm0, %v124_v62 }
  0xc8   :  { %679 = vmatprep.mubr.f32.mxu0 %v120_v63  ;;  %1678 = vmatprep.mubr.msk.f32.mxu1 %vm252_vm0, %v127_v0 }
  0xcb   :  { %680 = vmatmul.mubr.f32.gmra.mrb[68].mxu0 %v119_v1  ;;  %1679 = vmatmul.mubr.msk.f32.gmra.mrb[68].mxu1 %vm252_vm0, %v130_v2 }
  0xcc   :  { %684 = vmatprep.mubr.f32.mxu0 %v123_v3  ;;  %1681 = vmatprep.mubr.msk.f32.mxu1 %vm252_vm0, %v133_v4 }
  0xcf   :  { %685 = vmatmul.mubr.f32.gmra.mrb[70].mxu0 %v122_v5  ;;  %1682 = vmatmul.mubr.msk.f32.gmra.mrb[70].mxu1 %vm252_vm0, %v136_v6 }
  0xd0   :  { %689 = vmatprep.mubr.f32.mxu0 %v126_v7  ;;  %1684 = vmatprep.mubr.msk.f32.mxu1 %vm252_vm0, %v139_v8 }
  0xd3   :  { %690 = vmatmul.mubr.f32.gmra.mrb[72].mxu0 %v125_v9  ;;  %1685 = vmatmul.mubr.msk.f32.gmra.mrb[72].mxu1 %vm252_vm0, %v142_v10 }
  0xd4   :  { %694 = vmatprep.mubr.f32.mxu0 %v129_v11  ;;  %1687 = vmatprep.mubr.msk.f32.mxu1 %vm252_vm0, %v145_v12 }
  0xd7   :  { %695 = vmatmul.mubr.f32.gmra.mrb[74].mxu0 %v128_v13  ;;  %1688 = vmatmul.mubr.msk.f32.gmra.mrb[74].mxu1 %vm252_vm0, %v148_v14 }
  0xd8   :  { %699 = vmatprep.mubr.f32.mxu0 %v132_v15  ;;  %1690 = vmatprep.mubr.msk.f32.mxu1 %vm252_vm0, %v151_v16 }
  0xdb   :  { %700 = vmatmul.mubr.f32.gmra.mrb[76].mxu0 %v131_v17  ;;  %1691 = vmatmul.mubr.msk.f32.gmra.mrb[76].mxu1 %vm252_vm0, %v154_v18 }
  0xdc   :  { %704 = vmatprep.mubr.f32.mxu0 %v135_v19  ;;  %1693 = vmatprep.mubr.msk.f32.mxu1 %vm252_vm0, %v157_v20 }
  0xdf   :  { %705 = vmatmul.mubr.f32.gmra.mrb[78].mxu0 %v134_v21  ;;  %1694 = vmatmul.mubr.msk.f32.gmra.mrb[78].mxu1 %vm252_vm0, %v160_v22 }
  0xe0   :  { %709 = vmatprep.mubr.f32.mxu0 %v138_v23  ;;  %1696 = vmatprep.mubr.msk.f32.mxu1 %vm252_vm0, %v163_v24 }
  0xe3   :  { %710 = vmatmul.mubr.f32.gmra.mrb[80].mxu0 %v137_v25  ;;  %1697 = vmatmul.mubr.msk.f32.gmra.mrb[80].mxu1 %vm252_vm0, %v166_v26 }
  0xe4   :  { %714 = vmatprep.mubr.f32.mxu0 %v141_v27  ;;  %1699 = vmatprep.mubr.msk.f32.mxu1 %vm252_vm0, %v169_v28 }
  0xe7   :  { %715 = vmatmul.mubr.f32.gmra.mrb[82].mxu0 %v140_v29  ;;  %1700 = vmatmul.mubr.msk.f32.gmra.mrb[82].mxu1 %vm252_vm0, %v172_v30 }
  0xe8   :  { %719 = vmatprep.mubr.f32.mxu0 %v144_v31  ;;  %1702 = vmatprep.mubr.msk.f32.mxu1 %vm252_vm0, %v175_v32 }
  0xeb   :  { %720 = vmatmul.mubr.f32.gmra.mrb[84].mxu0 %v143_v33  ;;  %1703 = vmatmul.mubr.msk.f32.gmra.mrb[84].mxu1 %vm252_vm0, %v178_v34 }
  0xec   :  { %724 = vmatprep.mubr.f32.mxu0 %v147_v35  ;;  %1705 = vmatprep.mubr.msk.f32.mxu1 %vm252_vm0, %v181_v36 }
  0xef   :  { %725 = vmatmul.mubr.f32.gmra.mrb[86].mxu0 %v146_v37  ;;  %1706 = vmatmul.mubr.msk.f32.gmra.mrb[86].mxu1 %vm252_vm0, %v184_v38 }
  0xf0   :  { %729 = vmatprep.mubr.f32.mxu0 %v150_v39  ;;  %1708 = vmatprep.mubr.msk.f32.mxu1 %vm252_vm0, %v187_v40 }
  0xf3   :  { %730 = vmatmul.mubr.f32.gmra.mrb[88].mxu0 %v149_v41  ;;  %1709 = vmatmul.mubr.msk.f32.gmra.mrb[88].mxu1 %vm252_vm0, %v190_v42 }
  0xf4   :  { %734 = vmatprep.mubr.f32.mxu0 %v153_v43  ;;  %1711 = vmatprep.mubr.msk.f32.mxu1 %vm252_vm0, %v193_v44 }
  0xf7   :  { %735 = vmatmul.mubr.f32.gmra.mrb[90].mxu0 %v152_v45  ;;  %1712 = vmatmul.mubr.msk.f32.gmra.mrb[90].mxu1 %vm252_vm0, %v196_v46 }
  0xf8   :  { %739 = vmatprep.mubr.f32.mxu0 %v156_v47  ;;  %1714 = vmatprep.mubr.msk.f32.mxu1 %vm252_vm0, %v199_v48 }
  0xfb   :  { %740 = vmatmul.mubr.f32.gmra.mrb[92].mxu0 %v155_v49  ;;  %1715 = vmatmul.mubr.msk.f32.gmra.mrb[92].mxu1 %vm252_vm0, %v202_v50 }
  0xfc   :  { %744 = vmatprep.mubr.f32.mxu0 %v159_v51  ;;  %1717 = vmatprep.mubr.msk.f32.mxu1 %vm252_vm0, %v205_v52 }
  0xff   :  { %745 = vmatmul.mubr.f32.gmra.mrb[94].mxu0 %v158_v53  ;;  %1718 = vmatmul.mubr.msk.f32.gmra.mrb[94].mxu1 %vm252_vm0, %v208_v54  ;;  %v2682_v53 = vld [vmem:[%s3085_s2] ss:$0 sm:$0xff] }
 0x116   :  { %v2615_v55 = vpop.f32.mrb[0].mxu0  ;;  %v2617_v56 = vpop.f32.mrb[0].mxu1 }
 0x117   :  { %v513_v57 = vpop.f32.mrb[1].mxu0  ;;  %v753_v58 = vpop.f32.mrb[1].mxu1 }
 0x11a   :  { %v2619_v59 = vpop.f32.mrb[2].mxu0  ;;  %v2621_v60 = vpop.f32.mrb[2].mxu1 }
 0x11b   :  { %v518_v61 = vpop.f32.mrb[3].mxu0  ;;  %v758_v62 = vpop.f32.mrb[3].mxu1  ;;  %v517_v58 = vadd.f32 %v2682_v53, %v2619_v59 }
 0x11c   :  { %v512_v61 = vadd.f32 %v2682_v53, %v2615_v55 }
 0x11e   :  { %v2623_v63 = vpop.f32.mrb[4].mxu0  ;;  %v2625_v0 = vpop.f32.mrb[4].mxu1 }
 0x11f   :  { %v523_v1 = vpop.f32.mrb[5].mxu0  ;;  %v763_v2 = vpop.f32.mrb[5].mxu1  ;;  %v522_v55 = vadd.f32 %v2682_v53, %v2623_v63 }
 0x120   :  { %v2693_v2 = vld [vmem:[%s3086_s3] ss:$0 sm:$0xff] }
 0x122   :  { %v2627_v3 = vpop.f32.mrb[6].mxu0  ;;  %v2629_v4 = vpop.f32.mrb[6].mxu1 }
 0x123   :  { %v528_v5 = vpop.f32.mrb[7].mxu0  ;;  %v768_v6 = vpop.f32.mrb[7].mxu1 }
 0x126   :  { %v2631_v7 = vpop.f32.mrb[8].mxu0  ;;  %v2633_v8 = vpop.f32.mrb[8].mxu1 }
 0x127   :  { %v533_v9 = vpop.f32.mrb[9].mxu0  ;;  %v773_v10 = vpop.f32.mrb[9].mxu1 }
 0x12a   :  { %v2635_v11 = vpop.f32.mrb[10].mxu0  ;;  %v2637_v12 = vpop.f32.mrb[10].mxu1 }
 0x12b   :  { %v538_v13 = vpop.f32.mrb[11].mxu0  ;;  %v778_v14 = vpop.f32.mrb[11].mxu1 }
 0x12c   :  { %v527_v13 = vadd.f32 %v2682_v53, %v2627_v3 }
 0x12e   :  { %v2639_v15 = vpop.f32.mrb[12].mxu0  ;;  %v2641_v16 = vpop.f32.mrb[12].mxu1 }
 0x12f   :  { %v543_v17 = vpop.f32.mrb[13].mxu0  ;;  %v783_v18 = vpop.f32.mrb[13].mxu1 }
 0x132   :  { %v2643_v19 = vpop.f32.mrb[14].mxu0  ;;  %v2645_v20 = vpop.f32.mrb[14].mxu1 }
 0x133   :  { %v548_v21 = vpop.f32.mrb[15].mxu0  ;;  %v788_v22 = vpop.f32.mrb[15].mxu1 }
 0x136   :  { %v2647_v23 = vpop.f32.mrb[16].mxu0  ;;  %v2649_v24 = vpop.f32.mrb[16].mxu1 }
 0x137   :  { %v553_v25 = vpop.f32.mrb[17].mxu0  ;;  %v793_v26 = vpop.f32.mrb[17].mxu1 }
 0x13a   :  { %v2651_v27 = vpop.f32.mrb[18].mxu0  ;;  %v2653_v28 = vpop.f32.mrb[18].mxu1 }
 0x13b   :  { %v558_v29 = vpop.f32.mrb[19].mxu0  ;;  %v798_v30 = vpop.f32.mrb[19].mxu1 }
 0x13c   :  { %v537_v30 = vadd.f32 %v2682_v53, %v2635_v11 }
 0x13e   :  { %v2655_v31 = vpop.f32.mrb[20].mxu0  ;;  %v2657_v32 = vpop.f32.mrb[20].mxu1 }
 0x13f   :  { %v563_v33 = vpop.f32.mrb[21].mxu0  ;;  %v803_v34 = vpop.f32.mrb[21].mxu1 }
 0x140   :  { %v532_v33 = vadd.f32 %v2682_v53, %v2631_v7 }
 0x142   :  { %v2659_v35 = vpop.f32.mrb[22].mxu0  ;;  %v2661_v36 = vpop.f32.mrb[22].mxu1 }
 0x143   :  { %v568_v37 = vpop.f32.mrb[23].mxu0  ;;  %v808_v38 = vpop.f32.mrb[23].mxu1 }
 0x146   :  { %v2663_v39 = vpop.f32.mrb[24].mxu0  ;;  %v2665_v40 = vpop.f32.mrb[24].mxu1 }
 0x147   :  { %v573_v41 = vpop.f32.mrb[25].mxu0  ;;  %v813_v42 = vpop.f32.mrb[25].mxu1 }
 0x14a   :  { %v2667_v43 = vpop.f32.mrb[26].mxu0  ;;  %v2669_v44 = vpop.f32.mrb[26].mxu1 }
 0x14b   :  { %v578_v45 = vpop.f32.mrb[27].mxu0  ;;  %v818_v46 = vpop.f32.mrb[27].mxu1 }
 0x14e   :  { %v2671_v47 = vpop.f32.mrb[28].mxu0  ;;  %v2673_v48 = vpop.f32.mrb[28].mxu1 }
 0x14f   :  { %v583_v49 = vpop.f32.mrb[29].mxu0  ;;  %v823_v50 = vpop.f32.mrb[29].mxu1 }
 0x150   :  { %v547_v50 = vadd.f32 %v2682_v53, %v2643_v19 }
 0x152   :  { %v2675_v51 = vpop.f32.mrb[30].mxu0  ;;  %v2677_v52 = vpop.f32.mrb[30].mxu1 }
 0x153   :  { %v588_v54 = vpop.f32.mrb[31].mxu0  ;;  %v828_v57 = vpop.f32.mrb[31].mxu1 }
 0x154   :  { %v542_v54 = vadd.f32 %v2682_v53, %v2639_v15 }
 0x156   :  { %v2688_v62 = vpop.f32.mrb[32].mxu0  ;;  %v1626_v1 = vpop.f32.mrb[32].mxu1 }
 0x157   :  { %v902_v5 = vadd.f32 %v1626_v1, %v517_v58  ;;  %v593_v6 = vpop.f32.mrb[33].mxu0  ;;  %v896_v9 = vpop.f32.mrb[33].mxu1 }
 0x158   :  { %v897_v10 = vadd.f32 %v896_v9, %v512_v61 }
 0x159   :  { %vm1216_vm1 = vcmp.gt.f32.partialorder %v902_v5, 0.0  ;;  %v1287_v59 = vmul.f32 %v2693_v2, %v902_v5 }
 0x15a   :  { %vm1215_vm2 = vcmp.gt.f32.partialorder %v897_v10, 0.0  ;;  %v1286_v14 = vmul.f32 %v2693_v2, %v897_v10  ;;  %v2701_v17 = vpop.f32.mrb[34].mxu0  ;;  %v1629_v18 = vpop.f32.mrb[34].mxu1 }
 0x15b   :  { %v1351_v21 = vsel %vm1216_vm1, %v902_v5, %v1287_v59  ;;  %v912_v22 = vadd.f32 %v1629_v18, %v527_v13  ;;  %v598_v25 = vpop.f32.mrb[35].mxu0  ;;  %v906_v26 = vpop.f32.mrb[35].mxu1  ;;  %v557_v13 = vadd.f32 %v2682_v53, %v2651_v27  ;;  %v552_v59 = vadd.f32 %v2682_v53, %v2647_v23 }
 0x15c   :  { %1415 = vst [vmem:[%s3087_s4 + $0x8] sm:$0xff] %v1351_v21  ;;  %v1350_v3 = vsel %vm1215_vm2, %v897_v10, %v1286_v14  ;;  %v907_v29 = vadd.f32 %v906_v26, %v522_v55 }
 0x15d   :  { %1414 = vst [vmem:[%s3087_s4] sm:$0xff] %v1350_v3  ;;  %vm1218_vm3 = vcmp.gt.f32.partialorder %v912_v22, 0.0  ;;  %v1289_v63 = vmul.f32 %v2693_v2, %v912_v22 }
 0x15e   :  { %vm1217_vm4 = vcmp.gt.f32.partialorder %v907_v29, 0.0  ;;  %v1288_v34 = vmul.f32 %v2693_v2, %v907_v29  ;;  %v2715_v37 = vpop.f32.mrb[36].mxu0  ;;  %v1632_v38 = vpop.f32.mrb[36].mxu1 }
 0x15f   :  { %v1353_v41 = vsel %vm1218_vm3, %v912_v22, %v1289_v63  ;;  %v922_v42 = vadd.f32 %v1632_v38, %v537_v30  ;;  %v603_v45 = vpop.f32.mrb[37].mxu0  ;;  %v916_v11 = vpop.f32.mrb[37].mxu1  ;;  %v562_v30 = vadd.f32 %v2682_v53, %v2655_v31 }
 0x160   :  { %1417 = vst [vmem:[%s3087_s4 + $0x18] sm:$0xff] %v1353_v41  ;;  %v1352_v46 = vsel %vm1217_vm4, %v907_v29, %v1288_v34  ;;  %v917_v49 = vadd.f32 %v916_v11, %v532_v33  ;;  %v567_v29 = vadd.f32 %v2682_v53, %v2659_v35 }
 0x161   :  { %1416 = vst [vmem:[%s3087_s4 + $0x10] sm:$0xff] %v1352_v46  ;;  %vm1220_vm5 = vcmp.gt.f32.partialorder %v922_v42, 0.0  ;;  %v1291_v7 = vmul.f32 %v2693_v2, %v922_v42  ;;  %v577_v46 = vadd.f32 %v2682_v53, %v2667_v43 }
 0x162   :  { %vm1219_vm6 = vcmp.gt.f32.partialorder %v917_v49, 0.0  ;;  %v1290_v57 = vmul.f32 %v2693_v2, %v917_v49  ;;  %v2729_v58 = vpop.f32.mrb[38].mxu0  ;;  %v1635_v61 = vpop.f32.mrb[38].mxu1 }
 0x163   :  { %v1355_v1 = vsel %vm1220_vm5, %v922_v42, %v1291_v7  ;;  %v932_v5 = vadd.f32 %v1635_v61, %v547_v50  ;;  %v608_v6 = vpop.f32.mrb[39].mxu0  ;;  %v926_v19 = vpop.f32.mrb[39].mxu1 }
 0x164   :  { %1419 = vst [vmem:[%s3087_s4 + $0x28] sm:$0xff] %v1355_v1  ;;  %v1354_v9 = vsel %vm1219_vm6, %v917_v49, %v1290_v57  ;;  %v927_v10 = vadd.f32 %v926_v19, %v542_v54  ;;  %v572_v49 = vadd.f32 %v2682_v53, %v2663_v39  ;;  %v587_v19 = vadd.f32 %v2682_v53, %v2675_v51 }
 0x165   :  { %1418 = vst [vmem:[%s3087_s4 + $0x20] sm:$0xff] %v1354_v9  ;;  %vm1222_vm7 = vcmp.gt.f32.partialorder %v932_v5, 0.0  ;;  %v1293_v15 = vmul.f32 %v2693_v2, %v932_v5  ;;  %v582_v9 = vadd.f32 %v2682_v53, %v2671_v47 }
 0x166   :  { %vm1221_vm8 = vcmp.gt.f32.partialorder %v927_v10, 0.0  ;;  %v1292_v55 = vmul.f32 %v2693_v2, %v927_v10  ;;  %v2743_v14 = vpop.f32.mrb[40].mxu0  ;;  %v1638_v18 = vpop.f32.mrb[40].mxu1 }
 0x167   :  { %v1357_v21 = vsel %vm1222_vm7, %v932_v5, %v1293_v15  ;;  %v942_v22 = vadd.f32 %v1638_v18, %v557_v13  ;;  %v613_v25 = vpop.f32.mrb[41].mxu0  ;;  %v936_v27 = vpop.f32.mrb[41].mxu1 }
 0x168   :  { %1421 = vst [vmem:[%s3087_s4 + $0x38] sm:$0xff] %v1357_v21  ;;  %v1356_v26 = vsel %vm1221_vm8, %v927_v10, %v1292_v55  ;;  %v937_v3 = vadd.f32 %v936_v27, %v552_v59  ;;  %v597_v25 = vadd.f32 %v2682_v53, %v2701_v17  ;;  %v592_v27 = vadd.f32 %v2682_v53, %v2688_v62 }
 0x169   :  { %1420 = vst [vmem:[%s3087_s4 + $0x30] sm:$0xff] %v1356_v26  ;;  %vm1224_vm9 = vcmp.gt.f32.partialorder %v942_v22, 0.0  ;;  %v1295_v23 = vmul.f32 %v2693_v2, %v942_v22 }
 0x16a   :  { %vm1223_vm10 = vcmp.gt.f32.partialorder %v937_v3, 0.0  ;;  %v1294_v63 = vmul.f32 %v2693_v2, %v937_v3  ;;  %v2757_v33 = vpop.f32.mrb[42].mxu0  ;;  %v1641_v34 = vpop.f32.mrb[42].mxu1 }
 0x16b   :  { %v1359_v38 = vsel %vm1224_vm9, %v942_v22, %v1295_v23  ;;  %v952_v41 = vadd.f32 %v1641_v34, %v567_v29  ;;  %v618_v42 = vpop.f32.mrb[43].mxu0  ;;  %v946_v35 = vpop.f32.mrb[43].mxu1 }
 0x16c   :  { %1423 = vst [vmem:[%s3087_s4 + $0x48] sm:$0xff] %v1359_v38  ;;  %v1358_v45 = vsel %vm1223_vm10, %v937_v3, %v1294_v63  ;;  %v947_v11 = vadd.f32 %v946_v35, %v562_v30  ;;  %v602_v42 = vadd.f32 %v2682_v53, %v2715_v37 }
 0x16d   :  { %1422 = vst [vmem:[%s3087_s4 + $0x40] sm:$0xff] %v1358_v45  ;;  %vm1226_vm11 = vcmp.gt.f32.partialorder %v952_v41, 0.0  ;;  %v1297_v31 = vmul.f32 %v2693_v2, %v952_v41 }
 0x16e   :  { %vm1225_vm12 = vcmp.gt.f32.partialorder %v947_v11, 0.0  ;;  %v1296_v50 = vmul.f32 %v2693_v2, %v947_v11  ;;  %v2771_v7 = vpop.f32.mrb[44].mxu0  ;;  %v1644_v54 = vpop.f32.mrb[44].mxu1 }
 0x16f   :  { %v1361_v57 = vsel %vm1226_vm11, %v952_v41, %v1297_v31  ;;  %v962_v61 = vadd.f32 %v1644_v54, %v577_v46  ;;  %v623_v1 = vpop.f32.mrb[45].mxu0  ;;  %v956_v43 = vpop.f32.mrb[45].mxu1  ;;  %v607_v41 = vadd.f32 %v2682_v53, %v2729_v58 }
 0x170   :  { %1425 = vst [vmem:[%s3087_s4 + $0x58] sm:$0xff] %v1361_v57  ;;  %v1360_v5 = vsel %vm1225_vm12, %v947_v11, %v1296_v50  ;;  %v957_v6 = vadd.f32 %v956_v43, %v572_v49  ;;  %v617_v57 = vadd.f32 %v2682_v53, %v2757_v33 }
 0x171   :  { %1424 = vst [vmem:[%s3087_s4 + $0x50] sm:$0xff] %v1360_v5  ;;  %vm1228_vm13 = vcmp.gt.f32.partialorder %v962_v61, 0.0  ;;  %v1299_v39 = vmul.f32 %v2693_v2, %v962_v61 }
 0x172   :  { %vm1227_vm14 = vcmp.gt.f32.partialorder %v957_v6, 0.0  ;;  %v1298_v10 = vmul.f32 %v2693_v2, %v957_v6  ;;  %v626_v13 = vpop.f32.mrb[46].mxu0  ;;  %v1647_v15 = vpop.f32.mrb[46].mxu1 }
 0x173   :  { %v1363_v59 = vsel %vm1228_vm13, %v962_v61, %v1299_v39  ;;  %v972_v55 = vadd.f32 %v1647_v15, %v587_v19  ;;  %v628_v18 = vpop.f32.mrb[47].mxu0  ;;  %v966_v21 = vpop.f32.mrb[47].mxu1  ;;  %v612_v61 = vadd.f32 %v2682_v53, %v2743_v14  ;;  %v627_v15 = vadd.f32 %v2682_v53, %v626_v13 }
 0x174   :  { %1427 = vst [vmem:[%s3087_s4 + $0x68] sm:$0xff] %v1363_v59  ;;  %v1362_v51 = vsel %vm1227_vm14, %v957_v6, %v1298_v10  ;;  %v967_v22 = vadd.f32 %v966_v21, %v582_v9  ;;  %v622_v59 = vadd.f32 %v2682_v53, %v2771_v7 }
 0x175   :  { %1426 = vst [vmem:[%s3087_s4 + $0x60] sm:$0xff] %v1362_v51  ;;  %vm1230_vm15 = vcmp.gt.f32.partialorder %v972_v55, 0.0  ;;  %v1301_v47 = vmul.f32 %v2693_v2, %v972_v55 }
 0x176   :  { %vm1229_vm0 = vcmp.gt.f32.partialorder %v967_v22, 0.0  ;;  %v1300_v26 = vmul.f32 %v2693_v2, %v967_v22  ;;  %v631_v3 = vpop.f32.mrb[48].mxu0  ;;  %v1650_v29 = vpop.f32.mrb[48].mxu1 }
 0x177   :  { %v1365_v23 = vsel %vm1230_vm15, %v972_v55, %v1301_v47  ;;  %v982_v30 = vadd.f32 %v1650_v29, %v597_v25  ;;  %v633_v63 = vpop.f32.mrb[49].mxu0  ;;  %v976_v34 = vpop.f32.mrb[49].mxu1  ;;  %v632_v29 = vadd.f32 %v2682_v53, %v631_v3 }
 0x178   :  { %1429 = vst [vmem:[%s3087_s4 + $0x78] sm:$0xff] %v1365_v23  ;;  %v1364_v17 = vsel %vm1229_vm0, %v967_v22, %v1300_v26  ;;  %v977_v38 = vadd.f32 %v976_v34, %v592_v27 }
 0x179   :  { %1428 = vst [vmem:[%s3087_s4 + $0x70] sm:$0xff] %v1364_v17  ;;  %vm1232_vm1 = vcmp.gt.f32.partialorder %v982_v30, 0.0  ;;  %v1303_v62 = vmul.f32 %v2693_v2, %v982_v30 }
 0x17a   :  { %vm1231_vm2 = vcmp.gt.f32.partialorder %v977_v38, 0.0  ;;  %v1302_v35 = vmul.f32 %v2693_v2, %v977_v38  ;;  %v636_v45 = vpop.f32.mrb[50].mxu0  ;;  %v1653_v11 = vpop.f32.mrb[50].mxu1 }
 0x17b   :  { %v1367_v46 = vsel %vm1232_vm1, %v982_v30, %v1303_v62  ;;  %v992_v31 = vadd.f32 %v1653_v11, %v607_v41  ;;  %v638_v49 = vpop.f32.mrb[51].mxu0  ;;  %v986_v50 = vpop.f32.mrb[51].mxu1  ;;  %v637_v26 = vadd.f32 %v2682_v53, %v636_v45 }
 0x17c   :  { %1431 = vst [vmem:[%s3087_s4 + $0x88] sm:$0xff] %v1367_v46  ;;  %v1366_v58 = vsel %vm1231_vm2, %v977_v38, %v1302_v35  ;;  %v987_v54 = vadd.f32 %v986_v50, %v602_v42 }
 0x17d   :  { %1430 = vst [vmem:[%s3087_s4 + $0x80] sm:$0xff] %v1366_v58  ;;  %vm1234_vm3 = vcmp.gt.f32.partialorder %v992_v31, 0.0  ;;  %v1305_v37 = vmul.f32 %v2693_v2, %v992_v31 }
 0x17e   :  { %vm1233_vm4 = vcmp.gt.f32.partialorder %v987_v54, 0.0  ;;  %v1304_v1 = vmul.f32 %v2693_v2, %v987_v54  ;;  %v641_v43 = vpop.f32.mrb[52].mxu0  ;;  %v1656_v5 = vpop.f32.mrb[52].mxu1 }
 0x17f   :  { %v1369_v6 = vsel %vm1234_vm3, %v992_v31, %v1305_v37  ;;  %v1002_v19 = vadd.f32 %v1656_v5, %v617_v57  ;;  %v643_v39 = vpop.f32.mrb[53].mxu0  ;;  %v996_v9 = vpop.f32.mrb[53].mxu1  ;;  %v642_v45 = vadd.f32 %v2682_v53, %v641_v43 }
 0x180   :  { %1433 = vst [vmem:[%s3087_s4 + $0x98] sm:$0xff] %v1369_v6  ;;  %v1368_v33 = vsel %vm1233_vm4, %v987_v54, %v1304_v1  ;;  %v997_v10 = vadd.f32 %v996_v9, %v612_v61 }
 0x181   :  { %1432 = vst [vmem:[%s3087_s4 + $0x90] sm:$0xff] %v1368_v33  ;;  %vm1236_vm5 = vcmp.gt.f32.partialorder %v1002_v19, 0.0  ;;  %v1307_v14 = vmul.f32 %v2693_v2, %v1002_v19 }
 0x182   :  { %vm1235_vm6 = vcmp.gt.f32.partialorder %v997_v10, 0.0  ;;  %v1306_v55 = vmul.f32 %v2693_v2, %v997_v10  ;;  %v646_v18 = vpop.f32.mrb[54].mxu0  ;;  %v1659_v21 = vpop.f32.mrb[54].mxu1 }
 0x183   :  { %v1371_v51 = vsel %vm1236_vm5, %v1002_v19, %v1307_v14  ;;  %v1012_v22 = vadd.f32 %v1659_v21, %v627_v15  ;;  %v648_v25 = vpop.f32.mrb[55].mxu0  ;;  %v1006_v47 = vpop.f32.mrb[55].mxu1  ;;  %v647_v35 = vadd.f32 %v2682_v53, %v646_v18 }
 0x184   :  { %1435 = vst [vmem:[%s3087_s4 + $0xa8] sm:$0xff] %v1371_v51  ;;  %v1370_v13 = vsel %vm1235_vm6, %v997_v10, %v1306_v55  ;;  %v1007_v27 = vadd.f32 %v1006_v47, %v622_v59 }
 0x185   :  { %1434 = vst [vmem:[%s3087_s4 + $0xa0] sm:$0xff] %v1370_v13  ;;  %vm1238_vm7 = vcmp.gt.f32.partialorder %v1012_v22, 0.0  ;;  %v1309_v7 = vmul.f32 %v2693_v2, %v1012_v22 }
 0x186   :  { %vm1237_vm8 = vcmp.gt.f32.partialorder %v1007_v27, 0.0  ;;  %v1308_v23 = vmul.f32 %v2693_v2, %v1007_v27  ;;  %v651_v30 = vpop.f32.mrb[56].mxu0  ;;  %v1662_v63 = vpop.f32.mrb[56].mxu1 }
 0x187   :  { %v1373_v34 = vsel %vm1238_vm7, %v1012_v22, %v1309_v7  ;;  %v1022_v17 = vadd.f32 %v1662_v63, %v637_v26  ;;  %v653_v38 = vpop.f32.mrb[57].mxu0  ;;  %v1016_v41 = vpop.f32.mrb[57].mxu1  ;;  %v652_v43 = vadd.f32 %v2682_v53, %v651_v30 }
 0x188   :  { %1437 = vst [vmem:[%s3087_s4 + $0xb8] sm:$0xff] %v1373_v34  ;;  %v1372_v62 = vsel %vm1237_vm8, %v1007_v27, %v1308_v23  ;;  %v1017_v42 = vadd.f32 %v1016_v41, %v632_v29 }
 0x189   :  { %1436 = vst [vmem:[%s3087_s4 + $0xb0] sm:$0xff] %v1372_v62  ;;  %vm1240_vm9 = vcmp.gt.f32.partialorder %v1022_v17, 0.0  ;;  %v1311_v3 = vmul.f32 %v2693_v2, %v1022_v17 }
 0x18a   :  { %vm1239_vm10 = vcmp.gt.f32.partialorder %v1017_v42, 0.0  ;;  %v1310_v11 = vmul.f32 %v2693_v2, %v1017_v42  ;;  %v656_v46 = vpop.f32.mrb[58].mxu0  ;;  %v1665_v31 = vpop.f32.mrb[58].mxu1 }
 0x18b   :  { %v1375_v49 = vsel %vm1240_vm9, %v1022_v17, %v1311_v3  ;;  %v1032_v50 = vadd.f32 %v1665_v31, %v647_v35  ;;  %v658_v58 = vpop.f32.mrb[59].mxu0  ;;  %v1026_v54 = vpop.f32.mrb[59].mxu1  ;;  %v657_v61 = vadd.f32 %v2682_v53, %v656_v46 }
 0x18c   :  { %1439 = vst [vmem:[%s3087_s4 + $0xc8] sm:$0xff] %v1375_v49  ;;  %v1374_v57 = vsel %vm1239_vm10, %v1017_v42, %v1310_v11  ;;  %v1027_v37 = vadd.f32 %v1026_v54, %v642_v45 }
 0x18d   :  { %1438 = vst [vmem:[%s3087_s4 + $0xc0] sm:$0xff] %v1374_v57  ;;  %vm1242_vm11 = vcmp.gt.f32.partialorder %v1032_v50, 0.0  ;;  %v1313_v1 = vmul.f32 %v2693_v2, %v1032_v50 }
 0x18e   :  { %vm1241_vm12 = vcmp.gt.f32.partialorder %v1027_v37, 0.0  ;;  %v1312_v5 = vmul.f32 %v2693_v2, %v1027_v37  ;;  %v661_v6 = vpop.f32.mrb[60].mxu0  ;;  %v1668_v19 = vpop.f32.mrb[60].mxu1 }
 0x18f   :  { %v1377_v39 = vsel %vm1242_vm11, %v1032_v50, %v1313_v1  ;;  %v1042_v9 = vadd.f32 %v1668_v19, %v657_v61  ;;  %v663_v33 = vpop.f32.mrb[61].mxu0  ;;  %v1036_v10 = vpop.f32.mrb[61].mxu1  ;;  %v662_v55 = vadd.f32 %v2682_v53, %v661_v6 }
 0x190   :  { %1441 = vst [vmem:[%s3087_s4 + $0xd8] sm:$0xff] %v1377_v39  ;;  %v1376_v15 = vsel %vm1241_vm12, %v1027_v37, %v1312_v5  ;;  %v1037_v14 = vadd.f32 %v1036_v10, %v652_v43 }
 0x191   :  { %1440 = vst [vmem:[%s3087_s4 + $0xd0] sm:$0xff] %v1376_v15  ;;  %vm1244_vm13 = vcmp.gt.f32.partialorder %v1042_v9, 0.0  ;;  %v1315_v59 = vmul.f32 %v2693_v2, %v1042_v9 }
 0x192   :  { %vm1243_vm14 = vcmp.gt.f32.partialorder %v1037_v14, 0.0  ;;  %v1314_v18 = vmul.f32 %v2693_v2, %v1037_v14  ;;  %v666_v21 = vpop.f32.mrb[62].mxu0  ;;  %v1671_v51 = vpop.f32.mrb[62].mxu1 }
 0x193   :  { %v1379_v22 = vsel %vm1244_vm13, %v1042_v9, %v1315_v59  ;;  %v667_v25 = vadd.f32 %v2682_v53, %v666_v21  ;;  %v668_v47 = vpop.f32.mrb[63].mxu0  ;;  %v1046_v13 = vpop.f32.mrb[63].mxu1 }
 0x194   :  { %1443 = vst [vmem:[%s3087_s4 + $0xe8] sm:$0xff] %v1379_v22  ;;  %v1378_v27 = vsel %vm1243_vm14, %v1037_v14, %v1314_v18  ;;  %v1047_v26 = vadd.f32 %v1046_v13, %v662_v55 }
 0x195   :  { %1442 = vst [vmem:[%s3087_s4 + $0xe0] sm:$0xff] %v1378_v27  ;;  %v1052_v7 = vadd.f32 %v1671_v51, %v667_v25 }
 0x196   :  { %vm1245_vm15 = vcmp.gt.f32.partialorder %v1047_v26, 0.0  ;;  %v1316_v29 = vmul.f32 %v2693_v2, %v1047_v26  ;;  %v671_v23 = vpop.f32.mrb[64].mxu0  ;;  %v1674_v30 = vpop.f32.mrb[64].mxu1 }
 0x197   :  { %vm1246_vm0 = vcmp.gt.f32.partialorder %v1052_v7, 0.0  ;;  %v1317_v63 = vmul.f32 %v2693_v2, %v1052_v7  ;;  %v672_v34 = vadd.f32 %v2682_v53, %v671_v23  ;;  %v673_v17 = vpop.f32.mrb[65].mxu0  ;;  %v1056_v38 = vpop.f32.mrb[65].mxu1 }
 0x198   :  { %v1380_v41 = vsel %vm1245_vm15, %v1047_v26, %v1316_v29 }
 0x199   :  { %v1381_v62 = vsel %vm1246_vm0, %v1052_v7, %v1317_v63  ;;  %1444 = vst [vmem:[%s3087_s4 + $0xf0] sm:$0xff] %v1380_v41  ;;  %v1057_v42 = vadd.f32 %v1056_v38, %v672_v34 }
 0x19a   :  { %1445 = vst [vmem:[%s3087_s4 + $0xf8] sm:$0xff] %v1381_v62  ;;  %v676_v35 = vpop.f32.mrb[66].mxu0  ;;  %v1677_v3 = vpop.f32.mrb[66].mxu1 }
 0x19b   :  { %vm1247_vm1 = vcmp.gt.f32.partialorder %v1057_v42, 0.0  ;;  %v1318_v45 = vmul.f32 %v2693_v2, %v1057_v42  ;;  %v677_v11 = vadd.f32 %v2682_v53, %v676_v35  ;;  %v678_v46 = vpop.f32.mrb[67].mxu0  ;;  %v1066_v31 = vpop.f32.mrb[67].mxu1 }
 0x19d   :  { %v1382_v49 = vsel %vm1247_vm1, %v1057_v42, %v1318_v45  ;;  %v1062_v50 = vadd.f32 %v1674_v30, %v677_v11 }
 0x19e   :  { %1446 = vst [vmem:[%s3087_s4 + $0x100] sm:$0xff] %v1382_v49  ;;  %v681_v58 = vpop.f32.mrb[68].mxu0  ;;  %v1680_v54 = vpop.f32.mrb[68].mxu1 }
 0x19f   :  { %vm1248_vm2 = vcmp.gt.f32.partialorder %v1062_v50, 0.0  ;;  %v1319_v57 = vmul.f32 %v2693_v2, %v1062_v50  ;;  %v682_v37 = vadd.f32 %v2682_v53, %v681_v58  ;;  %v683_v61 = vpop.f32.mrb[69].mxu0  ;;  %v1076_v1 = vpop.f32.mrb[69].mxu1  ;;  %v757_v58 = vadd.f32 %v2682_v53, %v2621_v60 }
 0x1a1   :  { %v1383_v43 = vsel %vm1248_vm2, %v1062_v50, %v1319_v57  ;;  %v1067_v5 = vadd.f32 %v1066_v31, %v682_v37  ;;  %v752_v37 = vadd.f32 %v2682_v53, %v2617_v56 }
 0x1a2   :  { %1447 = vst [vmem:[%s3087_s4 + $0x108] sm:$0xff] %v1383_v43  ;;  %v686_v6 = vpop.f32.mrb[70].mxu0  ;;  %v1683_v19 = vpop.f32.mrb[70].mxu1 }
 0x1a3   :  { %vm1249_vm3 = vcmp.gt.f32.partialorder %v1067_v5, 0.0  ;;  %v1320_v39 = vmul.f32 %v2693_v2, %v1067_v5  ;;  %v687_v9 = vadd.f32 %v2682_v53, %v686_v6  ;;  %v688_v33 = vpop.f32.mrb[71].mxu0  ;;  %v1086_v10 = vpop.f32.mrb[71].mxu1 }
 0x1a5   :  { %v1384_v15 = vsel %vm1249_vm3, %v1067_v5, %v1320_v39  ;;  %v1072_v14 = vadd.f32 %v1677_v3, %v687_v9 }
 0x1a6   :  { %1448 = vst [vmem:[%s3087_s4 + $0x110] sm:$0xff] %v1384_v15  ;;  %v691_v59 = vpop.f32.mrb[72].mxu0  ;;  %v2902_v55 = vpop.f32.mrb[72].mxu1  ;;  %v767_v15 = vadd.f32 %v2682_v53, %v2629_v4 }
 0x1a7   :  { %vm1250_vm4 = vcmp.gt.f32.partialorder %v1072_v14, 0.0  ;;  %v1321_v18 = vmul.f32 %v2693_v2, %v1072_v14  ;;  %v692_v21 = vadd.f32 %v2682_v53, %v691_v59  ;;  %v693_v51 = vpop.f32.mrb[73].mxu0  ;;  %v1096_v22 = vpop.f32.mrb[73].mxu1 }
 0x1a9   :  { %v1385_v25 = vsel %vm1250_vm4, %v1072_v14, %v1321_v18  ;;  %v1077_v47 = vadd.f32 %v1076_v1, %v692_v21 }
 0x1aa   :  { %1449 = vst [vmem:[%s3087_s4 + $0x118] sm:$0xff] %v1385_v25  ;;  %v696_v13 = vpop.f32.mrb[74].mxu0  ;;  %v2909_v27 = vpop.f32.mrb[74].mxu1 }
 0x1ab   :  { %vm1251_vm5 = vcmp.gt.f32.partialorder %v1077_v47, 0.0  ;;  %v1322_v26 = vmul.f32 %v2693_v2, %v1077_v47  ;;  %v697_v7 = vadd.f32 %v2682_v53, %v696_v13  ;;  %v698_v29 = vpop.f32.mrb[75].mxu0  ;;  %v2913_v23 = vpop.f32.mrb[75].mxu1 }
 0x1ad   :  { %v1386_v30 = vsel %vm1251_vm5, %v1077_v47, %v1322_v26  ;;  %v1082_v63 = vadd.f32 %v1680_v54, %v697_v7  ;;  %v772_v26 = vadd.f32 %v2682_v53, %v2633_v8  ;;  %v777_v7 = vadd.f32 %v2682_v53, %v2637_v12 }
 0x1ae   :  { %1450 = vst [vmem:[%s3087_s4 + $0x120] sm:$0xff] %v1386_v30  ;;  %v701_v34 = vpop.f32.mrb[76].mxu0  ;;  %v2918_v17 = vpop.f32.mrb[76].mxu1 }
 0x1af   :  { %vm1252_vm6 = vcmp.gt.f32.partialorder %v1082_v63, 0.0  ;;  %v1323_v38 = vmul.f32 %v2693_v2, %v1082_v63  ;;  %v702_v41 = vadd.f32 %v2682_v53, %v701_v34  ;;  %v703_v62 = vpop.f32.mrb[77].mxu0  ;;  %v2922_v42 = vpop.f32.mrb[77].mxu1 }
 0x1b1   :  { %v1387_v35 = vsel %vm1252_vm6, %v1082_v63, %v1323_v38  ;;  %v1087_v3 = vadd.f32 %v1086_v10, %v702_v41  ;;  %v762_v10 = vadd.f32 %v2682_v53, %v2625_v0 }
 0x1b2   :  { %1451 = vst [vmem:[%s3087_s4 + $0x128] sm:$0xff] %v1387_v35  ;;  %v706_v45 = vpop.f32.mrb[78].mxu0  ;;  %v2927_v11 = vpop.f32.mrb[78].mxu1 }
 0x1b3   :  { %vm1253_vm7 = vcmp.gt.f32.partialorder %v1087_v3, 0.0  ;;  %v1324_v46 = vmul.f32 %v2693_v2, %v1087_v3  ;;  %v707_v31 = vadd.f32 %v2682_v53, %v706_v45  ;;  %v708_v49 = vpop.f32.mrb[79].mxu0  ;;  %v2931_v50 = vpop.f32.mrb[79].mxu1 }
 0x1b5   :  { %v1388_v54 = vsel %vm1253_vm7, %v1087_v3, %v1324_v46  ;;  %v1092_v57 = vadd.f32 %v1683_v19, %v707_v31 }
 0x1b6   :  { %1452 = vst [vmem:[%s3087_s4 + $0x130] sm:$0xff] %v1388_v54  ;;  %v711_v61 = vpop.f32.mrb[80].mxu0  ;;  %v1698_v1 = vpop.f32.mrb[80].mxu1  ;;  %v782_v54 = vadd.f32 %v2682_v53, %v2641_v16 }
 0x1b7   :  { %vm1254_vm8 = vcmp.gt.f32.partialorder %v1092_v57, 0.0  ;;  %v1325_v43 = vmul.f32 %v2693_v2, %v1092_v57  ;;  %v712_v5 = vadd.f32 %v2682_v53, %v711_v61  ;;  %v1142_v6 = vadd.f32 %v1698_v1, %v757_v58  ;;  %v713_v39 = vpop.f32.mrb[81].mxu0  ;;  %v1136_v9 = vpop.f32.mrb[81].mxu1 }
 0x1b8   :  { %v1137_v60 = vadd.f32 %v1136_v9, %v752_v37 }
 0x1b9   :  { %v1389_v33 = vsel %vm1254_vm8, %v1092_v57, %v1325_v43  ;;  %v1097_v19 = vadd.f32 %v1096_v22, %v712_v5  ;;  %vm1264_vm9 = vcmp.gt.f32.partialorder %v1142_v6, 0.0  ;;  %v1335_v56 = vmul.f32 %v2693_v2, %v1142_v6 }
 0x1ba   :  { %1453 = vst [vmem:[%s3087_s4 + $0x138] sm:$0xff] %v1389_v33  ;;  %vm1263_vm10 = vcmp.gt.f32.partialorder %v1137_v60, 0.0  ;;  %v1334_v14 = vmul.f32 %v2693_v2, %v1137_v60  ;;  %v716_v59 = vpop.f32.mrb[82].mxu0  ;;  %v1701_v18 = vpop.f32.mrb[82].mxu1  ;;  %v787_v57 = vadd.f32 %v2682_v53, %v2645_v20  ;;  %v797_v33 = vadd.f32 %v2682_v53, %v2653_v28 }
 0x1bb   :  { %vm1255_vm11 = vcmp.gt.f32.partialorder %v1097_v19, 0.0  ;;  %v1326_v21 = vmul.f32 %v2693_v2, %v1097_v19  ;;  %v1399_v51 = vsel %vm1264_vm9, %v1142_v6, %v1335_v56  ;;  %v717_v22 = vadd.f32 %v2682_v53, %v716_v59  ;;  %v718_v25 = vpop.f32.mrb[83].mxu0  ;;  %v1146_v0 = vpop.f32.mrb[83].mxu1 }
 0x1bc   :  { %1463 = vst [vmem:[%s3087_s4 + $0x188] sm:$0xff] %v1399_v51  ;;  %v1398_v4 = vsel %vm1263_vm10, %v1137_v60, %v1334_v14  ;;  %v1152_v47 = vadd.f32 %v1701_v18, %v767_v15  ;;  %v1147_v13 = vadd.f32 %v1146_v0, %v762_v10  ;;  %v792_v60 = vadd.f32 %v2682_v53, %v2649_v24 }
 0x1bd   :  { %v1390_v29 = vsel %vm1255_vm11, %v1097_v19, %v1326_v21  ;;  %1462 = vst [vmem:[%s3087_s4 + $0x180] sm:$0xff] %v1398_v4  ;;  %v1102_v30 = vadd.f32 %v2902_v55, %v717_v22 }
 0x1be   :  { %1454 = vst [vmem:[%s3087_s4 + $0x140] sm:$0xff] %v1390_v29  ;;  %vm1266_vm12 = vcmp.gt.f32.partialorder %v1152_v47, 0.0  ;;  %v1337_v63 = vmul.f32 %v2693_v2, %v1152_v47  ;;  %vm1265_vm13 = vcmp.gt.f32.partialorder %v1147_v13, 0.0  ;;  %v1336_v8 = vmul.f32 %v2693_v2, %v1147_v13  ;;  %v721_v34 = vpop.f32.mrb[84].mxu0  ;;  %v1704_v38 = vpop.f32.mrb[84].mxu1 }
 0x1bf   :  { %vm1256_vm14 = vcmp.gt.f32.partialorder %v1102_v30, 0.0  ;;  %v1327_v12 = vmul.f32 %v2693_v2, %v1102_v30  ;;  %v722_v41 = vadd.f32 %v2682_v53, %v721_v34  ;;  %v1162_v62 = vadd.f32 %v1704_v38, %v777_v7  ;;  %v723_v35 = vpop.f32.mrb[85].mxu0  ;;  %v1156_v55 = vpop.f32.mrb[85].mxu1 }
 0x1c0   :  { %v1401_v3 = vsel %vm1266_vm12, %v1152_v47, %v1337_v63  ;;  %v1400_v45 = vsel %vm1265_vm13, %v1147_v13, %v1336_v8  ;;  %v1157_v46 = vadd.f32 %v1156_v55, %v772_v26  ;;  %v802_v13 = vadd.f32 %v2682_v53, %v2657_v32 }
 0x1c1   :  { %v1391_v31 = vsel %vm1256_vm14, %v1102_v30, %v1327_v12  ;;  %1465 = vst [vmem:[%s3087_s4 + $0x198] sm:$0xff] %v1401_v3  ;;  %1464 = vst [vmem:[%s3087_s4 + $0x190] sm:$0xff] %v1400_v45  ;;  %v1107_v49 = vadd.f32 %v2913_v23, %v722_v41  ;;  %vm1268_vm15 = vcmp.gt.f32.partialorder %v1162_v62, 0.0  ;;  %v1339_v58 = vmul.f32 %v2693_v2, %v1162_v62 }
 0x1c2   :  { %1455 = vst [vmem:[%s3087_s4 + $0x148] sm:$0xff] %v1391_v31  ;;  %vm1267_vm0 = vcmp.gt.f32.partialorder %v1157_v46, 0.0  ;;  %v1338_v37 = vmul.f32 %v2693_v2, %v1157_v46  ;;  %v726_v61 = vpop.f32.mrb[86].mxu0  ;;  %v1707_v1 = vpop.f32.mrb[86].mxu1  ;;  %v807_v26 = vadd.f32 %v2682_v53, %v2661_v36  ;;  %v812_v41 = vadd.f32 %v2682_v53, %v2665_v40 }
 0x1c3   :  { %vm1257_vm1 = vcmp.gt.f32.partialorder %v1107_v49, 0.0  ;;  %v1328_v23 = vmul.f32 %v2693_v2, %v1107_v49  ;;  %v1403_v43 = vsel %vm1268_vm15, %v1162_v62, %v1339_v58  ;;  %v727_v5 = vadd.f32 %v2682_v53, %v726_v61  ;;  %v728_v6 = vpop.f32.mrb[87].mxu0  ;;  %v1166_v16 = vpop.f32.mrb[87].mxu1 }
 0x1c4   :  { %1467 = vst [vmem:[%s3087_s4 + $0x1a8] sm:$0xff] %v1403_v43  ;;  %v1402_v20 = vsel %vm1267_vm0, %v1157_v46, %v1338_v37  ;;  %v1172_v39 = vadd.f32 %v1707_v1, %v787_v57  ;;  %v1167_v9 = vadd.f32 %v1166_v16, %v782_v54  ;;  %v817_v62 = vadd.f32 %v2682_v53, %v2669_v44 }
 0x1c5   :  { %v1392_v19 = vsel %vm1257_vm1, %v1107_v49, %v1328_v23  ;;  %1466 = vst [vmem:[%s3087_s4 + $0x1a0] sm:$0xff] %v1402_v20  ;;  %v1112_v56 = vadd.f32 %v2909_v27, %v727_v5  ;;  %v822_v43 = vadd.f32 %v2682_v53, %v2673_v48  ;;  %v827_v5 = vadd.f32 %v2682_v53, %v2677_v52 }
 0x1c6   :  { %1456 = vst [vmem:[%s3087_s4 + $0x150] sm:$0xff] %v1392_v19  ;;  %vm1270_vm2 = vcmp.gt.f32.partialorder %v1172_v39, 0.0  ;;  %v1341_v10 = vmul.f32 %v2693_v2, %v1172_v39  ;;  %vm1269_vm3 = vcmp.gt.f32.partialorder %v1167_v9, 0.0  ;;  %v1340_v24 = vmul.f32 %v2693_v2, %v1167_v9  ;;  %v731_v15 = vpop.f32.mrb[88].mxu0  ;;  %v1710_v14 = vpop.f32.mrb[88].mxu1 }
 0x1c7   :  { %vm1258_vm4 = vcmp.gt.f32.partialorder %v1112_v56, 0.0  ;;  %v1329_v28 = vmul.f32 %v2693_v2, %v1112_v56  ;;  %v732_v59 = vadd.f32 %v2682_v53, %v731_v15  ;;  %v1182_v18 = vadd.f32 %v1710_v14, %v797_v33  ;;  %v733_v21 = vpop.f32.mrb[89].mxu0  ;;  %v1176_v27 = vpop.f32.mrb[89].mxu1 }
 0x1c8   :  { %v1405_v51 = vsel %vm1270_vm2, %v1172_v39, %v1341_v10  ;;  %v1404_v22 = vsel %vm1269_vm3, %v1167_v9, %v1340_v24  ;;  %v1177_v25 = vadd.f32 %v1176_v27, %v792_v60 }
 0x1c9   :  { %v1393_v0 = vsel %vm1258_vm4, %v1112_v56, %v1329_v28  ;;  %1469 = vst [vmem:[%s3087_s4 + $0x1b8] sm:$0xff] %v1405_v51  ;;  %1468 = vst [vmem:[%s3087_s4 + $0x1b0] sm:$0xff] %v1404_v22  ;;  %v1117_v4 = vadd.f32 %v2922_v42, %v732_v59  ;;  %vm1272_vm5 = vcmp.gt.f32.partialorder %v1182_v18, 0.0  ;;  %v1343_v47 = vmul.f32 %v2693_v2, %v1182_v18 }
 0x1ca   :  { %1457 = vst [vmem:[%s3087_s4 + $0x158] sm:$0xff] %v1393_v0  ;;  %vm1271_vm6 = vcmp.gt.f32.partialorder %v1177_v25, 0.0  ;;  %v1342_v7 = vmul.f32 %v2693_v2, %v1177_v25  ;;  %v736_v29 = vpop.f32.mrb[90].mxu0  ;;  %v1713_v30 = vpop.f32.mrb[90].mxu1 }
 0x1cb   :  { %vm1259_vm7 = vcmp.gt.f32.partialorder %v1117_v4, 0.0  ;;  %v1330_v42 = vmul.f32 %v2693_v2, %v1117_v4  ;;  %v1407_v63 = vsel %vm1272_vm5, %v1182_v18, %v1343_v47  ;;  %v737_v8 = vadd.f32 %v2682_v53, %v736_v29  ;;  %v738_v34 = vpop.f32.mrb[91].mxu0  ;;  %v1186_v32 = vpop.f32.mrb[91].mxu1 }
 0x1cc   :  { %1471 = vst [vmem:[%s3087_s4 + $0x1c8] sm:$0xff] %v1407_v63  ;;  %v1406_v36 = vsel %vm1271_vm6, %v1177_v25, %v1342_v7  ;;  %v1192_v38 = vadd.f32 %v1713_v30, %v807_v26  ;;  %v1187_v12 = vadd.f32 %v1186_v32, %v802_v13 }
 0x1cd   :  { %v1394_v35 = vsel %vm1259_vm7, %v1117_v4, %v1330_v42  ;;  %1470 = vst [vmem:[%s3087_s4 + $0x1c0] sm:$0xff] %v1406_v36  ;;  %v1122_v55 = vadd.f32 %v2918_v17, %v737_v8 }
 0x1ce   :  { %1458 = vst [vmem:[%s3087_s4 + $0x160] sm:$0xff] %v1394_v35  ;;  %vm1274_vm8 = vcmp.gt.f32.partialorder %v1192_v38, 0.0  ;;  %v1345_v3 = vmul.f32 %v2693_v2, %v1192_v38  ;;  %vm1273_vm9 = vcmp.gt.f32.partialorder %v1187_v12, 0.0  ;;  %v1344_v40 = vmul.f32 %v2693_v2, %v1187_v12  ;;  %v741_v45 = vpop.f32.mrb[92].mxu0  ;;  %v1716_v46 = vpop.f32.mrb[92].mxu1 }
 0x1cf   :  { %vm1260_vm10 = vcmp.gt.f32.partialorder %v1122_v55, 0.0  ;;  %v1331_v44 = vmul.f32 %v2693_v2, %v1122_v55  ;;  %v742_v31 = vadd.f32 %v2682_v53, %v741_v45  ;;  %v1202_v49 = vadd.f32 %v1716_v46, %v817_v62  ;;  %v743_v58 = vpop.f32.mrb[93].mxu0  ;;  %v1196_v17 = vpop.f32.mrb[93].mxu1 }
 0x1d0   :  { %v1409_v54 = vsel %vm1274_vm8, %v1192_v38, %v1345_v3  ;;  %v1408_v57 = vsel %vm1273_vm9, %v1187_v12, %v1344_v40  ;;  %v1197_v37 = vadd.f32 %v1196_v17, %v812_v41 }
 0x1d1   :  { %v1395_v61 = vsel %vm1260_vm10, %v1122_v55, %v1331_v44  ;;  %1473 = vst [vmem:[%s3087_s4 + $0x1d8] sm:$0xff] %v1409_v54  ;;  %1472 = vst [vmem:[%s3087_s4 + $0x1d0] sm:$0xff] %v1408_v57  ;;  %v1127_v1 = vadd.f32 %v2931_v50, %v742_v31  ;;  %vm1276_vm11 = vcmp.gt.f32.partialorder %v1202_v49, 0.0  ;;  %v1347_v23 = vmul.f32 %v2693_v2, %v1202_v49 }
 0x1d2   :  { %1459 = vst [vmem:[%s3087_s4 + $0x168] sm:$0xff] %v1395_v61  ;;  %vm1275_vm12 = vcmp.gt.f32.partialorder %v1197_v37, 0.0  ;;  %v1346_v6 = vmul.f32 %v2693_v2, %v1197_v37  ;;  %v746_v16 = vpop.f32.mrb[94].mxu0  ;;  %v1719_v20 = vpop.f32.mrb[94].mxu1 }
 0x1d3   :  { %vm1261_vm13 = vcmp.gt.f32.partialorder %v1127_v1, 0.0  ;;  %v1332_v50 = vmul.f32 %v2693_v2, %v1127_v1  ;;  %v1411_v39 = vsel %vm1276_vm11, %v1202_v49, %v1347_v23  ;;  %v747_v9 = vadd.f32 %v2682_v53, %v746_v16  ;;  %v748_v60 = vpop.f32.mrb[95].mxu0  ;;  %v1206_v48 = vpop.f32.mrb[95].mxu1 }
 0x1d4   :  { %1475 = vst [vmem:[%s3087_s4 + $0x1e8] sm:$0xff] %v1411_v39  ;;  %v1410_v52 = vsel %vm1275_vm12, %v1197_v37, %v1346_v6  ;;  %v1212_v33 = vadd.f32 %v1719_v20, %v827_v5  ;;  %v1207_v19 = vadd.f32 %v1206_v48, %v822_v43 }
 0x1d5   :  { %v1396_v56 = vsel %vm1261_vm13, %v1127_v1, %v1332_v50  ;;  %1474 = vst [vmem:[%s3087_s4 + $0x1e0] sm:$0xff] %v1410_v52  ;;  %v1132_v10 = vadd.f32 %v2927_v11, %v747_v9 }
 0x1d6   :  { %1460 = vst [vmem:[%s3087_s4 + $0x170] sm:$0xff] %v1396_v56  ;;  %vm1278_vm14 = vcmp.gt.f32.partialorder %v1212_v33, 0.0  ;;  %v1349_v53 = vmul.f32 %v2693_v2, %v1212_v33  ;;  %vm1277_vm15 = vcmp.gt.f32.partialorder %v1207_v19, 0.0  ;;  %v1348_v24 = vmul.f32 %v2693_v2, %v1207_v19 }
 0x1d7   :  { %vm1262_vm0 = vcmp.gt.f32.partialorder %v1132_v10, 0.0  ;;  %v1333_v15 = vmul.f32 %v2693_v2, %v1132_v10 }
 0x1d8   :  { %v1413_v14 = vsel %vm1278_vm14, %v1212_v33, %v1349_v53  ;;  %v1412_v28 = vsel %vm1277_vm15, %v1207_v19, %v1348_v24 }
 0x1d9   :  { %v1397_v59 = vsel %vm1262_vm0, %v1132_v10, %v1333_v15  ;;  %1477 = vst [vmem:[%s3087_s4 + $0x1f8] sm:$0xff] %v1413_v14  ;;  %1476 = vst [vmem:[%s3087_s4 + $0x1f0] sm:$0xff] %v1412_v28 }
 0x1da   :  { %1461 = vst [vmem:[%s3087_s4 + $0x178] sm:$0xff] %v1397_v59 }

// kernel: generator_forward.27
= control target key start
LH: loop header
LB: loop body
LE: loop exit
PB: predicated region body
PF: predicated region fallthrough
CT: control target
= control target key end

     0   :  { %9 = vsyncpa [#allocation3], 0  ;;  %s11939_s0 = inlined_call_operand.hbm [shape: f32[2048,2592], index: 0, kind: input, shape index: {}]   ;;  %s11940_s1 = inlined_call_operand.vmem [shape: f32[2592,128], index: 1, kind: input, shape index: {}]   ;;  %s11941_s2 = inlined_call_operand.vmem [shape: f32[1,128], index: 2, kind: input, shape index: {}]   ;;  %s11942_s3 = inlined_call_operand.vmem [shape: f32[1,128], index: 3, kind: input, shape index: {}]   ;;  %s11943_s4 = inlined_call_operand.vmem [shape: f32[2048,128], index: 4, kind: output, shape index: {}]  }
   0x1   :  { %11 = vsyncpa [#allocation3 + $0x1], 0  ;;  %s8709_s15 = smov 0   ;;  %s8711_s16 = smov 0  }
   0x2   :  { %s8713_s17 = smov 0   ;;  %s8715_s18 = smov 0  }
   0x3 LB: > { %s6519_s3 = sadd.s32 4294967295, %s8678_s18   ;;  %s8729_s19 = sadd.s32 1, %s8678_s18   ;;  %s8678_s18 = sphi %s8715_s18, %s11978_s18   ;;  %s8674_s17 = sphi %s8713_s17, %s11977_s17   ;;  %s8670_s16 = sphi %s8711_s16, %s11976_s16   ;;  %s8666_s15 = sphi %s8709_s15, %s11975_s15  }
   0x4   : > { %s21_s20 = ssub.s32 %s8678_s18, %s8729_s19  ;;  %s24_s21 = sadd.s32 1, %s8674_s17 }
   0x5   : > { %p22_p0 = scmp.eq.s32.totalorder %s21_s20, 0  ;;  %p31_p1 = scmp.ne.s32.totalorder %s8674_s17, %s8670_s16 }
   0x6   : > { %p32_p2 = scmp.eq.s32.totalorder %s8678_s18, 0  ;;  %p37_p3 = scmp.ne.s32.totalorder %s8670_s16, %s8666_s15 }
   0x7   : > { %s8739_s22 = scalar_select %p22_p0, %s8674_s17, %s24_s21  }
   0x8   : > { %p33_p4 = por %p32_p2, %p31_p1  ;;  %p38_p5 = scmp.eq.s32.totalorder %s6519_s3, 0 }
   0x9   : > { %p8449_p6 = scmp.lt.s32.totalorder %s8678_s18, 4  ;;  %s159_s24 = sand.u32 1, %s8674_s17  }
   0xa   : > { %p8744_p7 = por %p38_p5, %p37_p3  ;;  %s8440_s25 = smul.u32 10752, %s159_s24 }
   0xb   : > { %s8441_s26 = smul.u32 172032, %s8678_s18  ;;  %p8750_p8 = pnand %p8449_p6, %p33_p4 }
   0xc   : > { %s163_s5 = scalar_lea.vmem [#allocation2], %s8440_s25  ;;  %s8762_s7 = scalar_lea.sflag [#allocation3], %s159_s24 }
   0xd   : > { %s8757_s30 = scalar_lea.hbm %s11939_s0, %s8441_s26  ;;  %s171_s6 = sshll.u32 %s163_s5, 4  ;;  %s8759_s6 = int_to_ptr.vmem [resolvable:$true] %s171_s6 }
   0xe   : > { %s8614_s8 = scalar_lea.hbm %s8757_s30, 172032  ;;  %p8616_p11 = pneg %p8750_p8 }
   0xf   : > { %p8615_p10 = scmp.ne.s32.totalorder %s8757_s30, %s8614_s8  ;;  %s8619_s11 = scalar_lea.hbm %s11939_s0, 688128 }
  0x10   : > { %p8620_p0 = scmp.lt.u32.totalorder %s8757_s30, %s11939_s0  ;;  %p8621_p1 = scmp.lt.u32.totalorder %s8619_s11, %s8614_s8 }
  0x11   : > { %p8617_p12 = pnand %p8616_p11, %p8615_p10  ;;  %p8623_p3 = scmp.lt.u32.totalorder %s8614_s8, %s8757_s30 }
  0x12   : > { %p8622_p2 = por %p8621_p1, %p8620_p0 }
  0x13   : > { %p8618_p13 = pneg %p8617_p12 }
  0x14   : > { %p8624_p4 = por %p8623_p3, %p8622_p2 }
  0x16   : > { %p8625_p5 = pnand %p8624_p4, %p8618_p13 }
  0x18   : > { %8628 = shalt.err (!%p8625_p5)
}
  0x19   : > { %s8629_s14 = scalar_lea.vmem %s8759_s6, 172032  ;;  %s8680_s15 = smov [#allocation2]  }
  0x1a   : > { %p8630_p6 = scmp.ne.s32.totalorder %s8759_s6, %s8629_s14  ;;  %s8634_s20 = sshll.u32 %s8680_s15, 4  ;;  %s8635_s20 = int_to_ptr.vmem [resolvable:$false] %s8634_s20 }
  0x1b   : > { %s8636_s21 = scalar_lea.vmem %s8635_s20, 344064  ;;  %p8637_p9 = scmp.lt.s32.totalorder %s8759_s6, %s8635_s20 }
  0x1c   : > { %p8632_p10 = pnand %p8630_p6, %p8616_p11  ;;  %p8638_p0 = scmp.lt.s32.totalorder %s8636_s21, %s8629_s14 }
  0x1e   : > { %p8633_p12 = pneg %p8632_p10  ;;  %p8639_p1 = por %p8638_p0, %p8637_p9 }
  0x20   : > { %p8640_p2 = pnand %p8639_p1, %p8633_p12 }
  0x22   : > { %8643 = shalt.err (!%p8640_p2)
}
  0x23   : > { %s8681_s24 = smov 2688   ;;  %s8682_s25 = smov 168  }
  0x24   : > { %8448 = dma.hbm_to_vmem [thread:$0]  (!%p8750_p8), %s8757_s30, 172032, %s8759_s6, %s8762_s7, %s8681_s24, %s8681_s24, %s8682_s25  }
  0x25   : > { %p179_p11 = scmp.lt.s32.totalorder %s8678_s18, 5  ;;  %p11946_p13 = scmp.ge.s32.totalorder %s8678_s18, 1 }
  0x27   : > { %p180_p3 = pnand %p11946_p13, %p179_p11 }
  0x29   : > { %183 = sbr.rel (%p180_p3) target bundleno = 1688 (0x698), region = 36 }
  0x30   : > { %s185_s26 = sand.u32 1, %s8670_s16  }
  0x31   : > { %s8442_s28 = smul.u32 10752, %s185_s26  ;;  %s186_s29 = scalar_lea.sflag [#allocation3], %s185_s26 }
  0x33   : > { %s8794_s5 = scalar_lea.vmem [#allocation2], %s8442_s28 }
  0x34   : > { %8661 = dma.done.wait (%p8744_p7), %s186_s29, 172032  }
  0x35   : > { %8663 = vsyncadd (%p8744_p7), %s186_s29, 4294795264  ;;  %v8683_v0 = vmov 0.0|0.0   ;;  %v1565_v1 = vld [vmem:[%s11940_s1] sm:$0xff]  ;;  %v1566_v2 = vld [vmem:[%s11940_s1 + $0x8] sm:$0xff]  ;;  %vm1896_vm0 = vcmask 261120  }
  0x36   : > { %6768 = vmatprep.subr.bf16.mxu1 %v8683_v0  ;;  %6960 = vmatprep.subr.bf16.mxu0 %v8683_v0  ;;  %v1693_v3 = vld [vmem:[%s11940_s1 + $0x400] sm:$0xff]  ;;  %v6769_v4 = vpack.c.bf16 %v1566_v2, %v1565_v1  ;;  %v1694_v5 = vld [vmem:[%s11940_s1 + $0x408] sm:$0xff]  ;;  %v1567_v6 = vld [vmem:[%s11940_s1 + $0x10] sm:$0xff] }
  0x37   : > { %v1568_v7 = vld [vmem:[%s11940_s1 + $0x18] sm:$0xff]  ;;  %v8820_v8 = vpack.c.bf16 %v1694_v5, %v1693_v3  ;;  %v1695_v9 = vld [vmem:[%s11940_s1 + $0x410] sm:$0xff]  ;;  %v1569_v13 = vld [vmem:[%s11940_s1 + $0x20] sm:$0xff] }
  0x38   : > { %v1696_v10 = vld [vmem:[%s11940_s1 + $0x418] sm:$0xff]  ;;  %6770 = vmatpush1.bf16.msra.mxu1 %v6769_v4  ;;  %v6772_v11 = vpack.c.bf16 %v1568_v7, %v1567_v6  ;;  %v1570_v14 = vld [vmem:[%s11940_s1 + $0x28] sm:$0xff]  ;;  %v1697_v15 = vld [vmem:[%s11940_s1 + $0x420] sm:$0xff] }
  0x39   : > { %6962 = vmatpush1.bf16.msra.mxu0 %v8820_v8  ;;  %6771 = vmatprep.subr.bf16.mxu1 %v8683_v0  ;;  %v8830_v12 = vpack.c.bf16 %v1696_v10, %v1695_v9  ;;  %v1698_v16 = vld [vmem:[%s11940_s1 + $0x428] sm:$0xff]  ;;  %v6775_v17 = vpack.c.bf16 %v1570_v14, %v1569_v13  ;;  %v1571_v19 = vld [vmem:[%s11940_s1 + $0x30] sm:$0xff]  ;;  %v1572_v20 = vld [vmem:[%s11940_s1 + $0x38] sm:$0xff] }
  0x3a   : > { %6963 = vmatprep.subr.bf16.mxu0 %v8683_v0  ;;  %v8847_v18 = vpack.c.bf16 %v1698_v16, %v1697_v15  ;;  %v1699_v21 = vld [vmem:[%s11940_s1 + $0x430] sm:$0xff]  ;;  %v1700_v22 = vld [vmem:[%s11940_s1 + $0x438] sm:$0xff]  ;;  %v6778_v23 = vpack.c.bf16 %v1572_v20, %v1571_v19  ;;  %v1573_v25 = vld [vmem:[%s11940_s1 + $0x40] sm:$0xff] }
  0x3b   : > { %v8864_v24 = vpack.c.bf16 %v1700_v22, %v1699_v21  ;;  %v1574_v26 = vld [vmem:[%s11940_s1 + $0x48] sm:$0xff]  ;;  %v1701_v27 = vld [vmem:[%s11940_s1 + $0x440] sm:$0xff]  ;;  %v1575_v31 = vld [vmem:[%s11940_s1 + $0x50] sm:$0xff] }
  0x3c   : > { %6773 = vmatpush1.bf16.msra.mxu1 %v6772_v11  ;;  %v1702_v28 = vld [vmem:[%s11940_s1 + $0x448] sm:$0xff]  ;;  %v6781_v29 = vpack.c.bf16 %v1574_v26, %v1573_v25  ;;  %v1576_v32 = vld [vmem:[%s11940_s1 + $0x58] sm:$0xff]  ;;  %v1703_v33 = vld [vmem:[%s11940_s1 + $0x450] sm:$0xff] }
  0x3d   : > { %6965 = vmatpush1.bf16.msra.mxu0 %v8830_v12  ;;  %6774 = vmatprep.subr.bf16.mxu1 %v8683_v0  ;;  %v8881_v30 = vpack.c.bf16 %v1702_v28, %v1701_v27  ;;  %v1704_v34 = vld [vmem:[%s11940_s1 + $0x458] sm:$0xff]  ;;  %v6784_v35 = vpack.c.bf16 %v1576_v32, %v1575_v31  ;;  %v1577_v37 = vld [vmem:[%s11940_s1 + $0x60] sm:$0xff]  ;;  %v1578_v38 = vld [vmem:[%s11940_s1 + $0x68] sm:$0xff] }
  0x3e   : > { %6966 = vmatprep.subr.bf16.mxu0 %v8683_v0  ;;  %v8898_v36 = vpack.c.bf16 %v1704_v34, %v1703_v33  ;;  %v1705_v39 = vld [vmem:[%s11940_s1 + $0x460] sm:$0xff]  ;;  %v1706_v40 = vld [vmem:[%s11940_s1 + $0x468] sm:$0xff]  ;;  %v6787_v43 = vpack.c.bf16 %v1578_v38, %v1577_v37  ;;  %v1579_v45 = vld [vmem:[%s11940_s1 + $0x70] sm:$0xff] }
  0x3f   : > { %v222_v41 = vld [vmem:[%s8794_s5 + $0x8] sm:$0xff]  ;;  %v8917_v44 = vpack.c.bf16 %v1706_v40, %v1705_v39  ;;  %v1580_v46 = vld [vmem:[%s11940_s1 + $0x78] sm:$0xff]  ;;  %v1707_v47 = vld [vmem:[%s11940_s1 + $0x470] sm:$0xff] }
  0x40   : > { %6776 = vmatpush1.bf16.msra.mxu1 %v6775_v17  ;;  %v230_v42 = vld [vmem:[%s8794_s5 + $0x48] sm:$0xff]  ;;  %2153 = vmatprep.mubr.f32.mxu1 %v222_v41  ;;  %v1708_v48 = vld [vmem:[%s11940_s1 + $0x478] sm:$0xff]  ;;  %v6790_v49 = vpack.c.bf16 %v1580_v46, %v1579_v45  ;;  %v1581_v51 = vld [vmem:[%s11940_s1 + $0x80] sm:$0xff] }
  0x41   : > { %6968 = vmatpush1.bf16.msra.mxu0 %v8847_v18  ;;  %6777 = vmatprep.subr.bf16.mxu1 %v8683_v0  ;;  %v8934_v50 = vpack.c.bf16 %v1708_v48, %v1707_v47  ;;  %v1582_v52 = vld [vmem:[%s11940_s1 + $0x88] sm:$0xff]  ;;  %v1709_v53 = vld [vmem:[%s11940_s1 + $0x480] sm:$0xff]  ;;  %v1583_v57 = vld [vmem:[%s11940_s1 + $0x90] sm:$0xff] }
  0x42   : > { %6969 = vmatprep.subr.bf16.mxu0 %v8683_v0  ;;  %3693 = vmatprep.mubr.f32.mxu0 %v230_v42  ;;  %v1710_v54 = vld [vmem:[%s11940_s1 + $0x488] sm:$0xff]  ;;  %v6793_v55 = vpack.c.bf16 %v1582_v52, %v1581_v51  ;;  %v1584_v58 = vld [vmem:[%s11940_s1 + $0x98] sm:$0xff]  ;;  %v1711_v59 = vld [vmem:[%s11940_s1 + $0x490] sm:$0xff] }
  0x43   : > { %v8951_v56 = vpack.c.bf16 %v1710_v54, %v1709_v53  ;;  %v1712_v60 = vld [vmem:[%s11940_s1 + $0x498] sm:$0xff]  ;;  %v6796_v61 = vpack.c.bf16 %v1584_v58, %v1583_v57  ;;  %v1585_v63 = vld [vmem:[%s11940_s1 + $0xa0] sm:$0xff]  ;;  %v1586_v1 = vld [vmem:[%s11940_s1 + $0xa8] sm:$0xff] }
  0x44   : > { %6779 = vmatpush1.bf16.msra.mxu1 %v6778_v23  ;;  %v8968_v62 = vpack.c.bf16 %v1712_v60, %v1711_v59  ;;  %v1713_v2 = vld [vmem:[%s11940_s1 + $0x4a0] sm:$0xff]  ;;  %v1714_v3 = vld [vmem:[%s11940_s1 + $0x4a8] sm:$0xff]  ;;  %v6799_v4 = vpack.c.bf16 %v1586_v1, %v1585_v63  ;;  %v1587_v6 = vld [vmem:[%s11940_s1 + $0xb0] sm:$0xff] }
  0x45   : > { %6971 = vmatpush1.bf16.msra.mxu0 %v8864_v24  ;;  %6780 = vmatprep.subr.bf16.mxu1 %v8683_v0  ;;  %v8985_v5 = vpack.c.bf16 %v1714_v3, %v1713_v2  ;;  %v1588_v7 = vld [vmem:[%s11940_s1 + $0xb8] sm:$0xff]  ;;  %v1715_v9 = vld [vmem:[%s11940_s1 + $0x4b0] sm:$0xff]  ;;  %v1589_v14 = vld [vmem:[%s11940_s1 + $0xc0] sm:$0xff] }
  0x46   : > { %6972 = vmatprep.subr.bf16.mxu0 %v8683_v0  ;;  %v1716_v10 = vld [vmem:[%s11940_s1 + $0x4b8] sm:$0xff]  ;;  %v6802_v11 = vpack.c.bf16 %v1588_v7, %v1587_v6  ;;  %v1590_v15 = vld [vmem:[%s11940_s1 + $0xc8] sm:$0xff]  ;;  %v1717_v16 = vld [vmem:[%s11940_s1 + $0x4c0] sm:$0xff] }
  0x47   : > { %v9002_v13 = vpack.c.bf16 %v1716_v10, %v1715_v9  ;;  %v1718_v17 = vld [vmem:[%s11940_s1 + $0x4c8] sm:$0xff]  ;;  %v6805_v19 = vpack.c.bf16 %v1590_v15, %v1589_v14  ;;  %v1591_v21 = vld [vmem:[%s11940_s1 + $0xd0] sm:$0xff]  ;;  %v1592_v22 = vld [vmem:[%s11940_s1 + $0xd8] sm:$0xff] }
  0x48   : > { %6782 = vmatpush1.bf16.msra.mxu1 %v6781_v29  ;;  %v9019_v20 = vpack.c.bf16 %v1718_v17, %v1717_v16  ;;  %v1719_v23 = vld [vmem:[%s11940_s1 + $0x4d0] sm:$0xff]  ;;  %v1720_v25 = vld [vmem:[%s11940_s1 + $0x4d8] sm:$0xff]  ;;  %v6808_v26 = vpack.c.bf16 %v1592_v22, %v1591_v21  ;;  %v1593_v28 = vld [vmem:[%s11940_s1 + $0xe0] sm:$0xff] }
  0x49   : > { %6974 = vmatpush1.bf16.msra.mxu0 %v8881_v30  ;;  %6783 = vmatprep.subr.bf16.mxu1 %v8683_v0  ;;  %v9036_v27 = vpack.c.bf16 %v1720_v25, %v1719_v23  ;;  %v1594_v29 = vld [vmem:[%s11940_s1 + $0xe8] sm:$0xff]  ;;  %v1721_v31 = vld [vmem:[%s11940_s1 + $0x4e0] sm:$0xff]  ;;  %v1596_v37 = vld [vmem:[%s11940_s1 + $0xf8] sm:$0xff] }
  0x4a   : > { %6975 = vmatprep.subr.bf16.mxu0 %v8683_v0  ;;  %v1722_v32 = vld [vmem:[%s11940_s1 + $0x4e8] sm:$0xff]  ;;  %v6811_v33 = vpack.c.bf16 %v1594_v29, %v1593_v28  ;;  %v1723_v38 = vld [vmem:[%s11940_s1 + $0x4f0] sm:$0xff]  ;;  %v1724_v39 = vld [vmem:[%s11940_s1 + $0x4f8] sm:$0xff] }
  0x4b   : > { %v9053_v34 = vpack.c.bf16 %v1722_v32, %v1721_v31  ;;  %v9070_v41 = vpack.c.bf16 %v1724_v39, %v1723_v38  ;;  %v1597_v42 = vld [vmem:[%s11940_s1 + $0x100] sm:$0xff]  ;;  %v1726_v46 = vld [vmem:[%s11940_s1 + $0x508] sm:$0xff]  ;;  %v243_v52 = vld [vmem:[%s8794_s5 + $0xb0] sm:$0xff] }
  0x4c   : > { %6785 = vmatpush1.bf16.msra.mxu1 %v6784_v35  ;;  %v1595_v35 = vld [vmem:[%s11940_s1 + $0xf0] sm:$0xff]  ;;  %v1725_v45 = vld [vmem:[%s11940_s1 + $0x500] sm:$0xff]  ;;  %v1728_v54 = vld [vmem:[%s11940_s1 + $0x518] sm:$0xff] }
  0x4d   : > { %6977 = vmatpush1.bf16.msra.mxu0 %v8898_v36  ;;  %6786 = vmatprep.subr.bf16.mxu1 %v8683_v0  ;;  %v6814_v40 = vpack.c.bf16 %v1596_v37, %v1595_v35  ;;  %v221_v47 = vld [vmem:[%s8794_s5] sm:$0xff]  ;;  %v7009_v51 = vpack.c.bf16 %v1726_v46, %v1725_v45  ;;  %v1727_v53 = vld [vmem:[%s11940_s1 + $0x510] sm:$0xff]  ;;  %v1600_v58 = vld [vmem:[%s11940_s1 + $0x118] sm:$0xff] }
  0x4e   : > { %6978 = vmatprep.subr.bf16.mxu0 %v8683_v0  ;;  %v1599_v57 = vld [vmem:[%s11940_s1 + $0x110] sm:$0xff]  ;;  %v242_v59 = vld [vmem:[%s8794_s5 + $0xa8] sm:$0xff]  ;;  %v264_v63 = vld [vmem:[%s8794_s5 + $0x158] sm:$0xff] }
  0x4f   : > { %v250_v60 = vld [vmem:[%s8794_s5 + $0xe8] sm:$0xff]  ;;  %v272_v1 = vld [vmem:[%s8794_s5 + $0x198] sm:$0xff]  ;;  %v1729_v2 = vld [vmem:[%s11940_s1 + $0x520] sm:$0xff] }
  0x50   : > { %6788 = vmatpush1.bf16.msra.mxu1 %v6787_v43  ;;  %v1598_v43 = vld [vmem:[%s11940_s1 + $0x108] sm:$0xff]  ;;  %v1601_v6 = vld [vmem:[%s11940_s1 + $0x120] sm:$0xff]  ;;  %v263_v9 = vld [vmem:[%s8794_s5 + $0x150] sm:$0xff] }
  0x51   : > { %6980 = vmatpush1.bf16.msra.mxu0 %v8917_v44  ;;  %6789 = vmatprep.subr.bf16.mxu1 %v8683_v0  ;;  %v6817_v48 = vpack.c.bf16 %v1598_v43, %v1597_v42  ;;  %v1730_v3 = vld [vmem:[%s11940_s1 + $0x528] sm:$0xff]  ;;  %v271_v10 = vld [vmem:[%s8794_s5 + $0x190] sm:$0xff]  ;;  %v285_v14 = vld [vmem:[%s8794_s5 + $0x200] sm:$0xff] }
  0x52   : > { %6981 = vmatprep.subr.bf16.mxu0 %v8683_v0  ;;  %v1602_v7 = vld [vmem:[%s11940_s1 + $0x128] sm:$0xff]  ;;  %v293_v15 = vld [vmem:[%s8794_s5 + $0x240] sm:$0xff]  ;;  %v1731_v16 = vld [vmem:[%s11940_s1 + $0x530] sm:$0xff] }
  0x53   : > { %v1732_v17 = vld [vmem:[%s11940_s1 + $0x538] sm:$0xff]  ;;  %v1603_v21 = vld [vmem:[%s11940_s1 + $0x130] sm:$0xff]  ;;  %v306_v28 = vld [vmem:[%s8794_s5 + $0x2a8] sm:$0xff] }
  0x54   : > { %6791 = vmatpush1.bf16.msra.mxu1 %v6790_v49  ;;  %v229_v49 = vld [vmem:[%s8794_s5 + $0x40] sm:$0xff]  ;;  %v1604_v22 = vld [vmem:[%s11940_s1 + $0x138] sm:$0xff]  ;;  %v314_v29 = vld [vmem:[%s8794_s5 + $0x2e8] sm:$0xff] }
  0x55   : > { %6983 = vmatpush1.bf16.msra.mxu0 %v8934_v50  ;;  %6792 = vmatprep.subr.bf16.mxu1 %v8683_v0  ;;  %v284_v23 = vld [vmem:[%s8794_s5 + $0x1f8] sm:$0xff]  ;;  %v1733_v31 = vld [vmem:[%s11940_s1 + $0x540] sm:$0xff]  ;;  %v1734_v32 = vld [vmem:[%s11940_s1 + $0x548] sm:$0xff] }
  0x56   : > { %6984 = vmatprep.subr.bf16.mxu0 %v8683_v0  ;;  %v292_v25 = vld [vmem:[%s8794_s5 + $0x238] sm:$0xff]  ;;  %v1605_v35 = vld [vmem:[%s11940_s1 + $0x140] sm:$0xff]  ;;  %v1606_v37 = vld [vmem:[%s11940_s1 + $0x148] sm:$0xff] }
  0x57   : > { %v305_v38 = vld [vmem:[%s8794_s5 + $0x2a0] sm:$0xff]  ;;  %v327_v42 = vld [vmem:[%s8794_s5 + $0x350] sm:$0xff]  ;;  %v1736_v46 = vld [vmem:[%s11940_s1 + $0x558] sm:$0xff] }
  0x58   : > { %6794 = vmatpush1.bf16.msra.mxu1 %v6793_v55  ;;  %v251_v55 = vld [vmem:[%s8794_s5 + $0xf0] sm:$0xff]  ;;  %v313_v39 = vld [vmem:[%s8794_s5 + $0x2e0] sm:$0xff] }
  0x59   : > { %6986 = vmatpush1.bf16.msra.mxu0 %v8951_v56  ;;  %6795 = vmatprep.subr.bf16.mxu1 %v8683_v0  ;;  %v335_v43 = vld [vmem:[%s8794_s5 + $0x390] sm:$0xff] }
  0x5a   : > { %6987 = vmatprep.subr.bf16.mxu0 %v8683_v0  ;;  %v1735_v45 = vld [vmem:[%s11940_s1 + $0x550] sm:$0xff] }
  0x5c   : > { %6797 = vmatpush1.bf16.msra.mxu1 %v6796_v61  ;;  %v7012_v61 = vpack.c.bf16 %v1728_v54, %v1727_v53  ;;  %v7024_v53 = vpack.c.bf16 %v1736_v46, %v1735_v45  ;;  %v348_v54 = vld [vmem:[%s8794_s5 + $0x3f8] sm:$0xff] }
  0x5d   : > { %6989 = vmatpush1.bf16.msra.mxu0 %v8968_v62  ;;  %6798 = vmatprep.subr.bf16.mxu1 %v8683_v0  ;;  %v432_v46 = vld [vmem:[%s8794_s5 + $0x698] sm:$0xff] }
  0x5e   : > { %6990 = vmatprep.subr.bf16.mxu0 %v8683_v0 }
  0x60   : > { %6800 = vmatpush1.bf16.msra.mxu1 %v6799_v4  ;;  %v6820_v4 = vpack.c.bf16 %v1600_v58, %v1599_v57  ;;  %v1737_v57 = vld [vmem:[%s11940_s1 + $0x560] sm:$0xff]  ;;  %v1738_v58 = vld [vmem:[%s11940_s1 + $0x568] sm:$0xff] }
  0x61   : > { %6992 = vmatpush1.bf16.msra.mxu0 %v8985_v5  ;;  %6801 = vmatprep.subr.bf16.mxu1 %v8683_v0 }
  0x62   : > { %6993 = vmatprep.subr.bf16.mxu0 %v8683_v0 }
  0x64   : > { %6803 = vmatpush1.bf16.msra.mxu1 %v6802_v11  ;;  %v7015_v11 = vpack.c.bf16 %v1730_v3, %v1729_v2  ;;  %v7027_v2 = vpack.c.bf16 %v1738_v58, %v1737_v57  ;;  %v369_v3 = vld [vmem:[%s8794_s5 + $0x4a0] sm:$0xff] }
  0x65   : > { %6995 = vmatpush1.bf16.msra.mxu0 %v9002_v13  ;;  %6804 = vmatprep.subr.bf16.mxu1 %v8683_v0  ;;  %v453_v58 = vld [vmem:[%s8794_s5 + $0x740] sm:$0xff] }
  0x66   : > { %6996 = vmatprep.subr.bf16.mxu0 %v8683_v0 }
  0x68   : > { %6806 = vmatpush1.bf16.msra.mxu1 %v6805_v19  ;;  %v6823_v19 = vpack.c.bf16 %v1602_v7, %v1601_v6  ;;  %v1739_v6 = vld [vmem:[%s11940_s1 + $0x570] sm:$0xff]  ;;  %v1740_v7 = vld [vmem:[%s11940_s1 + $0x578] sm:$0xff] }
  0x69   : > { %6998 = vmatpush1.bf16.msra.mxu0 %v9019_v20  ;;  %6807 = vmatprep.subr.bf16.mxu1 %v8683_v0 }
  0x6a   : > { %6999 = vmatprep.subr.bf16.mxu0 %v8683_v0 }
  0x6c   : > { %6809 = vmatpush1.bf16.msra.mxu1 %v6808_v26  ;;  %v7018_v26 = vpack.c.bf16 %v1732_v17, %v1731_v16  ;;  %v7030_v16 = vpack.c.bf16 %v1740_v7, %v1739_v6  ;;  %v390_v17 = vld [vmem:[%s8794_s5 + $0x548] sm:$0xff]  ;;  %v1749_v7 = vld [vmem:[%s11940_s1 + $0x5c0] sm:$0xff] }
  0x6d   : > { %7001 = vmatpush1.bf16.msra.mxu0 %v9036_v27  ;;  %6810 = vmatprep.subr.bf16.mxu1 %v8683_v0  ;;  %v482_v6 = vld [vmem:[%s8794_s5 + $0x828] sm:$0xff] }
  0x6e   : > { %7002 = vmatprep.subr.bf16.mxu0 %v8683_v0 }
  0x70   : > { %6812 = vmatpush1.bf16.msra.mxu1 %v6811_v33  ;;  %v6826_v33 = vpack.c.bf16 %v1604_v22, %v1603_v21  ;;  %v1741_v21 = vld [vmem:[%s11940_s1 + $0x580] sm:$0xff]  ;;  %v1742_v22 = vld [vmem:[%s11940_s1 + $0x588] sm:$0xff] }
  0x71   : > { %7004 = vmatpush1.bf16.msra.mxu0 %v9053_v34  ;;  %6813 = vmatprep.subr.bf16.mxu1 %v8683_v0 }
  0x72   : > { %7005 = vmatprep.subr.bf16.mxu0 %v8683_v0 }
  0x74   : > { %6815 = vmatpush1.bf16.msra.mxu1 %v6814_v40  ;;  %v7021_v40 = vpack.c.bf16 %v1734_v32, %v1733_v31  ;;  %v7033_v31 = vpack.c.bf16 %v1742_v22, %v1741_v21  ;;  %v411_v32 = vld [vmem:[%s8794_s5 + $0x5f0] sm:$0xff]  ;;  %v494_v21 = vld [vmem:[%s8794_s5 + $0x888] sm:$0xff] }
  0x75   : > { %7007 = vmatpush1.bf16.msra.mxu0 %v9070_v41  ;;  %6816 = vmatprep.subr.bf16.mxu1 %v8683_v0  ;;  %v1619_v22 = vld [vmem:[%s11940_s1 + $0x1b0] sm:$0xff] }
  0x76   : > { %7008 = vmatprep.subr.bf16.mxu0 %v8683_v0 }
  0x77   : > { %2154 = vmatmul.mubr.f32.vlgmr.msra.gmra.mrb[0].mxu1 %v221_v47  ;;  %v6829_v47 = vpack.c.bf16 %v1606_v37, %v1605_v35  ;;  %v1743_v35 = vld [vmem:[%s11940_s1 + $0x590] sm:$0xff]  ;;  %v1744_v37 = vld [vmem:[%s11940_s1 + $0x598] sm:$0xff] }
  0x78   : > { %3694 = vmatmul.mubr.f32.vlgmr.msra.gmra.mrb[0].mxu0 %v229_v49  ;;  %6818 = vmatpush1.bf16.msra.mxu1 %v6817_v48  ;;  %v1607_v48 = vld [vmem:[%s11940_s1 + $0x150] sm:$0xff]  ;;  %v1608_v49 = vld [vmem:[%s11940_s1 + $0x158] sm:$0xff]  ;;  %v7036_v45 = vpack.c.bf16 %v1744_v37, %v1743_v35 }
  0x79   : > { %7010 = vmatpush1.bf16.msra.mxu0 %v7009_v51  ;;  %2158 = vmatprep.mubr.f32.mxu1 %v243_v52  ;;  %v326_v51 = vld [vmem:[%s8794_s5 + $0x348] sm:$0xff]  ;;  %v515_v35 = vld [vmem:[%s8794_s5 + $0x930] sm:$0xff] }
  0x7a   : > { %3698 = vmatprep.mubr.f32.mxu0 %v251_v55  ;;  %7011 = vmatprep.subr.bf16.mxu0 %v8683_v0  ;;  %v334_v52 = vld [vmem:[%s8794_s5 + $0x388] sm:$0xff]  ;;  %v356_v55 = vld [vmem:[%s8794_s5 + $0x438] sm:$0xff]  ;;  %v523_v37 = vld [vmem:[%s8794_s5 + $0x970] sm:$0xff] }
  0x7b   : > { %2159 = vmatmul.mubr.f32.gmra.mrb[2].mxu1 %v242_v59  ;;  %6819 = vmatprep.subr.bf16.mxu1 %v8683_v0  ;;  %v6832_v59 = vpack.c.bf16 %v1608_v49, %v1607_v48  ;;  %v1745_v48 = vld [vmem:[%s11940_s1 + $0x5a0] sm:$0xff]  ;;  %v1746_v49 = vld [vmem:[%s11940_s1 + $0x5a8] sm:$0xff] }
  0x7c   : > { %3699 = vmatmul.mubr.f32.gmra.mrb[2].mxu0 %v250_v60  ;;  %2163 = vmatprep.mubr.f32.mxu1 %v264_v63  ;;  %v1609_v60 = vld [vmem:[%s11940_s1 + $0x160] sm:$0xff]  ;;  %v347_v63 = vld [vmem:[%s8794_s5 + $0x3f0] sm:$0xff]  ;;  %v7039_v57 = vpack.c.bf16 %v1746_v49, %v1745_v48  ;;  %v558_v48 = vld [vmem:[%s8794_s5 + $0xa88] sm:$0xff] }
  0x7d   : > { %7013 = vmatpush1.bf16.msra.mxu0 %v7012_v61  ;;  %3703 = vmatprep.mubr.f32.mxu0 %v272_v1  ;;  %v1610_v61 = vld [vmem:[%s11940_s1 + $0x168] sm:$0xff]  ;;  %v355_v1 = vld [vmem:[%s8794_s5 + $0x430] sm:$0xff]  ;;  %v232_v49 = vld [vmem:[%s8794_s5 + $0x58] sm:$0xff] }
  0x7e   : > { %7014 = vmatprep.subr.bf16.mxu0 %v8683_v0  ;;  %6821 = vmatpush1.bf16.msra.mxu1 %v6820_v4  ;;  %v377_v4 = vld [vmem:[%s8794_s5 + $0x4e0] sm:$0xff] }
  0x7f   : > { %2164 = vmatmul.mubr.f32.gmra.mrb[4].mxu1 %v263_v9  ;;  %6822 = vmatprep.subr.bf16.mxu1 %v8683_v0  ;;  %v6835_v9 = vpack.c.bf16 %v1610_v61, %v1609_v60  ;;  %v1747_v60 = vld [vmem:[%s11940_s1 + $0x5b0] sm:$0xff]  ;;  %v1748_v61 = vld [vmem:[%s11940_s1 + $0x5b8] sm:$0xff] }
  0x80   : > { %3704 = vmatmul.mubr.f32.gmra.mrb[4].mxu0 %v271_v10  ;;  %2168 = vmatprep.mubr.f32.mxu1 %v285_v14  ;;  %v1611_v10 = vld [vmem:[%s11940_s1 + $0x170] sm:$0xff]  ;;  %v368_v14 = vld [vmem:[%s8794_s5 + $0x498] sm:$0xff] }
  0x81   : > { %7016 = vmatpush1.bf16.msra.mxu0 %v7015_v11  ;;  %3708 = vmatprep.mubr.f32.mxu0 %v293_v15  ;;  %v1612_v11 = vld [vmem:[%s11940_s1 + $0x178] sm:$0xff] }
  0x82   : > { %7017 = vmatprep.subr.bf16.mxu0 %v8683_v0  ;;  %6824 = vmatpush1.bf16.msra.mxu1 %v6823_v19  ;;  %v376_v15 = vld [vmem:[%s8794_s5 + $0x4d8] sm:$0xff]  ;;  %v398_v19 = vld [vmem:[%s8794_s5 + $0x588] sm:$0xff] }
  0x83   : > { %2169 = vmatmul.mubr.f32.gmra.mrb[6].mxu1 %v284_v23  ;;  %6825 = vmatprep.subr.bf16.mxu1 %v8683_v0  ;;  %v6838_v23 = vpack.c.bf16 %v1612_v11, %v1611_v10  ;;  %v473_v10 = vld [vmem:[%s8794_s5 + $0x7e0] sm:$0xff] }
  0x84   : > { %3709 = vmatmul.mubr.f32.gmra.mrb[6].mxu0 %v292_v25  ;;  %2173 = vmatprep.mubr.f32.mxu1 %v306_v28  ;;  %v1613_v25 = vld [vmem:[%s11940_s1 + $0x180] sm:$0xff] }
  0x85   : > { %7019 = vmatpush1.bf16.msra.mxu0 %v7018_v26  ;;  %3713 = vmatprep.mubr.f32.mxu0 %v314_v29  ;;  %v1614_v26 = vld [vmem:[%s11940_s1 + $0x188] sm:$0xff]  ;;  %v389_v28 = vld [vmem:[%s8794_s5 + $0x540] sm:$0xff] }
  0x86   : > { %7020 = vmatprep.subr.bf16.mxu0 %v8683_v0  ;;  %6827 = vmatpush1.bf16.msra.mxu1 %v6826_v33  ;;  %v397_v29 = vld [vmem:[%s8794_s5 + $0x580] sm:$0xff]  ;;  %v419_v33 = vld [vmem:[%s8794_s5 + $0x630] sm:$0xff] }
  0x87   : > { %2174 = vmatmul.mubr.f32.gmra.mrb[8].mxu1 %v305_v38  ;;  %6828 = vmatprep.subr.bf16.mxu1 %v8683_v0  ;;  %v6841_v38 = vpack.c.bf16 %v1614_v26, %v1613_v25  ;;  %v481_v11 = vld [vmem:[%s8794_s5 + $0x820] sm:$0xff]  ;;  %v516_v26 = vld [vmem:[%s8794_s5 + $0x938] sm:$0xff] }
  0x88   : > { %3714 = vmatmul.mubr.f32.gmra.mrb[8].mxu0 %v313_v39  ;;  %2178 = vmatprep.mubr.f32.mxu1 %v327_v42  ;;  %v1615_v39 = vld [vmem:[%s11940_s1 + $0x190] sm:$0xff]  ;;  %v410_v42 = vld [vmem:[%s8794_s5 + $0x5e8] sm:$0xff] }
  0x89   : > { %7022 = vmatpush1.bf16.msra.mxu0 %v7021_v40  ;;  %3718 = vmatprep.mubr.f32.mxu0 %v335_v43  ;;  %v1616_v40 = vld [vmem:[%s11940_s1 + $0x198] sm:$0xff]  ;;  %v418_v43 = vld [vmem:[%s8794_s5 + $0x628] sm:$0xff] }
  0x8a   : > { %7023 = vmatprep.subr.bf16.mxu0 %v8683_v0  ;;  %6830 = vmatpush1.bf16.msra.mxu1 %v6829_v47  ;;  %v440_v47 = vld [vmem:[%s8794_s5 + $0x6d8] sm:$0xff] }
  0x8b   : > { %2179 = vmatmul.mubr.f32.gmra.mrb[10].mxu1 %v326_v51  ;;  %6831 = vmatprep.subr.bf16.mxu1 %v8683_v0  ;;  %v6844_v51 = vpack.c.bf16 %v1616_v40, %v1615_v39  ;;  %v537_v39 = vld [vmem:[%s8794_s5 + $0x9e0] sm:$0xff] }
  0x8c   : > { %3719 = vmatmul.mubr.f32.gmra.mrb[10].mxu0 %v334_v52  ;;  %2183 = vmatprep.mubr.f32.mxu1 %v348_v54  ;;  %v1617_v52 = vld [vmem:[%s11940_s1 + $0x1a0] sm:$0xff]  ;;  %v431_v54 = vld [vmem:[%s8794_s5 + $0x690] sm:$0xff] }
  0x8d   : > { %7025 = vmatpush1.bf16.msra.mxu0 %v7024_v53  ;;  %3723 = vmatprep.mubr.f32.mxu0 %v356_v55  ;;  %v1618_v53 = vld [vmem:[%s11940_s1 + $0x1a8] sm:$0xff]  ;;  %v439_v55 = vld [vmem:[%s8794_s5 + $0x6d0] sm:$0xff]  ;;  %v545_v40 = vld [vmem:[%s8794_s5 + $0xa20] sm:$0xff] }
  0x8e   : > { %7026 = vmatprep.subr.bf16.mxu0 %v8683_v0  ;;  %6833 = vmatpush1.bf16.msra.mxu1 %v6832_v59  ;;  %v461_v59 = vld [vmem:[%s8794_s5 + $0x780] sm:$0xff] }
  0x8f   : > { %2184 = vmatmul.mubr.f32.gmra.mrb[12].mxu1 %v347_v63  ;;  %6834 = vmatprep.subr.bf16.mxu1 %v8683_v0  ;;  %v6847_v63 = vpack.c.bf16 %v1618_v53, %v1617_v52  ;;  %v1758_v52 = vld [vmem:[%s11940_s1 + $0x608] sm:$0xff]  ;;  %v557_v53 = vld [vmem:[%s8794_s5 + $0xa80] sm:$0xff] }
  0x90   : > { %3724 = vmatmul.mubr.f32.gmra.mrb[12].mxu0 %v355_v1  ;;  %2188 = vmatprep.mubr.f32.mxu1 %v369_v3  ;;  %v452_v1 = vld [vmem:[%s8794_s5 + $0x738] sm:$0xff]  ;;  %v7042_v3 = vpack.c.bf16 %v1748_v61, %v1747_v60  ;;  %v578_v61 = vld [vmem:[%s8794_s5 + $0xb28] sm:$0xff] }
  0x91   : > { %7028 = vmatpush1.bf16.msra.mxu0 %v7027_v2  ;;  %3728 = vmatprep.mubr.f32.mxu0 %v377_v4  ;;  %v460_v2 = vld [vmem:[%s8794_s5 + $0x778] sm:$0xff]  ;;  %v474_v4 = vld [vmem:[%s8794_s5 + $0x7e8] sm:$0xff] }
  0x92   : > { %7029 = vmatprep.subr.bf16.mxu0 %v8683_v0  ;;  %6836 = vmatpush1.bf16.msra.mxu1 %v6835_v9  ;;  %v1750_v9 = vld [vmem:[%s11940_s1 + $0x5c8] sm:$0xff]  ;;  %v1760_v60 = vld [vmem:[%s11940_s1 + $0x618] sm:$0xff] }
  0x93   : > { %2189 = vmatmul.mubr.f32.gmra.mrb[14].mxu1 %v368_v14  ;;  %6837 = vmatprep.subr.bf16.mxu1 %v8683_v0  ;;  %v7045_v14 = vpack.c.bf16 %v1750_v9, %v1749_v7  ;;  %v1761_v7 = vld [vmem:[%s11940_s1 + $0x620] sm:$0xff]  ;;  %v1762_v9 = vld [vmem:[%s11940_s1 + $0x628] sm:$0xff] }
  0x94   : > { %3729 = vmatmul.mubr.f32.gmra.mrb[14].mxu0 %v376_v15  ;;  %2193 = vmatprep.mubr.f32.mxu1 %v390_v17  ;;  %v495_v15 = vld [vmem:[%s8794_s5 + $0x890] sm:$0xff] }
  0x95   : > { %7031 = vmatpush1.bf16.msra.mxu0 %v7030_v16  ;;  %3733 = vmatprep.mubr.f32.mxu0 %v398_v19  ;;  %v503_v16 = vld [vmem:[%s8794_s5 + $0x8d0] sm:$0xff]  ;;  %v1752_v19 = vld [vmem:[%s11940_s1 + $0x5d8] sm:$0xff] }
  0x96   : > { %7032 = vmatprep.subr.bf16.mxu0 %v8683_v0  ;;  %6839 = vmatpush1.bf16.msra.mxu1 %v6838_v23  ;;  %v1751_v17 = vld [vmem:[%s11940_s1 + $0x5d0] sm:$0xff]  ;;  %v502_v23 = vld [vmem:[%s8794_s5 + $0x8c8] sm:$0xff] }
  0x97   : > { %2194 = vmatmul.mubr.f32.gmra.mrb[16].mxu1 %v389_v28  ;;  %6840 = vmatprep.subr.bf16.mxu1 %v8683_v0  ;;  %v7048_v25 = vpack.c.bf16 %v1752_v19, %v1751_v17  ;;  %v1620_v28 = vld [vmem:[%s11940_s1 + $0x1b8] sm:$0xff]  ;;  %v295_v17 = vld [vmem:[%s8794_s5 + $0x250] sm:$0xff] }
  0x98   : > { %3734 = vmatmul.mubr.f32.gmra.mrb[16].mxu0 %v397_v29  ;;  %2198 = vmatprep.mubr.f32.mxu1 %v411_v32  ;;  %v524_v29 = vld [vmem:[%s8794_s5 + $0x978] sm:$0xff]  ;;  %v1754_v32 = vld [vmem:[%s11940_s1 + $0x5e8] sm:$0xff]  ;;  %v1763_v19 = vld [vmem:[%s11940_s1 + $0x630] sm:$0xff] }
  0x99   : > { %7034 = vmatpush1.bf16.msra.mxu0 %v7033_v31  ;;  %3738 = vmatprep.mubr.f32.mxu0 %v419_v33  ;;  %v1753_v31 = vld [vmem:[%s11940_s1 + $0x5e0] sm:$0xff]  ;;  %v6850_v33 = vpack.c.bf16 %v1620_v28, %v1619_v22  ;;  %v620_v22 = vld [vmem:[%s8794_s5 + $0xc78] sm:$0xff] }
  0x9a   : > { %7035 = vmatprep.subr.bf16.mxu0 %v8683_v0  ;;  %6842 = vmatpush1.bf16.msra.mxu1 %v6841_v38  ;;  %v7051_v38 = vpack.c.bf16 %v1754_v32, %v1753_v31  ;;  %v316_v28 = vld [vmem:[%s8794_s5 + $0x2f8] sm:$0xff]  ;;  %v1766_v31 = vld [vmem:[%s11940_s1 + $0x648] sm:$0xff]  ;;  %v641_v32 = vld [vmem:[%s8794_s5 + $0xd20] sm:$0xff] }
  0x9b   : > { %2199 = vmatmul.mubr.f32.gmra.mrb[18].mxu1 %v410_v42  ;;  %6843 = vmatprep.subr.bf16.mxu1 %v8683_v0  ;;  %v1755_v42 = vld [vmem:[%s11940_s1 + $0x5f0] sm:$0xff] }
  0x9c   : > { %3739 = vmatmul.mubr.f32.gmra.mrb[18].mxu0 %v418_v43  ;;  %2203 = vmatprep.mubr.f32.mxu1 %v432_v46  ;;  %v1756_v43 = vld [vmem:[%s11940_s1 + $0x5f8] sm:$0xff] }
  0x9d   : > { %7037 = vmatpush1.bf16.msra.mxu0 %v7036_v45  ;;  %3743 = vmatprep.mubr.f32.mxu0 %v440_v47  ;;  %v536_v45 = vld [vmem:[%s8794_s5 + $0x9d8] sm:$0xff]  ;;  %v7054_v47 = vpack.c.bf16 %v1756_v43, %v1755_v42  ;;  %v662_v42 = vld [vmem:[%s8794_s5 + $0xdc8] sm:$0xff]  ;;  %v1623_v43 = vld [vmem:[%s11940_s1 + $0x1d0] sm:$0xff] }
  0x9e   : > { %7038 = vmatprep.subr.bf16.mxu0 %v8683_v0  ;;  %6845 = vmatpush1.bf16.msra.mxu1 %v6844_v51  ;;  %v544_v46 = vld [vmem:[%s8794_s5 + $0xa18] sm:$0xff]  ;;  %v1757_v51 = vld [vmem:[%s11940_s1 + $0x600] sm:$0xff] }
  0x9f   : > { %2204 = vmatmul.mubr.f32.gmra.mrb[20].mxu1 %v431_v54  ;;  %6846 = vmatprep.subr.bf16.mxu1 %v8683_v0  ;;  %v231_v54 = vld [vmem:[%s8794_s5 + $0x50] sm:$0xff] }
  0xa0   : > { %3744 = vmatmul.mubr.f32.gmra.mrb[20].mxu0 %v439_v55  ;;  %2208 = vmatprep.mubr.f32.mxu1 %v453_v58  ;;  %v7057_v55 = vpack.c.bf16 %v1758_v52, %v1757_v51  ;;  %v253_v58 = vld [vmem:[%s8794_s5 + $0x100] sm:$0xff]  ;;  %v1770_v52 = vld [vmem:[%s11940_s1 + $0x668] sm:$0xff] }
  0xa1   : > { %7040 = vmatpush1.bf16.msra.mxu0 %v7039_v57  ;;  %3748 = vmatprep.mubr.f32.mxu0 %v461_v59  ;;  %v579_v57 = vld [vmem:[%s8794_s5 + $0xb30] sm:$0xff]  ;;  %v1769_v51 = vld [vmem:[%s11940_s1 + $0x660] sm:$0xff] }
  0xa2   : > { %7041 = vmatprep.subr.bf16.mxu0 %v8683_v0  ;;  %6848 = vmatpush1.bf16.msra.mxu1 %v6847_v63  ;;  %v1759_v59 = vld [vmem:[%s11940_s1 + $0x610] sm:$0xff]  ;;  %v1621_v63 = vld [vmem:[%s11940_s1 + $0x1c0] sm:$0xff] }
  0xa3   : > { %2209 = vmatmul.mubr.f32.gmra.mrb[22].mxu1 %v452_v1  ;;  %6849 = vmatprep.subr.bf16.mxu1 %v8683_v0  ;;  %v252_v1 = vld [vmem:[%s8794_s5 + $0xf8] sm:$0xff] }
  0xa4   : > { %3749 = vmatmul.mubr.f32.gmra.mrb[22].mxu0 %v460_v2  ;;  %2213 = vmatprep.mubr.f32.mxu1 %v474_v4  ;;  %v600_v2 = vld [vmem:[%s8794_s5 + $0xbd8] sm:$0xff]  ;;  %v1622_v4 = vld [vmem:[%s11940_s1 + $0x1c8] sm:$0xff] }
  0xa5   : > { %7043 = vmatpush1.bf16.msra.mxu0 %v7042_v3  ;;  %3753 = vmatprep.mubr.f32.mxu0 %v482_v6  ;;  %v7060_v3 = vpack.c.bf16 %v1760_v60, %v1759_v59  ;;  %v274_v6 = vld [vmem:[%s8794_s5 + $0x1a8] sm:$0xff]  ;;  %v379_v59 = vld [vmem:[%s8794_s5 + $0x4f0] sm:$0xff] }
  0xa6   : > { %7044 = vmatprep.subr.bf16.mxu0 %v8683_v0  ;;  %6851 = vmatpush1.bf16.msra.mxu1 %v6850_v33  ;;  %v315_v33 = vld [vmem:[%s8794_s5 + $0x2f0] sm:$0xff] }
  0xa7   : > { %2214 = vmatmul.mubr.f32.gmra.mrb[24].mxu1 %v473_v10  ;;  %6852 = vmatprep.subr.bf16.mxu1 %v8683_v0  ;;  %v6853_v10 = vpack.c.bf16 %v1622_v4, %v1621_v63  ;;  %v1771_v60 = vld [vmem:[%s11940_s1 + $0x670] sm:$0xff]  ;;  %v704_v63 = vld [vmem:[%s8794_s5 + $0xf18] sm:$0xff] }
  0xa8   : > { %3754 = vmatmul.mubr.f32.gmra.mrb[24].mxu0 %v481_v11  ;;  %2218 = vmatprep.mubr.f32.mxu1 %v495_v15  ;;  %v599_v11 = vld [vmem:[%s8794_s5 + $0xbd0] sm:$0xff]  ;;  %v621_v15 = vld [vmem:[%s8794_s5 + $0xc80] sm:$0xff]  ;;  %v400_v4 = vld [vmem:[%s8794_s5 + $0x598] sm:$0xff] }
  0xa9   : > { %7046 = vmatpush1.bf16.msra.mxu0 %v7045_v14  ;;  %3758 = vmatprep.mubr.f32.mxu0 %v503_v16  ;;  %v273_v14 = vld [vmem:[%s8794_s5 + $0x1a0] sm:$0xff]  ;;  %v7063_v16 = vpack.c.bf16 %v1762_v9, %v1761_v7  ;;  %v1774_v7 = vld [vmem:[%s11940_s1 + $0x688] sm:$0xff] }
  0xaa   : > { %7047 = vmatprep.subr.bf16.mxu0 %v8683_v0  ;;  %6854 = vmatpush1.bf16.msra.mxu1 %v6853_v10  ;;  %v725_v9 = vld [vmem:[%s8794_s5 + $0xfc0] sm:$0xff]  ;;  %v399_v10 = vld [vmem:[%s8794_s5 + $0x590] sm:$0xff] }
  0xab   : > { %2219 = vmatmul.mubr.f32.gmra.mrb[26].mxu1 %v494_v21  ;;  %v1764_v21 = vld [vmem:[%s11940_s1 + $0x638] sm:$0xff]  ;;  %6855 = vmatprep.subr.bf16.mxu1 %v8683_v0 }
  0xac   : > { %3759 = vmatmul.mubr.f32.gmra.mrb[26].mxu0 %v502_v23  ;;  %2223 = vmatprep.mubr.f32.mxu1 %v516_v26  ;;  %v294_v23 = vld [vmem:[%s8794_s5 + $0x248] sm:$0xff]  ;;  %v7066_v26 = vpack.c.bf16 %v1764_v21, %v1763_v19  ;;  %v1625_v21 = vld [vmem:[%s11940_s1 + $0x1e0] sm:$0xff] }
  0xad   : > { %7049 = vmatpush1.bf16.msra.mxu0 %v7048_v25  ;;  %3763 = vmatprep.mubr.f32.mxu0 %v524_v29  ;;  %v642_v25 = vld [vmem:[%s8794_s5 + $0xd28] sm:$0xff]  ;;  %v1765_v29 = vld [vmem:[%s11940_s1 + $0x640] sm:$0xff] }
  0xae   : > { %7050 = vmatprep.subr.bf16.mxu0 %v8683_v0  ;;  %v746_v19 = vld [vmem:[%s8794_s5 + $0x1068] sm:$0xff] }
  0xaf   : > { %2224 = vmatmul.mubr.f32.gmra.mrb[28].mxu1 %v515_v35  ;;  %v663_v35 = vld [vmem:[%s8794_s5 + $0xdd0] sm:$0xff] }
  0xb0   : > { %3764 = vmatmul.mubr.f32.gmra.mrb[28].mxu0 %v523_v37  ;;  %2228 = vmatprep.mubr.f32.mxu1 %v537_v39  ;;  %v7069_v37 = vpack.c.bf16 %v1766_v31, %v1765_v29  ;;  %v1767_v39 = vld [vmem:[%s11940_s1 + $0x650] sm:$0xff]  ;;  %v1777_v29 = vld [vmem:[%s11940_s1 + $0x6a0] sm:$0xff]  ;;  %v1778_v31 = vld [vmem:[%s11940_s1 + $0x6a8] sm:$0xff] }
  0xb1   : > { %7052 = vmatpush1.bf16.msra.mxu0 %v7051_v38  ;;  %3768 = vmatprep.mubr.f32.mxu0 %v545_v40  ;;  %v337_v38 = vld [vmem:[%s8794_s5 + $0x3a0] sm:$0xff]  ;;  %v1768_v40 = vld [vmem:[%s11940_s1 + $0x658] sm:$0xff] }
  0xb2   : > { %7053 = vmatprep.subr.bf16.mxu0 %v8683_v0 }
  0xb3   : > { %2229 = vmatmul.mubr.f32.gmra.mrb[30].mxu1 %v536_v45  ;;  %v336_v45 = vld [vmem:[%s8794_s5 + $0x398] sm:$0xff] }
  0xb4   : > { %3769 = vmatmul.mubr.f32.gmra.mrb[30].mxu0 %v544_v46  ;;  %2233 = vmatprep.mubr.f32.mxu1 %v558_v48  ;;  %v684_v46 = vld [vmem:[%s8794_s5 + $0xe78] sm:$0xff] }
  0xb5   : > { %7055 = vmatpush1.bf16.msra.mxu0 %v7054_v47  ;;  %4078 = vmatprep.mubr.f32.mxu0 %v232_v49  ;;  %v7072_v47 = vpack.c.bf16 %v1768_v40, %v1767_v39  ;;  %v1624_v48 = vld [vmem:[%s11940_s1 + $0x1d8] sm:$0xff]  ;;  %v358_v49 = vld [vmem:[%s8794_s5 + $0x448] sm:$0xff]  ;;  %v463_v39 = vld [vmem:[%s8794_s5 + $0x790] sm:$0xff] }
  0xb6   : > { %7056 = vmatprep.subr.bf16.mxu0 %v8683_v0  ;;  %v788_v40 = vld [vmem:[%s8794_s5 + $0x11b8] sm:$0xff] }
  0xb7   : > { %2234 = vmatmul.mubr.f32.gmra.mrb[32].mxu1 %v557_v53  ;;  %v6856_v53 = vpack.c.bf16 %v1624_v48, %v1623_v43  ;;  %v810_v43 = vld [vmem:[%s8794_s5 + $0x1268] sm:$0xff]  ;;  %v831_v48 = vld [vmem:[%s8794_s5 + $0x1310] sm:$0xff] }
  0xb8   : > { %4079 = vmatmul.mubr.f32.vlgmr.msra.gmra.mrb[0].mxu0 %v231_v54  ;;  %2238 = vmatprep.mubr.f32.mxu1 %v579_v57  ;;  %v683_v54 = vld [vmem:[%s8794_s5 + $0xe70] sm:$0xff]  ;;  %v705_v57 = vld [vmem:[%s8794_s5 + $0xf20] sm:$0xff] }
  0xb9   : > { %7058 = vmatpush1.bf16.msra.mxu0 %v7057_v55  ;;  %4083 = vmatprep.mubr.f32.mxu0 %v253_v58  ;;  %v357_v55 = vld [vmem:[%s8794_s5 + $0x440] sm:$0xff]  ;;  %v7075_v58 = vpack.c.bf16 %v1770_v52, %v1769_v51  ;;  %v830_v51 = vld [vmem:[%s8794_s5 + $0x1308] sm:$0xff]  ;;  %v1779_v52 = vld [vmem:[%s11940_s1 + $0x6b0] sm:$0xff] }
  0xba   : > { %7059 = vmatprep.subr.bf16.mxu0 %v8683_v0  ;;  %6857 = vmatpush1.bf16.msra.mxu1 %v6856_v53  ;;  %v1780_v53 = vld [vmem:[%s11940_s1 + $0x6b8] sm:$0xff] }
  0xbb   : > { %2239 = vmatmul.mubr.f32.gmra.mrb[34].mxu1 %v578_v61  ;;  %v1772_v61 = vld [vmem:[%s11940_s1 + $0x678] sm:$0xff]  ;;  %6858 = vmatprep.subr.bf16.mxu1 %v8683_v0 }
  0xbc   : > { %4084 = vmatmul.mubr.f32.gmra.mrb[2].mxu0 %v252_v1  ;;  %2243 = vmatprep.mubr.f32.mxu1 %v600_v2  ;;  %v378_v1 = vld [vmem:[%s8794_s5 + $0x4e8] sm:$0xff] }
  0xbd   : > { %4088 = vmatprep.mubr.f32.mxu0 %v274_v6  ;;  %7061 = vmatpush1.bf16.msra.mxu0 %v7060_v3  ;;  %v726_v2 = vld [vmem:[%s8794_s5 + $0xfc8] sm:$0xff]  ;;  %v7078_v3 = vpack.c.bf16 %v1772_v61, %v1771_v60  ;;  %v1773_v6 = vld [vmem:[%s11940_s1 + $0x680] sm:$0xff] }
  0xbe   : > { %7062 = vmatprep.subr.bf16.mxu0 %v8683_v0  ;;  %v526_v60 = vld [vmem:[%s8794_s5 + $0x988] sm:$0xff] }
  0xbf   : > { %2244 = vmatmul.mubr.f32.gmra.mrb[36].mxu1 %v599_v11  ;;  %v747_v11 = vld [vmem:[%s8794_s5 + $0x1070] sm:$0xff] }
  0xc0   : > { %4089 = vmatmul.mubr.f32.gmra.mrb[4].mxu0 %v273_v14  ;;  %2248 = vmatprep.mubr.f32.mxu1 %v621_v15  ;;  %v7081_v14 = vpack.c.bf16 %v1774_v7, %v1773_v6  ;;  %v421_v15 = vld [vmem:[%s8794_s5 + $0x640] sm:$0xff]  ;;  %v546_v6 = vld [vmem:[%s8794_s5 + $0xa28] sm:$0xff] }
  0xc1   : > { %4093 = vmatprep.mubr.f32.mxu0 %v295_v17  ;;  %7064 = vmatpush1.bf16.msra.mxu0 %v7063_v16  ;;  %v1775_v16 = vld [vmem:[%s11940_s1 + $0x690] sm:$0xff]  ;;  %v1776_v17 = vld [vmem:[%s11940_s1 + $0x698] sm:$0xff]  ;;  %v894_v7 = vld [vmem:[%s8794_s5 + $0x1508] sm:$0xff] }
  0xc2   : > { %7065 = vmatprep.subr.bf16.mxu0 %v8683_v0 }
  0xc3   : > { %2249 = vmatmul.mubr.f32.gmra.mrb[38].mxu1 %v620_v22  ;;  %v420_v22 = vld [vmem:[%s8794_s5 + $0x638] sm:$0xff] }
  0xc4   : > { %4094 = vmatmul.mubr.f32.gmra.mrb[6].mxu0 %v294_v23  ;;  %2253 = vmatprep.mubr.f32.mxu1 %v642_v25  ;;  %v768_v23 = vld [vmem:[%s8794_s5 + $0x1118] sm:$0xff]  ;;  %v7084_v25 = vpack.c.bf16 %v1776_v17, %v1775_v16  ;;  %v914_v16 = vld [vmem:[%s8794_s5 + $0x15a8] sm:$0xff]  ;;  %v1781_v17 = vld [vmem:[%s11940_s1 + $0x6c0] sm:$0xff] }
  0xc5   : > { %4098 = vmatprep.mubr.f32.mxu0 %v316_v28  ;;  %7067 = vmatpush1.bf16.msra.mxu0 %v7066_v26  ;;  %v1626_v26 = vld [vmem:[%s11940_s1 + $0x1e8] sm:$0xff] }
  0xc6   : > { %7068 = vmatprep.subr.bf16.mxu0 %v8683_v0  ;;  %v442_v28 = vld [vmem:[%s8794_s5 + $0x6e8] sm:$0xff] }
  0xc7   : > { %2254 = vmatmul.mubr.f32.gmra.mrb[40].mxu1 %v641_v32  ;;  %v6859_v32 = vpack.c.bf16 %v1626_v26, %v1625_v21  ;;  %v588_v21 = vld [vmem:[%s8794_s5 + $0xb78] sm:$0xff]  ;;  %v935_v26 = vld [vmem:[%s8794_s5 + $0x1650] sm:$0xff] }
  0xc8   : > { %4099 = vmatmul.mubr.f32.gmra.mrb[8].mxu0 %v315_v33  ;;  %2258 = vmatprep.mubr.f32.mxu1 %v663_v35  ;;  %v767_v33 = vld [vmem:[%s8794_s5 + $0x1110] sm:$0xff]  ;;  %v441_v35 = vld [vmem:[%s8794_s5 + $0x6e0] sm:$0xff] }
  0xc9   : > { %4103 = vmatprep.mubr.f32.mxu0 %v337_v38  ;;  %7070 = vmatpush1.bf16.msra.mxu0 %v7069_v37  ;;  %v789_v37 = vld [vmem:[%s8794_s5 + $0x11c0] sm:$0xff]  ;;  %v7087_v38 = vpack.c.bf16 %v1778_v31, %v1777_v29  ;;  %v631_v31 = vld [vmem:[%s8794_s5 + $0xcd0] sm:$0xff] }
  0xca   : > { %7071 = vmatprep.subr.bf16.mxu0 %v8683_v0  ;;  %6860 = vmatpush1.bf16.msra.mxu1 %v6859_v32  ;;  %v957_v29 = vld [vmem:[%s8794_s5 + $0x1700] sm:$0xff]  ;;  %v956_v32 = vld [vmem:[%s8794_s5 + $0x16f8] sm:$0xff] }
  0xcb   : > { %2259 = vmatmul.mubr.f32.gmra.mrb[42].mxu1 %v662_v42  ;;  %6861 = vmatprep.subr.bf16.mxu1 %v8683_v0  ;;  %v462_v42 = vld [vmem:[%s8794_s5 + $0x788] sm:$0xff] }
  0xcc   : > { %4104 = vmatmul.mubr.f32.gmra.mrb[10].mxu0 %v336_v45  ;;  %2263 = vmatprep.mubr.f32.mxu1 %v684_v46  ;;  %v484_v45 = vld [vmem:[%s8794_s5 + $0x838] sm:$0xff]  ;;  %v809_v46 = vld [vmem:[%s8794_s5 + $0x1260] sm:$0xff] }
  0xcd   : > { %4108 = vmatprep.mubr.f32.mxu0 %v358_v49  ;;  %7073 = vmatpush1.bf16.msra.mxu0 %v7072_v47  ;;  %v483_v47 = vld [vmem:[%s8794_s5 + $0x830] sm:$0xff]  ;;  %v505_v49 = vld [vmem:[%s8794_s5 + $0x8e0] sm:$0xff] }
  0xce   : > { %7074 = vmatprep.subr.bf16.mxu0 %v8683_v0 }
  0xcf   : > { %2264 = vmatmul.mubr.f32.gmra.mrb[44].mxu1 %v683_v54  ;;  %v1627_v54 = vld [vmem:[%s11940_s1 + $0x1f0] sm:$0xff] }
  0xd0   : > { %4109 = vmatmul.mubr.f32.gmra.mrb[12].mxu0 %v357_v55  ;;  %2268 = vmatprep.mubr.f32.mxu1 %v705_v57  ;;  %v504_v55 = vld [vmem:[%s8794_s5 + $0x8d8] sm:$0xff] }
  0xd1   : > { %4113 = vmatprep.mubr.f32.mxu0 %v379_v59  ;;  %7076 = vmatpush1.bf16.msra.mxu0 %v7075_v58  ;;  %v852_v57 = vld [vmem:[%s8794_s5 + $0x13b8] sm:$0xff]  ;;  %v7090_v58 = vpack.c.bf16 %v1780_v53, %v1779_v52  ;;  %v1019_v52 = vld [vmem:[%s8794_s5 + $0x18f0] sm:$0xff]  ;;  %v693_v53 = vld [vmem:[%s8794_s5 + $0xec0] sm:$0xff] }
  0xd2   : > { %7077 = vmatprep.subr.bf16.mxu0 %v8683_v0  ;;  %v1628_v59 = vld [vmem:[%s11940_s1 + $0x1f8] sm:$0xff] }
  0xd3   : > { %2269 = vmatmul.mubr.f32.gmra.mrb[46].mxu1 %v704_v63  ;;  %v6862_v61 = vpack.c.bf16 %v1628_v59, %v1627_v54  ;;  %v851_v63 = vld [vmem:[%s8794_s5 + $0x13b0] sm:$0xff]  ;;  %v1041_v54 = vld [vmem:[%s8794_s5 + $0x19a0] sm:$0xff]  ;;  %v1062_v59 = vld [vmem:[%s8794_s5 + $0x1a48] sm:$0xff] }
  0xd4   : > { %4114 = vmatmul.mubr.f32.gmra.mrb[14].mxu0 %v378_v1  ;;  %2273 = vmatprep.mubr.f32.mxu1 %v726_v2  ;;  %v525_v1 = vld [vmem:[%s8794_s5 + $0x980] sm:$0xff] }
  0xd5   : > { %4118 = vmatprep.mubr.f32.mxu0 %v400_v4  ;;  %7079 = vmatpush1.bf16.msra.mxu0 %v7078_v3  ;;  %v873_v2 = vld [vmem:[%s8794_s5 + $0x1460] sm:$0xff]  ;;  %v547_v3 = vld [vmem:[%s8794_s5 + $0xa30] sm:$0xff]  ;;  %v872_v4 = vld [vmem:[%s8794_s5 + $0x1458] sm:$0xff] }
  0xd6   : > { %7080 = vmatprep.subr.bf16.mxu0 %v8683_v0  ;;  %6863 = vmatpush1.bf16.msra.mxu1 %v6862_v61  ;;  %v1061_v61 = vld [vmem:[%s8794_s5 + $0x1a40] sm:$0xff] }
  0xd7   : > { %2274 = vmatmul.mubr.f32.gmra.mrb[48].mxu1 %v725_v9  ;;  %6864 = vmatprep.subr.bf16.mxu1 %v8683_v0  ;;  %v568_v9 = vld [vmem:[%s8794_s5 + $0xad8] sm:$0xff] }
  0xd8   : > { %4119 = vmatmul.mubr.f32.gmra.mrb[16].mxu0 %v399_v10  ;;  %2278 = vmatprep.mubr.f32.mxu1 %v747_v11  ;;  %v893_v10 = vld [vmem:[%s8794_s5 + $0x1500] sm:$0xff]  ;;  %v567_v11 = vld [vmem:[%s8794_s5 + $0xad0] sm:$0xff] }
  0xd9   : > { %4123 = vmatprep.mubr.f32.mxu0 %v421_v15  ;;  %7082 = vmatpush1.bf16.msra.mxu0 %v7081_v14  ;;  %v915_v14 = vld [vmem:[%s8794_s5 + $0x15b0] sm:$0xff]  ;;  %v589_v15 = vld [vmem:[%s8794_s5 + $0xb80] sm:$0xff] }
  0xda   : > { %7083 = vmatprep.subr.bf16.mxu0 %v8683_v0 }
  0xdb   : > { %2279 = vmatmul.mubr.f32.gmra.mrb[50].mxu1 %v746_v19  ;;  %v1782_v19 = vld [vmem:[%s11940_s1 + $0x6c8] sm:$0xff] }
  0xdc   : > { %4124 = vmatmul.mubr.f32.gmra.mrb[18].mxu0 %v420_v22  ;;  %2283 = vmatprep.mubr.f32.mxu1 %v768_v23  ;;  %v936_v22 = vld [vmem:[%s8794_s5 + $0x1658] sm:$0xff]  ;;  %v7093_v23 = vpack.c.bf16 %v1782_v19, %v1781_v17  ;;  %v799_v17 = vld [vmem:[%s8794_s5 + $0x1210] sm:$0xff] }
  0xdd   : > { %4128 = vmatprep.mubr.f32.mxu0 %v442_v28  ;;  %7085 = vmatpush1.bf16.msra.mxu0 %v7084_v25  ;;  %v610_v25 = vld [vmem:[%s8794_s5 + $0xc28] sm:$0xff]  ;;  %v609_v28 = vld [vmem:[%s8794_s5 + $0xc20] sm:$0xff]  ;;  %v1124_v19 = vld [vmem:[%s8794_s5 + $0x1c38] sm:$0xff] }
  0xde   : > { %7086 = vmatprep.subr.bf16.mxu0 %v8683_v0 }
  0xdf   : > { %2284 = vmatmul.mubr.f32.gmra.mrb[52].mxu1 %v767_v33  ;;  %v630_v33 = vld [vmem:[%s8794_s5 + $0xcc8] sm:$0xff] }
  0xe0   : > { %4129 = vmatmul.mubr.f32.gmra.mrb[20].mxu0 %v441_v35  ;;  %2288 = vmatprep.mubr.f32.mxu1 %v789_v37  ;;  %v978_v35 = vld [vmem:[%s8794_s5 + $0x17a8] sm:$0xff]  ;;  %v652_v37 = vld [vmem:[%s8794_s5 + $0xd78] sm:$0xff] }
  0xe1   : > { %4133 = vmatprep.mubr.f32.mxu0 %v463_v39  ;;  %7088 = vmatpush1.bf16.msra.mxu0 %v7087_v38  ;;  %v977_v38 = vld [vmem:[%s8794_s5 + $0x17a0] sm:$0xff]  ;;  %v651_v39 = vld [vmem:[%s8794_s5 + $0xd70] sm:$0xff] }
  0xe2   : > { %7089 = vmatprep.subr.bf16.mxu0 %v8683_v0 }
  0xe3   : > { %2289 = vmatmul.mubr.f32.gmra.mrb[54].mxu1 %v788_v40  ;;  %v999_v40 = vld [vmem:[%s8794_s5 + $0x1850] sm:$0xff] }
  0xe4   : > { %4134 = vmatmul.mubr.f32.gmra.mrb[22].mxu0 %v462_v42  ;;  %2293 = vmatprep.mubr.f32.mxu1 %v810_v43  ;;  %v673_v42 = vld [vmem:[%s8794_s5 + $0xe20] sm:$0xff]  ;;  %v998_v43 = vld [vmem:[%s8794_s5 + $0x1848] sm:$0xff] }
  0xe5   : > { %4138 = vmatprep.mubr.f32.mxu0 %v484_v45  ;;  %7091 = vmatpush1.bf16.msra.mxu0 %v7090_v58  ;;  %v1783_v45 = vld [vmem:[%s11940_s1 + $0x6d0] sm:$0xff]  ;;  %v714_v58 = vld [vmem:[%s8794_s5 + $0xf68] sm:$0xff] }
  0xe6   : > { %7092 = vmatprep.subr.bf16.mxu0 %v8683_v0 }
  0xe7   : > { %2294 = vmatmul.mubr.f32.gmra.mrb[56].mxu1 %v809_v46  ;;  %v1784_v46 = vld [vmem:[%s11940_s1 + $0x6d8] sm:$0xff] }
  0xe8   : > { %4139 = vmatmul.mubr.f32.gmra.mrb[24].mxu0 %v483_v47  ;;  %2298 = vmatprep.mubr.f32.mxu1 %v831_v48  ;;  %v672_v47 = vld [vmem:[%s8794_s5 + $0xe18] sm:$0xff] }
  0xe9   : > { %4143 = vmatprep.mubr.f32.mxu0 %v505_v49  ;;  %7094 = vmatpush1.bf16.msra.mxu0 %v7093_v23  ;;  %v1020_v48 = vld [vmem:[%s8794_s5 + $0x18f8] sm:$0xff]  ;;  %v7096_v49 = vpack.c.bf16 %v1784_v46, %v1783_v45  ;;  %v883_v45 = vld [vmem:[%s8794_s5 + $0x14b0] sm:$0xff] }
  0xea   : > { %7095 = vmatprep.subr.bf16.mxu0 %v8683_v0  ;;  %v820_v23 = vld [vmem:[%s8794_s5 + $0x12b8] sm:$0xff] }
  0xeb   : > { %2299 = vmatmul.mubr.f32.gmra.mrb[58].mxu1 %v830_v51  ;;  %v694_v51 = vld [vmem:[%s8794_s5 + $0xec8] sm:$0xff]  ;;  %v1208_v46 = vld [vmem:[%s8794_s5 + $0x1ed8] sm:$0xff] }
  0xec   : > { %4144 = vmatmul.mubr.f32.gmra.mrb[26].mxu0 %v504_v55  ;;  %2303 = vmatprep.mubr.f32.mxu1 %v852_v57  ;;  %v715_v55 = vld [vmem:[%s8794_s5 + $0xf70] sm:$0xff]  ;;  %v1040_v57 = vld [vmem:[%s8794_s5 + $0x1998] sm:$0xff] }
  0xed   : > { %4148 = vmatprep.mubr.f32.mxu0 %v526_v60  ;;  %7097 = vmatpush1.bf16.msra.mxu0 %v7096_v49  ;;  %v736_v60 = vld [vmem:[%s8794_s5 + $0x1018] sm:$0xff] }
  0xee   : > { %7098 = vmatprep.subr.bf16.mxu0 %v8683_v0  ;;  %v904_v49 = vld [vmem:[%s8794_s5 + $0x1558] sm:$0xff] }
  0xef   : > { %2304 = vmatmul.mubr.f32.gmra.mrb[60].mxu1 %v851_v63  ;;  %v735_v63 = vld [vmem:[%s8794_s5 + $0x1010] sm:$0xff] }
  0xf0   : > { %4149 = vmatmul.mubr.f32.gmra.mrb[28].mxu0 %v525_v1  ;;  %2308 = vmatprep.mubr.f32.mxu1 %v873_v2  ;;  %v1083_v1 = vld [vmem:[%s8794_s5 + $0x1af0] sm:$0xff]  ;;  %v757_v2 = vld [vmem:[%s8794_s5 + $0x10c0] sm:$0xff] }
  0xf1   : > { %4153 = vmatprep.mubr.f32.mxu0 %v547_v3  ;;  %v1082_v3 = vld [vmem:[%s8794_s5 + $0x1ae8] sm:$0xff] }
  0xf3   : > { %2309 = vmatmul.mubr.f32.gmra.mrb[62].mxu1 %v872_v4  ;;  %v1785_v4 = vld [vmem:[%s11940_s1 + $0x6e0] sm:$0xff] }
  0xf4   : > { %4154 = vmatmul.mubr.f32.gmra.mrb[30].mxu0 %v546_v6  ;;  %2313 = vmatprep.mubr.f32.mxu1 %v894_v7  ;;  %v1786_v6 = vld [vmem:[%s11940_s1 + $0x6e8] sm:$0xff]  ;;  %v756_v7 = vld [vmem:[%s8794_s5 + $0x10b8] sm:$0xff] }
  0xf5   : > { %4158 = vmatprep.mubr.f32.mxu0 %v568_v9  ;;  %v1104_v9 = vld [vmem:[%s8794_s5 + $0x1b98] sm:$0xff] }
  0xf7   : > { %2314 = vmatmul.mubr.f32.gmra.mrb[64].mxu1 %v893_v10  ;;  %v7099_v10 = vpack.c.bf16 %v1786_v6, %v1785_v4  ;;  %v1314_v4 = vld [vmem:[%s8794_s5 + $0x2228] sm:$0xff]  ;;  %v988_v6 = vld [vmem:[%s8794_s5 + $0x17f8] sm:$0xff] }
  0xf8   : > { %4159 = vmatmul.mubr.f32.gmra.mrb[32].mxu0 %v567_v11  ;;  %2318 = vmatprep.mubr.f32.mxu1 %v915_v14  ;;  %v778_v11 = vld [vmem:[%s8794_s5 + $0x1168] sm:$0xff]  ;;  %v1103_v14 = vld [vmem:[%s8794_s5 + $0x1b90] sm:$0xff] }
  0xf9   : > { %4163 = vmatprep.mubr.f32.mxu0 %v589_v15  ;;  %7100 = vmatpush1.bf16.msra.mxu0 %v7099_v10  ;;  %v777_v15 = vld [vmem:[%s8794_s5 + $0x1160] sm:$0xff]  ;;  %v1335_v10 = vld [vmem:[%s8794_s5 + $0x22d0] sm:$0xff] }
  0xfa   : > { %7101 = vmatprep.subr.bf16.mxu0 %v8683_v0 }
  0xfb   : > { %2319 = vmatmul.mubr.f32.gmra.mrb[66].mxu1 %v914_v16  ;;  %v1125_v16 = vld [vmem:[%s8794_s5 + $0x1c40] sm:$0xff] }
  0xfc   : > { %4164 = vmatmul.mubr.f32.gmra.mrb[34].mxu0 %v588_v21  ;;  %2323 = vmatprep.mubr.f32.mxu1 %v936_v22  ;;  %v798_v21 = vld [vmem:[%s8794_s5 + $0x1208] sm:$0xff] }
  0xfd   : > { %4168 = vmatprep.mubr.f32.mxu0 %v610_v25  ;;  %v1146_v22 = vld [vmem:[%s8794_s5 + $0x1ce8] sm:$0xff]  ;;  %v1145_v25 = vld [vmem:[%s8794_s5 + $0x1ce0] sm:$0xff] }
  0xff   : > { %2324 = vmatmul.mubr.f32.gmra.mrb[68].mxu1 %v935_v26  ;;  %v819_v26 = vld [vmem:[%s8794_s5 + $0x12b0] sm:$0xff] }
 0x100   : > { %4169 = vmatmul.mubr.f32.gmra.mrb[36].mxu0 %v609_v28  ;;  %2328 = vmatprep.mubr.f32.mxu1 %v957_v29  ;;  %v1167_v28 = vld [vmem:[%s8794_s5 + $0x1d90] sm:$0xff]  ;;  %v841_v29 = vld [vmem:[%s8794_s5 + $0x1360] sm:$0xff] }
 0x101   : > { %4173 = vmatprep.mubr.f32.mxu0 %v631_v31  ;;  %v1166_v31 = vld [vmem:[%s8794_s5 + $0x1d88] sm:$0xff] }
 0x103   : > { %2329 = vmatmul.mubr.f32.gmra.mrb[70].mxu1 %v956_v32  ;;  %v1787_v32 = vld [vmem:[%s11940_s1 + $0x6f0] sm:$0xff] }
 0x104   : > { %4174 = vmatmul.mubr.f32.gmra.mrb[38].mxu0 %v630_v33  ;;  %2333 = vmatprep.mubr.f32.mxu1 %v978_v35  ;;  %v1788_v33 = vld [vmem:[%s11940_s1 + $0x6f8] sm:$0xff] }
 0x105   : > { %4178 = vmatprep.mubr.f32.mxu0 %v652_v37  ;;  %v840_v35 = vld [vmem:[%s8794_s5 + $0x1358] sm:$0xff] }
 0x106   : > { %v1188_v37 = vld [vmem:[%s8794_s5 + $0x1e38] sm:$0xff] }
 0x107   : > { %2334 = vmatmul.mubr.f32.gmra.mrb[72].mxu1 %v977_v38  ;;  %v7102_v38 = vpack.c.bf16 %v1788_v33, %v1787_v32  ;;  %v1071_v32 = vld [vmem:[%s8794_s5 + $0x1a90] sm:$0xff] }
 0x108   : > { %4179 = vmatmul.mubr.f32.gmra.mrb[40].mxu0 %v651_v39  ;;  %2338 = vmatprep.mubr.f32.mxu1 %v999_v40  ;;  %v862_v39 = vld [vmem:[%s8794_s5 + $0x1408] sm:$0xff]  ;;  %v1187_v40 = vld [vmem:[%s8794_s5 + $0x1e30] sm:$0xff] }
 0x109   : > { %4183 = vmatprep.mubr.f32.mxu0 %v673_v42  ;;  %7103 = vmatpush1.bf16.msra.mxu0 %v7102_v38  ;;  %v861_v42 = vld [vmem:[%s8794_s5 + $0x1400] sm:$0xff]  ;;  %v1419_v33 = vld [vmem:[%s8794_s5 + $0x2570] sm:$0xff]  ;;  %v1092_v38 = vld [vmem:[%s8794_s5 + $0x1b38] sm:$0xff] }
 0x10a   : > { %7104 = vmatprep.subr.bf16.mxu0 %v8683_v0 }
 0x10b   : > { %2339 = vmatmul.mubr.f32.gmra.mrb[74].mxu1 %v998_v43  ;;  %v1209_v43 = vld [vmem:[%s8794_s5 + $0x1ee0] sm:$0xff] }
 0x10c   : > { %4184 = vmatmul.mubr.f32.gmra.mrb[42].mxu0 %v672_v47  ;;  %2343 = vmatprep.mubr.f32.mxu1 %v1020_v48  ;;  %v882_v47 = vld [vmem:[%s8794_s5 + $0x14a8] sm:$0xff] }
 0x10d   : > { %4188 = vmatprep.mubr.f32.mxu0 %v694_v51  ;;  %v1230_v48 = vld [vmem:[%s8794_s5 + $0x1f88] sm:$0xff]  ;;  %v1229_v51 = vld [vmem:[%s8794_s5 + $0x1f80] sm:$0xff] }
 0x10f   : > { %2344 = vmatmul.mubr.f32.gmra.mrb[76].mxu1 %v1019_v52  ;;  %v903_v52 = vld [vmem:[%s8794_s5 + $0x1550] sm:$0xff] }
 0x110   : > { %4189 = vmatmul.mubr.f32.gmra.mrb[44].mxu0 %v693_v53  ;;  %2348 = vmatprep.mubr.f32.mxu1 %v1041_v54  ;;  %v1251_v53 = vld [vmem:[%s8794_s5 + $0x2030] sm:$0xff]  ;;  %v925_v54 = vld [vmem:[%s8794_s5 + $0x1600] sm:$0xff] }
 0x111   : > { %4193 = vmatprep.mubr.f32.mxu0 %v715_v55  ;;  %v1250_v55 = vld [vmem:[%s8794_s5 + $0x2028] sm:$0xff] }
 0x113   : > { %2349 = vmatmul.mubr.f32.gmra.mrb[78].mxu1 %v1040_v57  ;;  %v924_v57 = vld [vmem:[%s8794_s5 + $0x15f8] sm:$0xff] }
 0x114   : > { %4194 = vmatmul.mubr.f32.gmra.mrb[46].mxu0 %v714_v58  ;;  %2353 = vmatprep.mubr.f32.mxu1 %v1062_v59  ;;  %v1272_v58 = vld [vmem:[%s8794_s5 + $0x20d8] sm:$0xff]  ;;  %v946_v59 = vld [vmem:[%s8794_s5 + $0x16a8] sm:$0xff] }
 0x115   : > { %4198 = vmatprep.mubr.f32.mxu0 %v736_v60  ;;  %v1271_v60 = vld [vmem:[%s8794_s5 + $0x20d0] sm:$0xff] }
 0x117   : > { %2354 = vmatmul.mubr.f32.gmra.mrb[80].mxu1 %v1061_v61  ;;  %v945_v61 = vld [vmem:[%s8794_s5 + $0x16a0] sm:$0xff] }
 0x118   : > { %4199 = vmatmul.mubr.f32.gmra.mrb[48].mxu0 %v735_v63  ;;  %2358 = vmatprep.mubr.f32.mxu1 %v1083_v1  ;;  %v1293_v63 = vld [vmem:[%s8794_s5 + $0x2180] sm:$0xff]  ;;  %v967_v1 = vld [vmem:[%s8794_s5 + $0x1750] sm:$0xff] }
 0x119   : > { %4203 = vmatprep.mubr.f32.mxu0 %v757_v2  ;;  %v1292_v2 = vld [vmem:[%s8794_s5 + $0x2178] sm:$0xff] }
 0x11b   : > { %2359 = vmatmul.mubr.f32.gmra.mrb[82].mxu1 %v1082_v3  ;;  %v966_v3 = vld [vmem:[%s8794_s5 + $0x1748] sm:$0xff] }
 0x11c   : > { %4204 = vmatmul.mubr.f32.gmra.mrb[50].mxu0 %v756_v7  ;;  %2363 = vmatprep.mubr.f32.mxu1 %v1104_v9  ;;  %v1313_v7 = vld [vmem:[%s8794_s5 + $0x2220] sm:$0xff]  ;;  %v987_v9 = vld [vmem:[%s8794_s5 + $0x17f0] sm:$0xff] }
 0x11d   : > { %4208 = vmatprep.mubr.f32.mxu0 %v778_v11  ;;  %v1009_v11 = vld [vmem:[%s8794_s5 + $0x18a0] sm:$0xff] }
 0x11f   : > { %2364 = vmatmul.mubr.f32.gmra.mrb[84].mxu1 %v1103_v14  ;;  %v1334_v14 = vld [vmem:[%s8794_s5 + $0x22c8] sm:$0xff] }
 0x120   : > { %4209 = vmatmul.mubr.f32.gmra.mrb[52].mxu0 %v777_v15  ;;  %2368 = vmatprep.mubr.f32.mxu1 %v1125_v16  ;;  %v1008_v15 = vld [vmem:[%s8794_s5 + $0x1898] sm:$0xff] }
 0x121   : > { %4213 = vmatprep.mubr.f32.mxu0 %v799_v17  ;;  %v1356_v16 = vld [vmem:[%s8794_s5 + $0x2378] sm:$0xff]  ;;  %v1030_v17 = vld [vmem:[%s8794_s5 + $0x1948] sm:$0xff] }
 0x123   : > { %2369 = vmatmul.mubr.f32.gmra.mrb[86].mxu1 %v1124_v19  ;;  %v1355_v19 = vld [vmem:[%s8794_s5 + $0x2370] sm:$0xff] }
 0x124   : > { %4214 = vmatmul.mubr.f32.gmra.mrb[54].mxu0 %v798_v21  ;;  %2373 = vmatprep.mubr.f32.mxu1 %v1146_v22  ;;  %v1029_v21 = vld [vmem:[%s8794_s5 + $0x1940] sm:$0xff] }
 0x125   : > { %4218 = vmatprep.mubr.f32.mxu0 %v820_v23  ;;  %v1377_v22 = vld [vmem:[%s8794_s5 + $0x2420] sm:$0xff]  ;;  %v1051_v23 = vld [vmem:[%s8794_s5 + $0x19f0] sm:$0xff] }
 0x127   : > { %2374 = vmatmul.mubr.f32.gmra.mrb[88].mxu1 %v1145_v25  ;;  %v1376_v25 = vld [vmem:[%s8794_s5 + $0x2418] sm:$0xff] }
 0x128   : > { %4219 = vmatmul.mubr.f32.gmra.mrb[56].mxu0 %v819_v26  ;;  %2378 = vmatprep.mubr.f32.mxu1 %v1167_v28  ;;  %v1050_v26 = vld [vmem:[%s8794_s5 + $0x19e8] sm:$0xff] }
 0x129   : > { %4223 = vmatprep.mubr.f32.mxu0 %v841_v29  ;;  %v1398_v28 = vld [vmem:[%s8794_s5 + $0x24c8] sm:$0xff]  ;;  %v1072_v29 = vld [vmem:[%s8794_s5 + $0x1a98] sm:$0xff] }
 0x12b   : > { %2379 = vmatmul.mubr.f32.gmra.mrb[90].mxu1 %v1166_v31  ;;  %v1397_v31 = vld [vmem:[%s8794_s5 + $0x24c0] sm:$0xff] }
 0x12c   : > { %4224 = vmatmul.mubr.f32.gmra.mrb[58].mxu0 %v840_v35  ;;  %2383 = vmatprep.mubr.f32.mxu1 %v1188_v37  ;;  %v1093_v35 = vld [vmem:[%s8794_s5 + $0x1b40] sm:$0xff]  ;;  %v1418_v37 = vld [vmem:[%s8794_s5 + $0x2568] sm:$0xff] }
 0x12d   : > { %4228 = vmatprep.mubr.f32.mxu0 %v862_v39  ;;  %v1440_v39 = vld [vmem:[%s8794_s5 + $0x2618] sm:$0xff] }
 0x12f   : > { %2384 = vmatmul.mubr.f32.gmra.mrb[92].mxu1 %v1187_v40  ;;  %v1114_v40 = vld [vmem:[%s8794_s5 + $0x1be8] sm:$0xff] }
 0x130   : > { %4229 = vmatmul.mubr.f32.gmra.mrb[60].mxu0 %v861_v42  ;;  %2388 = vmatprep.mubr.f32.mxu1 %v1209_v43  ;;  %v1439_v42 = vld [vmem:[%s8794_s5 + $0x2610] sm:$0xff]  ;;  %v1113_v43 = vld [vmem:[%s8794_s5 + $0x1be0] sm:$0xff] }
 0x131   : > { %4233 = vmatprep.mubr.f32.mxu0 %v883_v45  ;;  %v1461_v45 = vld [vmem:[%s8794_s5 + $0x26c0] sm:$0xff] }
 0x133   : > { %2389 = vmatmul.mubr.f32.gmra.mrb[94].mxu1 %v1208_v46  ;;  %v1135_v46 = vld [vmem:[%s8794_s5 + $0x1c90] sm:$0xff] }
 0x134   : > { %4234 = vmatmul.mubr.f32.gmra.mrb[62].mxu0 %v882_v47  ;;  %2393 = vmatprep.mubr.f32.mxu1 %v1230_v48  ;;  %v1460_v47 = vld [vmem:[%s8794_s5 + $0x26b8] sm:$0xff]  ;;  %v1134_v48 = vld [vmem:[%s8794_s5 + $0x1c88] sm:$0xff] }
 0x135   : > { %4238 = vmatprep.mubr.f32.mxu0 %v904_v49  ;;  %v1482_v49 = vld [vmem:[%s8794_s5 + $0x2768] sm:$0xff] }
 0x137   : > { %2394 = vmatmul.mubr.f32.gmra.mrb[96].mxu1 %v1229_v51  ;;  %v1156_v51 = vld [vmem:[%s8794_s5 + $0x1d38] sm:$0xff] }
 0x138   : > { %4239 = vmatmul.mubr.f32.gmra.mrb[64].mxu0 %v903_v52  ;;  %2398 = vmatprep.mubr.f32.mxu1 %v1251_v53  ;;  %v1481_v52 = vld [vmem:[%s8794_s5 + $0x2760] sm:$0xff]  ;;  %v1155_v53 = vld [vmem:[%s8794_s5 + $0x1d30] sm:$0xff] }
 0x139   : > { %4243 = vmatprep.mubr.f32.mxu0 %v925_v54  ;;  %v1503_v54 = vld [vmem:[%s8794_s5 + $0x2810] sm:$0xff] }
 0x13b   : > { %2399 = vmatmul.mubr.f32.gmra.mrb[98].mxu1 %v1250_v55  ;;  %v1177_v55 = vld [vmem:[%s8794_s5 + $0x1de0] sm:$0xff] }
 0x13c   : > { %4244 = vmatmul.mubr.f32.gmra.mrb[66].mxu0 %v924_v57  ;;  %2403 = vmatprep.mubr.f32.mxu1 %v1272_v58  ;;  %v1502_v57 = vld [vmem:[%s8794_s5 + $0x2808] sm:$0xff]  ;;  %v1176_v58 = vld [vmem:[%s8794_s5 + $0x1dd8] sm:$0xff] }
 0x13d   : > { %4248 = vmatprep.mubr.f32.mxu0 %v946_v59  ;;  %v1524_v59 = vld [vmem:[%s8794_s5 + $0x28b8] sm:$0xff] }
 0x13f   : > { %2404 = vmatmul.mubr.f32.gmra.mrb[100].mxu1 %v1271_v60  ;;  %v1198_v60 = vld [vmem:[%s8794_s5 + $0x1e88] sm:$0xff] }
 0x140   : > { %4249 = vmatmul.mubr.f32.gmra.mrb[68].mxu0 %v945_v61  ;;  %2408 = vmatprep.mubr.f32.mxu1 %v1293_v63  ;;  %v1523_v61 = vld [vmem:[%s8794_s5 + $0x28b0] sm:$0xff]  ;;  %v1197_v63 = vld [vmem:[%s8794_s5 + $0x1e80] sm:$0xff] }
 0x141   : > { %4253 = vmatprep.mubr.f32.mxu0 %v967_v1  ;;  %v1545_v1 = vld [vmem:[%s8794_s5 + $0x2960] sm:$0xff] }
 0x143   : > { %2409 = vmatmul.mubr.f32.gmra.mrb[102].mxu1 %v1292_v2  ;;  %v1219_v2 = vld [vmem:[%s8794_s5 + $0x1f30] sm:$0xff] }
 0x144   : > { %4254 = vmatmul.mubr.f32.gmra.mrb[70].mxu0 %v966_v3  ;;  %2413 = vmatprep.mubr.f32.mxu1 %v1314_v4  ;;  %v1544_v3 = vld [vmem:[%s8794_s5 + $0x2958] sm:$0xff]  ;;  %v1218_v4 = vld [vmem:[%s8794_s5 + $0x1f28] sm:$0xff] }
 0x145   : > { %4258 = vmatprep.mubr.f32.mxu0 %v988_v6  ;;  %v224_v6 = vld [vmem:[%s8794_s5 + $0x18] sm:$0xff] }
 0x147   : > { %2414 = vmatmul.mubr.f32.gmra.mrb[104].mxu1 %v1313_v7  ;;  %v1629_v7 = vld [vmem:[%s11940_s1 + $0x200] sm:$0xff] }
 0x148   : > { %4259 = vmatmul.mubr.f32.gmra.mrb[72].mxu0 %v987_v9  ;;  %2418 = vmatprep.mubr.f32.mxu1 %v1335_v10  ;;  %v1630_v9 = vld [vmem:[%s11940_s1 + $0x208] sm:$0xff]  ;;  %v1240_v10 = vld [vmem:[%s8794_s5 + $0x1fd8] sm:$0xff] }
 0x149   : > { %4263 = vmatprep.mubr.f32.mxu0 %v1009_v11  ;;  %v223_v11 = vld [vmem:[%s8794_s5 + $0x10] sm:$0xff] }
 0x14b   : > { %2419 = vmatmul.mubr.f32.gmra.mrb[106].mxu1 %v1334_v14  ;;  %v6865_v14 = vpack.c.bf16 %v1630_v9, %v1629_v7  ;;  %v371_v7 = vld [vmem:[%s8794_s5 + $0x4b0] sm:$0xff] }
 0x14c   : > { %4264 = vmatmul.mubr.f32.gmra.mrb[74].mxu0 %v1008_v15  ;;  %2423 = vmatprep.mubr.f32.mxu1 %v1356_v16  ;;  %v1239_v15 = vld [vmem:[%s8794_s5 + $0x1fd0] sm:$0xff]  ;;  %v245_v16 = vld [vmem:[%s8794_s5 + $0xc0] sm:$0xff] }
 0x14d   : > { %4268 = vmatprep.mubr.f32.mxu0 %v1030_v17  ;;  %v1261_v17 = vld [vmem:[%s8794_s5 + $0x2080] sm:$0xff] }
 0x14f   : > { %2424 = vmatmul.mubr.f32.gmra.mrb[108].mxu1 %v1355_v19  ;;  %v1631_v19 = vld [vmem:[%s11940_s1 + $0x210] sm:$0xff] }
 0x150   : > { %4269 = vmatmul.mubr.f32.gmra.mrb[76].mxu0 %v1029_v21  ;;  %2428 = vmatprep.mubr.f32.mxu1 %v1377_v22  ;;  %v1632_v21 = vld [vmem:[%s11940_s1 + $0x218] sm:$0xff] }
 0x151   : > { %4273 = vmatprep.mubr.f32.mxu0 %v1051_v23  ;;  %v244_v22 = vld [vmem:[%s8794_s5 + $0xb8] sm:$0xff] }
 0x152   : > { %v1260_v23 = vld [vmem:[%s8794_s5 + $0x2078] sm:$0xff] }
 0x153   : > { %2429 = vmatmul.mubr.f32.gmra.mrb[110].mxu1 %v1376_v25  ;;  %v266_v25 = vld [vmem:[%s8794_s5 + $0x168] sm:$0xff] }
 0x154   : > { %4274 = vmatmul.mubr.f32.gmra.mrb[78].mxu0 %v1050_v26  ;;  %2433 = vmatprep.mubr.f32.mxu1 %v1398_v28  ;;  %v6868_v26 = vpack.c.bf16 %v1632_v21, %v1631_v19  ;;  %v1282_v28 = vld [vmem:[%s8794_s5 + $0x2128] sm:$0xff]  ;;  %v1408_v21 = vld [vmem:[%s8794_s5 + $0x2518] sm:$0xff] }
 0x155   : > { %4278 = vmatprep.mubr.f32.mxu0 %v1072_v29  ;;  %v1633_v29 = vld [vmem:[%s11940_s1 + $0x220] sm:$0xff] }
 0x157   : > { %2434 = vmatmul.mubr.f32.gmra.mrb[112].mxu1 %v1397_v31  ;;  %v1634_v31 = vld [vmem:[%s11940_s1 + $0x228] sm:$0xff] }
 0x158   : > { %4279 = vmatmul.mubr.f32.gmra.mrb[80].mxu0 %v1071_v32  ;;  %2438 = vmatprep.mubr.f32.mxu1 %v1419_v33  ;;  %v265_v32 = vld [vmem:[%s8794_s5 + $0x160] sm:$0xff] }
 0x159   : > { %4283 = vmatprep.mubr.f32.mxu0 %v1093_v35  ;;  %v1281_v33 = vld [vmem:[%s8794_s5 + $0x2120] sm:$0xff]  ;;  %v287_v35 = vld [vmem:[%s8794_s5 + $0x210] sm:$0xff] }
 0x15b   : > { %2439 = vmatmul.mubr.f32.gmra.mrb[114].mxu1 %v1418_v37  ;;  %v6871_v37 = vpack.c.bf16 %v1634_v31, %v1633_v29  ;;  %v1429_v31 = vld [vmem:[%s8794_s5 + $0x25c0] sm:$0xff] }
 0x15c   : > { %4284 = vmatmul.mubr.f32.gmra.mrb[82].mxu0 %v1092_v38  ;;  %2443 = vmatprep.mubr.f32.mxu1 %v1440_v39  ;;  %v1303_v38 = vld [vmem:[%s8794_s5 + $0x21d0] sm:$0xff] }
 0x15d   : > { %4288 = vmatprep.mubr.f32.mxu0 %v1114_v40  ;;  %v1635_v39 = vld [vmem:[%s11940_s1 + $0x230] sm:$0xff]  ;;  %v1636_v40 = vld [vmem:[%s11940_s1 + $0x238] sm:$0xff] }
 0x15f   : > { %2444 = vmatmul.mubr.f32.gmra.mrb[116].mxu1 %v1439_v42  ;;  %v286_v42 = vld [vmem:[%s8794_s5 + $0x208] sm:$0xff] }
 0x160   : > { %4289 = vmatmul.mubr.f32.gmra.mrb[84].mxu0 %v1113_v43  ;;  %2448 = vmatprep.mubr.f32.mxu1 %v1461_v45  ;;  %v1302_v43 = vld [vmem:[%s8794_s5 + $0x21c8] sm:$0xff]  ;;  %v308_v45 = vld [vmem:[%s8794_s5 + $0x2b8] sm:$0xff] }
 0x161   : > { %4293 = vmatprep.mubr.f32.mxu0 %v1135_v46  ;;  %v6874_v46 = vpack.c.bf16 %v1636_v40, %v1635_v39  ;;  %v1450_v40 = vld [vmem:[%s8794_s5 + $0x2668] sm:$0xff] }
 0x163   : > { %2449 = vmatmul.mubr.f32.gmra.mrb[118].mxu1 %v1460_v47  ;;  %v1324_v47 = vld [vmem:[%s8794_s5 + $0x2278] sm:$0xff] }
 0x164   : > { %4294 = vmatmul.mubr.f32.gmra.mrb[86].mxu0 %v1134_v48  ;;  %2453 = vmatprep.mubr.f32.mxu1 %v1482_v49  ;;  %v1637_v48 = vld [vmem:[%s11940_s1 + $0x240] sm:$0xff]  ;;  %v1638_v49 = vld [vmem:[%s11940_s1 + $0x248] sm:$0xff] }
 0x165   : > { %4298 = vmatprep.mubr.f32.mxu0 %v1156_v51  ;;  %v307_v51 = vld [vmem:[%s8794_s5 + $0x2b0] sm:$0xff] }
 0x167   : > { %2454 = vmatmul.mubr.f32.gmra.mrb[120].mxu1 %v1481_v52  ;;  %v1323_v52 = vld [vmem:[%s8794_s5 + $0x2270] sm:$0xff] }
 0x168   : > { %4299 = vmatmul.mubr.f32.gmra.mrb[88].mxu0 %v1155_v53  ;;  %2458 = vmatprep.mubr.f32.mxu1 %v1503_v54  ;;  %v329_v53 = vld [vmem:[%s8794_s5 + $0x360] sm:$0xff]  ;;  %v6877_v54 = vpack.c.bf16 %v1638_v49, %v1637_v48  ;;  %v1471_v49 = vld [vmem:[%s8794_s5 + $0x2710] sm:$0xff] }
 0x169   : > { %4303 = vmatprep.mubr.f32.mxu0 %v1177_v55  ;;  %v1345_v55 = vld [vmem:[%s8794_s5 + $0x2320] sm:$0xff] }
 0x16b   : > { %2459 = vmatmul.mubr.f32.gmra.mrb[122].mxu1 %v1502_v57  ;;  %v1639_v57 = vld [vmem:[%s11940_s1 + $0x250] sm:$0xff] }
 0x16c   : > { %4304 = vmatmul.mubr.f32.gmra.mrb[90].mxu0 %v1176_v58  ;;  %2463 = vmatprep.mubr.f32.mxu1 %v1524_v59  ;;  %v1640_v58 = vld [vmem:[%s11940_s1 + $0x258] sm:$0xff] }
 0x16d   : > { %4308 = vmatprep.mubr.f32.mxu0 %v1198_v60  ;;  %v328_v59 = vld [vmem:[%s8794_s5 + $0x358] sm:$0xff] }
 0x16e   : > { %v1344_v60 = vld [vmem:[%s8794_s5 + $0x2318] sm:$0xff] }
 0x16f   : > { %2464 = vmatmul.mubr.f32.gmra.mrb[124].mxu1 %v1523_v61  ;;  %v350_v61 = vld [vmem:[%s8794_s5 + $0x408] sm:$0xff] }
 0x170   : > { %4309 = vmatmul.mubr.f32.gmra.mrb[92].mxu0 %v1197_v63  ;;  %2468 = vmatprep.mubr.f32.mxu1 %v1545_v1  ;;  %v6880_v63 = vpack.c.bf16 %v1640_v58, %v1639_v57  ;;  %v1366_v1 = vld [vmem:[%s8794_s5 + $0x23c8] sm:$0xff]  ;;  %v1491_v57 = vld [vmem:[%s8794_s5 + $0x27b0] sm:$0xff]  ;;  %v497_v58 = vld [vmem:[%s8794_s5 + $0x8a0] sm:$0xff] }
 0x171   : > { %4313 = vmatprep.mubr.f32.mxu0 %v1219_v2  ;;  %v1641_v2 = vld [vmem:[%s11940_s1 + $0x260] sm:$0xff] }
 0x173   : > { %2469 = vmatmul.mubr.f32.gmra.mrb[126].mxu1 %v1544_v3  ;;  %v1642_v3 = vld [vmem:[%s11940_s1 + $0x268] sm:$0xff] }
 0x174   : > { %4314 = vmatmul.mubr.f32.gmra.mrb[94].mxu0 %v1218_v4  ;;  %2538 = vmatprep.mubr.f32.mxu1 %v224_v6  ;;  %v349_v4 = vld [vmem:[%s8794_s5 + $0x400] sm:$0xff]  ;;  %v6883_v9 = vpack.c.bf16 %v1642_v3, %v1641_v2  ;;  %v1652_v2 = vld [vmem:[%s11940_s1 + $0x2b8] sm:$0xff]  ;;  %v1534_v3 = vld [vmem:[%s8794_s5 + $0x2908] sm:$0xff] }
 0x175   : > { %4318 = vmatprep.mubr.f32.mxu0 %v1240_v10  ;;  %v1365_v6 = vld [vmem:[%s8794_s5 + $0x23c0] sm:$0xff]  ;;  %v1387_v10 = vld [vmem:[%s8794_s5 + $0x2470] sm:$0xff] }
 0x177   : > { %2539 = vmatmul.mubr.f32.vlgmr.msra.gmra.mrb[0].mxu1 %v223_v11  ;;  %v1643_v11 = vld [vmem:[%s11940_s1 + $0x270] sm:$0xff] }
 0x178   : > { %4319 = vmatmul.mubr.f32.gmra.mrb[96].mxu0 %v1239_v15  ;;  %6866 = vmatpush1.bf16.msra.mxu1 %v6865_v14  ;;  %v1644_v14 = vld [vmem:[%s11940_s1 + $0x278] sm:$0xff]  ;;  %v370_v15 = vld [vmem:[%s8794_s5 + $0x4a8] sm:$0xff] }
 0x179   : > { %2543 = vmatprep.mubr.f32.mxu1 %v245_v16  ;;  %4323 = vmatprep.mubr.f32.mxu0 %v1261_v17  ;;  %v1386_v16 = vld [vmem:[%s8794_s5 + $0x2468] sm:$0xff]  ;;  %v392_v17 = vld [vmem:[%s8794_s5 + $0x558] sm:$0xff]  ;;  %v6886_v19 = vpack.c.bf16 %v1644_v14, %v1643_v11 }
 0x17a   : > { %6867 = vmatprep.subr.bf16.mxu1 %v8683_v0  ;;  %v538_v11 = vld [vmem:[%s8794_s5 + $0x9e8] sm:$0xff] }
 0x17b   : > { %2544 = vmatmul.mubr.f32.gmra.mrb[2].mxu1 %v244_v22  ;;  %v1645_v22 = vld [vmem:[%s11940_s1 + $0x280] sm:$0xff]  ;;  %v1554_v14 = vld [vmem:[%s8794_s5 + $0x29a8] sm:$0xff] }
 0x17c   : > { %4324 = vmatmul.mubr.f32.gmra.mrb[98].mxu0 %v1260_v23  ;;  %2548 = vmatprep.mubr.f32.mxu1 %v266_v25  ;;  %v1646_v23 = vld [vmem:[%s11940_s1 + $0x288] sm:$0xff]  ;;  %v391_v25 = vld [vmem:[%s8794_s5 + $0x550] sm:$0xff] }
 0x17d   : > { %4328 = vmatprep.mubr.f32.mxu0 %v1282_v28  ;;  %6869 = vmatpush1.bf16.msra.mxu1 %v6868_v26  ;;  %v1407_v26 = vld [vmem:[%s8794_s5 + $0x2510] sm:$0xff]  ;;  %v413_v28 = vld [vmem:[%s8794_s5 + $0x600] sm:$0xff]  ;;  %v6889_v29 = vpack.c.bf16 %v1646_v23, %v1645_v22 }
 0x17e   : > { %6870 = vmatprep.subr.bf16.mxu1 %v8683_v0  ;;  %v233_v22 = vld [vmem:[%s8794_s5 + $0x60] sm:$0xff] }
 0x17f   : > { %2549 = vmatmul.mubr.f32.gmra.mrb[4].mxu1 %v265_v32  ;;  %v1647_v32 = vld [vmem:[%s11940_s1 + $0x290] sm:$0xff] }
 0x180   : > { %4329 = vmatmul.mubr.f32.gmra.mrb[100].mxu0 %v1281_v33  ;;  %2553 = vmatprep.mubr.f32.mxu1 %v287_v35  ;;  %v1648_v33 = vld [vmem:[%s11940_s1 + $0x298] sm:$0xff] }
 0x181   : > { %4333 = vmatprep.mubr.f32.mxu0 %v1303_v38  ;;  %6872 = vmatpush1.bf16.msra.mxu1 %v6871_v37  ;;  %v412_v35 = vld [vmem:[%s8794_s5 + $0x5f8] sm:$0xff]  ;;  %v434_v38 = vld [vmem:[%s8794_s5 + $0x6a8] sm:$0xff]  ;;  %v6892_v39 = vpack.c.bf16 %v1648_v33, %v1647_v32  ;;  %v1653_v32 = vld [vmem:[%s11940_s1 + $0x2c0] sm:$0xff] }
 0x182   : > { %6873 = vmatprep.subr.bf16.mxu1 %v8683_v0  ;;  %v1428_v37 = vld [vmem:[%s8794_s5 + $0x25b8] sm:$0xff]  ;;  %v254_v33 = vld [vmem:[%s8794_s5 + $0x108] sm:$0xff] }
 0x183   : > { %2554 = vmatmul.mubr.f32.gmra.mrb[6].mxu1 %v286_v42  ;;  %v1649_v42 = vld [vmem:[%s11940_s1 + $0x2a0] sm:$0xff] }
 0x184   : > { %4334 = vmatmul.mubr.f32.gmra.mrb[102].mxu0 %v1302_v43  ;;  %2558 = vmatprep.mubr.f32.mxu1 %v308_v45  ;;  %v1650_v43 = vld [vmem:[%s11940_s1 + $0x2a8] sm:$0xff]  ;;  %v433_v45 = vld [vmem:[%s8794_s5 + $0x6a0] sm:$0xff] }
 0x185   : > { %4338 = vmatprep.mubr.f32.mxu0 %v1324_v47  ;;  %6875 = vmatpush1.bf16.msra.mxu1 %v6874_v46  ;;  %v1449_v46 = vld [vmem:[%s8794_s5 + $0x2660] sm:$0xff]  ;;  %v455_v47 = vld [vmem:[%s8794_s5 + $0x750] sm:$0xff]  ;;  %v6895_v48 = vpack.c.bf16 %v1650_v43, %v1649_v42  ;;  %v1794_v42 = vld [vmem:[%s11940_s1 + $0x728] sm:$0xff] }
 0x186   : > { %6876 = vmatprep.subr.bf16.mxu1 %v8683_v0 }
 0x187   : > { %2559 = vmatmul.mubr.f32.gmra.mrb[8].mxu1 %v307_v51  ;;  %v454_v51 = vld [vmem:[%s8794_s5 + $0x748] sm:$0xff] }
 0x188   : > { %4339 = vmatmul.mubr.f32.gmra.mrb[104].mxu0 %v1323_v52  ;;  %2563 = vmatprep.mubr.f32.mxu1 %v329_v53  ;;  %v1470_v52 = vld [vmem:[%s8794_s5 + $0x2708] sm:$0xff]  ;;  %v476_v53 = vld [vmem:[%s8794_s5 + $0x7f8] sm:$0xff] }
 0x189   : > { %4343 = vmatprep.mubr.f32.mxu0 %v1345_v55  ;;  %6878 = vmatpush1.bf16.msra.mxu1 %v6877_v54  ;;  %v1492_v54 = vld [vmem:[%s8794_s5 + $0x27b8] sm:$0xff]  ;;  %v475_v55 = vld [vmem:[%s8794_s5 + $0x7f0] sm:$0xff] }
 0x18a   : > { %6879 = vmatprep.subr.bf16.mxu1 %v8683_v0 }
 0x18b   : > { %2564 = vmatmul.mubr.f32.gmra.mrb[10].mxu1 %v328_v59  ;;  %v1513_v59 = vld [vmem:[%s8794_s5 + $0x2860] sm:$0xff] }
 0x18c   : > { %4344 = vmatmul.mubr.f32.gmra.mrb[106].mxu0 %v1344_v60  ;;  %2568 = vmatprep.mubr.f32.mxu1 %v350_v61  ;;  %v496_v60 = vld [vmem:[%s8794_s5 + $0x898] sm:$0xff]  ;;  %v1651_v61 = vld [vmem:[%s11940_s1 + $0x2b0] sm:$0xff] }
 0x18d   : > { %4348 = vmatprep.mubr.f32.mxu0 %v1366_v1  ;;  %6881 = vmatpush1.bf16.msra.mxu1 %v6880_v63  ;;  %v1512_v63 = vld [vmem:[%s8794_s5 + $0x2858] sm:$0xff]  ;;  %v518_v1 = vld [vmem:[%s8794_s5 + $0x948] sm:$0xff] }
 0x18e   : > { %6882 = vmatprep.subr.bf16.mxu1 %v8683_v0 }
 0x18f   : > { %2569 = vmatmul.mubr.f32.gmra.mrb[12].mxu1 %v349_v4  ;;  %v6898_v4 = vpack.c.bf16 %v1652_v2, %v1651_v61  ;;  %v643_v61 = vld [vmem:[%s8794_s5 + $0xd30] sm:$0xff] }
 0x190   : > { %4349 = vmatmul.mubr.f32.gmra.mrb[108].mxu0 %v1365_v6  ;;  %2573 = vmatprep.mubr.f32.mxu1 %v371_v7  ;;  %v517_v6 = vld [vmem:[%s8794_s5 + $0x940] sm:$0xff] }
 0x191   : > { %4353 = vmatprep.mubr.f32.mxu0 %v1387_v10  ;;  %6884 = vmatpush1.bf16.msra.mxu1 %v6883_v9  ;;  %v1533_v7 = vld [vmem:[%s8794_s5 + $0x2900] sm:$0xff]  ;;  %v539_v9 = vld [vmem:[%s8794_s5 + $0x9f0] sm:$0xff] }
 0x192   : > { %6885 = vmatprep.subr.bf16.mxu1 %v8683_v0  ;;  %v1555_v10 = vld [vmem:[%s8794_s5 + $0x29b0] sm:$0xff] }
 0x193   : > { %2574 = vmatmul.mubr.f32.gmra.mrb[14].mxu1 %v370_v15  ;;  %v560_v15 = vld [vmem:[%s8794_s5 + $0xa98] sm:$0xff] }
 0x194   : > { %4354 = vmatmul.mubr.f32.gmra.mrb[110].mxu0 %v1386_v16  ;;  %2578 = vmatprep.mubr.f32.mxu1 %v392_v17  ;;  %v234_v16 = vld [vmem:[%s8794_s5 + $0x68] sm:$0xff]  ;;  %v1789_v17 = vld [vmem:[%s11940_s1 + $0x700] sm:$0xff] }
 0x195   : > { %4358 = vmatprep.mubr.f32.mxu0 %v1408_v21  ;;  %6887 = vmatpush1.bf16.msra.mxu1 %v6886_v19  ;;  %v1790_v19 = vld [vmem:[%s11940_s1 + $0x708] sm:$0xff]  ;;  %v559_v21 = vld [vmem:[%s8794_s5 + $0xa90] sm:$0xff] }
 0x196   : > { %6888 = vmatprep.subr.bf16.mxu1 %v8683_v0  ;;  %v7105_v23 = vpack.c.bf16 %v1790_v19, %v1789_v17  ;;  %v1801_v17 = vld [vmem:[%s11940_s1 + $0x760] sm:$0xff]  ;;  %v1802_v19 = vld [vmem:[%s11940_s1 + $0x768] sm:$0xff] }
 0x197   : > { %2579 = vmatmul.mubr.f32.gmra.mrb[16].mxu1 %v391_v25  ;;  %v581_v25 = vld [vmem:[%s8794_s5 + $0xb40] sm:$0xff] }
 0x198   : > { %4359 = vmatmul.mubr.f32.gmra.mrb[112].mxu0 %v1407_v26  ;;  %2583 = vmatprep.mubr.f32.mxu1 %v413_v28  ;;  %v255_v26 = vld [vmem:[%s8794_s5 + $0x110] sm:$0xff] }
 0x199   : > { %4363 = vmatprep.mubr.f32.mxu0 %v1429_v31  ;;  %6890 = vmatpush1.bf16.msra.mxu1 %v6889_v29  ;;  %v1791_v28 = vld [vmem:[%s11940_s1 + $0x710] sm:$0xff]  ;;  %v1792_v29 = vld [vmem:[%s11940_s1 + $0x718] sm:$0xff] }
 0x19a   : > { %6891 = vmatprep.subr.bf16.mxu1 %v8683_v0  ;;  %v580_v31 = vld [vmem:[%s8794_s5 + $0xb38] sm:$0xff] }
 0x19b   : > { %2584 = vmatmul.mubr.f32.gmra.mrb[18].mxu1 %v412_v35  ;;  %v602_v35 = vld [vmem:[%s8794_s5 + $0xbe8] sm:$0xff] }
 0x19c   : > { %4364 = vmatmul.mubr.f32.gmra.mrb[114].mxu0 %v1428_v37  ;;  %2588 = vmatprep.mubr.f32.mxu1 %v434_v38  ;;  %v7108_v37 = vpack.c.bf16 %v1792_v29, %v1791_v28  ;;  %v1654_v38 = vld [vmem:[%s11940_s1 + $0x2c8] sm:$0xff]  ;;  %v381_v28 = vld [vmem:[%s8794_s5 + $0x500] sm:$0xff]  ;;  %v1803_v29 = vld [vmem:[%s11940_s1 + $0x770] sm:$0xff] }
 0x19d   : > { %4368 = vmatprep.mubr.f32.mxu0 %v1450_v40  ;;  %6893 = vmatpush1.bf16.msra.mxu1 %v6892_v39  ;;  %v276_v39 = vld [vmem:[%s8794_s5 + $0x1b8] sm:$0xff]  ;;  %v1793_v40 = vld [vmem:[%s11940_s1 + $0x720] sm:$0xff]  ;;  %v6901_v43 = vpack.c.bf16 %v1654_v38, %v1653_v32  ;;  %v706_v32 = vld [vmem:[%s8794_s5 + $0xf28] sm:$0xff] }
 0x19e   : > { %6894 = vmatprep.subr.bf16.mxu1 %v8683_v0  ;;  %v402_v38 = vld [vmem:[%s8794_s5 + $0x5a8] sm:$0xff] }
 0x19f   : > { %2589 = vmatmul.mubr.f32.gmra.mrb[20].mxu1 %v433_v45  ;;  %v601_v45 = vld [vmem:[%s8794_s5 + $0xbe0] sm:$0xff] }
 0x1a0   : > { %4369 = vmatmul.mubr.f32.gmra.mrb[116].mxu0 %v1449_v46  ;;  %2593 = vmatprep.mubr.f32.mxu1 %v455_v47  ;;  %v275_v46 = vld [vmem:[%s8794_s5 + $0x1b0] sm:$0xff] }
 0x1a1   : > { %4373 = vmatprep.mubr.f32.mxu0 %v1471_v49  ;;  %6896 = vmatpush1.bf16.msra.mxu1 %v6895_v48  ;;  %v623_v47 = vld [vmem:[%s8794_s5 + $0xc90] sm:$0xff]  ;;  %v7111_v48 = vpack.c.bf16 %v1794_v42, %v1793_v40  ;;  %v297_v49 = vld [vmem:[%s8794_s5 + $0x260] sm:$0xff]  ;;  %v1806_v40 = vld [vmem:[%s11940_s1 + $0x788] sm:$0xff] }
 0x1a2   : > { %6897 = vmatprep.subr.bf16.mxu1 %v8683_v0  ;;  %v727_v42 = vld [vmem:[%s8794_s5 + $0xfd0] sm:$0xff] }
 0x1a3   : > { %2594 = vmatmul.mubr.f32.gmra.mrb[22].mxu1 %v454_v51  ;;  %v1795_v51 = vld [vmem:[%s11940_s1 + $0x730] sm:$0xff] }
 0x1a4   : > { %4374 = vmatmul.mubr.f32.gmra.mrb[118].mxu0 %v1470_v52  ;;  %2598 = vmatprep.mubr.f32.mxu1 %v476_v53  ;;  %v1796_v52 = vld [vmem:[%s11940_s1 + $0x738] sm:$0xff]  ;;  %v622_v53 = vld [vmem:[%s8794_s5 + $0xc88] sm:$0xff] }
 0x1a5   : > { %4378 = vmatprep.mubr.f32.mxu0 %v1492_v54  ;;  %6899 = vmatpush1.bf16.msra.mxu1 %v6898_v4  ;;  %v296_v54 = vld [vmem:[%s8794_s5 + $0x258] sm:$0xff]  ;;  %v1799_v4 = vld [vmem:[%s11940_s1 + $0x750] sm:$0xff] }
 0x1a6   : > { %6900 = vmatprep.subr.bf16.mxu1 %v8683_v0 }
 0x1a7   : > { %2599 = vmatmul.mubr.f32.gmra.mrb[24].mxu1 %v475_v55  ;;  %v644_v55 = vld [vmem:[%s8794_s5 + $0xd38] sm:$0xff] }
 0x1a8   : > { %4379 = vmatmul.mubr.f32.gmra.mrb[120].mxu0 %v1491_v57  ;;  %2603 = vmatprep.mubr.f32.mxu1 %v497_v58  ;;  %v7114_v57 = vpack.c.bf16 %v1796_v52, %v1795_v51  ;;  %v318_v58 = vld [vmem:[%s8794_s5 + $0x308] sm:$0xff]  ;;  %v748_v51 = vld [vmem:[%s8794_s5 + $0x1078] sm:$0xff]  ;;  %v1657_v52 = vld [vmem:[%s11940_s1 + $0x2e0] sm:$0xff] }
 0x1a9   : > { %4383 = vmatprep.mubr.f32.mxu0 %v1513_v59  ;;  %6902 = vmatpush1.bf16.msra.mxu1 %v6901_v43  ;;  %v1797_v59 = vld [vmem:[%s11940_s1 + $0x740] sm:$0xff] }
 0x1aa   : > { %6903 = vmatprep.subr.bf16.mxu1 %v8683_v0  ;;  %v401_v43 = vld [vmem:[%s8794_s5 + $0x5a0] sm:$0xff] }
 0x1ab   : > { %2604 = vmatmul.mubr.f32.gmra.mrb[26].mxu1 %v496_v60  ;;  %v1798_v60 = vld [vmem:[%s11940_s1 + $0x748] sm:$0xff] }
 0x1ac   : > { %4384 = vmatmul.mubr.f32.gmra.mrb[122].mxu0 %v1512_v63  ;;  %2608 = vmatprep.mubr.f32.mxu1 %v518_v1  ;;  %v317_v63 = vld [vmem:[%s8794_s5 + $0x300] sm:$0xff]  ;;  %v7117_v2 = vpack.c.bf16 %v1798_v60, %v1797_v59  ;;  %v1810_v60 = vld [vmem:[%s11940_s1 + $0x7a8] sm:$0xff] }
 0x1ad   : > { %4388 = vmatprep.mubr.f32.mxu0 %v1534_v3  ;;  %v665_v1 = vld [vmem:[%s8794_s5 + $0xde0] sm:$0xff]  ;;  %v339_v3 = vld [vmem:[%s8794_s5 + $0x3b0] sm:$0xff] }
 0x1ae   : > { %v1809_v59 = vld [vmem:[%s11940_s1 + $0x7a0] sm:$0xff] }
 0x1af   : > { %2609 = vmatmul.mubr.f32.gmra.mrb[28].mxu1 %v517_v6  ;;  %v1800_v6 = vld [vmem:[%s11940_s1 + $0x758] sm:$0xff] }
 0x1b0   : > { %4389 = vmatmul.mubr.f32.gmra.mrb[124].mxu0 %v1533_v7  ;;  %2613 = vmatprep.mubr.f32.mxu1 %v539_v9  ;;  %v664_v7 = vld [vmem:[%s8794_s5 + $0xdd8] sm:$0xff]  ;;  %v1655_v9 = vld [vmem:[%s11940_s1 + $0x2d0] sm:$0xff] }
 0x1b1   : > { %4393 = vmatprep.mubr.f32.mxu0 %v1555_v10  ;;  %v338_v10 = vld [vmem:[%s8794_s5 + $0x3a8] sm:$0xff] }
 0x1b3   : > { %2614 = vmatmul.mubr.f32.gmra.mrb[30].mxu1 %v538_v11  ;;  %v686_v11 = vld [vmem:[%s8794_s5 + $0xe88] sm:$0xff] }
 0x1b4   : > { %4394 = vmatmul.mubr.f32.gmra.mrb[126].mxu0 %v1554_v14  ;;  %2618 = vmatprep.mubr.f32.mxu1 %v560_v15  ;;  %v7120_v14 = vpack.c.bf16 %v1800_v6, %v1799_v4  ;;  %v1656_v15 = vld [vmem:[%s11940_s1 + $0x2d8] sm:$0xff]  ;;  %v465_v4 = vld [vmem:[%s8794_s5 + $0x7a0] sm:$0xff]  ;;  %v790_v6 = vld [vmem:[%s8794_s5 + $0x11c8] sm:$0xff] }
 0x1b5   : > { %4463 = vmatprep.mubr.f32.mxu0 %v234_v16  ;;  %v360_v16 = vld [vmem:[%s8794_s5 + $0x458] sm:$0xff] }
 0x1b7   : > { %2619 = vmatmul.mubr.f32.gmra.mrb[32].mxu1 %v559_v21  ;;  %v6904_v21 = vpack.c.bf16 %v1656_v15, %v1655_v9  ;;  %v812_v9 = vld [vmem:[%s8794_s5 + $0x1278] sm:$0xff]  ;;  %v833_v15 = vld [vmem:[%s8794_s5 + $0x1320] sm:$0xff] }
 0x1b8   : > { %4464 = vmatmul.mubr.f32.vlgmr.msra.gmra.mrb[0].mxu0 %v233_v22  ;;  %2623 = vmatprep.mubr.f32.mxu1 %v581_v25  ;;  %v685_v22 = vld [vmem:[%s8794_s5 + $0xe80] sm:$0xff]  ;;  %v707_v25 = vld [vmem:[%s8794_s5 + $0xf30] sm:$0xff] }
 0x1b9   : > { %7106 = vmatpush1.bf16.msra.mxu0 %v7105_v23  ;;  %4468 = vmatprep.mubr.f32.mxu0 %v255_v26  ;;  %v359_v23 = vld [vmem:[%s8794_s5 + $0x450] sm:$0xff]  ;;  %v7123_v26 = vpack.c.bf16 %v1802_v19, %v1801_v17  ;;  %v832_v17 = vld [vmem:[%s8794_s5 + $0x1318] sm:$0xff] }
 0x1ba   : > { %7107 = vmatprep.subr.bf16.mxu0 %v8683_v0  ;;  %6905 = vmatpush1.bf16.msra.mxu1 %v6904_v21  ;;  %v1811_v19 = vld [vmem:[%s11940_s1 + $0x7b0] sm:$0xff]  ;;  %v1812_v21 = vld [vmem:[%s11940_s1 + $0x7b8] sm:$0xff] }
 0x1bb   : > { %2624 = vmatmul.mubr.f32.gmra.mrb[34].mxu1 %v580_v31  ;;  %v1804_v31 = vld [vmem:[%s11940_s1 + $0x778] sm:$0xff]  ;;  %6906 = vmatprep.subr.bf16.mxu1 %v8683_v0 }
 0x1bc   : > { %4469 = vmatmul.mubr.f32.gmra.mrb[2].mxu0 %v254_v33  ;;  %2628 = vmatprep.mubr.f32.mxu1 %v602_v35  ;;  %v380_v33 = vld [vmem:[%s8794_s5 + $0x4f8] sm:$0xff] }
 0x1bd   : > { %4473 = vmatprep.mubr.f32.mxu0 %v276_v39  ;;  %7109 = vmatpush1.bf16.msra.mxu0 %v7108_v37  ;;  %v728_v35 = vld [vmem:[%s8794_s5 + $0xfd8] sm:$0xff]  ;;  %v7126_v37 = vpack.c.bf16 %v1804_v31, %v1803_v29  ;;  %v1805_v39 = vld [vmem:[%s11940_s1 + $0x780] sm:$0xff] }
 0x1be   : > { %7110 = vmatprep.subr.bf16.mxu0 %v8683_v0  ;;  %v528_v29 = vld [vmem:[%s8794_s5 + $0x998] sm:$0xff] }
 0x1bf   : > { %2629 = vmatmul.mubr.f32.gmra.mrb[36].mxu1 %v601_v45  ;;  %v749_v45 = vld [vmem:[%s8794_s5 + $0x1080] sm:$0xff] }
 0x1c0   : > { %4474 = vmatmul.mubr.f32.gmra.mrb[4].mxu0 %v275_v46  ;;  %2633 = vmatprep.mubr.f32.mxu1 %v623_v47  ;;  %v7129_v46 = vpack.c.bf16 %v1806_v40, %v1805_v39  ;;  %v423_v47 = vld [vmem:[%s8794_s5 + $0x650] sm:$0xff]  ;;  %v548_v39 = vld [vmem:[%s8794_s5 + $0xa38] sm:$0xff] }
 0x1c1   : > { %4478 = vmatprep.mubr.f32.mxu0 %v297_v49  ;;  %7112 = vmatpush1.bf16.msra.mxu0 %v7111_v48  ;;  %v1807_v48 = vld [vmem:[%s11940_s1 + $0x790] sm:$0xff]  ;;  %v1808_v49 = vld [vmem:[%s11940_s1 + $0x798] sm:$0xff] }
 0x1c2   : > { %7113 = vmatprep.subr.bf16.mxu0 %v8683_v0  ;;  %v896_v40 = vld [vmem:[%s8794_s5 + $0x1518] sm:$0xff] }
 0x1c3   : > { %2634 = vmatmul.mubr.f32.gmra.mrb[38].mxu1 %v622_v53  ;;  %v422_v53 = vld [vmem:[%s8794_s5 + $0x648] sm:$0xff] }
 0x1c4   : > { %4479 = vmatmul.mubr.f32.gmra.mrb[6].mxu0 %v296_v54  ;;  %2638 = vmatprep.mubr.f32.mxu1 %v644_v55  ;;  %v770_v54 = vld [vmem:[%s8794_s5 + $0x1128] sm:$0xff]  ;;  %v7132_v55 = vpack.c.bf16 %v1808_v49, %v1807_v48  ;;  %v916_v48 = vld [vmem:[%s8794_s5 + $0x15b8] sm:$0xff]  ;;  %v1813_v49 = vld [vmem:[%s11940_s1 + $0x7c0] sm:$0xff] }
 0x1c5   : > { %4483 = vmatprep.mubr.f32.mxu0 %v318_v58  ;;  %7115 = vmatpush1.bf16.msra.mxu0 %v7114_v57  ;;  %v1658_v57 = vld [vmem:[%s11940_s1 + $0x2e8] sm:$0xff]  ;;  %v444_v58 = vld [vmem:[%s8794_s5 + $0x6f8] sm:$0xff] }
 0x1c6   : > { %7116 = vmatprep.subr.bf16.mxu0 %v8683_v0 }
 0x1c7   : > { %2639 = vmatmul.mubr.f32.gmra.mrb[40].mxu1 %v643_v61  ;;  %v6907_v61 = vpack.c.bf16 %v1658_v57, %v1657_v52  ;;  %v590_v52 = vld [vmem:[%s8794_s5 + $0xb88] sm:$0xff]  ;;  %v937_v57 = vld [vmem:[%s8794_s5 + $0x1660] sm:$0xff] }
 0x1c8   : > { %4484 = vmatmul.mubr.f32.gmra.mrb[8].mxu0 %v317_v63  ;;  %2643 = vmatprep.mubr.f32.mxu1 %v665_v1  ;;  %v769_v63 = vld [vmem:[%s8794_s5 + $0x1120] sm:$0xff]  ;;  %v443_v1 = vld [vmem:[%s8794_s5 + $0x6f0] sm:$0xff] }
 0x1c9   : > { %4488 = vmatprep.mubr.f32.mxu0 %v339_v3  ;;  %7118 = vmatpush1.bf16.msra.mxu0 %v7117_v2  ;;  %v791_v2 = vld [vmem:[%s8794_s5 + $0x11d0] sm:$0xff]  ;;  %v7135_v3 = vpack.c.bf16 %v1810_v60, %v1809_v59  ;;  %v633_v60 = vld [vmem:[%s8794_s5 + $0xce0] sm:$0xff] }
 0x1ca   : > { %7119 = vmatprep.subr.bf16.mxu0 %v8683_v0  ;;  %6908 = vmatpush1.bf16.msra.mxu1 %v6907_v61  ;;  %v959_v59 = vld [vmem:[%s8794_s5 + $0x1710] sm:$0xff]  ;;  %v958_v61 = vld [vmem:[%s8794_s5 + $0x1708] sm:$0xff] }
 0x1cb   : > { %2644 = vmatmul.mubr.f32.gmra.mrb[42].mxu1 %v664_v7  ;;  %6909 = vmatprep.subr.bf16.mxu1 %v8683_v0  ;;  %v464_v7 = vld [vmem:[%s8794_s5 + $0x798] sm:$0xff] }
 0x1cc   : > { %4489 = vmatmul.mubr.f32.gmra.mrb[10].mxu0 %v338_v10  ;;  %2648 = vmatprep.mubr.f32.mxu1 %v686_v11  ;;  %v486_v10 = vld [vmem:[%s8794_s5 + $0x848] sm:$0xff]  ;;  %v811_v11 = vld [vmem:[%s8794_s5 + $0x1270] sm:$0xff] }
 0x1cd   : > { %4493 = vmatprep.mubr.f32.mxu0 %v360_v16  ;;  %7121 = vmatpush1.bf16.msra.mxu0 %v7120_v14  ;;  %v485_v14 = vld [vmem:[%s8794_s5 + $0x840] sm:$0xff]  ;;  %v507_v16 = vld [vmem:[%s8794_s5 + $0x8f0] sm:$0xff] }
 0x1ce   : > { %7122 = vmatprep.subr.bf16.mxu0 %v8683_v0 }
 0x1cf   : > { %2649 = vmatmul.mubr.f32.gmra.mrb[44].mxu1 %v685_v22  ;;  %v1659_v22 = vld [vmem:[%s11940_s1 + $0x2f0] sm:$0xff] }
 0x1d0   : > { %4494 = vmatmul.mubr.f32.gmra.mrb[12].mxu0 %v359_v23  ;;  %2653 = vmatprep.mubr.f32.mxu1 %v707_v25  ;;  %v506_v23 = vld [vmem:[%s8794_s5 + $0x8e8] sm:$0xff] }
 0x1d1   : > { %4498 = vmatprep.mubr.f32.mxu0 %v381_v28  ;;  %7124 = vmatpush1.bf16.msra.mxu0 %v7123_v26  ;;  %v854_v25 = vld [vmem:[%s8794_s5 + $0x13c8] sm:$0xff]  ;;  %v7138_v26 = vpack.c.bf16 %v1812_v21, %v1811_v19  ;;  %v1660_v28 = vld [vmem:[%s11940_s1 + $0x2f8] sm:$0xff]  ;;  %v1021_v19 = vld [vmem:[%s8794_s5 + $0x1900] sm:$0xff] }
 0x1d2   : > { %7125 = vmatprep.subr.bf16.mxu0 %v8683_v0  ;;  %v6910_v31 = vpack.c.bf16 %v1660_v28, %v1659_v22  ;;  %v695_v21 = vld [vmem:[%s8794_s5 + $0xed0] sm:$0xff]  ;;  %v1064_v28 = vld [vmem:[%s8794_s5 + $0x1a58] sm:$0xff] }
 0x1d3   : > { %2654 = vmatmul.mubr.f32.gmra.mrb[46].mxu1 %v706_v32  ;;  %v853_v32 = vld [vmem:[%s8794_s5 + $0x13c0] sm:$0xff]  ;;  %v1043_v22 = vld [vmem:[%s8794_s5 + $0x19b0] sm:$0xff] }
 0x1d4   : > { %4499 = vmatmul.mubr.f32.gmra.mrb[14].mxu0 %v380_v33  ;;  %2658 = vmatprep.mubr.f32.mxu1 %v728_v35  ;;  %v527_v33 = vld [vmem:[%s8794_s5 + $0x990] sm:$0xff] }
 0x1d5   : > { %4503 = vmatprep.mubr.f32.mxu0 %v402_v38  ;;  %7127 = vmatpush1.bf16.msra.mxu0 %v7126_v37  ;;  %v875_v35 = vld [vmem:[%s8794_s5 + $0x1470] sm:$0xff]  ;;  %v549_v37 = vld [vmem:[%s8794_s5 + $0xa40] sm:$0xff]  ;;  %v874_v38 = vld [vmem:[%s8794_s5 + $0x1468] sm:$0xff] }
 0x1d6   : > { %7128 = vmatprep.subr.bf16.mxu0 %v8683_v0  ;;  %6911 = vmatpush1.bf16.msra.mxu1 %v6910_v31  ;;  %v1063_v31 = vld [vmem:[%s8794_s5 + $0x1a50] sm:$0xff] }
 0x1d7   : > { %2659 = vmatmul.mubr.f32.gmra.mrb[48].mxu1 %v727_v42  ;;  %6912 = vmatprep.subr.bf16.mxu1 %v8683_v0  ;;  %v570_v42 = vld [vmem:[%s8794_s5 + $0xae8] sm:$0xff] }
 0x1d8   : > { %4504 = vmatmul.mubr.f32.gmra.mrb[16].mxu0 %v401_v43  ;;  %2663 = vmatprep.mubr.f32.mxu1 %v749_v45  ;;  %v895_v43 = vld [vmem:[%s8794_s5 + $0x1510] sm:$0xff]  ;;  %v569_v45 = vld [vmem:[%s8794_s5 + $0xae0] sm:$0xff] }
 0x1d9   : > { %4508 = vmatprep.mubr.f32.mxu0 %v423_v47  ;;  %7130 = vmatpush1.bf16.msra.mxu0 %v7129_v46  ;;  %v917_v46 = vld [vmem:[%s8794_s5 + $0x15c0] sm:$0xff]  ;;  %v591_v47 = vld [vmem:[%s8794_s5 + $0xb90] sm:$0xff] }
 0x1da   : > { %7131 = vmatprep.subr.bf16.mxu0 %v8683_v0 }
 0x1db   : > { %2664 = vmatmul.mubr.f32.gmra.mrb[50].mxu1 %v748_v51  ;;  %v1814_v51 = vld [vmem:[%s11940_s1 + $0x7c8] sm:$0xff] }
 0x1dc   : > { %4509 = vmatmul.mubr.f32.gmra.mrb[18].mxu0 %v422_v53  ;;  %2668 = vmatprep.mubr.f32.mxu1 %v770_v54  ;;  %v938_v53 = vld [vmem:[%s8794_s5 + $0x1668] sm:$0xff]  ;;  %v7141_v54 = vpack.c.bf16 %v1814_v51, %v1813_v49  ;;  %v801_v49 = vld [vmem:[%s8794_s5 + $0x1220] sm:$0xff] }
 0x1dd   : > { %4513 = vmatprep.mubr.f32.mxu0 %v444_v58  ;;  %7133 = vmatpush1.bf16.msra.mxu0 %v7132_v55  ;;  %v612_v55 = vld [vmem:[%s8794_s5 + $0xc38] sm:$0xff]  ;;  %v611_v58 = vld [vmem:[%s8794_s5 + $0xc30] sm:$0xff]  ;;  %v1126_v51 = vld [vmem:[%s8794_s5 + $0x1c48] sm:$0xff] }
 0x1de   : > { %7134 = vmatprep.subr.bf16.mxu0 %v8683_v0 }
 0x1df   : > { %2669 = vmatmul.mubr.f32.gmra.mrb[52].mxu1 %v769_v63  ;;  %v632_v63 = vld [vmem:[%s8794_s5 + $0xcd8] sm:$0xff] }
 0x1e0   : > { %4514 = vmatmul.mubr.f32.gmra.mrb[20].mxu0 %v443_v1  ;;  %2673 = vmatprep.mubr.f32.mxu1 %v791_v2  ;;  %v980_v1 = vld [vmem:[%s8794_s5 + $0x17b8] sm:$0xff]  ;;  %v654_v2 = vld [vmem:[%s8794_s5 + $0xd88] sm:$0xff] }
 0x1e1   : > { %4518 = vmatprep.mubr.f32.mxu0 %v465_v4  ;;  %7136 = vmatpush1.bf16.msra.mxu0 %v7135_v3  ;;  %v979_v3 = vld [vmem:[%s8794_s5 + $0x17b0] sm:$0xff]  ;;  %v653_v4 = vld [vmem:[%s8794_s5 + $0xd80] sm:$0xff] }
 0x1e2   : > { %7137 = vmatprep.subr.bf16.mxu0 %v8683_v0 }
 0x1e3   : > { %2674 = vmatmul.mubr.f32.gmra.mrb[54].mxu1 %v790_v6  ;;  %v1001_v6 = vld [vmem:[%s8794_s5 + $0x1860] sm:$0xff] }
 0x1e4   : > { %4519 = vmatmul.mubr.f32.gmra.mrb[22].mxu0 %v464_v7  ;;  %2678 = vmatprep.mubr.f32.mxu1 %v812_v9  ;;  %v675_v7 = vld [vmem:[%s8794_s5 + $0xe30] sm:$0xff]  ;;  %v1000_v9 = vld [vmem:[%s8794_s5 + $0x1858] sm:$0xff] }
 0x1e5   : > { %4523 = vmatprep.mubr.f32.mxu0 %v486_v10  ;;  %7139 = vmatpush1.bf16.msra.mxu0 %v7138_v26  ;;  %v1815_v10 = vld [vmem:[%s11940_s1 + $0x7d0] sm:$0xff]  ;;  %v716_v26 = vld [vmem:[%s8794_s5 + $0xf78] sm:$0xff] }
 0x1e6   : > { %7140 = vmatprep.subr.bf16.mxu0 %v8683_v0 }
 0x1e7   : > { %2679 = vmatmul.mubr.f32.gmra.mrb[56].mxu1 %v811_v11  ;;  %v1816_v11 = vld [vmem:[%s11940_s1 + $0x7d8] sm:$0xff] }
 0x1e8   : > { %4524 = vmatmul.mubr.f32.gmra.mrb[24].mxu0 %v485_v14  ;;  %2683 = vmatprep.mubr.f32.mxu1 %v833_v15  ;;  %v674_v14 = vld [vmem:[%s8794_s5 + $0xe28] sm:$0xff] }
 0x1e9   : > { %4528 = vmatprep.mubr.f32.mxu0 %v507_v16  ;;  %7142 = vmatpush1.bf16.msra.mxu0 %v7141_v54  ;;  %v1022_v15 = vld [vmem:[%s8794_s5 + $0x1908] sm:$0xff]  ;;  %v7144_v16 = vpack.c.bf16 %v1816_v11, %v1815_v10  ;;  %v885_v10 = vld [vmem:[%s8794_s5 + $0x14c0] sm:$0xff] }
 0x1ea   : > { %7143 = vmatprep.subr.bf16.mxu0 %v8683_v0  ;;  %v822_v54 = vld [vmem:[%s8794_s5 + $0x12c8] sm:$0xff] }
 0x1eb   : > { %2684 = vmatmul.mubr.f32.gmra.mrb[58].mxu1 %v832_v17  ;;  %v696_v17 = vld [vmem:[%s8794_s5 + $0xed8] sm:$0xff]  ;;  %v1210_v11 = vld [vmem:[%s8794_s5 + $0x1ee8] sm:$0xff] }
 0x1ec   : > { %4529 = vmatmul.mubr.f32.gmra.mrb[26].mxu0 %v506_v23  ;;  %2688 = vmatprep.mubr.f32.mxu1 %v854_v25  ;;  %v717_v23 = vld [vmem:[%s8794_s5 + $0xf80] sm:$0xff]  ;;  %v1042_v25 = vld [vmem:[%s8794_s5 + $0x19a8] sm:$0xff] }
 0x1ed   : > { %4533 = vmatprep.mubr.f32.mxu0 %v528_v29  ;;  %7145 = vmatpush1.bf16.msra.mxu0 %v7144_v16  ;;  %v738_v29 = vld [vmem:[%s8794_s5 + $0x1028] sm:$0xff] }
 0x1ee   : > { %7146 = vmatprep.subr.bf16.mxu0 %v8683_v0  ;;  %v906_v16 = vld [vmem:[%s8794_s5 + $0x1568] sm:$0xff] }
 0x1ef   : > { %2689 = vmatmul.mubr.f32.gmra.mrb[60].mxu1 %v853_v32  ;;  %v737_v32 = vld [vmem:[%s8794_s5 + $0x1020] sm:$0xff] }
 0x1f0   : > { %4534 = vmatmul.mubr.f32.gmra.mrb[28].mxu0 %v527_v33  ;;  %2693 = vmatprep.mubr.f32.mxu1 %v875_v35  ;;  %v1085_v33 = vld [vmem:[%s8794_s5 + $0x1b00] sm:$0xff]  ;;  %v759_v35 = vld [vmem:[%s8794_s5 + $0x10d0] sm:$0xff] }
 0x1f1   : > { %4538 = vmatprep.mubr.f32.mxu0 %v549_v37  ;;  %v1084_v37 = vld [vmem:[%s8794_s5 + $0x1af8] sm:$0xff] }
 0x1f3   : > { %2694 = vmatmul.mubr.f32.gmra.mrb[62].mxu1 %v874_v38  ;;  %v1817_v38 = vld [vmem:[%s11940_s1 + $0x7e0] sm:$0xff] }
 0x1f4   : > { %4539 = vmatmul.mubr.f32.gmra.mrb[30].mxu0 %v548_v39  ;;  %2698 = vmatprep.mubr.f32.mxu1 %v896_v40  ;;  %v1818_v39 = vld [vmem:[%s11940_s1 + $0x7e8] sm:$0xff] }
 0x1f5   : > { %4543 = vmatprep.mubr.f32.mxu0 %v570_v42  ;;  %v758_v40 = vld [vmem:[%s8794_s5 + $0x10c8] sm:$0xff] }
 0x1f6   : > { %v1106_v42 = vld [vmem:[%s8794_s5 + $0x1ba8] sm:$0xff] }
 0x1f7   : > { %2699 = vmatmul.mubr.f32.gmra.mrb[64].mxu1 %v895_v43  ;;  %v7147_v43 = vpack.c.bf16 %v1818_v39, %v1817_v38  ;;  %v1316_v38 = vld [vmem:[%s8794_s5 + $0x2238] sm:$0xff]  ;;  %v990_v39 = vld [vmem:[%s8794_s5 + $0x1808] sm:$0xff] }
 0x1f8   : > { %4544 = vmatmul.mubr.f32.gmra.mrb[32].mxu0 %v569_v45  ;;  %2703 = vmatprep.mubr.f32.mxu1 %v917_v46  ;;  %v780_v45 = vld [vmem:[%s8794_s5 + $0x1178] sm:$0xff]  ;;  %v1105_v46 = vld [vmem:[%s8794_s5 + $0x1ba0] sm:$0xff] }
 0x1f9   : > { %4548 = vmatprep.mubr.f32.mxu0 %v591_v47  ;;  %7148 = vmatpush1.bf16.msra.mxu0 %v7147_v43  ;;  %v779_v47 = vld [vmem:[%s8794_s5 + $0x1170] sm:$0xff]  ;;  %v1337_v43 = vld [vmem:[%s8794_s5 + $0x22e0] sm:$0xff] }
 0x1fa   : > { %7149 = vmatprep.subr.bf16.mxu0 %v8683_v0 }
 0x1fb   : > { %2704 = vmatmul.mubr.f32.gmra.mrb[66].mxu1 %v916_v48  ;;  %v1127_v48 = vld [vmem:[%s8794_s5 + $0x1c50] sm:$0xff] }
 0x1fc   : > { %4549 = vmatmul.mubr.f32.gmra.mrb[34].mxu0 %v590_v52  ;;  %2708 = vmatprep.mubr.f32.mxu1 %v938_v53  ;;  %v800_v52 = vld [vmem:[%s8794_s5 + $0x1218] sm:$0xff] }
 0x1fd   : > { %4553 = vmatprep.mubr.f32.mxu0 %v612_v55  ;;  %v1148_v53 = vld [vmem:[%s8794_s5 + $0x1cf8] sm:$0xff]  ;;  %v1147_v55 = vld [vmem:[%s8794_s5 + $0x1cf0] sm:$0xff] }
 0x1ff   : > { %2709 = vmatmul.mubr.f32.gmra.mrb[68].mxu1 %v937_v57  ;;  %v821_v57 = vld [vmem:[%s8794_s5 + $0x12c0] sm:$0xff] }
 0x200   : > { %4554 = vmatmul.mubr.f32.gmra.mrb[36].mxu0 %v611_v58  ;;  %2713 = vmatprep.mubr.f32.mxu1 %v959_v59  ;;  %v1169_v58 = vld [vmem:[%s8794_s5 + $0x1da0] sm:$0xff]  ;;  %v843_v59 = vld [vmem:[%s8794_s5 + $0x1370] sm:$0xff] }
 0x201   : > { %4558 = vmatprep.mubr.f32.mxu0 %v633_v60  ;;  %v1168_v60 = vld [vmem:[%s8794_s5 + $0x1d98] sm:$0xff] }
 0x203   : > { %2714 = vmatmul.mubr.f32.gmra.mrb[70].mxu1 %v958_v61  ;;  %v1819_v61 = vld [vmem:[%s11940_s1 + $0x7f0] sm:$0xff] }
 0x204   : > { %4559 = vmatmul.mubr.f32.gmra.mrb[38].mxu0 %v632_v63  ;;  %2718 = vmatprep.mubr.f32.mxu1 %v980_v1  ;;  %v1820_v63 = vld [vmem:[%s11940_s1 + $0x7f8] sm:$0xff]  ;;  %v842_v1 = vld [vmem:[%s8794_s5 + $0x1368] sm:$0xff] }
 0x205   : > { %4563 = vmatprep.mubr.f32.mxu0 %v654_v2  ;;  %v1190_v2 = vld [vmem:[%s8794_s5 + $0x1e48] sm:$0xff] }
 0x207   : > { %2719 = vmatmul.mubr.f32.gmra.mrb[72].mxu1 %v979_v3  ;;  %v7150_v3 = vpack.c.bf16 %v1820_v63, %v1819_v61  ;;  %v1073_v61 = vld [vmem:[%s8794_s5 + $0x1aa0] sm:$0xff] }
 0x208   : > { %4564 = vmatmul.mubr.f32.gmra.mrb[40].mxu0 %v653_v4  ;;  %2723 = vmatprep.mubr.f32.mxu1 %v1001_v6  ;;  %v864_v4 = vld [vmem:[%s8794_s5 + $0x1418] sm:$0xff]  ;;  %v1189_v6 = vld [vmem:[%s8794_s5 + $0x1e40] sm:$0xff] }
 0x209   : > { %4568 = vmatprep.mubr.f32.mxu0 %v675_v7  ;;  %7151 = vmatpush1.bf16.msra.mxu0 %v7150_v3  ;;  %v863_v7 = vld [vmem:[%s8794_s5 + $0x1410] sm:$0xff]  ;;  %v1421_v63 = vld [vmem:[%s8794_s5 + $0x2580] sm:$0xff]  ;;  %v1094_v3 = vld [vmem:[%s8794_s5 + $0x1b48] sm:$0xff] }
 0x20a   : > { %7152 = vmatprep.subr.bf16.mxu0 %v8683_v0 }
 0x20b   : > { %2724 = vmatmul.mubr.f32.gmra.mrb[74].mxu1 %v1000_v9  ;;  %v1211_v9 = vld [vmem:[%s8794_s5 + $0x1ef0] sm:$0xff] }
 0x20c   : > { %4569 = vmatmul.mubr.f32.gmra.mrb[42].mxu0 %v674_v14  ;;  %2728 = vmatprep.mubr.f32.mxu1 %v1022_v15  ;;  %v884_v14 = vld [vmem:[%s8794_s5 + $0x14b8] sm:$0xff] }
 0x20d   : > { %4573 = vmatprep.mubr.f32.mxu0 %v696_v17  ;;  %v1232_v15 = vld [vmem:[%s8794_s5 + $0x1f98] sm:$0xff]  ;;  %v1231_v17 = vld [vmem:[%s8794_s5 + $0x1f90] sm:$0xff] }
 0x20f   : > { %2729 = vmatmul.mubr.f32.gmra.mrb[76].mxu1 %v1021_v19  ;;  %v905_v19 = vld [vmem:[%s8794_s5 + $0x1560] sm:$0xff] }
 0x210   : > { %4574 = vmatmul.mubr.f32.gmra.mrb[44].mxu0 %v695_v21  ;;  %2733 = vmatprep.mubr.f32.mxu1 %v1043_v22  ;;  %v1253_v21 = vld [vmem:[%s8794_s5 + $0x2040] sm:$0xff]  ;;  %v927_v22 = vld [vmem:[%s8794_s5 + $0x1610] sm:$0xff] }
 0x211   : > { %4578 = vmatprep.mubr.f32.mxu0 %v717_v23  ;;  %v1252_v23 = vld [vmem:[%s8794_s5 + $0x2038] sm:$0xff] }
 0x213   : > { %2734 = vmatmul.mubr.f32.gmra.mrb[78].mxu1 %v1042_v25  ;;  %v926_v25 = vld [vmem:[%s8794_s5 + $0x1608] sm:$0xff] }
 0x214   : > { %4579 = vmatmul.mubr.f32.gmra.mrb[46].mxu0 %v716_v26  ;;  %2738 = vmatprep.mubr.f32.mxu1 %v1064_v28  ;;  %v1274_v26 = vld [vmem:[%s8794_s5 + $0x20e8] sm:$0xff]  ;;  %v948_v28 = vld [vmem:[%s8794_s5 + $0x16b8] sm:$0xff] }
 0x215   : > { %4583 = vmatprep.mubr.f32.mxu0 %v738_v29  ;;  %v1273_v29 = vld [vmem:[%s8794_s5 + $0x20e0] sm:$0xff] }
 0x217   : > { %2739 = vmatmul.mubr.f32.gmra.mrb[80].mxu1 %v1063_v31  ;;  %v947_v31 = vld [vmem:[%s8794_s5 + $0x16b0] sm:$0xff] }
 0x218   : > { %4584 = vmatmul.mubr.f32.gmra.mrb[48].mxu0 %v737_v32  ;;  %2743 = vmatprep.mubr.f32.mxu1 %v1085_v33  ;;  %v1295_v32 = vld [vmem:[%s8794_s5 + $0x2190] sm:$0xff]  ;;  %v969_v33 = vld [vmem:[%s8794_s5 + $0x1760] sm:$0xff] }
 0x219   : > { %4588 = vmatprep.mubr.f32.mxu0 %v759_v35  ;;  %v1294_v35 = vld [vmem:[%s8794_s5 + $0x2188] sm:$0xff] }
 0x21b   : > { %2744 = vmatmul.mubr.f32.gmra.mrb[82].mxu1 %v1084_v37  ;;  %v968_v37 = vld [vmem:[%s8794_s5 + $0x1758] sm:$0xff] }
 0x21c   : > { %4589 = vmatmul.mubr.f32.gmra.mrb[50].mxu0 %v758_v40  ;;  %2748 = vmatprep.mubr.f32.mxu1 %v1106_v42  ;;  %v1315_v40 = vld [vmem:[%s8794_s5 + $0x2230] sm:$0xff]  ;;  %v989_v42 = vld [vmem:[%s8794_s5 + $0x1800] sm:$0xff] }
 0x21d   : > { %4593 = vmatprep.mubr.f32.mxu0 %v780_v45  ;;  %v1011_v45 = vld [vmem:[%s8794_s5 + $0x18b0] sm:$0xff] }
 0x21f   : > { %2749 = vmatmul.mubr.f32.gmra.mrb[84].mxu1 %v1105_v46  ;;  %v1336_v46 = vld [vmem:[%s8794_s5 + $0x22d8] sm:$0xff] }
 0x220   : > { %4594 = vmatmul.mubr.f32.gmra.mrb[52].mxu0 %v779_v47  ;;  %2753 = vmatprep.mubr.f32.mxu1 %v1127_v48  ;;  %v1010_v47 = vld [vmem:[%s8794_s5 + $0x18a8] sm:$0xff] }
 0x221   : > { %4598 = vmatprep.mubr.f32.mxu0 %v801_v49  ;;  %v1358_v48 = vld [vmem:[%s8794_s5 + $0x2388] sm:$0xff]  ;;  %v1032_v49 = vld [vmem:[%s8794_s5 + $0x1958] sm:$0xff] }
 0x223   : > { %2754 = vmatmul.mubr.f32.gmra.mrb[86].mxu1 %v1126_v51  ;;  %v1357_v51 = vld [vmem:[%s8794_s5 + $0x2380] sm:$0xff] }
 0x224   : > { %4599 = vmatmul.mubr.f32.gmra.mrb[54].mxu0 %v800_v52  ;;  %2758 = vmatprep.mubr.f32.mxu1 %v1148_v53  ;;  %v1031_v52 = vld [vmem:[%s8794_s5 + $0x1950] sm:$0xff] }
 0x225   : > { %4603 = vmatprep.mubr.f32.mxu0 %v822_v54  ;;  %v1379_v53 = vld [vmem:[%s8794_s5 + $0x2430] sm:$0xff]  ;;  %v1053_v54 = vld [vmem:[%s8794_s5 + $0x1a00] sm:$0xff] }
 0x227   : > { %2759 = vmatmul.mubr.f32.gmra.mrb[88].mxu1 %v1147_v55  ;;  %v1378_v55 = vld [vmem:[%s8794_s5 + $0x2428] sm:$0xff] }
 0x228   : > { %4604 = vmatmul.mubr.f32.gmra.mrb[56].mxu0 %v821_v57  ;;  %2763 = vmatprep.mubr.f32.mxu1 %v1169_v58  ;;  %v1052_v57 = vld [vmem:[%s8794_s5 + $0x19f8] sm:$0xff] }
 0x229   : > { %4608 = vmatprep.mubr.f32.mxu0 %v843_v59  ;;  %v1400_v58 = vld [vmem:[%s8794_s5 + $0x24d8] sm:$0xff]  ;;  %v1074_v59 = vld [vmem:[%s8794_s5 + $0x1aa8] sm:$0xff] }
 0x22b   : > { %2764 = vmatmul.mubr.f32.gmra.mrb[90].mxu1 %v1168_v60  ;;  %v1399_v60 = vld [vmem:[%s8794_s5 + $0x24d0] sm:$0xff] }
 0x22c   : > { %4609 = vmatmul.mubr.f32.gmra.mrb[58].mxu0 %v842_v1  ;;  %2768 = vmatprep.mubr.f32.mxu1 %v1190_v2  ;;  %v1095_v1 = vld [vmem:[%s8794_s5 + $0x1b50] sm:$0xff]  ;;  %v1420_v2 = vld [vmem:[%s8794_s5 + $0x2578] sm:$0xff] }
 0x22d   : > { %4613 = vmatprep.mubr.f32.mxu0 %v864_v4  ;;  %v1442_v4 = vld [vmem:[%s8794_s5 + $0x2628] sm:$0xff] }
 0x22f   : > { %2769 = vmatmul.mubr.f32.gmra.mrb[92].mxu1 %v1189_v6  ;;  %v1116_v6 = vld [vmem:[%s8794_s5 + $0x1bf8] sm:$0xff] }
 0x230   : > { %4614 = vmatmul.mubr.f32.gmra.mrb[60].mxu0 %v863_v7  ;;  %2773 = vmatprep.mubr.f32.mxu1 %v1211_v9  ;;  %v1441_v7 = vld [vmem:[%s8794_s5 + $0x2620] sm:$0xff]  ;;  %v1115_v9 = vld [vmem:[%s8794_s5 + $0x1bf0] sm:$0xff] }
 0x231   : > { %4618 = vmatprep.mubr.f32.mxu0 %v885_v10  ;;  %v1463_v10 = vld [vmem:[%s8794_s5 + $0x26d0] sm:$0xff] }
 0x233   : > { %2774 = vmatmul.mubr.f32.gmra.mrb[94].mxu1 %v1210_v11  ;;  %v1137_v11 = vld [vmem:[%s8794_s5 + $0x1ca0] sm:$0xff] }
 0x234   : > { %4619 = vmatmul.mubr.f32.gmra.mrb[62].mxu0 %v884_v14  ;;  %2778 = vmatprep.mubr.f32.mxu1 %v1232_v15  ;;  %v1462_v14 = vld [vmem:[%s8794_s5 + $0x26c8] sm:$0xff]  ;;  %v1136_v15 = vld [vmem:[%s8794_s5 + $0x1c98] sm:$0xff] }
 0x235   : > { %4623 = vmatprep.mubr.f32.mxu0 %v906_v16  ;;  %v1484_v16 = vld [vmem:[%s8794_s5 + $0x2778] sm:$0xff] }
 0x237   : > { %2779 = vmatmul.mubr.f32.gmra.mrb[96].mxu1 %v1231_v17  ;;  %v1158_v17 = vld [vmem:[%s8794_s5 + $0x1d48] sm:$0xff] }
 0x238   : > { %4624 = vmatmul.mubr.f32.gmra.mrb[64].mxu0 %v905_v19  ;;  %2783 = vmatprep.mubr.f32.mxu1 %v1253_v21  ;;  %v1483_v19 = vld [vmem:[%s8794_s5 + $0x2770] sm:$0xff]  ;;  %v1157_v21 = vld [vmem:[%s8794_s5 + $0x1d40] sm:$0xff] }
 0x239   : > { %4628 = vmatprep.mubr.f32.mxu0 %v927_v22  ;;  %v1505_v22 = vld [vmem:[%s8794_s5 + $0x2820] sm:$0xff] }
 0x23b   : > { %2784 = vmatmul.mubr.f32.gmra.mrb[98].mxu1 %v1252_v23  ;;  %v1179_v23 = vld [vmem:[%s8794_s5 + $0x1df0] sm:$0xff] }
 0x23c   : > { %4629 = vmatmul.mubr.f32.gmra.mrb[66].mxu0 %v926_v25  ;;  %2788 = vmatprep.mubr.f32.mxu1 %v1274_v26  ;;  %v1504_v25 = vld [vmem:[%s8794_s5 + $0x2818] sm:$0xff]  ;;  %v1178_v26 = vld [vmem:[%s8794_s5 + $0x1de8] sm:$0xff] }
 0x23d   : > { %4633 = vmatprep.mubr.f32.mxu0 %v948_v28  ;;  %v1526_v28 = vld [vmem:[%s8794_s5 + $0x28c8] sm:$0xff] }
 0x23f   : > { %2789 = vmatmul.mubr.f32.gmra.mrb[100].mxu1 %v1273_v29  ;;  %v1200_v29 = vld [vmem:[%s8794_s5 + $0x1e98] sm:$0xff] }
 0x240   : > { %4634 = vmatmul.mubr.f32.gmra.mrb[68].mxu0 %v947_v31  ;;  %2793 = vmatprep.mubr.f32.mxu1 %v1295_v32  ;;  %v1525_v31 = vld [vmem:[%s8794_s5 + $0x28c0] sm:$0xff]  ;;  %v1199_v32 = vld [vmem:[%s8794_s5 + $0x1e90] sm:$0xff] }
 0x241   : > { %4638 = vmatprep.mubr.f32.mxu0 %v969_v33  ;;  %v1547_v33 = vld [vmem:[%s8794_s5 + $0x2970] sm:$0xff] }
 0x243   : > { %2794 = vmatmul.mubr.f32.gmra.mrb[102].mxu1 %v1294_v35  ;;  %v1221_v35 = vld [vmem:[%s8794_s5 + $0x1f40] sm:$0xff] }
 0x244   : > { %4639 = vmatmul.mubr.f32.gmra.mrb[70].mxu0 %v968_v37  ;;  %2798 = vmatprep.mubr.f32.mxu1 %v1316_v38  ;;  %v1546_v37 = vld [vmem:[%s8794_s5 + $0x2968] sm:$0xff]  ;;  %v1220_v38 = vld [vmem:[%s8794_s5 + $0x1f38] sm:$0xff] }
 0x245   : > { %4643 = vmatprep.mubr.f32.mxu0 %v990_v39  ;;  %v226_v39 = vld [vmem:[%s8794_s5 + $0x28] sm:$0xff] }
 0x247   : > { %2799 = vmatmul.mubr.f32.gmra.mrb[104].mxu1 %v1315_v40  ;;  %v1661_v40 = vld [vmem:[%s11940_s1 + $0x300] sm:$0xff] }
 0x248   : > { %4644 = vmatmul.mubr.f32.gmra.mrb[72].mxu0 %v989_v42  ;;  %2803 = vmatprep.mubr.f32.mxu1 %v1337_v43  ;;  %v1662_v42 = vld [vmem:[%s11940_s1 + $0x308] sm:$0xff] }
 0x249   : > { %4648 = vmatprep.mubr.f32.mxu0 %v1011_v45  ;;  %v1242_v43 = vld [vmem:[%s8794_s5 + $0x1fe8] sm:$0xff]  ;;  %v225_v45 = vld [vmem:[%s8794_s5 + $0x20] sm:$0xff] }
 0x24b   : > { %2804 = vmatmul.mubr.f32.gmra.mrb[106].mxu1 %v1336_v46  ;;  %v6913_v46 = vpack.c.bf16 %v1662_v42, %v1661_v40  ;;  %v373_v40 = vld [vmem:[%s8794_s5 + $0x4c0] sm:$0xff] }
 0x24c   : > { %4649 = vmatmul.mubr.f32.gmra.mrb[74].mxu0 %v1010_v47  ;;  %2808 = vmatprep.mubr.f32.mxu1 %v1358_v48  ;;  %v1241_v47 = vld [vmem:[%s8794_s5 + $0x1fe0] sm:$0xff]  ;;  %v247_v48 = vld [vmem:[%s8794_s5 + $0xd0] sm:$0xff] }
 0x24d   : > { %4653 = vmatprep.mubr.f32.mxu0 %v1032_v49  ;;  %v1263_v49 = vld [vmem:[%s8794_s5 + $0x2090] sm:$0xff] }
 0x24f   : > { %2809 = vmatmul.mubr.f32.gmra.mrb[108].mxu1 %v1357_v51  ;;  %v1663_v51 = vld [vmem:[%s11940_s1 + $0x310] sm:$0xff] }
 0x250   : > { %4654 = vmatmul.mubr.f32.gmra.mrb[76].mxu0 %v1031_v52  ;;  %2813 = vmatprep.mubr.f32.mxu1 %v1379_v53  ;;  %v1664_v52 = vld [vmem:[%s11940_s1 + $0x318] sm:$0xff]  ;;  %v246_v53 = vld [vmem:[%s8794_s5 + $0xc8] sm:$0xff] }
 0x251   : > { %4658 = vmatprep.mubr.f32.mxu0 %v1053_v54  ;;  %v1262_v54 = vld [vmem:[%s8794_s5 + $0x2088] sm:$0xff] }
 0x253   : > { %2814 = vmatmul.mubr.f32.gmra.mrb[110].mxu1 %v1378_v55  ;;  %v268_v55 = vld [vmem:[%s8794_s5 + $0x178] sm:$0xff] }
 0x254   : > { %4659 = vmatmul.mubr.f32.gmra.mrb[78].mxu0 %v1052_v57  ;;  %2818 = vmatprep.mubr.f32.mxu1 %v1400_v58  ;;  %v6916_v57 = vpack.c.bf16 %v1664_v52, %v1663_v51  ;;  %v1284_v58 = vld [vmem:[%s8794_s5 + $0x2138] sm:$0xff]  ;;  %v1410_v52 = vld [vmem:[%s8794_s5 + $0x2528] sm:$0xff] }
 0x255   : > { %4663 = vmatprep.mubr.f32.mxu0 %v1074_v59  ;;  %v1665_v59 = vld [vmem:[%s11940_s1 + $0x320] sm:$0xff] }
 0x257   : > { %2819 = vmatmul.mubr.f32.gmra.mrb[112].mxu1 %v1399_v60  ;;  %v1666_v60 = vld [vmem:[%s11940_s1 + $0x328] sm:$0xff] }
 0x258   : > { %4664 = vmatmul.mubr.f32.gmra.mrb[80].mxu0 %v1073_v61  ;;  %2823 = vmatprep.mubr.f32.mxu1 %v1421_v63  ;;  %v267_v61 = vld [vmem:[%s8794_s5 + $0x170] sm:$0xff] }
 0x259   : > { %4668 = vmatprep.mubr.f32.mxu0 %v1095_v1  ;;  %v1283_v63 = vld [vmem:[%s8794_s5 + $0x2130] sm:$0xff]  ;;  %v289_v1 = vld [vmem:[%s8794_s5 + $0x220] sm:$0xff] }
 0x25b   : > { %2824 = vmatmul.mubr.f32.gmra.mrb[114].mxu1 %v1420_v2  ;;  %v6919_v2 = vpack.c.bf16 %v1666_v60, %v1665_v59  ;;  %v1431_v60 = vld [vmem:[%s8794_s5 + $0x25d0] sm:$0xff] }
 0x25c   : > { %4669 = vmatmul.mubr.f32.gmra.mrb[82].mxu0 %v1094_v3  ;;  %2828 = vmatprep.mubr.f32.mxu1 %v1442_v4  ;;  %v1305_v3 = vld [vmem:[%s8794_s5 + $0x21e0] sm:$0xff]  ;;  %v1667_v4 = vld [vmem:[%s11940_s1 + $0x330] sm:$0xff] }
 0x25d   : > { %4673 = vmatprep.mubr.f32.mxu0 %v1116_v6  ;;  %v1668_v6 = vld [vmem:[%s11940_s1 + $0x338] sm:$0xff] }
 0x25f   : > { %2829 = vmatmul.mubr.f32.gmra.mrb[116].mxu1 %v1441_v7  ;;  %v288_v7 = vld [vmem:[%s8794_s5 + $0x218] sm:$0xff] }
 0x260   : > { %4674 = vmatmul.mubr.f32.gmra.mrb[84].mxu0 %v1115_v9  ;;  %2833 = vmatprep.mubr.f32.mxu1 %v1463_v10  ;;  %v1304_v9 = vld [vmem:[%s8794_s5 + $0x21d8] sm:$0xff]  ;;  %v310_v10 = vld [vmem:[%s8794_s5 + $0x2c8] sm:$0xff] }
 0x261   : > { %4678 = vmatprep.mubr.f32.mxu0 %v1137_v11  ;;  %v6922_v11 = vpack.c.bf16 %v1668_v6, %v1667_v4  ;;  %v1452_v6 = vld [vmem:[%s8794_s5 + $0x2678] sm:$0xff] }
 0x263   : > { %2834 = vmatmul.mubr.f32.gmra.mrb[118].mxu1 %v1462_v14  ;;  %v1326_v14 = vld [vmem:[%s8794_s5 + $0x2288] sm:$0xff] }
 0x264   : > { %4679 = vmatmul.mubr.f32.gmra.mrb[86].mxu0 %v1136_v15  ;;  %2838 = vmatprep.mubr.f32.mxu1 %v1484_v16  ;;  %v1669_v15 = vld [vmem:[%s11940_s1 + $0x340] sm:$0xff]  ;;  %v1670_v16 = vld [vmem:[%s11940_s1 + $0x348] sm:$0xff] }
 0x265   : > { %4683 = vmatprep.mubr.f32.mxu0 %v1158_v17  ;;  %v309_v17 = vld [vmem:[%s8794_s5 + $0x2c0] sm:$0xff] }
 0x267   : > { %2839 = vmatmul.mubr.f32.gmra.mrb[120].mxu1 %v1483_v19  ;;  %v1325_v19 = vld [vmem:[%s8794_s5 + $0x2280] sm:$0xff] }
 0x268   : > { %4684 = vmatmul.mubr.f32.gmra.mrb[88].mxu0 %v1157_v21  ;;  %2843 = vmatprep.mubr.f32.mxu1 %v1505_v22  ;;  %v331_v21 = vld [vmem:[%s8794_s5 + $0x370] sm:$0xff]  ;;  %v6925_v22 = vpack.c.bf16 %v1670_v16, %v1669_v15  ;;  %v1473_v16 = vld [vmem:[%s8794_s5 + $0x2720] sm:$0xff] }
 0x269   : > { %4688 = vmatprep.mubr.f32.mxu0 %v1179_v23  ;;  %v1347_v23 = vld [vmem:[%s8794_s5 + $0x2330] sm:$0xff] }
 0x26b   : > { %2844 = vmatmul.mubr.f32.gmra.mrb[122].mxu1 %v1504_v25  ;;  %v1671_v25 = vld [vmem:[%s11940_s1 + $0x350] sm:$0xff] }
 0x26c   : > { %4689 = vmatmul.mubr.f32.gmra.mrb[90].mxu0 %v1178_v26  ;;  %2848 = vmatprep.mubr.f32.mxu1 %v1526_v28  ;;  %v1672_v26 = vld [vmem:[%s11940_s1 + $0x358] sm:$0xff]  ;;  %v330_v28 = vld [vmem:[%s8794_s5 + $0x368] sm:$0xff] }
 0x26d   : > { %4693 = vmatprep.mubr.f32.mxu0 %v1200_v29  ;;  %v1346_v29 = vld [vmem:[%s8794_s5 + $0x2328] sm:$0xff] }
 0x26f   : > { %2849 = vmatmul.mubr.f32.gmra.mrb[124].mxu1 %v1525_v31  ;;  %v352_v31 = vld [vmem:[%s8794_s5 + $0x418] sm:$0xff] }
 0x270   : > { %4694 = vmatmul.mubr.f32.gmra.mrb[92].mxu0 %v1199_v32  ;;  %2853 = vmatprep.mubr.f32.mxu1 %v1547_v33  ;;  %v6928_v32 = vpack.c.bf16 %v1672_v26, %v1671_v25  ;;  %v1368_v33 = vld [vmem:[%s8794_s5 + $0x23d8] sm:$0xff]  ;;  %v1493_v25 = vld [vmem:[%s8794_s5 + $0x27c0] sm:$0xff]  ;;  %v499_v26 = vld [vmem:[%s8794_s5 + $0x8b0] sm:$0xff] }
 0x271   : > { %4698 = vmatprep.mubr.f32.mxu0 %v1221_v35  ;;  %v1673_v35 = vld [vmem:[%s11940_s1 + $0x360] sm:$0xff] }
 0x273   : > { %2854 = vmatmul.mubr.f32.gmra.mrb[126].mxu1 %v1546_v37  ;;  %v1674_v37 = vld [vmem:[%s11940_s1 + $0x368] sm:$0xff] }
 0x274   : > { %4699 = vmatmul.mubr.f32.gmra.mrb[94].mxu0 %v1220_v38  ;;  %2923 = vmatprep.mubr.f32.mxu1 %v226_v39  ;;  %v351_v38 = vld [vmem:[%s8794_s5 + $0x410] sm:$0xff]  ;;  %v6931_v42 = vpack.c.bf16 %v1674_v37, %v1673_v35  ;;  %v1684_v35 = vld [vmem:[%s11940_s1 + $0x3b8] sm:$0xff] }
 0x275   : > { %4703 = vmatprep.mubr.f32.mxu0 %v1242_v43  ;;  %v1367_v39 = vld [vmem:[%s8794_s5 + $0x23d0] sm:$0xff]  ;;  %v1389_v43 = vld [vmem:[%s8794_s5 + $0x2480] sm:$0xff]  ;;  %v1536_v37 = vld [vmem:[%s8794_s5 + $0x2918] sm:$0xff] }
 0x277   : > { %2924 = vmatmul.mubr.f32.vlgmr.msra.gmra.mrb[0].mxu1 %v225_v45  ;;  %v1675_v45 = vld [vmem:[%s11940_s1 + $0x370] sm:$0xff] }
 0x278   : > { %4704 = vmatmul.mubr.f32.gmra.mrb[96].mxu0 %v1241_v47  ;;  %6914 = vmatpush1.bf16.msra.mxu1 %v6913_v46  ;;  %v1676_v46 = vld [vmem:[%s11940_s1 + $0x378] sm:$0xff] }
 0x279   : > { %2928 = vmatprep.mubr.f32.mxu1 %v247_v48  ;;  %4708 = vmatprep.mubr.f32.mxu0 %v1263_v49  ;;  %v372_v47 = vld [vmem:[%s8794_s5 + $0x4b8] sm:$0xff]  ;;  %v394_v49 = vld [vmem:[%s8794_s5 + $0x568] sm:$0xff]  ;;  %v6934_v51 = vpack.c.bf16 %v1676_v46, %v1675_v45 }
 0x27a   : > { %6915 = vmatprep.subr.bf16.mxu1 %v8683_v0  ;;  %v1388_v48 = vld [vmem:[%s8794_s5 + $0x2478] sm:$0xff] }
 0x27b   : > { %2929 = vmatmul.mubr.f32.gmra.mrb[2].mxu1 %v246_v53  ;;  %v1677_v53 = vld [vmem:[%s11940_s1 + $0x380] sm:$0xff]  ;;  %v540_v45 = vld [vmem:[%s8794_s5 + $0x9f8] sm:$0xff] }
 0x27c   : > { %4709 = vmatmul.mubr.f32.gmra.mrb[98].mxu0 %v1262_v54  ;;  %2933 = vmatprep.mubr.f32.mxu1 %v268_v55  ;;  %v1678_v54 = vld [vmem:[%s11940_s1 + $0x388] sm:$0xff]  ;;  %v393_v55 = vld [vmem:[%s8794_s5 + $0x560] sm:$0xff]  ;;  %v1556_v46 = vld [vmem:[%s8794_s5 + $0x29b8] sm:$0xff] }
 0x27d   : > { %4713 = vmatprep.mubr.f32.mxu0 %v1284_v58  ;;  %6917 = vmatpush1.bf16.msra.mxu1 %v6916_v57  ;;  %v1409_v57 = vld [vmem:[%s8794_s5 + $0x2520] sm:$0xff]  ;;  %v415_v58 = vld [vmem:[%s8794_s5 + $0x610] sm:$0xff]  ;;  %v6937_v59 = vpack.c.bf16 %v1678_v54, %v1677_v53 }
 0x27e   : > { %6918 = vmatprep.subr.bf16.mxu1 %v8683_v0  ;;  %v235_v53 = vld [vmem:[%s8794_s5 + $0x70] sm:$0xff] }
 0x27f   : > { %2934 = vmatmul.mubr.f32.gmra.mrb[4].mxu1 %v267_v61  ;;  %v1679_v61 = vld [vmem:[%s11940_s1 + $0x390] sm:$0xff] }
 0x280   : > { %4714 = vmatmul.mubr.f32.gmra.mrb[100].mxu0 %v1283_v63  ;;  %2938 = vmatprep.mubr.f32.mxu1 %v289_v1  ;;  %v1680_v63 = vld [vmem:[%s11940_s1 + $0x398] sm:$0xff]  ;;  %v414_v1 = vld [vmem:[%s8794_s5 + $0x608] sm:$0xff] }
 0x281   : > { %4718 = vmatprep.mubr.f32.mxu0 %v1305_v3  ;;  %6920 = vmatpush1.bf16.msra.mxu1 %v6919_v2  ;;  %v1430_v2 = vld [vmem:[%s8794_s5 + $0x25c8] sm:$0xff]  ;;  %v436_v3 = vld [vmem:[%s8794_s5 + $0x6b8] sm:$0xff]  ;;  %v6940_v4 = vpack.c.bf16 %v1680_v63, %v1679_v61  ;;  %v1685_v61 = vld [vmem:[%s11940_s1 + $0x3c0] sm:$0xff] }
 0x282   : > { %6921 = vmatprep.subr.bf16.mxu1 %v8683_v0  ;;  %v256_v63 = vld [vmem:[%s8794_s5 + $0x118] sm:$0xff] }
 0x283   : > { %2939 = vmatmul.mubr.f32.gmra.mrb[6].mxu1 %v288_v7  ;;  %v1681_v7 = vld [vmem:[%s11940_s1 + $0x3a0] sm:$0xff] }
 0x284   : > { %4719 = vmatmul.mubr.f32.gmra.mrb[102].mxu0 %v1304_v9  ;;  %2943 = vmatprep.mubr.f32.mxu1 %v310_v10  ;;  %v1682_v9 = vld [vmem:[%s11940_s1 + $0x3a8] sm:$0xff]  ;;  %v435_v10 = vld [vmem:[%s8794_s5 + $0x6b0] sm:$0xff] }
 0x285   : > { %4723 = vmatprep.mubr.f32.mxu0 %v1326_v14  ;;  %6923 = vmatpush1.bf16.msra.mxu1 %v6922_v11  ;;  %v1451_v11 = vld [vmem:[%s8794_s5 + $0x2670] sm:$0xff]  ;;  %v457_v14 = vld [vmem:[%s8794_s5 + $0x760] sm:$0xff]  ;;  %v6943_v15 = vpack.c.bf16 %v1682_v9, %v1681_v7  ;;  %v1826_v7 = vld [vmem:[%s11940_s1 + $0x828] sm:$0xff] }
 0x286   : > { %6924 = vmatprep.subr.bf16.mxu1 %v8683_v0 }
 0x287   : > { %2944 = vmatmul.mubr.f32.gmra.mrb[8].mxu1 %v309_v17  ;;  %v456_v17 = vld [vmem:[%s8794_s5 + $0x758] sm:$0xff] }
 0x288   : > { %4724 = vmatmul.mubr.f32.gmra.mrb[104].mxu0 %v1325_v19  ;;  %2948 = vmatprep.mubr.f32.mxu1 %v331_v21  ;;  %v1472_v19 = vld [vmem:[%s8794_s5 + $0x2718] sm:$0xff]  ;;  %v478_v21 = vld [vmem:[%s8794_s5 + $0x808] sm:$0xff] }
 0x289   : > { %4728 = vmatprep.mubr.f32.mxu0 %v1347_v23  ;;  %6926 = vmatpush1.bf16.msra.mxu1 %v6925_v22  ;;  %v1494_v22 = vld [vmem:[%s8794_s5 + $0x27c8] sm:$0xff]  ;;  %v477_v23 = vld [vmem:[%s8794_s5 + $0x800] sm:$0xff] }
 0x28a   : > { %6927 = vmatprep.subr.bf16.mxu1 %v8683_v0 }
 0x28b   : > { %2949 = vmatmul.mubr.f32.gmra.mrb[10].mxu1 %v330_v28  ;;  %v1515_v28 = vld [vmem:[%s8794_s5 + $0x2870] sm:$0xff] }
 0x28c   : > { %4729 = vmatmul.mubr.f32.gmra.mrb[106].mxu0 %v1346_v29  ;;  %2953 = vmatprep.mubr.f32.mxu1 %v352_v31  ;;  %v498_v29 = vld [vmem:[%s8794_s5 + $0x8a8] sm:$0xff]  ;;  %v1683_v31 = vld [vmem:[%s11940_s1 + $0x3b0] sm:$0xff] }
 0x28d   : > { %4733 = vmatprep.mubr.f32.mxu0 %v1368_v33  ;;  %6929 = vmatpush1.bf16.msra.mxu1 %v6928_v32  ;;  %v1514_v32 = vld [vmem:[%s8794_s5 + $0x2868] sm:$0xff]  ;;  %v520_v33 = vld [vmem:[%s8794_s5 + $0x958] sm:$0xff] }
 0x28e   : > { %6930 = vmatprep.subr.bf16.mxu1 %v8683_v0 }
 0x28f   : > { %2954 = vmatmul.mubr.f32.gmra.mrb[12].mxu1 %v351_v38  ;;  %v6946_v38 = vpack.c.bf16 %v1684_v35, %v1683_v31  ;;  %v645_v31 = vld [vmem:[%s8794_s5 + $0xd40] sm:$0xff] }
 0x290   : > { %4734 = vmatmul.mubr.f32.gmra.mrb[108].mxu0 %v1367_v39  ;;  %2958 = vmatprep.mubr.f32.mxu1 %v373_v40  ;;  %v519_v39 = vld [vmem:[%s8794_s5 + $0x950] sm:$0xff] }
 0x291   : > { %4738 = vmatprep.mubr.f32.mxu0 %v1389_v43  ;;  %6932 = vmatpush1.bf16.msra.mxu1 %v6931_v42  ;;  %v1535_v40 = vld [vmem:[%s8794_s5 + $0x2910] sm:$0xff]  ;;  %v541_v42 = vld [vmem:[%s8794_s5 + $0xa00] sm:$0xff] }
 0x292   : > { %6933 = vmatprep.subr.bf16.mxu1 %v8683_v0  ;;  %v1557_v43 = vld [vmem:[%s8794_s5 + $0x29c0] sm:$0xff] }
 0x293   : > { %2959 = vmatmul.mubr.f32.gmra.mrb[14].mxu1 %v372_v47  ;;  %v562_v47 = vld [vmem:[%s8794_s5 + $0xaa8] sm:$0xff] }
 0x294   : > { %4739 = vmatmul.mubr.f32.gmra.mrb[110].mxu0 %v1388_v48  ;;  %2963 = vmatprep.mubr.f32.mxu1 %v394_v49  ;;  %v236_v48 = vld [vmem:[%s8794_s5 + $0x78] sm:$0xff]  ;;  %v1821_v49 = vld [vmem:[%s11940_s1 + $0x800] sm:$0xff] }
 0x295   : > { %4743 = vmatprep.mubr.f32.mxu0 %v1410_v52  ;;  %6935 = vmatpush1.bf16.msra.mxu1 %v6934_v51  ;;  %v1822_v51 = vld [vmem:[%s11940_s1 + $0x808] sm:$0xff]  ;;  %v561_v52 = vld [vmem:[%s8794_s5 + $0xaa0] sm:$0xff] }
 0x296   : > { %6936 = vmatprep.subr.bf16.mxu1 %v8683_v0  ;;  %v7153_v54 = vpack.c.bf16 %v1822_v51, %v1821_v49  ;;  %v1833_v49 = vld [vmem:[%s11940_s1 + $0x860] sm:$0xff]  ;;  %v1834_v51 = vld [vmem:[%s11940_s1 + $0x868] sm:$0xff] }
 0x297   : > { %2964 = vmatmul.mubr.f32.gmra.mrb[16].mxu1 %v393_v55  ;;  %v583_v55 = vld [vmem:[%s8794_s5 + $0xb50] sm:$0xff] }
 0x298   : > { %4744 = vmatmul.mubr.f32.gmra.mrb[112].mxu0 %v1409_v57  ;;  %2968 = vmatprep.mubr.f32.mxu1 %v415_v58  ;;  %v257_v57 = vld [vmem:[%s8794_s5 + $0x120] sm:$0xff]  ;;  %v1823_v58 = vld [vmem:[%s11940_s1 + $0x810] sm:$0xff] }
 0x299   : > { %4748 = vmatprep.mubr.f32.mxu0 %v1431_v60  ;;  %6938 = vmatpush1.bf16.msra.mxu1 %v6937_v59  ;;  %v1824_v59 = vld [vmem:[%s11940_s1 + $0x818] sm:$0xff]  ;;  %v582_v60 = vld [vmem:[%s8794_s5 + $0xb48] sm:$0xff] }
 0x29a   : > { %6939 = vmatprep.subr.bf16.mxu1 %v8683_v0 }
 0x29b   : > { %2969 = vmatmul.mubr.f32.gmra.mrb[18].mxu1 %v414_v1  ;;  %v604_v1 = vld [vmem:[%s8794_s5 + $0xbf8] sm:$0xff] }
 0x29c   : > { %4749 = vmatmul.mubr.f32.gmra.mrb[114].mxu0 %v1430_v2  ;;  %2973 = vmatprep.mubr.f32.mxu1 %v436_v3  ;;  %v7156_v2 = vpack.c.bf16 %v1824_v59, %v1823_v58  ;;  %v1686_v3 = vld [vmem:[%s11940_s1 + $0x3c8] sm:$0xff]  ;;  %v383_v58 = vld [vmem:[%s8794_s5 + $0x510] sm:$0xff] }
 0x29d   : > { %4753 = vmatprep.mubr.f32.mxu0 %v1452_v6  ;;  %6941 = vmatpush1.bf16.msra.mxu1 %v6940_v4  ;;  %v278_v4 = vld [vmem:[%s8794_s5 + $0x1c8] sm:$0xff]  ;;  %v1825_v6 = vld [vmem:[%s11940_s1 + $0x820] sm:$0xff]  ;;  %v6949_v9 = vpack.c.bf16 %v1686_v3, %v1685_v61  ;;  %v1835_v59 = vld [vmem:[%s11940_s1 + $0x870] sm:$0xff] }
 0x29e   : > { %6942 = vmatprep.subr.bf16.mxu1 %v8683_v0  ;;  %v708_v61 = vld [vmem:[%s8794_s5 + $0xf38] sm:$0xff] }
 0x29f   : > { %2974 = vmatmul.mubr.f32.gmra.mrb[20].mxu1 %v435_v10  ;;  %v603_v10 = vld [vmem:[%s8794_s5 + $0xbf0] sm:$0xff]  ;;  %v404_v3 = vld [vmem:[%s8794_s5 + $0x5b8] sm:$0xff] }
 0x2a0   : > { %4754 = vmatmul.mubr.f32.gmra.mrb[116].mxu0 %v1451_v11  ;;  %2978 = vmatprep.mubr.f32.mxu1 %v457_v14  ;;  %v277_v11 = vld [vmem:[%s8794_s5 + $0x1c0] sm:$0xff] }
 0x2a1   : > { %4758 = vmatprep.mubr.f32.mxu0 %v1473_v16  ;;  %6944 = vmatpush1.bf16.msra.mxu1 %v6943_v15  ;;  %v625_v14 = vld [vmem:[%s8794_s5 + $0xca0] sm:$0xff]  ;;  %v7159_v15 = vpack.c.bf16 %v1826_v7, %v1825_v6  ;;  %v299_v16 = vld [vmem:[%s8794_s5 + $0x270] sm:$0xff]  ;;  %v1838_v6 = vld [vmem:[%s11940_s1 + $0x888] sm:$0xff] }
 0x2a2   : > { %6945 = vmatprep.subr.bf16.mxu1 %v8683_v0  ;;  %v729_v7 = vld [vmem:[%s8794_s5 + $0xfe0] sm:$0xff] }
 0x2a3   : > { %2979 = vmatmul.mubr.f32.gmra.mrb[22].mxu1 %v456_v17  ;;  %v1827_v17 = vld [vmem:[%s11940_s1 + $0x830] sm:$0xff] }
 0x2a4   : > { %4759 = vmatmul.mubr.f32.gmra.mrb[118].mxu0 %v1472_v19  ;;  %2983 = vmatprep.mubr.f32.mxu1 %v478_v21  ;;  %v1828_v19 = vld [vmem:[%s11940_s1 + $0x838] sm:$0xff] }
 0x2a5   : > { %4763 = vmatprep.mubr.f32.mxu0 %v1494_v22  ;;  %6947 = vmatpush1.bf16.msra.mxu1 %v6946_v38  ;;  %v624_v21 = vld [vmem:[%s8794_s5 + $0xc98] sm:$0xff]  ;;  %v298_v22 = vld [vmem:[%s8794_s5 + $0x268] sm:$0xff]  ;;  %v1831_v38 = vld [vmem:[%s11940_s1 + $0x850] sm:$0xff] }
 0x2a6   : > { %6948 = vmatprep.subr.bf16.mxu1 %v8683_v0 }
 0x2a7   : > { %2984 = vmatmul.mubr.f32.gmra.mrb[24].mxu1 %v477_v23  ;;  %v646_v23 = vld [vmem:[%s8794_s5 + $0xd48] sm:$0xff] }
 0x2a8   : > { %4764 = vmatmul.mubr.f32.gmra.mrb[120].mxu0 %v1493_v25  ;;  %2988 = vmatprep.mubr.f32.mxu1 %v499_v26  ;;  %v7162_v25 = vpack.c.bf16 %v1828_v19, %v1827_v17  ;;  %v320_v26 = vld [vmem:[%s8794_s5 + $0x318] sm:$0xff]  ;;  %v750_v17 = vld [vmem:[%s8794_s5 + $0x1088] sm:$0xff]  ;;  %v1689_v19 = vld [vmem:[%s11940_s1 + $0x3e0] sm:$0xff] }
 0x2a9   : > { %4768 = vmatprep.mubr.f32.mxu0 %v1515_v28  ;;  %6950 = vmatpush1.bf16.msra.mxu1 %v6949_v9  ;;  %v1829_v28 = vld [vmem:[%s11940_s1 + $0x840] sm:$0xff]  ;;  %v403_v9 = vld [vmem:[%s8794_s5 + $0x5b0] sm:$0xff] }
 0x2aa   : > { %6951 = vmatprep.subr.bf16.mxu1 %v8683_v0 }
 0x2ab   : > { %2989 = vmatmul.mubr.f32.gmra.mrb[26].mxu1 %v498_v29  ;;  %v1830_v29 = vld [vmem:[%s11940_s1 + $0x848] sm:$0xff] }
 0x2ac   : > { %4769 = vmatmul.mubr.f32.gmra.mrb[122].mxu0 %v1514_v32  ;;  %2993 = vmatprep.mubr.f32.mxu1 %v520_v33  ;;  %v319_v32 = vld [vmem:[%s8794_s5 + $0x310] sm:$0xff]  ;;  %v7165_v35 = vpack.c.bf16 %v1830_v29, %v1829_v28  ;;  %v1841_v28 = vld [vmem:[%s11940_s1 + $0x8a0] sm:$0xff]  ;;  %v1842_v29 = vld [vmem:[%s11940_s1 + $0x8a8] sm:$0xff] }
 0x2ad   : > { %4773 = vmatprep.mubr.f32.mxu0 %v1536_v37  ;;  %v667_v33 = vld [vmem:[%s8794_s5 + $0xdf0] sm:$0xff]  ;;  %v341_v37 = vld [vmem:[%s8794_s5 + $0x3c0] sm:$0xff] }
 0x2af   : > { %2994 = vmatmul.mubr.f32.gmra.mrb[28].mxu1 %v519_v39  ;;  %v1832_v39 = vld [vmem:[%s11940_s1 + $0x858] sm:$0xff] }
 0x2b0   : > { %4774 = vmatmul.mubr.f32.gmra.mrb[124].mxu0 %v1535_v40  ;;  %2998 = vmatprep.mubr.f32.mxu1 %v541_v42  ;;  %v666_v40 = vld [vmem:[%s8794_s5 + $0xde8] sm:$0xff]  ;;  %v1687_v42 = vld [vmem:[%s11940_s1 + $0x3d0] sm:$0xff] }
 0x2b1   : > { %4778 = vmatprep.mubr.f32.mxu0 %v1557_v43  ;;  %v340_v43 = vld [vmem:[%s8794_s5 + $0x3b8] sm:$0xff] }
 0x2b3   : > { %2999 = vmatmul.mubr.f32.gmra.mrb[30].mxu1 %v540_v45  ;;  %v688_v45 = vld [vmem:[%s8794_s5 + $0xe98] sm:$0xff] }
 0x2b4   : > { %4779 = vmatmul.mubr.f32.gmra.mrb[126].mxu0 %v1556_v46  ;;  %3003 = vmatprep.mubr.f32.mxu1 %v562_v47  ;;  %v7168_v46 = vpack.c.bf16 %v1832_v39, %v1831_v38  ;;  %v1688_v47 = vld [vmem:[%s11940_s1 + $0x3d8] sm:$0xff]  ;;  %v467_v38 = vld [vmem:[%s8794_s5 + $0x7b0] sm:$0xff] }
 0x2b5   : > { %4848 = vmatprep.mubr.f32.mxu0 %v236_v48  ;;  %v362_v48 = vld [vmem:[%s8794_s5 + $0x468] sm:$0xff]  ;;  %v792_v39 = vld [vmem:[%s8794_s5 + $0x11d8] sm:$0xff] }
 0x2b7   : > { %3004 = vmatmul.mubr.f32.gmra.mrb[32].mxu1 %v561_v52  ;;  %v6952_v52 = vpack.c.bf16 %v1688_v47, %v1687_v42  ;;  %v814_v42 = vld [vmem:[%s8794_s5 + $0x1288] sm:$0xff]  ;;  %v835_v47 = vld [vmem:[%s8794_s5 + $0x1330] sm:$0xff] }
 0x2b8   : > { %4849 = vmatmul.mubr.f32.vlgmr.msra.gmra.mrb[0].mxu0 %v235_v53  ;;  %3008 = vmatprep.mubr.f32.mxu1 %v583_v55  ;;  %v687_v53 = vld [vmem:[%s8794_s5 + $0xe90] sm:$0xff]  ;;  %v709_v55 = vld [vmem:[%s8794_s5 + $0xf40] sm:$0xff] }
 0x2b9   : > { %7154 = vmatpush1.bf16.msra.mxu0 %v7153_v54  ;;  %4853 = vmatprep.mubr.f32.mxu0 %v257_v57  ;;  %v361_v54 = vld [vmem:[%s8794_s5 + $0x460] sm:$0xff]  ;;  %v7171_v57 = vpack.c.bf16 %v1834_v51, %v1833_v49  ;;  %v834_v49 = vld [vmem:[%s8794_s5 + $0x1328] sm:$0xff]  ;;  %v1843_v51 = vld [vmem:[%s11940_s1 + $0x8b0] sm:$0xff] }
 0x2ba   : > { %7155 = vmatprep.subr.bf16.mxu0 %v8683_v0  ;;  %6953 = vmatpush1.bf16.msra.mxu1 %v6952_v52  ;;  %v1844_v52 = vld [vmem:[%s11940_s1 + $0x8b8] sm:$0xff] }
 0x2bb   : > { %3009 = vmatmul.mubr.f32.gmra.mrb[34].mxu1 %v582_v60  ;;  %v1836_v60 = vld [vmem:[%s11940_s1 + $0x878] sm:$0xff]  ;;  %6954 = vmatprep.subr.bf16.mxu1 %v8683_v0 }
 0x2bc   : > { %4854 = vmatmul.mubr.f32.gmra.mrb[2].mxu0 %v256_v63  ;;  %3013 = vmatprep.mubr.f32.mxu1 %v604_v1  ;;  %v382_v63 = vld [vmem:[%s8794_s5 + $0x508] sm:$0xff] }
 0x2bd   : > { %4858 = vmatprep.mubr.f32.mxu0 %v278_v4  ;;  %7157 = vmatpush1.bf16.msra.mxu0 %v7156_v2  ;;  %v730_v1 = vld [vmem:[%s8794_s5 + $0xfe8] sm:$0xff]  ;;  %v7174_v2 = vpack.c.bf16 %v1836_v60, %v1835_v59  ;;  %v1837_v4 = vld [vmem:[%s11940_s1 + $0x880] sm:$0xff] }
 0x2be   : > { %7158 = vmatprep.subr.bf16.mxu0 %v8683_v0  ;;  %v530_v59 = vld [vmem:[%s8794_s5 + $0x9a8] sm:$0xff] }
 0x2bf   : > { %3014 = vmatmul.mubr.f32.gmra.mrb[36].mxu1 %v603_v10  ;;  %v751_v10 = vld [vmem:[%s8794_s5 + $0x1090] sm:$0xff] }
 0x2c0   : > { %4859 = vmatmul.mubr.f32.gmra.mrb[4].mxu0 %v277_v11  ;;  %3018 = vmatprep.mubr.f32.mxu1 %v625_v14  ;;  %v7177_v11 = vpack.c.bf16 %v1838_v6, %v1837_v4  ;;  %v425_v14 = vld [vmem:[%s8794_s5 + $0x660] sm:$0xff]  ;;  %v550_v4 = vld [vmem:[%s8794_s5 + $0xa48] sm:$0xff] }
 0x2c1   : > { %4863 = vmatprep.mubr.f32.mxu0 %v299_v16  ;;  %7160 = vmatpush1.bf16.msra.mxu0 %v7159_v15  ;;  %v1839_v15 = vld [vmem:[%s11940_s1 + $0x890] sm:$0xff]  ;;  %v1840_v16 = vld [vmem:[%s11940_s1 + $0x898] sm:$0xff]  ;;  %v898_v6 = vld [vmem:[%s8794_s5 + $0x1528] sm:$0xff] }
 0x2c2   : > { %7161 = vmatprep.subr.bf16.mxu0 %v8683_v0 }
 0x2c3   : > { %3019 = vmatmul.mubr.f32.gmra.mrb[38].mxu1 %v624_v21  ;;  %v424_v21 = vld [vmem:[%s8794_s5 + $0x658] sm:$0xff] }
 0x2c4   : > { %4864 = vmatmul.mubr.f32.gmra.mrb[6].mxu0 %v298_v22  ;;  %3023 = vmatprep.mubr.f32.mxu1 %v646_v23  ;;  %v772_v22 = vld [vmem:[%s8794_s5 + $0x1138] sm:$0xff]  ;;  %v7180_v23 = vpack.c.bf16 %v1840_v16, %v1839_v15  ;;  %v918_v15 = vld [vmem:[%s8794_s5 + $0x15c8] sm:$0xff]  ;;  %v1845_v16 = vld [vmem:[%s11940_s1 + $0x8c0] sm:$0xff] }
 0x2c5   : > { %4868 = vmatprep.mubr.f32.mxu0 %v320_v26  ;;  %7163 = vmatpush1.bf16.msra.mxu0 %v7162_v25  ;;  %v1690_v25 = vld [vmem:[%s11940_s1 + $0x3e8] sm:$0xff] }
 0x2c6   : > { %7164 = vmatprep.subr.bf16.mxu0 %v8683_v0  ;;  %v446_v26 = vld [vmem:[%s8794_s5 + $0x708] sm:$0xff] }
 0x2c7   : > { %3024 = vmatmul.mubr.f32.gmra.mrb[40].mxu1 %v645_v31  ;;  %v6955_v31 = vpack.c.bf16 %v1690_v25, %v1689_v19  ;;  %v592_v19 = vld [vmem:[%s8794_s5 + $0xb98] sm:$0xff]  ;;  %v939_v25 = vld [vmem:[%s8794_s5 + $0x1670] sm:$0xff] }
 0x2c8   : > { %4869 = vmatmul.mubr.f32.gmra.mrb[8].mxu0 %v319_v32  ;;  %3028 = vmatprep.mubr.f32.mxu1 %v667_v33  ;;  %v771_v32 = vld [vmem:[%s8794_s5 + $0x1130] sm:$0xff]  ;;  %v445_v33 = vld [vmem:[%s8794_s5 + $0x700] sm:$0xff] }
 0x2c9   : > { %4873 = vmatprep.mubr.f32.mxu0 %v341_v37  ;;  %7166 = vmatpush1.bf16.msra.mxu0 %v7165_v35  ;;  %v793_v35 = vld [vmem:[%s8794_s5 + $0x11e0] sm:$0xff]  ;;  %v7183_v37 = vpack.c.bf16 %v1842_v29, %v1841_v28  ;;  %v635_v29 = vld [vmem:[%s8794_s5 + $0xcf0] sm:$0xff] }
 0x2ca   : > { %7167 = vmatprep.subr.bf16.mxu0 %v8683_v0  ;;  %6956 = vmatpush1.bf16.msra.mxu1 %v6955_v31  ;;  %v961_v28 = vld [vmem:[%s8794_s5 + $0x1720] sm:$0xff]  ;;  %v960_v31 = vld [vmem:[%s8794_s5 + $0x1718] sm:$0xff] }
 0x2cb   : > { %3029 = vmatmul.mubr.f32.gmra.mrb[42].mxu1 %v666_v40  ;;  %6957 = vmatprep.subr.bf16.mxu1 %v8683_v0  ;;  %v466_v40 = vld [vmem:[%s8794_s5 + $0x7a8] sm:$0xff] }
 0x2cc   : > { %4874 = vmatmul.mubr.f32.gmra.mrb[10].mxu0 %v340_v43  ;;  %3033 = vmatprep.mubr.f32.mxu1 %v688_v45  ;;  %v488_v43 = vld [vmem:[%s8794_s5 + $0x858] sm:$0xff]  ;;  %v813_v45 = vld [vmem:[%s8794_s5 + $0x1280] sm:$0xff] }
 0x2cd   : > { %4878 = vmatprep.mubr.f32.mxu0 %v362_v48  ;;  %7169 = vmatpush1.bf16.msra.mxu0 %v7168_v46  ;;  %v487_v46 = vld [vmem:[%s8794_s5 + $0x850] sm:$0xff]  ;;  %v509_v48 = vld [vmem:[%s8794_s5 + $0x900] sm:$0xff] }
 0x2ce   : > { %7170 = vmatprep.subr.bf16.mxu0 %v8683_v0 }
 0x2cf   : > { %3034 = vmatmul.mubr.f32.gmra.mrb[44].mxu1 %v687_v53  ;;  %v1691_v53 = vld [vmem:[%s11940_s1 + $0x3f0] sm:$0xff] }
 0x2d0   : > { %4879 = vmatmul.mubr.f32.gmra.mrb[12].mxu0 %v361_v54  ;;  %3038 = vmatprep.mubr.f32.mxu1 %v709_v55  ;;  %v508_v54 = vld [vmem:[%s8794_s5 + $0x8f8] sm:$0xff] }
 0x2d1   : > { %4883 = vmatprep.mubr.f32.mxu0 %v383_v58  ;;  %7172 = vmatpush1.bf16.msra.mxu0 %v7171_v57  ;;  %v856_v55 = vld [vmem:[%s8794_s5 + $0x13d8] sm:$0xff]  ;;  %v7186_v57 = vpack.c.bf16 %v1844_v52, %v1843_v51  ;;  %v1023_v51 = vld [vmem:[%s8794_s5 + $0x1910] sm:$0xff]  ;;  %v697_v52 = vld [vmem:[%s8794_s5 + $0xee0] sm:$0xff] }
 0x2d2   : > { %7173 = vmatprep.subr.bf16.mxu0 %v8683_v0  ;;  %v1692_v58 = vld [vmem:[%s11940_s1 + $0x3f8] sm:$0xff] }
 0x2d3   : > { %3039 = vmatmul.mubr.f32.gmra.mrb[46].mxu1 %v708_v61  ;;  %v6958_v60 = vpack.c.bf16 %v1692_v58, %v1691_v53  ;;  %v855_v61 = vld [vmem:[%s8794_s5 + $0x13d0] sm:$0xff]  ;;  %v1045_v53 = vld [vmem:[%s8794_s5 + $0x19c0] sm:$0xff]  ;;  %v1066_v58 = vld [vmem:[%s8794_s5 + $0x1a68] sm:$0xff] }
 0x2d4   : > { %4884 = vmatmul.mubr.f32.gmra.mrb[14].mxu0 %v382_v63  ;;  %3043 = vmatprep.mubr.f32.mxu1 %v730_v1  ;;  %v529_v63 = vld [vmem:[%s8794_s5 + $0x9a0] sm:$0xff] }
 0x2d5   : > { %4888 = vmatprep.mubr.f32.mxu0 %v404_v3  ;;  %7175 = vmatpush1.bf16.msra.mxu0 %v7174_v2  ;;  %v877_v1 = vld [vmem:[%s8794_s5 + $0x1480] sm:$0xff]  ;;  %v551_v2 = vld [vmem:[%s8794_s5 + $0xa50] sm:$0xff]  ;;  %v876_v3 = vld [vmem:[%s8794_s5 + $0x1478] sm:$0xff] }
 0x2d6   : > { %7176 = vmatprep.subr.bf16.mxu0 %v8683_v0  ;;  %6959 = vmatpush1.bf16.msra.mxu1 %v6958_v60  ;;  %v1065_v60 = vld [vmem:[%s8794_s5 + $0x1a60] sm:$0xff] }
 0x2d7   : > { %3044 = vmatmul.mubr.f32.gmra.mrb[48].mxu1 %v729_v7  ;;  %7256 = vmatprep.subr.bf16.mxu1 %v8683_v0  ;;  %v572_v7 = vld [vmem:[%s8794_s5 + $0xaf8] sm:$0xff] }
 0x2d8   : > { %4889 = vmatmul.mubr.f32.gmra.mrb[16].mxu0 %v403_v9  ;;  %3048 = vmatprep.mubr.f32.mxu1 %v751_v10  ;;  %v897_v9 = vld [vmem:[%s8794_s5 + $0x1520] sm:$0xff]  ;;  %v571_v10 = vld [vmem:[%s8794_s5 + $0xaf0] sm:$0xff] }
 0x2d9   : > { %4893 = vmatprep.mubr.f32.mxu0 %v425_v14  ;;  %7178 = vmatpush1.bf16.msra.mxu0 %v7177_v11  ;;  %v919_v11 = vld [vmem:[%s8794_s5 + $0x15d0] sm:$0xff]  ;;  %v593_v14 = vld [vmem:[%s8794_s5 + $0xba0] sm:$0xff] }
 0x2da   : > { %7179 = vmatprep.subr.bf16.mxu0 %v8683_v0 }
 0x2db   : > { %3049 = vmatmul.mubr.f32.gmra.mrb[50].mxu1 %v750_v17  ;;  %v1846_v17 = vld [vmem:[%s11940_s1 + $0x8c8] sm:$0xff] }
 0x2dc   : > { %4894 = vmatmul.mubr.f32.gmra.mrb[18].mxu0 %v424_v21  ;;  %3053 = vmatprep.mubr.f32.mxu1 %v772_v22  ;;  %v940_v21 = vld [vmem:[%s8794_s5 + $0x1678] sm:$0xff]  ;;  %v7189_v22 = vpack.c.bf16 %v1846_v17, %v1845_v16  ;;  %v803_v16 = vld [vmem:[%s8794_s5 + $0x1230] sm:$0xff] }
 0x2dd   : > { %4898 = vmatprep.mubr.f32.mxu0 %v446_v26  ;;  %7181 = vmatpush1.bf16.msra.mxu0 %v7180_v23  ;;  %v614_v23 = vld [vmem:[%s8794_s5 + $0xc48] sm:$0xff]  ;;  %v613_v26 = vld [vmem:[%s8794_s5 + $0xc40] sm:$0xff]  ;;  %v1128_v17 = vld [vmem:[%s8794_s5 + $0x1c58] sm:$0xff] }
 0x2de   : > { %7182 = vmatprep.subr.bf16.mxu0 %v8683_v0 }
 0x2df   : > { %3054 = vmatmul.mubr.f32.gmra.mrb[52].mxu1 %v771_v32  ;;  %v634_v32 = vld [vmem:[%s8794_s5 + $0xce8] sm:$0xff] }
 0x2e0   : > { %4899 = vmatmul.mubr.f32.gmra.mrb[20].mxu0 %v445_v33  ;;  %3058 = vmatprep.mubr.f32.mxu1 %v793_v35  ;;  %v982_v33 = vld [vmem:[%s8794_s5 + $0x17c8] sm:$0xff]  ;;  %v656_v35 = vld [vmem:[%s8794_s5 + $0xd98] sm:$0xff] }
 0x2e1   : > { %4903 = vmatprep.mubr.f32.mxu0 %v467_v38  ;;  %7184 = vmatpush1.bf16.msra.mxu0 %v7183_v37  ;;  %v981_v37 = vld [vmem:[%s8794_s5 + $0x17c0] sm:$0xff]  ;;  %v655_v38 = vld [vmem:[%s8794_s5 + $0xd90] sm:$0xff] }
 0x2e2   : > { %7185 = vmatprep.subr.bf16.mxu0 %v8683_v0 }
 0x2e3   : > { %3059 = vmatmul.mubr.f32.gmra.mrb[54].mxu1 %v792_v39  ;;  %v1003_v39 = vld [vmem:[%s8794_s5 + $0x1870] sm:$0xff] }
 0x2e4   : > { %4904 = vmatmul.mubr.f32.gmra.mrb[22].mxu0 %v466_v40  ;;  %3063 = vmatprep.mubr.f32.mxu1 %v814_v42  ;;  %v677_v40 = vld [vmem:[%s8794_s5 + $0xe40] sm:$0xff]  ;;  %v1002_v42 = vld [vmem:[%s8794_s5 + $0x1868] sm:$0xff] }
 0x2e5   : > { %4908 = vmatprep.mubr.f32.mxu0 %v488_v43  ;;  %7187 = vmatpush1.bf16.msra.mxu0 %v7186_v57  ;;  %v1847_v43 = vld [vmem:[%s11940_s1 + $0x8d0] sm:$0xff]  ;;  %v718_v57 = vld [vmem:[%s8794_s5 + $0xf88] sm:$0xff] }
 0x2e6   : > { %7188 = vmatprep.subr.bf16.mxu0 %v8683_v0 }
 0x2e7   : > { %3064 = vmatmul.mubr.f32.gmra.mrb[56].mxu1 %v813_v45  ;;  %v1848_v45 = vld [vmem:[%s11940_s1 + $0x8d8] sm:$0xff] }
 0x2e8   : > { %4909 = vmatmul.mubr.f32.gmra.mrb[24].mxu0 %v487_v46  ;;  %3068 = vmatprep.mubr.f32.mxu1 %v835_v47  ;;  %v676_v46 = vld [vmem:[%s8794_s5 + $0xe38] sm:$0xff] }
 0x2e9   : > { %4913 = vmatprep.mubr.f32.mxu0 %v509_v48  ;;  %7190 = vmatpush1.bf16.msra.mxu0 %v7189_v22  ;;  %v1024_v47 = vld [vmem:[%s8794_s5 + $0x1918] sm:$0xff]  ;;  %v7192_v48 = vpack.c.bf16 %v1848_v45, %v1847_v43  ;;  %v887_v43 = vld [vmem:[%s8794_s5 + $0x14d0] sm:$0xff] }
 0x2ea   : > { %7191 = vmatprep.subr.bf16.mxu0 %v8683_v0  ;;  %v824_v22 = vld [vmem:[%s8794_s5 + $0x12d8] sm:$0xff] }
 0x2eb   : > { %3069 = vmatmul.mubr.f32.gmra.mrb[58].mxu1 %v834_v49  ;;  %v698_v49 = vld [vmem:[%s8794_s5 + $0xee8] sm:$0xff]  ;;  %v1212_v45 = vld [vmem:[%s8794_s5 + $0x1ef8] sm:$0xff] }
 0x2ec   : > { %4914 = vmatmul.mubr.f32.gmra.mrb[26].mxu0 %v508_v54  ;;  %3073 = vmatprep.mubr.f32.mxu1 %v856_v55  ;;  %v719_v54 = vld [vmem:[%s8794_s5 + $0xf90] sm:$0xff]  ;;  %v1044_v55 = vld [vmem:[%s8794_s5 + $0x19b8] sm:$0xff] }
 0x2ed   : > { %4918 = vmatprep.mubr.f32.mxu0 %v530_v59  ;;  %7193 = vmatpush1.bf16.msra.mxu0 %v7192_v48  ;;  %v740_v59 = vld [vmem:[%s8794_s5 + $0x1038] sm:$0xff] }
 0x2ee   : > { %7194 = vmatprep.subr.bf16.mxu0 %v8683_v0  ;;  %v908_v48 = vld [vmem:[%s8794_s5 + $0x1578] sm:$0xff] }
 0x2ef   : > { %3074 = vmatmul.mubr.f32.gmra.mrb[60].mxu1 %v855_v61  ;;  %v739_v61 = vld [vmem:[%s8794_s5 + $0x1030] sm:$0xff] }
 0x2f0   : > { %4919 = vmatmul.mubr.f32.gmra.mrb[28].mxu0 %v529_v63  ;;  %3078 = vmatprep.mubr.f32.mxu1 %v877_v1  ;;  %v1087_v63 = vld [vmem:[%s8794_s5 + $0x1b10] sm:$0xff]  ;;  %v761_v1 = vld [vmem:[%s8794_s5 + $0x10e0] sm:$0xff] }
 0x2f1   : > { %4923 = vmatprep.mubr.f32.mxu0 %v551_v2  ;;  %v1086_v2 = vld [vmem:[%s8794_s5 + $0x1b08] sm:$0xff] }
 0x2f3   : > { %3079 = vmatmul.mubr.f32.gmra.mrb[62].mxu1 %v876_v3  ;;  %v1849_v3 = vld [vmem:[%s11940_s1 + $0x8e0] sm:$0xff] }
 0x2f4   : > { %4924 = vmatmul.mubr.f32.gmra.mrb[30].mxu0 %v550_v4  ;;  %3083 = vmatprep.mubr.f32.mxu1 %v898_v6  ;;  %v1850_v4 = vld [vmem:[%s11940_s1 + $0x8e8] sm:$0xff]  ;;  %v760_v6 = vld [vmem:[%s8794_s5 + $0x10d8] sm:$0xff] }
 0x2f5   : > { %4928 = vmatprep.mubr.f32.mxu0 %v572_v7  ;;  %v1108_v7 = vld [vmem:[%s8794_s5 + $0x1bb8] sm:$0xff] }
 0x2f7   : > { %3084 = vmatmul.mubr.f32.gmra.mrb[64].mxu1 %v897_v9  ;;  %v7195_v9 = vpack.c.bf16 %v1850_v4, %v1849_v3  ;;  %v1318_v3 = vld [vmem:[%s8794_s5 + $0x2248] sm:$0xff]  ;;  %v992_v4 = vld [vmem:[%s8794_s5 + $0x1818] sm:$0xff] }
 0x2f8   : > { %4929 = vmatmul.mubr.f32.gmra.mrb[32].mxu0 %v571_v10  ;;  %3088 = vmatprep.mubr.f32.mxu1 %v919_v11  ;;  %v782_v10 = vld [vmem:[%s8794_s5 + $0x1188] sm:$0xff]  ;;  %v1107_v11 = vld [vmem:[%s8794_s5 + $0x1bb0] sm:$0xff] }
 0x2f9   : > { %4933 = vmatprep.mubr.f32.mxu0 %v593_v14  ;;  %7196 = vmatpush1.bf16.msra.mxu0 %v7195_v9  ;;  %v781_v14 = vld [vmem:[%s8794_s5 + $0x1180] sm:$0xff]  ;;  %v1339_v9 = vld [vmem:[%s8794_s5 + $0x22f0] sm:$0xff] }
 0x2fa   : > { %7197 = vmatprep.subr.bf16.mxu0 %v8683_v0 }
 0x2fb   : > { %3089 = vmatmul.mubr.f32.gmra.mrb[66].mxu1 %v918_v15  ;;  %v1129_v15 = vld [vmem:[%s8794_s5 + $0x1c60] sm:$0xff] }
 0x2fc   : > { %4934 = vmatmul.mubr.f32.gmra.mrb[34].mxu0 %v592_v19  ;;  %3093 = vmatprep.mubr.f32.mxu1 %v940_v21  ;;  %v802_v19 = vld [vmem:[%s8794_s5 + $0x1228] sm:$0xff] }
 0x2fd   : > { %4938 = vmatprep.mubr.f32.mxu0 %v614_v23  ;;  %v1150_v21 = vld [vmem:[%s8794_s5 + $0x1d08] sm:$0xff]  ;;  %v1149_v23 = vld [vmem:[%s8794_s5 + $0x1d00] sm:$0xff] }
 0x2ff   : > { %3094 = vmatmul.mubr.f32.gmra.mrb[68].mxu1 %v939_v25  ;;  %v823_v25 = vld [vmem:[%s8794_s5 + $0x12d0] sm:$0xff] }
 0x300   : > { %4939 = vmatmul.mubr.f32.gmra.mrb[36].mxu0 %v613_v26  ;;  %3098 = vmatprep.mubr.f32.mxu1 %v961_v28  ;;  %v1171_v26 = vld [vmem:[%s8794_s5 + $0x1db0] sm:$0xff]  ;;  %v845_v28 = vld [vmem:[%s8794_s5 + $0x1380] sm:$0xff] }
 0x301   : > { %4943 = vmatprep.mubr.f32.mxu0 %v635_v29  ;;  %v1170_v29 = vld [vmem:[%s8794_s5 + $0x1da8] sm:$0xff] }
 0x303   : > { %3099 = vmatmul.mubr.f32.gmra.mrb[70].mxu1 %v960_v31  ;;  %v1851_v31 = vld [vmem:[%s11940_s1 + $0x8f0] sm:$0xff] }
 0x304   : > { %4944 = vmatmul.mubr.f32.gmra.mrb[38].mxu0 %v634_v32  ;;  %3103 = vmatprep.mubr.f32.mxu1 %v982_v33  ;;  %v1852_v32 = vld [vmem:[%s11940_s1 + $0x8f8] sm:$0xff] }
 0x305   : > { %4948 = vmatprep.mubr.f32.mxu0 %v656_v35  ;;  %v844_v33 = vld [vmem:[%s8794_s5 + $0x1378] sm:$0xff] }
 0x306   : > { %v1192_v35 = vld [vmem:[%s8794_s5 + $0x1e58] sm:$0xff] }
 0x307   : > { %3104 = vmatmul.mubr.f32.gmra.mrb[72].mxu1 %v981_v37  ;;  %v7198_v37 = vpack.c.bf16 %v1852_v32, %v1851_v31  ;;  %v1075_v31 = vld [vmem:[%s8794_s5 + $0x1ab0] sm:$0xff] }
 0x308   : > { %4949 = vmatmul.mubr.f32.gmra.mrb[40].mxu0 %v655_v38  ;;  %3108 = vmatprep.mubr.f32.mxu1 %v1003_v39  ;;  %v866_v38 = vld [vmem:[%s8794_s5 + $0x1428] sm:$0xff]  ;;  %v1191_v39 = vld [vmem:[%s8794_s5 + $0x1e50] sm:$0xff] }
 0x309   : > { %4953 = vmatprep.mubr.f32.mxu0 %v677_v40  ;;  %7199 = vmatpush1.bf16.msra.mxu0 %v7198_v37  ;;  %v865_v40 = vld [vmem:[%s8794_s5 + $0x1420] sm:$0xff]  ;;  %v1423_v32 = vld [vmem:[%s8794_s5 + $0x2590] sm:$0xff]  ;;  %v1096_v37 = vld [vmem:[%s8794_s5 + $0x1b58] sm:$0xff] }
 0x30a   : > { %7200 = vmatprep.subr.bf16.mxu0 %v8683_v0 }
 0x30b   : > { %3109 = vmatmul.mubr.f32.gmra.mrb[74].mxu1 %v1002_v42  ;;  %v1213_v42 = vld [vmem:[%s8794_s5 + $0x1f00] sm:$0xff] }
 0x30c   : > { %4954 = vmatmul.mubr.f32.gmra.mrb[42].mxu0 %v676_v46  ;;  %3113 = vmatprep.mubr.f32.mxu1 %v1024_v47  ;;  %v886_v46 = vld [vmem:[%s8794_s5 + $0x14c8] sm:$0xff] }
 0x30d   : > { %4958 = vmatprep.mubr.f32.mxu0 %v698_v49  ;;  %v1234_v47 = vld [vmem:[%s8794_s5 + $0x1fa8] sm:$0xff]  ;;  %v1233_v49 = vld [vmem:[%s8794_s5 + $0x1fa0] sm:$0xff] }
 0x30f   : > { %3114 = vmatmul.mubr.f32.gmra.mrb[76].mxu1 %v1023_v51  ;;  %v907_v51 = vld [vmem:[%s8794_s5 + $0x1570] sm:$0xff] }
 0x310   : > { %4959 = vmatmul.mubr.f32.gmra.mrb[44].mxu0 %v697_v52  ;;  %3118 = vmatprep.mubr.f32.mxu1 %v1045_v53  ;;  %v1255_v52 = vld [vmem:[%s8794_s5 + $0x2050] sm:$0xff]  ;;  %v929_v53 = vld [vmem:[%s8794_s5 + $0x1620] sm:$0xff] }
 0x311   : > { %4963 = vmatprep.mubr.f32.mxu0 %v719_v54  ;;  %v1254_v54 = vld [vmem:[%s8794_s5 + $0x2048] sm:$0xff] }
 0x313   : > { %3119 = vmatmul.mubr.f32.gmra.mrb[78].mxu1 %v1044_v55  ;;  %v928_v55 = vld [vmem:[%s8794_s5 + $0x1618] sm:$0xff] }
 0x314   : > { %4964 = vmatmul.mubr.f32.gmra.mrb[46].mxu0 %v718_v57  ;;  %3123 = vmatprep.mubr.f32.mxu1 %v1066_v58  ;;  %v1276_v57 = vld [vmem:[%s8794_s5 + $0x20f8] sm:$0xff]  ;;  %v950_v58 = vld [vmem:[%s8794_s5 + $0x16c8] sm:$0xff] }
 0x315   : > { %4968 = vmatprep.mubr.f32.mxu0 %v740_v59  ;;  %v1275_v59 = vld [vmem:[%s8794_s5 + $0x20f0] sm:$0xff] }
 0x317   : > { %3124 = vmatmul.mubr.f32.gmra.mrb[80].mxu1 %v1065_v60  ;;  %v949_v60 = vld [vmem:[%s8794_s5 + $0x16c0] sm:$0xff] }
 0x318   : > { %4969 = vmatmul.mubr.f32.gmra.mrb[48].mxu0 %v739_v61  ;;  %3128 = vmatprep.mubr.f32.mxu1 %v1087_v63  ;;  %v1297_v61 = vld [vmem:[%s8794_s5 + $0x21a0] sm:$0xff]  ;;  %v971_v63 = vld [vmem:[%s8794_s5 + $0x1770] sm:$0xff] }
 0x319   : > { %4973 = vmatprep.mubr.f32.mxu0 %v761_v1  ;;  %v1296_v1 = vld [vmem:[%s8794_s5 + $0x2198] sm:$0xff] }
 0x31b   : > { %3129 = vmatmul.mubr.f32.gmra.mrb[82].mxu1 %v1086_v2  ;;  %v970_v2 = vld [vmem:[%s8794_s5 + $0x1768] sm:$0xff] }
 0x31c   : > { %4974 = vmatmul.mubr.f32.gmra.mrb[50].mxu0 %v760_v6  ;;  %3133 = vmatprep.mubr.f32.mxu1 %v1108_v7  ;;  %v1317_v6 = vld [vmem:[%s8794_s5 + $0x2240] sm:$0xff]  ;;  %v991_v7 = vld [vmem:[%s8794_s5 + $0x1810] sm:$0xff] }
 0x31d   : > { %4978 = vmatprep.mubr.f32.mxu0 %v782_v10  ;;  %v1013_v10 = vld [vmem:[%s8794_s5 + $0x18c0] sm:$0xff] }
 0x31f   : > { %3134 = vmatmul.mubr.f32.gmra.mrb[84].mxu1 %v1107_v11  ;;  %v1338_v11 = vld [vmem:[%s8794_s5 + $0x22e8] sm:$0xff] }
 0x320   : > { %4979 = vmatmul.mubr.f32.gmra.mrb[52].mxu0 %v781_v14  ;;  %3138 = vmatprep.mubr.f32.mxu1 %v1129_v15  ;;  %v1012_v14 = vld [vmem:[%s8794_s5 + $0x18b8] sm:$0xff] }
 0x321   : > { %4983 = vmatprep.mubr.f32.mxu0 %v803_v16  ;;  %v1360_v15 = vld [vmem:[%s8794_s5 + $0x2398] sm:$0xff]  ;;  %v1034_v16 = vld [vmem:[%s8794_s5 + $0x1968] sm:$0xff] }
 0x323   : > { %3139 = vmatmul.mubr.f32.gmra.mrb[86].mxu1 %v1128_v17  ;;  %v1359_v17 = vld [vmem:[%s8794_s5 + $0x2390] sm:$0xff] }
 0x324   : > { %4984 = vmatmul.mubr.f32.gmra.mrb[54].mxu0 %v802_v19  ;;  %3143 = vmatprep.mubr.f32.mxu1 %v1150_v21  ;;  %v1033_v19 = vld [vmem:[%s8794_s5 + $0x1960] sm:$0xff] }
 0x325   : > { %4988 = vmatprep.mubr.f32.mxu0 %v824_v22  ;;  %v1381_v21 = vld [vmem:[%s8794_s5 + $0x2440] sm:$0xff]  ;;  %v1055_v22 = vld [vmem:[%s8794_s5 + $0x1a10] sm:$0xff] }
 0x327   : > { %3144 = vmatmul.mubr.f32.gmra.mrb[88].mxu1 %v1149_v23  ;;  %v1380_v23 = vld [vmem:[%s8794_s5 + $0x2438] sm:$0xff] }
 0x328   : > { %4989 = vmatmul.mubr.f32.gmra.mrb[56].mxu0 %v823_v25  ;;  %3148 = vmatprep.mubr.f32.mxu1 %v1171_v26  ;;  %v1054_v25 = vld [vmem:[%s8794_s5 + $0x1a08] sm:$0xff] }
 0x329   : > { %4993 = vmatprep.mubr.f32.mxu0 %v845_v28  ;;  %v1402_v26 = vld [vmem:[%s8794_s5 + $0x24e8] sm:$0xff]  ;;  %v1076_v28 = vld [vmem:[%s8794_s5 + $0x1ab8] sm:$0xff] }
 0x32b   : > { %3149 = vmatmul.mubr.f32.gmra.mrb[90].mxu1 %v1170_v29  ;;  %v1401_v29 = vld [vmem:[%s8794_s5 + $0x24e0] sm:$0xff] }
 0x32c   : > { %4994 = vmatmul.mubr.f32.gmra.mrb[58].mxu0 %v844_v33  ;;  %3153 = vmatprep.mubr.f32.mxu1 %v1192_v35  ;;  %v1097_v33 = vld [vmem:[%s8794_s5 + $0x1b60] sm:$0xff]  ;;  %v1422_v35 = vld [vmem:[%s8794_s5 + $0x2588] sm:$0xff] }
 0x32d   : > { %4998 = vmatprep.mubr.f32.mxu0 %v866_v38  ;;  %v1444_v38 = vld [vmem:[%s8794_s5 + $0x2638] sm:$0xff] }
 0x32f   : > { %3154 = vmatmul.mubr.f32.gmra.mrb[92].mxu1 %v1191_v39  ;;  %v1118_v39 = vld [vmem:[%s8794_s5 + $0x1c08] sm:$0xff] }
 0x330   : > { %4999 = vmatmul.mubr.f32.gmra.mrb[60].mxu0 %v865_v40  ;;  %3158 = vmatprep.mubr.f32.mxu1 %v1213_v42  ;;  %v1443_v40 = vld [vmem:[%s8794_s5 + $0x2630] sm:$0xff]  ;;  %v1117_v42 = vld [vmem:[%s8794_s5 + $0x1c00] sm:$0xff] }
 0x331   : > { %5003 = vmatprep.mubr.f32.mxu0 %v887_v43  ;;  %v1465_v43 = vld [vmem:[%s8794_s5 + $0x26e0] sm:$0xff] }
 0x333   : > { %3159 = vmatmul.mubr.f32.gmra.mrb[94].mxu1 %v1212_v45  ;;  %v1139_v45 = vld [vmem:[%s8794_s5 + $0x1cb0] sm:$0xff] }
 0x334   : > { %5004 = vmatmul.mubr.f32.gmra.mrb[62].mxu0 %v886_v46  ;;  %3163 = vmatprep.mubr.f32.mxu1 %v1234_v47  ;;  %v1464_v46 = vld [vmem:[%s8794_s5 + $0x26d8] sm:$0xff]  ;;  %v1138_v47 = vld [vmem:[%s8794_s5 + $0x1ca8] sm:$0xff] }
 0x335   : > { %5008 = vmatprep.mubr.f32.mxu0 %v908_v48  ;;  %v1486_v48 = vld [vmem:[%s8794_s5 + $0x2788] sm:$0xff] }
 0x337   : > { %3164 = vmatmul.mubr.f32.gmra.mrb[96].mxu1 %v1233_v49  ;;  %v1160_v49 = vld [vmem:[%s8794_s5 + $0x1d58] sm:$0xff] }
 0x338   : > { %5009 = vmatmul.mubr.f32.gmra.mrb[64].mxu0 %v907_v51  ;;  %3168 = vmatprep.mubr.f32.mxu1 %v1255_v52  ;;  %v1485_v51 = vld [vmem:[%s8794_s5 + $0x2780] sm:$0xff]  ;;  %v1159_v52 = vld [vmem:[%s8794_s5 + $0x1d50] sm:$0xff] }
 0x339   : > { %5013 = vmatprep.mubr.f32.mxu0 %v929_v53  ;;  %v1507_v53 = vld [vmem:[%s8794_s5 + $0x2830] sm:$0xff] }
 0x33b   : > { %3169 = vmatmul.mubr.f32.gmra.mrb[98].mxu1 %v1254_v54  ;;  %v1181_v54 = vld [vmem:[%s8794_s5 + $0x1e00] sm:$0xff] }
 0x33c   : > { %5014 = vmatmul.mubr.f32.gmra.mrb[66].mxu0 %v928_v55  ;;  %3173 = vmatprep.mubr.f32.mxu1 %v1276_v57  ;;  %v1506_v55 = vld [vmem:[%s8794_s5 + $0x2828] sm:$0xff]  ;;  %v1180_v57 = vld [vmem:[%s8794_s5 + $0x1df8] sm:$0xff] }
 0x33d   : > { %5018 = vmatprep.mubr.f32.mxu0 %v950_v58  ;;  %v1528_v58 = vld [vmem:[%s8794_s5 + $0x28d8] sm:$0xff] }
 0x33f   : > { %3174 = vmatmul.mubr.f32.gmra.mrb[100].mxu1 %v1275_v59  ;;  %v1202_v59 = vld [vmem:[%s8794_s5 + $0x1ea8] sm:$0xff] }
 0x340   : > { %5019 = vmatmul.mubr.f32.gmra.mrb[68].mxu0 %v949_v60  ;;  %3178 = vmatprep.mubr.f32.mxu1 %v1297_v61  ;;  %v1527_v60 = vld [vmem:[%s8794_s5 + $0x28d0] sm:$0xff]  ;;  %v1201_v61 = vld [vmem:[%s8794_s5 + $0x1ea0] sm:$0xff] }
 0x341   : > { %5023 = vmatprep.mubr.f32.mxu0 %v971_v63  ;;  %v1549_v63 = vld [vmem:[%s8794_s5 + $0x2980] sm:$0xff] }
 0x343   : > { %3179 = vmatmul.mubr.f32.gmra.mrb[102].mxu1 %v1296_v1  ;;  %v1223_v1 = vld [vmem:[%s8794_s5 + $0x1f50] sm:$0xff] }
 0x344   : > { %5024 = vmatmul.mubr.f32.gmra.mrb[70].mxu0 %v970_v2  ;;  %3183 = vmatprep.mubr.f32.mxu1 %v1318_v3  ;;  %v1548_v2 = vld [vmem:[%s8794_s5 + $0x2978] sm:$0xff]  ;;  %v1222_v3 = vld [vmem:[%s8794_s5 + $0x1f48] sm:$0xff] }
 0x345   : > { %5028 = vmatprep.mubr.f32.mxu0 %v992_v4  ;;  %v228_v4 = vld [vmem:[%s8794_s5 + $0x38] sm:$0xff] }
 0x347   : > { %3184 = vmatmul.mubr.f32.gmra.mrb[104].mxu1 %v1317_v6  ;;  %v1244_v6 = vld [vmem:[%s8794_s5 + $0x1ff8] sm:$0xff] }
 0x348   : > { %5029 = vmatmul.mubr.f32.gmra.mrb[72].mxu0 %v991_v7  ;;  %3188 = vmatprep.mubr.f32.mxu1 %v1339_v9  ;;  %v227_v7 = vld [vmem:[%s8794_s5 + $0x30] sm:$0xff] }
 0x349   : > { %5033 = vmatprep.mubr.f32.mxu0 %v1013_v10  ;;  %v1243_v9 = vld [vmem:[%s8794_s5 + $0x1ff0] sm:$0xff]  ;;  %v249_v10 = vld [vmem:[%s8794_s5 + $0xe0] sm:$0xff] }
 0x34b   : > { %3189 = vmatmul.mubr.f32.gmra.mrb[106].mxu1 %v1338_v11  ;;  %v1265_v11 = vld [vmem:[%s8794_s5 + $0x20a0] sm:$0xff] }
 0x34c   : > { %5034 = vmatmul.mubr.f32.gmra.mrb[74].mxu0 %v1012_v14  ;;  %3193 = vmatprep.mubr.f32.mxu1 %v1360_v15  ;;  %v248_v14 = vld [vmem:[%s8794_s5 + $0xd8] sm:$0xff] }
 0x34d   : > { %5038 = vmatprep.mubr.f32.mxu0 %v1034_v16  ;;  %v1264_v15 = vld [vmem:[%s8794_s5 + $0x2098] sm:$0xff]  ;;  %v270_v16 = vld [vmem:[%s8794_s5 + $0x188] sm:$0xff] }
 0x34f   : > { %3194 = vmatmul.mubr.f32.gmra.mrb[108].mxu1 %v1359_v17  ;;  %v1286_v17 = vld [vmem:[%s8794_s5 + $0x2148] sm:$0xff] }
 0x350   : > { %5039 = vmatmul.mubr.f32.gmra.mrb[76].mxu0 %v1033_v19  ;;  %3198 = vmatprep.mubr.f32.mxu1 %v1381_v21  ;;  %v269_v19 = vld [vmem:[%s8794_s5 + $0x180] sm:$0xff] }
 0x351   : > { %5043 = vmatprep.mubr.f32.mxu0 %v1055_v22  ;;  %v1285_v21 = vld [vmem:[%s8794_s5 + $0x2140] sm:$0xff]  ;;  %v1307_v22 = vld [vmem:[%s8794_s5 + $0x21f0] sm:$0xff] }
 0x353   : > { %3199 = vmatmul.mubr.f32.gmra.mrb[110].mxu1 %v1380_v23  ;;  %v290_v23 = vld [vmem:[%s8794_s5 + $0x228] sm:$0xff] }
 0x354   : > { %5044 = vmatmul.mubr.f32.gmra.mrb[78].mxu0 %v1054_v25  ;;  %3203 = vmatprep.mubr.f32.mxu1 %v1402_v26  ;;  %v1306_v25 = vld [vmem:[%s8794_s5 + $0x21e8] sm:$0xff]  ;;  %v312_v26 = vld [vmem:[%s8794_s5 + $0x2d8] sm:$0xff] }
 0x355   : > { %5048 = vmatprep.mubr.f32.mxu0 %v1076_v28  ;;  %v1328_v28 = vld [vmem:[%s8794_s5 + $0x2298] sm:$0xff] }
 0x357   : > { %3204 = vmatmul.mubr.f32.gmra.mrb[112].mxu1 %v1401_v29  ;;  %v1327_v29 = vld [vmem:[%s8794_s5 + $0x2290] sm:$0xff] }
 0x358   : > { %5049 = vmatmul.mubr.f32.gmra.mrb[80].mxu0 %v1075_v31  ;;  %3208 = vmatprep.mubr.f32.mxu1 %v1423_v32  ;;  %v333_v31 = vld [vmem:[%s8794_s5 + $0x380] sm:$0xff] }
 0x359   : > { %5053 = vmatprep.mubr.f32.mxu0 %v1097_v33  ;;  %v1349_v32 = vld [vmem:[%s8794_s5 + $0x2340] sm:$0xff]  ;;  %v1348_v33 = vld [vmem:[%s8794_s5 + $0x2338] sm:$0xff] }
 0x35b   : > { %3209 = vmatmul.mubr.f32.gmra.mrb[114].mxu1 %v1422_v35  ;;  %v354_v35 = vld [vmem:[%s8794_s5 + $0x428] sm:$0xff] }
 0x35c   : > { %5054 = vmatmul.mubr.f32.gmra.mrb[82].mxu0 %v1096_v37  ;;  %3213 = vmatprep.mubr.f32.mxu1 %v1444_v38  ;;  %v1370_v37 = vld [vmem:[%s8794_s5 + $0x23e8] sm:$0xff]  ;;  %v1369_v38 = vld [vmem:[%s8794_s5 + $0x23e0] sm:$0xff] }
 0x35d   : > { %5058 = vmatprep.mubr.f32.mxu0 %v1118_v39  ;;  %v375_v39 = vld [vmem:[%s8794_s5 + $0x4d0] sm:$0xff] }
 0x35f   : > { %3214 = vmatmul.mubr.f32.gmra.mrb[116].mxu1 %v1443_v40  ;;  %v1391_v40 = vld [vmem:[%s8794_s5 + $0x2490] sm:$0xff] }
 0x360   : > { %5059 = vmatmul.mubr.f32.gmra.mrb[84].mxu0 %v1117_v42  ;;  %3218 = vmatprep.mubr.f32.mxu1 %v1465_v43  ;;  %v1390_v42 = vld [vmem:[%s8794_s5 + $0x2488] sm:$0xff]  ;;  %v396_v43 = vld [vmem:[%s8794_s5 + $0x578] sm:$0xff] }
 0x361   : > { %5063 = vmatprep.mubr.f32.mxu0 %v1139_v45  ;;  %v1412_v45 = vld [vmem:[%s8794_s5 + $0x2538] sm:$0xff] }
 0x363   : > { %3219 = vmatmul.mubr.f32.gmra.mrb[118].mxu1 %v1464_v46  ;;  %v1411_v46 = vld [vmem:[%s8794_s5 + $0x2530] sm:$0xff] }
 0x364   : > { %5064 = vmatmul.mubr.f32.gmra.mrb[86].mxu0 %v1138_v47  ;;  %3223 = vmatprep.mubr.f32.mxu1 %v1486_v48  ;;  %v417_v47 = vld [vmem:[%s8794_s5 + $0x620] sm:$0xff] }
 0x365   : > { %5068 = vmatprep.mubr.f32.mxu0 %v1160_v49  ;;  %v1433_v48 = vld [vmem:[%s8794_s5 + $0x25e0] sm:$0xff]  ;;  %v1432_v49 = vld [vmem:[%s8794_s5 + $0x25d8] sm:$0xff] }
 0x367   : > { %3224 = vmatmul.mubr.f32.gmra.mrb[120].mxu1 %v1485_v51  ;;  %v438_v51 = vld [vmem:[%s8794_s5 + $0x6c8] sm:$0xff] }
 0x368   : > { %5069 = vmatmul.mubr.f32.gmra.mrb[88].mxu0 %v1159_v52  ;;  %3228 = vmatprep.mubr.f32.mxu1 %v1507_v53  ;;  %v1454_v52 = vld [vmem:[%s8794_s5 + $0x2688] sm:$0xff]  ;;  %v1453_v53 = vld [vmem:[%s8794_s5 + $0x2680] sm:$0xff] }
 0x369   : > { %5073 = vmatprep.mubr.f32.mxu0 %v1181_v54  ;;  %v459_v54 = vld [vmem:[%s8794_s5 + $0x770] sm:$0xff] }
 0x36b   : > { %3229 = vmatmul.mubr.f32.gmra.mrb[122].mxu1 %v1506_v55  ;;  %v1475_v55 = vld [vmem:[%s8794_s5 + $0x2730] sm:$0xff] }
 0x36c   : > { %5074 = vmatmul.mubr.f32.gmra.mrb[90].mxu0 %v1180_v57  ;;  %3233 = vmatprep.mubr.f32.mxu1 %v1528_v58  ;;  %v1474_v57 = vld [vmem:[%s8794_s5 + $0x2728] sm:$0xff]  ;;  %v480_v58 = vld [vmem:[%s8794_s5 + $0x818] sm:$0xff] }
 0x36d   : > { %5078 = vmatprep.mubr.f32.mxu0 %v1202_v59  ;;  %v1496_v59 = vld [vmem:[%s8794_s5 + $0x27d8] sm:$0xff] }
 0x36f   : > { %3234 = vmatmul.mubr.f32.gmra.mrb[124].mxu1 %v1527_v60  ;;  %v1495_v60 = vld [vmem:[%s8794_s5 + $0x27d0] sm:$0xff] }
 0x370   : > { %5079 = vmatmul.mubr.f32.gmra.mrb[92].mxu0 %v1201_v61  ;;  %3238 = vmatprep.mubr.f32.mxu1 %v1549_v63  ;;  %v501_v61 = vld [vmem:[%s8794_s5 + $0x8c0] sm:$0xff] }
 0x371   : > { %5083 = vmatprep.mubr.f32.mxu0 %v1223_v1  ;;  %v1517_v63 = vld [vmem:[%s8794_s5 + $0x2880] sm:$0xff]  ;;  %v1516_v1 = vld [vmem:[%s8794_s5 + $0x2878] sm:$0xff] }
 0x373   : > { %3239 = vmatmul.mubr.f32.gmra.mrb[126].mxu1 %v1548_v2  ;;  %v522_v2 = vld [vmem:[%s8794_s5 + $0x968] sm:$0xff] }
 0x374   : > { %5084 = vmatmul.mubr.f32.gmra.mrb[94].mxu0 %v1222_v3  ;;  %3308 = vmatprep.mubr.f32.mxu1 %v228_v4  ;;  %v1538_v3 = vld [vmem:[%s8794_s5 + $0x2928] sm:$0xff]  ;;  %v1537_v4 = vld [vmem:[%s8794_s5 + $0x2920] sm:$0xff] }
 0x375   : > { %5088 = vmatprep.mubr.f32.mxu0 %v1244_v6  ;;  %v543_v6 = vld [vmem:[%s8794_s5 + $0xa10] sm:$0xff] }
 0x377   : > { %3309 = vmatmul.mubr.f32.vlgmr.msra.gmra.mrb[0].mxu1 %v227_v7  ;;  %v1559_v7 = vld [vmem:[%s8794_s5 + $0x29d0] sm:$0xff] }
 0x378   : > { %5089 = vmatmul.mubr.f32.gmra.mrb[96].mxu0 %v1243_v9  ;;  %7272 = vmatpush1.bf16.msra.mxu1 %v8820_v8  ;;  %v291_v8 = vld [vmem:[%s8794_s5 + $0x230] sm:$0xff]  ;;  %v1558_v9 = vld [vmem:[%s8794_s5 + $0x29c8] sm:$0xff] }
 0x379   : > { %3313 = vmatprep.mubr.f32.mxu1 %v249_v10  ;;  %5093 = vmatprep.mubr.f32.mxu0 %v1265_v11  ;;  %v564_v10 = vld [vmem:[%s8794_s5 + $0xab8] sm:$0xff]  ;;  %v238_v11 = vld [vmem:[%s8794_s5 + $0x88] sm:$0xff] }
 0x37a   : > { %7257 = vmatprep.subr.bf16.mxu1 %v8683_v0 }
 0x37b   : > { %3314 = vmatmul.mubr.f32.gmra.mrb[2].mxu1 %v248_v14  ;;  %v1854_v14 = vld [vmem:[%s11940_s1 + $0x908] sm:$0xff] }
 0x37c   : > { %5094 = vmatmul.mubr.f32.gmra.mrb[98].mxu0 %v1264_v15  ;;  %3318 = vmatprep.mubr.f32.mxu1 %v270_v16  ;;  %v563_v15 = vld [vmem:[%s8794_s5 + $0xab0] sm:$0xff] }
 0x37d   : > { %5098 = vmatprep.mubr.f32.mxu0 %v1286_v17  ;;  %7273 = vmatpush1.bf16.msra.mxu1 %v8830_v12  ;;  %v311_v12 = vld [vmem:[%s8794_s5 + $0x2d0] sm:$0xff]  ;;  %v585_v17 = vld [vmem:[%s8794_s5 + $0xb60] sm:$0xff] }
 0x37e   : > { %7258 = vmatprep.subr.bf16.mxu1 %v8683_v0 }
 0x37f   : > { %3319 = vmatmul.mubr.f32.gmra.mrb[4].mxu1 %v269_v19  ;;  %v259_v19 = vld [vmem:[%s8794_s5 + $0x130] sm:$0xff] }
 0x380   : > { %5099 = vmatmul.mubr.f32.gmra.mrb[100].mxu0 %v1285_v21  ;;  %3323 = vmatprep.mubr.f32.mxu1 %v291_v8  ;;  %v1855_v21 = vld [vmem:[%s11940_s1 + $0x910] sm:$0xff]  ;;  %v1856_v8 = vld [vmem:[%s11940_s1 + $0x918] sm:$0xff] }
 0x381   : > { %5103 = vmatprep.mubr.f32.mxu0 %v1307_v22  ;;  %7274 = vmatpush1.bf16.msra.mxu1 %v8847_v18  ;;  %v332_v18 = vld [vmem:[%s8794_s5 + $0x378] sm:$0xff] }
 0x382   : > { %7259 = vmatprep.subr.bf16.mxu1 %v8683_v0  ;;  %v584_v22 = vld [vmem:[%s8794_s5 + $0xb58] sm:$0xff] }
 0x383   : > { %3324 = vmatmul.mubr.f32.gmra.mrb[6].mxu1 %v290_v23  ;;  %v258_v23 = vld [vmem:[%s8794_s5 + $0x128] sm:$0xff] }
 0x384   : > { %5104 = vmatmul.mubr.f32.gmra.mrb[102].mxu0 %v1306_v25  ;;  %3328 = vmatprep.mubr.f32.mxu1 %v312_v26  ;;  %v7204_v25 = vpack.c.bf16 %v1856_v8, %v1855_v21  ;;  %v280_v26 = vld [vmem:[%s8794_s5 + $0x1d8] sm:$0xff]  ;;  %v1873_v21 = vld [vmem:[%s11940_s1 + $0x9a0] sm:$0xff]  ;;  %v1874_v8 = vld [vmem:[%s11940_s1 + $0x9a8] sm:$0xff] }
 0x385   : > { %5108 = vmatprep.mubr.f32.mxu0 %v1328_v28  ;;  %7275 = vmatpush1.bf16.msra.mxu1 %v8864_v24  ;;  %v353_v24 = vld [vmem:[%s8794_s5 + $0x420] sm:$0xff] }
 0x386   : > { %7260 = vmatprep.subr.bf16.mxu1 %v8683_v0  ;;  %v1857_v28 = vld [vmem:[%s11940_s1 + $0x920] sm:$0xff] }
 0x387   : > { %3329 = vmatmul.mubr.f32.gmra.mrb[8].mxu1 %v311_v12  ;;  %v1858_v12 = vld [vmem:[%s11940_s1 + $0x928] sm:$0xff] }
 0x388   : > { %5109 = vmatmul.mubr.f32.gmra.mrb[104].mxu0 %v1327_v29  ;;  %3333 = vmatprep.mubr.f32.mxu1 %v333_v31  ;;  %v605_v29 = vld [vmem:[%s8794_s5 + $0xc00] sm:$0xff]  ;;  %v279_v31 = vld [vmem:[%s8794_s5 + $0x1d0] sm:$0xff] }
 0x389   : > { %5113 = vmatprep.mubr.f32.mxu0 %v1349_v32  ;;  %7276 = vmatpush1.bf16.msra.mxu1 %v8881_v30  ;;  %v374_v30 = vld [vmem:[%s8794_s5 + $0x4c8] sm:$0xff]  ;;  %v627_v32 = vld [vmem:[%s8794_s5 + $0xcb0] sm:$0xff] }
 0x38a   : > { %7261 = vmatprep.subr.bf16.mxu1 %v8683_v0 }
 0x38b   : > { %3334 = vmatmul.mubr.f32.gmra.mrb[10].mxu1 %v332_v18  ;;  %v7207_v18 = vpack.c.bf16 %v1858_v12, %v1857_v28  ;;  %v794_v28 = vld [vmem:[%s8794_s5 + $0x11e8] sm:$0xff]  ;;  %v468_v12 = vld [vmem:[%s8794_s5 + $0x7b8] sm:$0xff] }
 0x38c   : > { %5114 = vmatmul.mubr.f32.gmra.mrb[106].mxu0 %v1348_v33  ;;  %3338 = vmatprep.mubr.f32.mxu1 %v354_v35  ;;  %v301_v33 = vld [vmem:[%s8794_s5 + $0x280] sm:$0xff]  ;;  %v1859_v35 = vld [vmem:[%s11940_s1 + $0x930] sm:$0xff] }
 0x38d   : > { %5118 = vmatprep.mubr.f32.mxu0 %v1370_v37  ;;  %7277 = vmatpush1.bf16.msra.mxu1 %v8898_v36  ;;  %v395_v36 = vld [vmem:[%s8794_s5 + $0x570] sm:$0xff]  ;;  %v1860_v37 = vld [vmem:[%s11940_s1 + $0x938] sm:$0xff] }
 0x38e   : > { %7262 = vmatprep.subr.bf16.mxu1 %v8683_v0 }
 0x38f   : > { %3339 = vmatmul.mubr.f32.gmra.mrb[12].mxu1 %v353_v24  ;;  %v626_v24 = vld [vmem:[%s8794_s5 + $0xca8] sm:$0xff] }
 0x390   : > { %5119 = vmatmul.mubr.f32.gmra.mrb[108].mxu0 %v1369_v38  ;;  %3343 = vmatprep.mubr.f32.mxu1 %v375_v39  ;;  %v300_v38 = vld [vmem:[%s8794_s5 + $0x278] sm:$0xff] }
 0x391   : > { %5123 = vmatprep.mubr.f32.mxu0 %v1391_v40  ;;  %7278 = vmatpush1.bf16.msra.mxu1 %v8917_v44  ;;  %v416_v44 = vld [vmem:[%s8794_s5 + $0x618] sm:$0xff]  ;;  %v7210_v40 = vpack.c.bf16 %v1860_v37, %v1859_v35  ;;  %v511_v35 = vld [vmem:[%s8794_s5 + $0x910] sm:$0xff] }
 0x392   : > { %7263 = vmatprep.subr.bf16.mxu1 %v8683_v0  ;;  %v648_v39 = vld [vmem:[%s8794_s5 + $0xd58] sm:$0xff] }
 0x393   : > { %3344 = vmatmul.mubr.f32.gmra.mrb[14].mxu1 %v374_v30  ;;  %v322_v30 = vld [vmem:[%s8794_s5 + $0x328] sm:$0xff]  ;;  %v836_v37 = vld [vmem:[%s8794_s5 + $0x1338] sm:$0xff] }
 0x394   : > { %5124 = vmatmul.mubr.f32.gmra.mrb[110].mxu0 %v1390_v42  ;;  %3348 = vmatprep.mubr.f32.mxu1 %v396_v43  ;;  %v1861_v42 = vld [vmem:[%s11940_s1 + $0x940] sm:$0xff]  ;;  %v1862_v43 = vld [vmem:[%s11940_s1 + $0x948] sm:$0xff] }
 0x395   : > { %5128 = vmatprep.mubr.f32.mxu0 %v1412_v45  ;;  %7279 = vmatpush1.bf16.msra.mxu1 %v8934_v50  ;;  %v437_v50 = vld [vmem:[%s8794_s5 + $0x6c0] sm:$0xff]  ;;  %v647_v45 = vld [vmem:[%s8794_s5 + $0xd50] sm:$0xff] }
 0x396   : > { %7264 = vmatprep.subr.bf16.mxu1 %v8683_v0 }
 0x397   : > { %3349 = vmatmul.mubr.f32.gmra.mrb[16].mxu1 %v395_v36  ;;  %v321_v36 = vld [vmem:[%s8794_s5 + $0x320] sm:$0xff] }
 0x398   : > { %5129 = vmatmul.mubr.f32.gmra.mrb[112].mxu0 %v1411_v46  ;;  %3353 = vmatprep.mubr.f32.mxu1 %v417_v47  ;;  %v669_v46 = vld [vmem:[%s8794_s5 + $0xe00] sm:$0xff]  ;;  %v7213_v47 = vpack.c.bf16 %v1862_v43, %v1861_v42  ;;  %v532_v42 = vld [vmem:[%s8794_s5 + $0x9b8] sm:$0xff] }
 0x399   : > { %5133 = vmatprep.mubr.f32.mxu0 %v1433_v48  ;;  %7280 = vmatpush1.bf16.msra.mxu1 %v8951_v56  ;;  %v458_v56 = vld [vmem:[%s8794_s5 + $0x768] sm:$0xff]  ;;  %v343_v48 = vld [vmem:[%s8794_s5 + $0x3d0] sm:$0xff]  ;;  %v857_v43 = vld [vmem:[%s8794_s5 + $0x13e0] sm:$0xff] }
 0x39a   : > { %7265 = vmatprep.subr.bf16.mxu1 %v8683_v0 }
 0x39b   : > { %3354 = vmatmul.mubr.f32.gmra.mrb[18].mxu1 %v416_v44  ;;  %v1863_v44 = vld [vmem:[%s11940_s1 + $0x950] sm:$0xff] }
 0x39c   : > { %5134 = vmatmul.mubr.f32.gmra.mrb[114].mxu0 %v1432_v49  ;;  %3358 = vmatprep.mubr.f32.mxu1 %v438_v51  ;;  %v1864_v49 = vld [vmem:[%s11940_s1 + $0x958] sm:$0xff] }
 0x39d   : > { %5138 = vmatprep.mubr.f32.mxu0 %v1454_v52  ;;  %7281 = vmatpush1.bf16.msra.mxu1 %v8968_v62  ;;  %v479_v62 = vld [vmem:[%s8794_s5 + $0x810] sm:$0xff]  ;;  %v668_v51 = vld [vmem:[%s8794_s5 + $0xdf8] sm:$0xff]  ;;  %v342_v52 = vld [vmem:[%s8794_s5 + $0x3c8] sm:$0xff] }
 0x39e   : > { %7266 = vmatprep.subr.bf16.mxu1 %v8683_v0 }
 0x39f   : > { %3359 = vmatmul.mubr.f32.gmra.mrb[20].mxu1 %v437_v50  ;;  %v690_v50 = vld [vmem:[%s8794_s5 + $0xea8] sm:$0xff] }
 0x3a0   : > { %5139 = vmatmul.mubr.f32.gmra.mrb[116].mxu0 %v1453_v53  ;;  %3363 = vmatprep.mubr.f32.mxu1 %v459_v54  ;;  %v7216_v53 = vpack.c.bf16 %v1864_v49, %v1863_v44  ;;  %v364_v54 = vld [vmem:[%s8794_s5 + $0x478] sm:$0xff]  ;;  %v574_v49 = vld [vmem:[%s8794_s5 + $0xb08] sm:$0xff] }
 0x3a1   : > { %5143 = vmatprep.mubr.f32.mxu0 %v1475_v55  ;;  %7282 = vmatpush1.bf16.msra.mxu1 %v8985_v5  ;;  %v500_v5 = vld [vmem:[%s8794_s5 + $0x8b8] sm:$0xff]  ;;  %v1865_v55 = vld [vmem:[%s11940_s1 + $0x960] sm:$0xff] }
 0x3a2   : > { %7267 = vmatprep.subr.bf16.mxu1 %v8683_v0  ;;  %v900_v44 = vld [vmem:[%s8794_s5 + $0x1538] sm:$0xff] }
 0x3a3   : > { %3364 = vmatmul.mubr.f32.gmra.mrb[22].mxu1 %v458_v56  ;;  %v1866_v56 = vld [vmem:[%s11940_s1 + $0x968] sm:$0xff] }
 0x3a4   : > { %5144 = vmatmul.mubr.f32.gmra.mrb[118].mxu0 %v1474_v57  ;;  %3368 = vmatprep.mubr.f32.mxu1 %v480_v58  ;;  %v689_v57 = vld [vmem:[%s8794_s5 + $0xea0] sm:$0xff]  ;;  %v363_v58 = vld [vmem:[%s8794_s5 + $0x470] sm:$0xff] }
 0x3a5   : > { %5148 = vmatprep.mubr.f32.mxu0 %v1496_v59  ;;  %7283 = vmatpush1.bf16.msra.mxu1 %v9002_v13  ;;  %v521_v13 = vld [vmem:[%s8794_s5 + $0x960] sm:$0xff]  ;;  %v711_v59 = vld [vmem:[%s8794_s5 + $0xf50] sm:$0xff] }
 0x3a6   : > { %7268 = vmatprep.subr.bf16.mxu1 %v8683_v0 }
 0x3a7   : > { %3369 = vmatmul.mubr.f32.gmra.mrb[24].mxu1 %v479_v62  ;;  %v7219_v62 = vpack.c.bf16 %v1866_v56, %v1865_v55  ;;  %v1877_v55 = vld [vmem:[%s11940_s1 + $0x9c0] sm:$0xff]  ;;  %v1878_v56 = vld [vmem:[%s11940_s1 + $0x9c8] sm:$0xff] }
 0x3a8   : > { %5149 = vmatmul.mubr.f32.gmra.mrb[120].mxu0 %v1495_v60  ;;  %3373 = vmatprep.mubr.f32.mxu1 %v501_v61  ;;  %v385_v60 = vld [vmem:[%s8794_s5 + $0x520] sm:$0xff]  ;;  %v1867_v61 = vld [vmem:[%s11940_s1 + $0x970] sm:$0xff] }
 0x3a9   : > { %5153 = vmatprep.mubr.f32.mxu0 %v1517_v63  ;;  %7284 = vmatpush1.bf16.msra.mxu1 %v9019_v20  ;;  %v542_v20 = vld [vmem:[%s8794_s5 + $0xa08] sm:$0xff]  ;;  %v1868_v63 = vld [vmem:[%s11940_s1 + $0x978] sm:$0xff] }
 0x3aa   : > { %7269 = vmatprep.subr.bf16.mxu1 %v8683_v0 }
 0x3ab   : > { %3374 = vmatmul.mubr.f32.gmra.mrb[26].mxu1 %v500_v5  ;;  %v710_v5 = vld [vmem:[%s8794_s5 + $0xf48] sm:$0xff] }
 0x3ac   : > { %5154 = vmatmul.mubr.f32.gmra.mrb[122].mxu0 %v1516_v1  ;;  %3378 = vmatprep.mubr.f32.mxu1 %v522_v2  ;;  %v384_v1 = vld [vmem:[%s8794_s5 + $0x518] sm:$0xff] }
 0x3ad   : > { %5158 = vmatprep.mubr.f32.mxu0 %v1538_v3  ;;  %7285 = vmatpush1.bf16.msra.mxu1 %v9036_v27  ;;  %v1853_v27 = vld [vmem:[%s11940_s1 + $0x900] sm:$0xff]  ;;  %v732_v2 = vld [vmem:[%s8794_s5 + $0xff8] sm:$0xff]  ;;  %v7222_v3 = vpack.c.bf16 %v1868_v63, %v1867_v61 }
 0x3ae   : > { %7270 = vmatprep.subr.bf16.mxu1 %v8683_v0  ;;  %v7201_v16 = vpack.c.bf16 %v1854_v14, %v1853_v27  ;;  %v1871_v27 = vld [vmem:[%s11940_s1 + $0x990] sm:$0xff]  ;;  %v1872_v14 = vld [vmem:[%s11940_s1 + $0x998] sm:$0xff] }
 0x3af   : > { %3379 = vmatmul.mubr.f32.gmra.mrb[28].mxu1 %v521_v13  ;;  %v406_v13 = vld [vmem:[%s8794_s5 + $0x5c8] sm:$0xff]  ;;  %v616_v61 = vld [vmem:[%s8794_s5 + $0xc58] sm:$0xff] }
 0x3b0   : > { %5159 = vmatmul.mubr.f32.gmra.mrb[124].mxu0 %v1537_v4  ;;  %3383 = vmatprep.mubr.f32.mxu1 %v543_v6  ;;  %v1869_v4 = vld [vmem:[%s11940_s1 + $0x980] sm:$0xff]  ;;  %v1870_v6 = vld [vmem:[%s11940_s1 + $0x988] sm:$0xff] }
 0x3b1   : > { %5163 = vmatprep.mubr.f32.mxu0 %v1559_v7  ;;  %7286 = vmatpush1.bf16.msra.mxu1 %v9053_v34  ;;  %v237_v34 = vld [vmem:[%s8794_s5 + $0x80] sm:$0xff]  ;;  %v731_v7 = vld [vmem:[%s8794_s5 + $0xff0] sm:$0xff] }
 0x3b2   : > { %7271 = vmatprep.subr.bf16.mxu1 %v8683_v0 }
 0x3b3   : > { %3384 = vmatmul.mubr.f32.gmra.mrb[30].mxu1 %v542_v20  ;;  %v405_v20 = vld [vmem:[%s8794_s5 + $0x5c0] sm:$0xff] }
 0x3b4   : > { %5164 = vmatmul.mubr.f32.gmra.mrb[126].mxu0 %v1558_v9  ;;  %3388 = vmatprep.mubr.f32.mxu1 %v564_v10  ;;  %v753_v9 = vld [vmem:[%s8794_s5 + $0x10a0] sm:$0xff]  ;;  %v7225_v10 = vpack.c.bf16 %v1870_v6, %v1869_v4  ;;  %v636_v4 = vld [vmem:[%s8794_s5 + $0xcf8] sm:$0xff] }
 0x3b5   : > { %5233 = vmatprep.mubr.f32.mxu0 %v238_v11  ;;  %7287 = vmatpush1.bf16.msra.mxu1 %v9070_v41  ;;  %v606_v41 = vld [vmem:[%s8794_s5 + $0xc08] sm:$0xff]  ;;  %v427_v11 = vld [vmem:[%s8794_s5 + $0x670] sm:$0xff]  ;;  %v984_v6 = vld [vmem:[%s8794_s5 + $0x17d8] sm:$0xff] }
 0x3b7   : > { %3389 = vmatmul.mubr.f32.gmra.mrb[32].mxu1 %v563_v15  ;;  %v752_v15 = vld [vmem:[%s8794_s5 + $0x1098] sm:$0xff] }
 0x3b8   : > { %5234 = vmatmul.mubr.f32.vlgmr.msra.gmra.mrb[0].mxu0 %v237_v34  ;;  %3393 = vmatprep.mubr.f32.mxu1 %v585_v17  ;;  %v426_v34 = vld [vmem:[%s8794_s5 + $0x668] sm:$0xff]  ;;  %v7228_v17 = vpack.c.bf16 %v1872_v14, %v1871_v27  ;;  %v1004_v27 = vld [vmem:[%s8794_s5 + $0x1878] sm:$0xff]  ;;  %v1879_v14 = vld [vmem:[%s11940_s1 + $0x9d0] sm:$0xff] }
 0x3b9   : > { %7202 = vmatpush1.bf16.msra.mxu0 %v7201_v16  ;;  %5238 = vmatprep.mubr.f32.mxu0 %v259_v19  ;;  %v774_v16 = vld [vmem:[%s8794_s5 + $0x1148] sm:$0xff]  ;;  %v448_v19 = vld [vmem:[%s8794_s5 + $0x718] sm:$0xff] }
 0x3ba   : > { %7203 = vmatprep.subr.bf16.mxu0 %v8683_v0 }
 0x3bb   : > { %3394 = vmatmul.mubr.f32.gmra.mrb[34].mxu1 %v584_v22  ;;  %v773_v22 = vld [vmem:[%s8794_s5 + $0x1140] sm:$0xff] }
 0x3bc   : > { %5239 = vmatmul.mubr.f32.gmra.mrb[2].mxu0 %v258_v23  ;;  %3398 = vmatprep.mubr.f32.mxu1 %v606_v41  ;;  %v447_v23 = vld [vmem:[%s8794_s5 + $0x710] sm:$0xff] }
 0x3bd   : > { %5243 = vmatprep.mubr.f32.mxu0 %v280_v26  ;;  %7205 = vmatpush1.bf16.msra.mxu0 %v7204_v25  ;;  %v795_v41 = vld [vmem:[%s8794_s5 + $0x11f0] sm:$0xff]  ;;  %v7231_v25 = vpack.c.bf16 %v1874_v8, %v1873_v21  ;;  %v469_v26 = vld [vmem:[%s8794_s5 + $0x7c0] sm:$0xff] }
 0x3be   : > { %7206 = vmatprep.subr.bf16.mxu0 %v8683_v0  ;;  %v1025_v21 = vld [vmem:[%s8794_s5 + $0x1920] sm:$0xff]  ;;  %v699_v8 = vld [vmem:[%s8794_s5 + $0xef0] sm:$0xff] }
 0x3bf   : > { %3399 = vmatmul.mubr.f32.gmra.mrb[36].mxu1 %v605_v29  ;;  %v816_v29 = vld [vmem:[%s8794_s5 + $0x1298] sm:$0xff] }
 0x3c0   : > { %5244 = vmatmul.mubr.f32.gmra.mrb[4].mxu0 %v279_v31  ;;  %3403 = vmatprep.mubr.f32.mxu1 %v627_v32  ;;  %v490_v31 = vld [vmem:[%s8794_s5 + $0x868] sm:$0xff]  ;;  %v815_v32 = vld [vmem:[%s8794_s5 + $0x1290] sm:$0xff] }
 0x3c1   : > { %5248 = vmatprep.mubr.f32.mxu0 %v301_v33  ;;  %7208 = vmatpush1.bf16.msra.mxu0 %v7207_v18  ;;  %v489_v18 = vld [vmem:[%s8794_s5 + $0x860] sm:$0xff] }
 0x3c2   : > { %7209 = vmatprep.subr.bf16.mxu0 %v8683_v0  ;;  %v837_v33 = vld [vmem:[%s8794_s5 + $0x1340] sm:$0xff] }
 0x3c3   : > { %3404 = vmatmul.mubr.f32.gmra.mrb[38].mxu1 %v626_v24  ;;  %v1875_v24 = vld [vmem:[%s11940_s1 + $0x9b0] sm:$0xff] }
 0x3c4   : > { %5249 = vmatmul.mubr.f32.gmra.mrb[6].mxu0 %v300_v38  ;;  %3408 = vmatprep.mubr.f32.mxu1 %v648_v39  ;;  %v1876_v38 = vld [vmem:[%s11940_s1 + $0x9b8] sm:$0xff]  ;;  %v510_v39 = vld [vmem:[%s8794_s5 + $0x908] sm:$0xff] }
 0x3c5   : > { %5253 = vmatprep.mubr.f32.mxu0 %v322_v30  ;;  %7211 = vmatpush1.bf16.msra.mxu0 %v7210_v40  ;;  %v858_v40 = vld [vmem:[%s8794_s5 + $0x13e8] sm:$0xff]  ;;  %v7234_v30 = vpack.c.bf16 %v1876_v38, %v1875_v24 }
 0x3c6   : > { %7212 = vmatprep.subr.bf16.mxu0 %v8683_v0  ;;  %v1110_v24 = vld [vmem:[%s8794_s5 + $0x1bc8] sm:$0xff] }
 0x3c7   : > { %3409 = vmatmul.mubr.f32.gmra.mrb[40].mxu1 %v647_v45  ;;  %v531_v45 = vld [vmem:[%s8794_s5 + $0x9b0] sm:$0xff] }
 0x3c8   : > { %5254 = vmatmul.mubr.f32.gmra.mrb[8].mxu0 %v321_v36  ;;  %3413 = vmatprep.mubr.f32.mxu1 %v669_v46  ;;  %v879_v36 = vld [vmem:[%s8794_s5 + $0x1490] sm:$0xff]  ;;  %v553_v46 = vld [vmem:[%s8794_s5 + $0xa60] sm:$0xff] }
 0x3c9   : > { %5258 = vmatprep.mubr.f32.mxu0 %v343_v48  ;;  %7214 = vmatpush1.bf16.msra.mxu0 %v7213_v47  ;;  %v878_v47 = vld [vmem:[%s8794_s5 + $0x1488] sm:$0xff]  ;;  %v552_v48 = vld [vmem:[%s8794_s5 + $0xa58] sm:$0xff] }
 0x3ca   : > { %7215 = vmatprep.subr.bf16.mxu0 %v8683_v0 }
 0x3cb   : > { %3414 = vmatmul.mubr.f32.gmra.mrb[42].mxu1 %v668_v51  ;;  %v899_v51 = vld [vmem:[%s8794_s5 + $0x1530] sm:$0xff] }
 0x3cc   : > { %5259 = vmatmul.mubr.f32.gmra.mrb[10].mxu0 %v342_v52  ;;  %3418 = vmatprep.mubr.f32.mxu1 %v690_v50  ;;  %v573_v52 = vld [vmem:[%s8794_s5 + $0xb00] sm:$0xff] }
 0x3cd   : > { %5263 = vmatprep.mubr.f32.mxu0 %v364_v54  ;;  %7217 = vmatpush1.bf16.msra.mxu0 %v7216_v53  ;;  %v921_v50 = vld [vmem:[%s8794_s5 + $0x15e0] sm:$0xff]  ;;  %v595_v53 = vld [vmem:[%s8794_s5 + $0xbb0] sm:$0xff]  ;;  %v920_v54 = vld [vmem:[%s8794_s5 + $0x15d8] sm:$0xff] }
 0x3ce   : > { %7218 = vmatprep.subr.bf16.mxu0 %v8683_v0 }
 0x3cf   : > { %3419 = vmatmul.mubr.f32.gmra.mrb[44].mxu1 %v689_v57  ;;  %v1885_v57 = vld [vmem:[%s11940_s1 + $0xa00] sm:$0xff] }
 0x3d0   : > { %5264 = vmatmul.mubr.f32.gmra.mrb[12].mxu0 %v363_v58  ;;  %3423 = vmatprep.mubr.f32.mxu1 %v711_v59  ;;  %v594_v58 = vld [vmem:[%s8794_s5 + $0xba8] sm:$0xff] }
 0x3d1   : > { %5268 = vmatprep.mubr.f32.mxu0 %v385_v60  ;;  %7220 = vmatpush1.bf16.msra.mxu0 %v7219_v62  ;;  %v942_v59 = vld [vmem:[%s8794_s5 + $0x1688] sm:$0xff]  ;;  %v7237_v62 = vpack.c.bf16 %v1878_v56, %v1877_v55  ;;  %v868_v56 = vld [vmem:[%s8794_s5 + $0x1438] sm:$0xff] }
 0x3d2   : > { %7221 = vmatprep.subr.bf16.mxu0 %v8683_v0  ;;  %v1886_v60 = vld [vmem:[%s11940_s1 + $0xa08] sm:$0xff] }
 0x3d3   : > { %3424 = vmatmul.mubr.f32.gmra.mrb[46].mxu1 %v710_v5  ;;  %v10891_v63 = vpack.c.bf16 %v1886_v60, %v1885_v57  ;;  %v941_v5 = vld [vmem:[%s8794_s5 + $0x1680] sm:$0xff]  ;;  %v1214_v60 = vld [vmem:[%s8794_s5 + $0x1f08] sm:$0xff] }
 0x3d4   : > { %5269 = vmatmul.mubr.f32.gmra.mrb[14].mxu0 %v384_v1  ;;  %3428 = vmatprep.mubr.f32.mxu1 %v732_v2  ;;  %v615_v1 = vld [vmem:[%s8794_s5 + $0xc50] sm:$0xff]  ;;  %v1193_v57 = vld [vmem:[%s8794_s5 + $0x1e60] sm:$0xff] }
 0x3d5   : > { %5273 = vmatprep.mubr.f32.mxu0 %v406_v13  ;;  %7223 = vmatpush1.bf16.msra.mxu0 %v7222_v3  ;;  %v963_v2 = vld [vmem:[%s8794_s5 + $0x1730] sm:$0xff]  ;;  %v637_v3 = vld [vmem:[%s8794_s5 + $0xd00] sm:$0xff]  ;;  %v962_v13 = vld [vmem:[%s8794_s5 + $0x1728] sm:$0xff] }
 0x3d6   : > { %7224 = vmatprep.subr.bf16.mxu0 %v8683_v0  ;;  %7249 = vmatprep.subr.bf16.mxu1 %v10891_v63 }
 0x3d7   : > { %3429 = vmatmul.mubr.f32.gmra.mrb[48].mxu1 %v731_v7  ;;  %v658_v7 = vld [vmem:[%s8794_s5 + $0xda8] sm:$0xff] }
 0x3d8   : > { %5274 = vmatmul.mubr.f32.gmra.mrb[16].mxu0 %v405_v20  ;;  %3433 = vmatprep.mubr.f32.mxu1 %v753_v9  ;;  %v983_v20 = vld [vmem:[%s8794_s5 + $0x17d0] sm:$0xff]  ;;  %v657_v9 = vld [vmem:[%s8794_s5 + $0xda0] sm:$0xff] }
 0x3d9   : > { %5278 = vmatprep.mubr.f32.mxu0 %v427_v11  ;;  %7226 = vmatpush1.bf16.msra.mxu0 %v7225_v10  ;;  %v1005_v10 = vld [vmem:[%s8794_s5 + $0x1880] sm:$0xff]  ;;  %v679_v11 = vld [vmem:[%s8794_s5 + $0xe50] sm:$0xff] }
 0x3da   : > { %7227 = vmatprep.subr.bf16.mxu0 %v8683_v0 }
 0x3db   : > { %3434 = vmatmul.mubr.f32.gmra.mrb[50].mxu1 %v752_v15  ;;  %v1880_v15 = vld [vmem:[%s11940_s1 + $0x9d8] sm:$0xff] }
 0x3dc   : > { %5279 = vmatmul.mubr.f32.gmra.mrb[18].mxu0 %v426_v34  ;;  %3438 = vmatprep.mubr.f32.mxu1 %v774_v16  ;;  %v678_v34 = vld [vmem:[%s8794_s5 + $0xe48] sm:$0xff] }
 0x3dd   : > { %5283 = vmatprep.mubr.f32.mxu0 %v448_v19  ;;  %7229 = vmatpush1.bf16.msra.mxu0 %v7228_v17  ;;  %v1026_v16 = vld [vmem:[%s8794_s5 + $0x1928] sm:$0xff]  ;;  %v7240_v17 = vpack.c.bf16 %v1880_v15, %v1879_v14  ;;  %v700_v19 = vld [vmem:[%s8794_s5 + $0xef8] sm:$0xff]  ;;  %v973_v14 = vld [vmem:[%s8794_s5 + $0x1780] sm:$0xff] }
 0x3de   : > { %7230 = vmatprep.subr.bf16.mxu0 %v8683_v0  ;;  %v1298_v15 = vld [vmem:[%s8794_s5 + $0x21a8] sm:$0xff] }
 0x3df   : > { %3439 = vmatmul.mubr.f32.gmra.mrb[52].mxu1 %v773_v22  ;;  %v1047_v22 = vld [vmem:[%s8794_s5 + $0x19d0] sm:$0xff] }
 0x3e0   : > { %5284 = vmatmul.mubr.f32.gmra.mrb[20].mxu0 %v447_v23  ;;  %3443 = vmatprep.mubr.f32.mxu1 %v795_v41  ;;  %v721_v23 = vld [vmem:[%s8794_s5 + $0xfa0] sm:$0xff]  ;;  %v1046_v41 = vld [vmem:[%s8794_s5 + $0x19c8] sm:$0xff] }
 0x3e1   : > { %5288 = vmatprep.mubr.f32.mxu0 %v469_v26  ;;  %7232 = vmatpush1.bf16.msra.mxu0 %v7231_v25  ;;  %v720_v25 = vld [vmem:[%s8794_s5 + $0xf98] sm:$0xff] }
 0x3e2   : > { %7233 = vmatprep.subr.bf16.mxu0 %v8683_v0  ;;  %v1068_v26 = vld [vmem:[%s8794_s5 + $0x1a78] sm:$0xff] }
 0x3e3   : > { %3444 = vmatmul.mubr.f32.gmra.mrb[54].mxu1 %v794_v28  ;;  %v742_v28 = vld [vmem:[%s8794_s5 + $0x1048] sm:$0xff] }
 0x3e4   : > { %5289 = vmatmul.mubr.f32.gmra.mrb[22].mxu0 %v468_v12  ;;  %3448 = vmatprep.mubr.f32.mxu1 %v816_v29  ;;  %v1067_v12 = vld [vmem:[%s8794_s5 + $0x1a70] sm:$0xff]  ;;  %v741_v29 = vld [vmem:[%s8794_s5 + $0x1040] sm:$0xff] }
 0x3e5   : > { %5293 = vmatprep.mubr.f32.mxu0 %v490_v31  ;;  %7235 = vmatpush1.bf16.msra.mxu0 %v7234_v30  ;;  %v1089_v31 = vld [vmem:[%s8794_s5 + $0x1b20] sm:$0xff]  ;;  %v783_v30 = vld [vmem:[%s8794_s5 + $0x1190] sm:$0xff] }
 0x3e6   : > { %7236 = vmatprep.subr.bf16.mxu0 %v8683_v0 }
 0x3e7   : > { %3449 = vmatmul.mubr.f32.gmra.mrb[56].mxu1 %v815_v32  ;;  %v763_v32 = vld [vmem:[%s8794_s5 + $0x10f0] sm:$0xff] }
 0x3e8   : > { %5294 = vmatmul.mubr.f32.gmra.mrb[24].mxu0 %v489_v18  ;;  %3453 = vmatprep.mubr.f32.mxu1 %v837_v33  ;;  %v1088_v18 = vld [vmem:[%s8794_s5 + $0x1b18] sm:$0xff]  ;;  %v1881_v33 = vld [vmem:[%s11940_s1 + $0x9e0] sm:$0xff] }
 0x3e9   : > { %5298 = vmatprep.mubr.f32.mxu0 %v511_v35  ;;  %7238 = vmatpush1.bf16.msra.mxu0 %v7237_v62  ;;  %v1882_v35 = vld [vmem:[%s11940_s1 + $0x9e8] sm:$0xff]  ;;  %v889_v62 = vld [vmem:[%s8794_s5 + $0x14e0] sm:$0xff] }
 0x3ea   : > { %7239 = vmatprep.subr.bf16.mxu0 %v8683_v0  ;;  %v7243_v38 = vpack.c.bf16 %v1882_v35, %v1881_v33  ;;  %v1057_v33 = vld [vmem:[%s8794_s5 + $0x1a20] sm:$0xff] }
 0x3eb   : > { %3454 = vmatmul.mubr.f32.gmra.mrb[58].mxu1 %v836_v37  ;;  %v762_v37 = vld [vmem:[%s8794_s5 + $0x10e8] sm:$0xff] }
 0x3ec   : > { %5299 = vmatmul.mubr.f32.gmra.mrb[26].mxu0 %v510_v39  ;;  %3458 = vmatprep.mubr.f32.mxu1 %v858_v40  ;;  %v784_v39 = vld [vmem:[%s8794_s5 + $0x1198] sm:$0xff]  ;;  %v1109_v40 = vld [vmem:[%s8794_s5 + $0x1bc0] sm:$0xff] }
 0x3ed   : > { %5303 = vmatprep.mubr.f32.mxu0 %v532_v42  ;;  %7241 = vmatpush1.bf16.msra.mxu0 %v7240_v17  ;;  %v1131_v42 = vld [vmem:[%s8794_s5 + $0x1c70] sm:$0xff]  ;;  %v994_v17 = vld [vmem:[%s8794_s5 + $0x1828] sm:$0xff] }
 0x3ee   : > { %7242 = vmatprep.subr.bf16.mxu0 %v8683_v0 }
 0x3ef   : > { %3459 = vmatmul.mubr.f32.gmra.mrb[60].mxu1 %v857_v43  ;;  %v805_v43 = vld [vmem:[%s8794_s5 + $0x1240] sm:$0xff] }
 0x3f0   : > { %5304 = vmatmul.mubr.f32.gmra.mrb[28].mxu0 %v531_v45  ;;  %3463 = vmatprep.mubr.f32.mxu1 %v879_v36  ;;  %v1130_v45 = vld [vmem:[%s8794_s5 + $0x1c68] sm:$0xff]  ;;  %v804_v36 = vld [vmem:[%s8794_s5 + $0x1238] sm:$0xff] }
 0x3f1   : > { %5308 = vmatprep.mubr.f32.mxu0 %v553_v46  ;;  %7244 = vmatpush1.bf16.msra.mxu0 %v7243_v38  ;;  %v1152_v46 = vld [vmem:[%s8794_s5 + $0x1d18] sm:$0xff] }
 0x3f2   : > { %7245 = vmatprep.subr.bf16.mxu0 %v8683_v0  ;;  %v825_v0 = vld [vmem:[%s8794_s5 + $0x12e0] sm:$0xff]  ;;  %v1404_v38 = vld [vmem:[%s8794_s5 + $0x24f8] sm:$0xff] }
 0x3f3   : > { %3464 = vmatmul.mubr.f32.gmra.mrb[62].mxu1 %v878_v47  ;;  %v826_v47 = vld [vmem:[%s8794_s5 + $0x12e8] sm:$0xff] }
 0x3f4   : > { %5309 = vmatmul.mubr.f32.gmra.mrb[30].mxu0 %v552_v48  ;;  %3468 = vmatprep.mubr.f32.mxu1 %v900_v44  ;;  %v1151_v48 = vld [vmem:[%s8794_s5 + $0x1d10] sm:$0xff]  ;;  %v1173_v44 = vld [vmem:[%s8794_s5 + $0x1dc0] sm:$0xff] }
 0x3f5   : > { %5313 = vmatprep.mubr.f32.mxu0 %v574_v49  ;;  %v847_v49 = vld [vmem:[%s8794_s5 + $0x1390] sm:$0xff] }
 0x3f7   : > { %3469 = vmatmul.mubr.f32.gmra.mrb[64].mxu1 %v899_v51  ;;  %v1172_v51 = vld [vmem:[%s8794_s5 + $0x1db8] sm:$0xff] }
 0x3f8   : > { %5314 = vmatmul.mubr.f32.gmra.mrb[32].mxu0 %v573_v52  ;;  %3473 = vmatprep.mubr.f32.mxu1 %v921_v50  ;;  %v1883_v52 = vld [vmem:[%s11940_s1 + $0x9f0] sm:$0xff]  ;;  %v1884_v50 = vld [vmem:[%s11940_s1 + $0x9f8] sm:$0xff] }
 0x3f9   : > { %5318 = vmatprep.mubr.f32.mxu0 %v595_v53  ;;  %v846_v53 = vld [vmem:[%s8794_s5 + $0x1388] sm:$0xff]  ;;  %v7246_v55 = vpack.c.bf16 %v1884_v50, %v1883_v52  ;;  %v1445_v50 = vld [vmem:[%s8794_s5 + $0x2640] sm:$0xff] }
 0x3fb   : > { %3474 = vmatmul.mubr.f32.gmra.mrb[66].mxu1 %v920_v54  ;;  %v1194_v54 = vld [vmem:[%s8794_s5 + $0x1e68] sm:$0xff]  ;;  %7247 = vmatpush1.bf16.msra.mxu0 %v7246_v55 }
 0x3fc   : > { %5319 = vmatmul.mubr.f32.gmra.mrb[34].mxu0 %v594_v58  ;;  %3478 = vmatprep.mubr.f32.mxu1 %v942_v59  ;;  %v867_v58 = vld [vmem:[%s8794_s5 + $0x1430] sm:$0xff] }
 0x3fd   : > { %5323 = vmatprep.mubr.f32.mxu0 %v616_v61  ;;  %v1215_v59 = vld [vmem:[%s8794_s5 + $0x1f10] sm:$0xff]  ;;  %v888_v61 = vld [vmem:[%s8794_s5 + $0x14d8] sm:$0xff] }
 0x3ff   : > { %3479 = vmatmul.mubr.f32.gmra.mrb[68].mxu1 %v941_v5  ;;  %v1236_v5 = vld [vmem:[%s8794_s5 + $0x1fb8] sm:$0xff] }
 0x400   : > { %5324 = vmatmul.mubr.f32.gmra.mrb[36].mxu0 %v615_v1  ;;  %3483 = vmatprep.mubr.f32.mxu1 %v963_v2  ;;  %v910_v1 = vld [vmem:[%s8794_s5 + $0x1588] sm:$0xff]  ;;  %v1235_v2 = vld [vmem:[%s8794_s5 + $0x1fb0] sm:$0xff] }
 0x401   : > { %5328 = vmatprep.mubr.f32.mxu0 %v637_v3  ;;  %v909_v3 = vld [vmem:[%s8794_s5 + $0x1580] sm:$0xff] }
 0x403   : > { %3484 = vmatmul.mubr.f32.gmra.mrb[70].mxu1 %v962_v13  ;;  %v1257_v13 = vld [vmem:[%s8794_s5 + $0x2060] sm:$0xff] }
 0x404   : > { %5329 = vmatmul.mubr.f32.gmra.mrb[38].mxu0 %v636_v4  ;;  %3488 = vmatprep.mubr.f32.mxu1 %v984_v6  ;;  %v931_v4 = vld [vmem:[%s8794_s5 + $0x1630] sm:$0xff]  ;;  %v1256_v6 = vld [vmem:[%s8794_s5 + $0x2058] sm:$0xff] }
 0x405   : > { %5333 = vmatprep.mubr.f32.mxu0 %v658_v7  ;;  %v930_v7 = vld [vmem:[%s8794_s5 + $0x1628] sm:$0xff] }
 0x407   : > { %3489 = vmatmul.mubr.f32.gmra.mrb[72].mxu1 %v983_v20  ;;  %v1278_v20 = vld [vmem:[%s8794_s5 + $0x2108] sm:$0xff] }
 0x408   : > { %5334 = vmatmul.mubr.f32.gmra.mrb[40].mxu0 %v657_v9  ;;  %3493 = vmatprep.mubr.f32.mxu1 %v1005_v10  ;;  %v952_v9 = vld [vmem:[%s8794_s5 + $0x16d8] sm:$0xff]  ;;  %v1277_v10 = vld [vmem:[%s8794_s5 + $0x2100] sm:$0xff] }
 0x409   : > { %5338 = vmatprep.mubr.f32.mxu0 %v679_v11  ;;  %v951_v11 = vld [vmem:[%s8794_s5 + $0x16d0] sm:$0xff] }
 0x40b   : > { %3494 = vmatmul.mubr.f32.gmra.mrb[74].mxu1 %v1004_v27  ;;  %v1299_v27 = vld [vmem:[%s8794_s5 + $0x21b0] sm:$0xff] }
 0x40c   : > { %5339 = vmatmul.mubr.f32.gmra.mrb[42].mxu0 %v678_v34  ;;  %3498 = vmatprep.mubr.f32.mxu1 %v1026_v16  ;;  %v972_v34 = vld [vmem:[%s8794_s5 + $0x1778] sm:$0xff] }
 0x40d   : > { %5343 = vmatprep.mubr.f32.mxu0 %v700_v19  ;;  %v1320_v16 = vld [vmem:[%s8794_s5 + $0x2258] sm:$0xff]  ;;  %v1319_v19 = vld [vmem:[%s8794_s5 + $0x2250] sm:$0xff] }
 0x40f   : > { %3499 = vmatmul.mubr.f32.gmra.mrb[76].mxu1 %v1025_v21  ;;  %v993_v21 = vld [vmem:[%s8794_s5 + $0x1820] sm:$0xff] }
 0x410   : > { %5344 = vmatmul.mubr.f32.gmra.mrb[44].mxu0 %v699_v8  ;;  %3503 = vmatprep.mubr.f32.mxu1 %v1047_v22  ;;  %v1341_v8 = vld [vmem:[%s8794_s5 + $0x2300] sm:$0xff]  ;;  %v1015_v22 = vld [vmem:[%s8794_s5 + $0x18d0] sm:$0xff] }
 0x411   : > { %5348 = vmatprep.mubr.f32.mxu0 %v721_v23  ;;  %v1340_v23 = vld [vmem:[%s8794_s5 + $0x22f8] sm:$0xff] }
 0x413   : > { %3504 = vmatmul.mubr.f32.gmra.mrb[78].mxu1 %v1046_v41  ;;  %v1014_v41 = vld [vmem:[%s8794_s5 + $0x18c8] sm:$0xff] }
 0x414   : > { %5349 = vmatmul.mubr.f32.gmra.mrb[46].mxu0 %v720_v25  ;;  %3508 = vmatprep.mubr.f32.mxu1 %v1068_v26  ;;  %v1362_v25 = vld [vmem:[%s8794_s5 + $0x23a8] sm:$0xff] }
 0x415   : > { %5353 = vmatprep.mubr.f32.mxu0 %v742_v28  ;;  %v1036_v28 = vld [vmem:[%s8794_s5 + $0x1978] sm:$0xff] }
 0x417   : > { %3509 = vmatmul.mubr.f32.gmra.mrb[80].mxu1 %v1067_v12 }
 0x418   : > { %5354 = vmatmul.mubr.f32.gmra.mrb[48].mxu0 %v741_v29  ;;  %3513 = vmatprep.mubr.f32.mxu1 %v1089_v31  ;;  %v1361_v29 = vld [vmem:[%s8794_s5 + $0x23a0] sm:$0xff]  ;;  %v1035_v31 = vld [vmem:[%s8794_s5 + $0x1970] sm:$0xff] }
 0x419   : > { %5358 = vmatprep.mubr.f32.mxu0 %v763_v32  ;;  %v1383_v32 = vld [vmem:[%s8794_s5 + $0x2450] sm:$0xff] }
 0x41b   : > { %3514 = vmatmul.mubr.f32.gmra.mrb[82].mxu1 %v1088_v18 }
 0x41c   : > { %5359 = vmatmul.mubr.f32.gmra.mrb[50].mxu0 %v762_v37  ;;  %3518 = vmatprep.mubr.f32.mxu1 %v1110_v24  ;;  %v1382_v37 = vld [vmem:[%s8794_s5 + $0x2448] sm:$0xff]  ;;  %v1056_v24 = vld [vmem:[%s8794_s5 + $0x1a18] sm:$0xff] }
 0x41d   : > { %5363 = vmatprep.mubr.f32.mxu0 %v784_v39 }
 0x41f   : > { %3519 = vmatmul.mubr.f32.gmra.mrb[84].mxu1 %v1109_v40  ;;  %v1078_v40 = vld [vmem:[%s8794_s5 + $0x1ac8] sm:$0xff] }
 0x420   : > { %5364 = vmatmul.mubr.f32.gmra.mrb[52].mxu0 %v783_v30  ;;  %3523 = vmatprep.mubr.f32.mxu1 %v1131_v42  ;;  %v1403_v42 = vld [vmem:[%s8794_s5 + $0x24f0] sm:$0xff] }
 0x421   : > { %5368 = vmatprep.mubr.f32.mxu0 %v805_v43  ;;  %v1077_v43 = vld [vmem:[%s8794_s5 + $0x1ac0] sm:$0xff] }
 0x423   : > { %3524 = vmatmul.mubr.f32.gmra.mrb[86].mxu1 %v1130_v45  ;;  %v1425_v45 = vld [vmem:[%s8794_s5 + $0x25a0] sm:$0xff] }
 0x424   : > { %5369 = vmatmul.mubr.f32.gmra.mrb[54].mxu0 %v804_v36  ;;  %3528 = vmatprep.mubr.f32.mxu1 %v1152_v46  ;;  %v1099_v46 = vld [vmem:[%s8794_s5 + $0x1b70] sm:$0xff] }
 0x425   : > { %5373 = vmatprep.mubr.f32.mxu0 %v826_v47 }
 0x427   : > { %3529 = vmatmul.mubr.f32.gmra.mrb[88].mxu1 %v1151_v48  ;;  %v1424_v48 = vld [vmem:[%s8794_s5 + $0x2598] sm:$0xff] }
 0x428   : > { %5374 = vmatmul.mubr.f32.gmra.mrb[56].mxu0 %v825_v0  ;;  %3533 = vmatprep.mubr.f32.mxu1 %v1173_v44  ;;  %v1098_v0 = vld [vmem:[%s8794_s5 + $0x1b68] sm:$0xff] }
 0x429   : > { %5378 = vmatprep.mubr.f32.mxu0 %v847_v49  ;;  %v1446_v44 = vld [vmem:[%s8794_s5 + $0x2648] sm:$0xff] }
 0x42b   : > { %3534 = vmatmul.mubr.f32.gmra.mrb[90].mxu1 %v1172_v51  ;;  %v1120_v51 = vld [vmem:[%s8794_s5 + $0x1c18] sm:$0xff] }
 0x42c   : > { %5379 = vmatmul.mubr.f32.gmra.mrb[58].mxu0 %v846_v53  ;;  %3538 = vmatprep.mubr.f32.mxu1 %v1194_v54  ;;  %v1119_v53 = vld [vmem:[%s8794_s5 + $0x1c10] sm:$0xff] }
 0x42d   : > { %5383 = vmatprep.mubr.f32.mxu0 %v868_v56  ;;  %v1467_v54 = vld [vmem:[%s8794_s5 + $0x26f0] sm:$0xff]  ;;  %v1141_v56 = vld [vmem:[%s8794_s5 + $0x1cc0] sm:$0xff] }
 0x42f   : > { %3539 = vmatmul.mubr.f32.gmra.mrb[92].mxu1 %v1193_v57 }
 0x430   : > { %5384 = vmatmul.mubr.f32.gmra.mrb[60].mxu0 %v867_v58  ;;  %3543 = vmatprep.mubr.f32.mxu1 %v1215_v59  ;;  %v1466_v58 = vld [vmem:[%s8794_s5 + $0x26e8] sm:$0xff]  ;;  %v1140_v59 = vld [vmem:[%s8794_s5 + $0x1cb8] sm:$0xff] }
 0x431   : > { %5388 = vmatprep.mubr.f32.mxu0 %v889_v62  ;;  %v1488_v62 = vld [vmem:[%s8794_s5 + $0x2798] sm:$0xff] }
 0x433   : > { %3544 = vmatmul.mubr.f32.gmra.mrb[94].mxu1 %v1214_v60 }
 0x434   : > { %5389 = vmatmul.mubr.f32.gmra.mrb[62].mxu0 %v888_v61  ;;  %3548 = vmatprep.mubr.f32.mxu1 %v1236_v5  ;;  %v1162_v61 = vld [vmem:[%s8794_s5 + $0x1d68] sm:$0xff] }
 0x435   : > { %5393 = vmatprep.mubr.f32.mxu0 %v910_v1  ;;  %v1487_v1 = vld [vmem:[%s8794_s5 + $0x2790] sm:$0xff] }
 0x437   : > { %3549 = vmatmul.mubr.f32.gmra.mrb[96].mxu1 %v1235_v2  ;;  %v1161_v2 = vld [vmem:[%s8794_s5 + $0x1d60] sm:$0xff] }
 0x438   : > { %5394 = vmatmul.mubr.f32.gmra.mrb[64].mxu0 %v909_v3  ;;  %3553 = vmatprep.mubr.f32.mxu1 %v1257_v13  ;;  %v1509_v3 = vld [vmem:[%s8794_s5 + $0x2840] sm:$0xff] }
 0x439   : > { %5398 = vmatprep.mubr.f32.mxu0 %v931_v4  ;;  %v1183_v4 = vld [vmem:[%s8794_s5 + $0x1e10] sm:$0xff] }
 0x43b   : > { %3554 = vmatmul.mubr.f32.gmra.mrb[98].mxu1 %v1256_v6 }
 0x43c   : > { %5399 = vmatmul.mubr.f32.gmra.mrb[66].mxu0 %v930_v7  ;;  %3558 = vmatprep.mubr.f32.mxu1 %v1278_v20  ;;  %v1508_v7 = vld [vmem:[%s8794_s5 + $0x2838] sm:$0xff]  ;;  %v1182_v20 = vld [vmem:[%s8794_s5 + $0x1e08] sm:$0xff] }
 0x43d   : > { %5403 = vmatprep.mubr.f32.mxu0 %v952_v9  ;;  %v1530_v9 = vld [vmem:[%s8794_s5 + $0x28e8] sm:$0xff] }
 0x43f   : > { %3559 = vmatmul.mubr.f32.gmra.mrb[100].mxu1 %v1277_v10 }
 0x440   : > { %5404 = vmatmul.mubr.f32.gmra.mrb[68].mxu0 %v951_v11  ;;  %3563 = vmatprep.mubr.f32.mxu1 %v1299_v27  ;;  %v1204_v11 = vld [vmem:[%s8794_s5 + $0x1eb8] sm:$0xff] }
 0x441   : > { %5408 = vmatprep.mubr.f32.mxu0 %v973_v14  ;;  %v1529_v14 = vld [vmem:[%s8794_s5 + $0x28e0] sm:$0xff] }
 0x443   : > { %3564 = vmatmul.mubr.f32.gmra.mrb[102].mxu1 %v1298_v15  ;;  %v1203_v15 = vld [vmem:[%s8794_s5 + $0x1eb0] sm:$0xff] }
 0x444   : > { %5409 = vmatmul.mubr.f32.gmra.mrb[70].mxu0 %v972_v34  ;;  %3568 = vmatprep.mubr.f32.mxu1 %v1320_v16  ;;  %v1551_v34 = vld [vmem:[%s8794_s5 + $0x2990] sm:$0xff] }
 0x445   : > { %5413 = vmatprep.mubr.f32.mxu0 %v994_v17  ;;  %v1225_v17 = vld [vmem:[%s8794_s5 + $0x1f60] sm:$0xff] }
 0x447   : > { %3569 = vmatmul.mubr.f32.gmra.mrb[104].mxu1 %v1319_v19 }
 0x448   : > { %5414 = vmatmul.mubr.f32.gmra.mrb[72].mxu0 %v993_v21  ;;  %3573 = vmatprep.mubr.f32.mxu1 %v1341_v8  ;;  %v1550_v21 = vld [vmem:[%s8794_s5 + $0x2988] sm:$0xff]  ;;  %v1224_v8 = vld [vmem:[%s8794_s5 + $0x1f58] sm:$0xff] }
 0x449   : > { %5418 = vmatprep.mubr.f32.mxu0 %v1015_v22  ;;  %v566_v22 = vld [vmem:[%s8794_s5 + $0xac8] sm:$0xff] }
 0x44a   : > { %v10994_v26 = vpop.f32.mrb[0].mxu1 }
 0x44b   : > { %v3312_v12 = vpop.f32.mrb[1].mxu1  ;;  %3574 = vmatmul.mubr.f32.gmra.mrb[106].mxu1 %v1340_v23 }
 0x44c   : > { %5419 = vmatmul.mubr.f32.gmra.mrb[74].mxu0 %v1014_v41  ;;  %3578 = vmatprep.mubr.f32.mxu1 %v1362_v25  ;;  %v1246_v41 = vld [vmem:[%s8794_s5 + $0x2008] sm:$0xff]  ;;  %v1888_v12 = vld [vmem:[%s11940_s1 + $0xa18] sm:$0xff] }
 0x44d   : > { %5423 = vmatprep.mubr.f32.mxu0 %v1036_v28  ;;  %v1887_v28 = vld [vmem:[%s11940_s1 + $0xa10] sm:$0xff] }
 0x44e   : > { %v11000_v18 = vpop.f32.mrb[2].mxu1 }
 0x44f   : > { %v3317_v35 = vpop.f32.mrb[3].mxu1  ;;  %3579 = vmatmul.mubr.f32.gmra.mrb[108].mxu1 %v1361_v29  ;;  %v565_v29 = vld [vmem:[%s8794_s5 + $0xac0] sm:$0xff] }
 0x450   : > { %5424 = vmatmul.mubr.f32.gmra.mrb[76].mxu0 %v1035_v31  ;;  %3583 = vmatprep.mubr.f32.mxu1 %v1383_v32  ;;  %v1245_v31 = vld [vmem:[%s8794_s5 + $0x2000] sm:$0xff]  ;;  %v1267_v35 = vld [vmem:[%s8794_s5 + $0x20b0] sm:$0xff] }
 0x451   : > { %5428 = vmatprep.mubr.f32.mxu0 %v1057_v33  ;;  %v587_v33 = vld [vmem:[%s8794_s5 + $0xb70] sm:$0xff] }
 0x452   : > { %v11006_v39 = vpop.f32.mrb[4].mxu1 }
 0x453   : > { %v3322_v30 = vpop.f32.mrb[5].mxu1  ;;  %3584 = vmatmul.mubr.f32.gmra.mrb[110].mxu1 %v1382_v37  ;;  %v7252_v37 = vpack.c.bf16 %v1888_v12, %v1887_v28  ;;  %v775_v28 = vld [vmem:[%s8794_s5 + $0x1150] sm:$0xff] }
 0x454   : > { %5429 = vmatmul.mubr.f32.gmra.mrb[78].mxu0 %v1056_v24  ;;  %3588 = vmatprep.mubr.f32.mxu1 %v1404_v38  ;;  %v586_v38 = vld [vmem:[%s8794_s5 + $0xb68] sm:$0xff]  ;;  %v608_v30 = vld [vmem:[%s8794_s5 + $0xc18] sm:$0xff]  ;;  %v1455_v12 = vld [vmem:[%s8794_s5 + $0x2690] sm:$0xff] }
 0x455   : > { %5433 = vmatprep.mubr.f32.mxu0 %v1078_v40  ;;  %v1266_v40 = vld [vmem:[%s8794_s5 + $0x20a8] sm:$0xff] }
 0x456   : > { %v11012_v36 = vpop.f32.mrb[6].mxu1 }
 0x457   : > { %v3327_v47 = vpop.f32.mrb[7].mxu1  ;;  %3589 = vmatmul.mubr.f32.gmra.mrb[112].mxu1 %v1403_v42 }
 0x458   : > { %5434 = vmatmul.mubr.f32.gmra.mrb[80].mxu0 %v1077_v43  ;;  %3593 = vmatprep.mubr.f32.mxu1 %v1425_v45  ;;  %v1288_v43 = vld [vmem:[%s8794_s5 + $0x2158] sm:$0xff]  ;;  %v629_v47 = vld [vmem:[%s8794_s5 + $0xcc0] sm:$0xff] }
 0x459   : > { %5438 = vmatprep.mubr.f32.mxu0 %v1099_v46  ;;  %v607_v46 = vld [vmem:[%s8794_s5 + $0xc10] sm:$0xff] }
 0x45a   : > { %v11018_v49 = vpop.f32.mrb[8].mxu1 }
 0x45b   : > { %v3332_v52 = vpop.f32.mrb[9].mxu1  ;;  %3594 = vmatmul.mubr.f32.gmra.mrb[114].mxu1 %v1424_v48 }
 0x45c   : > { %5439 = vmatmul.mubr.f32.gmra.mrb[82].mxu0 %v1098_v0  ;;  %3598 = vmatprep.mubr.f32.mxu1 %v1446_v44  ;;  %v1309_v0 = vld [vmem:[%s8794_s5 + $0x2200] sm:$0xff]  ;;  %v1308_v52 = vld [vmem:[%s8794_s5 + $0x21f8] sm:$0xff] }
 0x45d   : > { %5443 = vmatprep.mubr.f32.mxu0 %v1120_v51  ;;  %v628_v51 = vld [vmem:[%s8794_s5 + $0xcb8] sm:$0xff] }
 0x45e   : > { %v11024_v55 = vpop.f32.mrb[10].mxu1 }
 0x45f   : > { %v3337_v57 = vpop.f32.mrb[11].mxu1  ;;  %3599 = vmatmul.mubr.f32.gmra.mrb[116].mxu1 %v1445_v50  ;;  %v650_v50 = vld [vmem:[%s8794_s5 + $0xd68] sm:$0xff] }
 0x460   : > { %5444 = vmatmul.mubr.f32.gmra.mrb[84].mxu0 %v1119_v53  ;;  %3603 = vmatprep.mubr.f32.mxu1 %v1467_v54  ;;  %v1330_v54 = vld [vmem:[%s8794_s5 + $0x22a8] sm:$0xff]  ;;  %v649_v57 = vld [vmem:[%s8794_s5 + $0xd60] sm:$0xff] }
 0x461   : > { %5448 = vmatprep.mubr.f32.mxu0 %v1141_v56 }
 0x462   : > { %v11030_v60 = vpop.f32.mrb[12].mxu1 }
 0x463   : > { %v3342_v5 = vpop.f32.mrb[13].mxu1  ;;  %3604 = vmatmul.mubr.f32.gmra.mrb[118].mxu1 %v1466_v58  ;;  %v1329_v58 = vld [vmem:[%s8794_s5 + $0x22a0] sm:$0xff] }
 0x464   : > { %5449 = vmatmul.mubr.f32.gmra.mrb[86].mxu0 %v1140_v59  ;;  %3608 = vmatprep.mubr.f32.mxu1 %v1488_v62  ;;  %v671_v59 = vld [vmem:[%s8794_s5 + $0xe10] sm:$0xff] }
 0x465   : > { %5453 = vmatprep.mubr.f32.mxu0 %v1162_v61  ;;  %v1351_v61 = vld [vmem:[%s8794_s5 + $0x2350] sm:$0xff] }
 0x466   : > { %v11036_v13 = vpop.f32.mrb[14].mxu1 }
 0x467   : > { %v3347_v6 = vpop.f32.mrb[15].mxu1  ;;  %3609 = vmatmul.mubr.f32.gmra.mrb[120].mxu1 %v1487_v1  ;;  %v670_v1 = vld [vmem:[%s8794_s5 + $0xe08] sm:$0xff] }
 0x468   : > { %5454 = vmatmul.mubr.f32.gmra.mrb[88].mxu0 %v1161_v2  ;;  %3613 = vmatprep.mubr.f32.mxu1 %v1509_v3  ;;  %v1350_v2 = vld [vmem:[%s8794_s5 + $0x2348] sm:$0xff]  ;;  %v692_v3 = vld [vmem:[%s8794_s5 + $0xeb8] sm:$0xff]  ;;  %v691_v6 = vld [vmem:[%s8794_s5 + $0xeb0] sm:$0xff] }
 0x469   : > { %5458 = vmatprep.mubr.f32.mxu0 %v1183_v4  ;;  %v1372_v4 = vld [vmem:[%s8794_s5 + $0x23f8] sm:$0xff] }
 0x46a   : > { %v11042_v10 = vpop.f32.mrb[16].mxu1 }
 0x46b   : > { %v3352_v27 = vpop.f32.mrb[17].mxu1  ;;  %3614 = vmatmul.mubr.f32.gmra.mrb[122].mxu1 %v1508_v7  ;;  %v1371_v7 = vld [vmem:[%s8794_s5 + $0x23f0] sm:$0xff] }
 0x46c   : > { %5459 = vmatmul.mubr.f32.gmra.mrb[90].mxu0 %v1182_v20  ;;  %3618 = vmatprep.mubr.f32.mxu1 %v1530_v9  ;;  %v713_v20 = vld [vmem:[%s8794_s5 + $0xf60] sm:$0xff]  ;;  %v1392_v27 = vld [vmem:[%s8794_s5 + $0x2498] sm:$0xff] }
 0x46d   : > { %5463 = vmatprep.mubr.f32.mxu0 %v1204_v11  ;;  %v1393_v9 = vld [vmem:[%s8794_s5 + $0x24a0] sm:$0xff]  ;;  %v712_v11 = vld [vmem:[%s8794_s5 + $0xf58] sm:$0xff] }
 0x46e   : > { %v11048_v16 = vpop.f32.mrb[18].mxu1 }
 0x46f   : > { %v3357_v19 = vpop.f32.mrb[19].mxu1  ;;  %3619 = vmatmul.mubr.f32.gmra.mrb[124].mxu1 %v1529_v14  ;;  %v734_v14 = vld [vmem:[%s8794_s5 + $0x1008] sm:$0xff] }
 0x470   : > { %5464 = vmatmul.mubr.f32.gmra.mrb[92].mxu0 %v1203_v15  ;;  %3623 = vmatprep.mubr.f32.mxu1 %v1551_v34  ;;  %v1414_v15 = vld [vmem:[%s8794_s5 + $0x2548] sm:$0xff]  ;;  %v733_v34 = vld [vmem:[%s8794_s5 + $0x1000] sm:$0xff]  ;;  %v755_v19 = vld [vmem:[%s8794_s5 + $0x10b0] sm:$0xff] }
 0x471   : > { %5468 = vmatprep.mubr.f32.mxu0 %v1225_v17  ;;  %v1413_v17 = vld [vmem:[%s8794_s5 + $0x2540] sm:$0xff] }
 0x472   : > { %v11054_v23 = vpop.f32.mrb[20].mxu1 }
 0x473   : > { %v3362_v25 = vpop.f32.mrb[21].mxu1  ;;  %3624 = vmatmul.mubr.f32.gmra.mrb[126].mxu1 %v1550_v21  ;;  %v1435_v21 = vld [vmem:[%s8794_s5 + $0x25f0] sm:$0xff] }
 0x474   : > { %5469 = vmatmul.mubr.f32.gmra.mrb[94].mxu0 %v1224_v8  ;;  %3773 = vmatprep.mubr.f32.mxu1 %v566_v22  ;;  %v754_v8 = vld [vmem:[%s8794_s5 + $0x10a8] sm:$0xff]  ;;  %v1456_v25 = vld [vmem:[%s8794_s5 + $0x2698] sm:$0xff] }
 0x475   : > { %5473 = vmatprep.mubr.f32.mxu0 %v1246_v41  ;;  %v1434_v22 = vld [vmem:[%s8794_s5 + $0x25e8] sm:$0xff]  ;;  %v776_v41 = vld [vmem:[%s8794_s5 + $0x1158] sm:$0xff] }
 0x476   : > { %v11065_v32 = vpop.f32.mrb[22].mxu1 }
 0x477   : > { %v3367_v24 = vpop.f32.mrb[23].mxu1  ;;  %3774 = vmatmul.mubr.f32.vlgmr.msra.gmra.mrb[32].mxu1 %v565_v29  ;;  %v797_v29 = vld [vmem:[%s8794_s5 + $0x1200] sm:$0xff] }
 0x478   : > { %5474 = vmatmul.mubr.f32.gmra.mrb[96].mxu0 %v1245_v31  ;;  %7251 = vmatpush3.bf16.msra.mxu1 %v10891_v63  ;;  %v1287_v63 = vld [vmem:[%s8794_s5 + $0x2150] sm:$0xff]  ;;  %v1477_v31 = vld [vmem:[%s8794_s5 + $0x2740] sm:$0xff]  ;;  %v1498_v24 = vld [vmem:[%s8794_s5 + $0x27e8] sm:$0xff] }
 0x479   : > { %3778 = vmatprep.mubr.f32.mxu1 %v587_v33  ;;  %5478 = vmatprep.mubr.f32.mxu0 %v1267_v35  ;;  %v796_v33 = vld [vmem:[%s8794_s5 + $0x11f8] sm:$0xff] }
 0x47a   : > { %v11073_v42 = vpop.f32.mrb[24].mxu1  ;;  %7253 = vmatprep.subr.bf16.mxu1 %v7252_v37  ;;  %v1476_v35 = vld [vmem:[%s8794_s5 + $0x2738] sm:$0xff] }
 0x47b   : > { %v3372_v45 = vpop.f32.mrb[25].mxu1  ;;  %3779 = vmatmul.mubr.f32.gmra.mrb[34].mxu1 %v586_v38  ;;  %v817_v38 = vld [vmem:[%s8794_s5 + $0x12a0] sm:$0xff] }
 0x47c   : > { %5479 = vmatmul.mubr.f32.gmra.mrb[98].mxu0 %v1266_v40  ;;  %3783 = vmatprep.mubr.f32.mxu1 %v608_v30  ;;  %v1497_v40 = vld [vmem:[%s8794_s5 + $0x27e0] sm:$0xff]  ;;  %v839_v30 = vld [vmem:[%s8794_s5 + $0x1350] sm:$0xff]  ;;  %v838_v45 = vld [vmem:[%s8794_s5 + $0x1348] sm:$0xff] }
 0x47d   : > { %5483 = vmatprep.mubr.f32.mxu0 %v1288_v43  ;;  %7255 = vmatpush3.bf16.msra.mxu1 %v7252_v37  ;;  %v818_v37 = vld [vmem:[%s8794_s5 + $0x12a8] sm:$0xff]  ;;  %v1519_v43 = vld [vmem:[%s8794_s5 + $0x2890] sm:$0xff] }
 0x47e   : > { %v11079_v48 = vpop.f32.mrb[26].mxu1 }
 0x47f   : > { %v3377_v44 = vpop.f32.mrb[27].mxu1  ;;  %3784 = vmatmul.mubr.f32.gmra.mrb[36].mxu1 %v607_v46  ;;  %v1518_v46 = vld [vmem:[%s8794_s5 + $0x2888] sm:$0xff] }
 0x480   : > { %5484 = vmatmul.mubr.f32.gmra.mrb[100].mxu0 %v1287_v63  ;;  %3788 = vmatprep.mubr.f32.mxu1 %v629_v47  ;;  %v860_v63 = vld [vmem:[%s8794_s5 + $0x13f8] sm:$0xff]  ;;  %v1539_v44 = vld [vmem:[%s8794_s5 + $0x2930] sm:$0xff] }
 0x481   : > { %5488 = vmatprep.mubr.f32.mxu0 %v1309_v0  ;;  %v1540_v47 = vld [vmem:[%s8794_s5 + $0x2938] sm:$0xff]  ;;  %v859_v0 = vld [vmem:[%s8794_s5 + $0x13f0] sm:$0xff] }
 0x482   : > { %v11085_v53 = vpop.f32.mrb[28].mxu1 }
 0x483   : > { %v3382_v56 = vpop.f32.mrb[29].mxu1  ;;  %3789 = vmatmul.mubr.f32.gmra.mrb[38].mxu1 %v628_v51  ;;  %v881_v51 = vld [vmem:[%s8794_s5 + $0x14a0] sm:$0xff] }
 0x484   : > { %5489 = vmatmul.mubr.f32.gmra.mrb[102].mxu0 %v1308_v52  ;;  %3793 = vmatprep.mubr.f32.mxu1 %v650_v50  ;;  %v1561_v52 = vld [vmem:[%s8794_s5 + $0x29e0] sm:$0xff]  ;;  %v880_v50 = vld [vmem:[%s8794_s5 + $0x1498] sm:$0xff]  ;;  %v902_v56 = vld [vmem:[%s8794_s5 + $0x1548] sm:$0xff] }
 0x485   : > { %5493 = vmatprep.mubr.f32.mxu0 %v1330_v54  ;;  %v1560_v54 = vld [vmem:[%s8794_s5 + $0x29d8] sm:$0xff] }
 0x486   : > { %v11091_v62 = vpop.f32.mrb[30].mxu1 }
 0x487   : > { %v3387_v5 = vpop.f32.mrb[31].mxu1  ;;  %3794 = vmatmul.mubr.f32.gmra.mrb[40].mxu1 %v649_v57  ;;  %v240_v57 = vld [vmem:[%s8794_s5 + $0x98] sm:$0xff] }
 0x488   : > { %5494 = vmatmul.mubr.f32.gmra.mrb[104].mxu0 %v1329_v58  ;;  %3798 = vmatprep.mubr.f32.mxu1 %v671_v59  ;;  %v901_v58 = vld [vmem:[%s8794_s5 + $0x1540] sm:$0xff]  ;;  %v239_v59 = vld [vmem:[%s8794_s5 + $0x90] sm:$0xff] }
 0x489   : > { %5498 = vmatprep.mubr.f32.mxu0 %v1351_v61  ;;  %v923_v61 = vld [vmem:[%s8794_s5 + $0x15f0] sm:$0xff]  ;;  %v261_v5 = vld [vmem:[%s8794_s5 + $0x140] sm:$0xff] }
 0x48b   : > { %3799 = vmatmul.mubr.f32.gmra.mrb[42].mxu1 %v670_v1  ;;  %v922_v1 = vld [vmem:[%s8794_s5 + $0x15e8] sm:$0xff] }
 0x48c   : > { %5499 = vmatmul.mubr.f32.gmra.mrb[106].mxu0 %v1350_v2  ;;  %3803 = vmatprep.mubr.f32.mxu1 %v692_v3  ;;  %v260_v2 = vld [vmem:[%s8794_s5 + $0x138] sm:$0xff] }
 0x48d   : > { %5503 = vmatprep.mubr.f32.mxu0 %v1372_v4  ;;  %v944_v3 = vld [vmem:[%s8794_s5 + $0x1698] sm:$0xff]  ;;  %v282_v4 = vld [vmem:[%s8794_s5 + $0x1e8] sm:$0xff] }
 0x48f   : > { %3804 = vmatmul.mubr.f32.gmra.mrb[44].mxu1 %v691_v6  ;;  %v943_v6 = vld [vmem:[%s8794_s5 + $0x1690] sm:$0xff] }
 0x490   : > { %5504 = vmatmul.mubr.f32.gmra.mrb[108].mxu0 %v1371_v7  ;;  %3808 = vmatprep.mubr.f32.mxu1 %v713_v20  ;;  %v281_v7 = vld [vmem:[%s8794_s5 + $0x1e0] sm:$0xff] }
 0x491   : > { %5508 = vmatprep.mubr.f32.mxu0 %v1393_v9  ;;  %v965_v20 = vld [vmem:[%s8794_s5 + $0x1740] sm:$0xff]  ;;  %v303_v9 = vld [vmem:[%s8794_s5 + $0x290] sm:$0xff] }
 0x493   : > { %3809 = vmatmul.mubr.f32.gmra.mrb[46].mxu1 %v712_v11  ;;  %v964_v11 = vld [vmem:[%s8794_s5 + $0x1738] sm:$0xff] }
 0x494   : > { %5509 = vmatmul.mubr.f32.gmra.mrb[110].mxu0 %v1392_v27  ;;  %3813 = vmatprep.mubr.f32.mxu1 %v734_v14  ;;  %v302_v27 = vld [vmem:[%s8794_s5 + $0x288] sm:$0xff] }
 0x495   : > { %5513 = vmatprep.mubr.f32.mxu0 %v1414_v15  ;;  %v986_v14 = vld [vmem:[%s8794_s5 + $0x17e8] sm:$0xff]  ;;  %v324_v15 = vld [vmem:[%s8794_s5 + $0x338] sm:$0xff] }
 0x497   : > { %3814 = vmatmul.mubr.f32.gmra.mrb[48].mxu1 %v733_v34  ;;  %v985_v34 = vld [vmem:[%s8794_s5 + $0x17e0] sm:$0xff] }
 0x498   : > { %5514 = vmatmul.mubr.f32.gmra.mrb[112].mxu0 %v1413_v17  ;;  %3818 = vmatprep.mubr.f32.mxu1 %v755_v19  ;;  %v323_v17 = vld [vmem:[%s8794_s5 + $0x330] sm:$0xff] }
 0x499   : > { %5518 = vmatprep.mubr.f32.mxu0 %v1435_v21  ;;  %v1007_v19 = vld [vmem:[%s8794_s5 + $0x1890] sm:$0xff]  ;;  %v345_v21 = vld [vmem:[%s8794_s5 + $0x3e0] sm:$0xff] }
 0x49b   : > { %3819 = vmatmul.mubr.f32.gmra.mrb[50].mxu1 %v754_v8  ;;  %v1006_v8 = vld [vmem:[%s8794_s5 + $0x1888] sm:$0xff] }
 0x49c   : > { %5519 = vmatmul.mubr.f32.gmra.mrb[114].mxu0 %v1434_v22  ;;  %3823 = vmatprep.mubr.f32.mxu1 %v776_v41  ;;  %v344_v22 = vld [vmem:[%s8794_s5 + $0x3d8] sm:$0xff] }
 0x49d   : > { %5523 = vmatprep.mubr.f32.mxu0 %v1456_v25  ;;  %v1028_v41 = vld [vmem:[%s8794_s5 + $0x1938] sm:$0xff]  ;;  %v366_v25 = vld [vmem:[%s8794_s5 + $0x488] sm:$0xff] }
 0x49f   : > { %3824 = vmatmul.mubr.f32.gmra.mrb[52].mxu1 %v775_v28  ;;  %v1027_v28 = vld [vmem:[%s8794_s5 + $0x1930] sm:$0xff] }
 0x4a0   : > { %5524 = vmatmul.mubr.f32.gmra.mrb[116].mxu0 %v1455_v12  ;;  %3828 = vmatprep.mubr.f32.mxu1 %v797_v29  ;;  %v365_v12 = vld [vmem:[%s8794_s5 + $0x480] sm:$0xff] }
 0x4a1   : > { %5528 = vmatprep.mubr.f32.mxu0 %v1477_v31  ;;  %v1049_v29 = vld [vmem:[%s8794_s5 + $0x19e0] sm:$0xff]  ;;  %v387_v31 = vld [vmem:[%s8794_s5 + $0x530] sm:$0xff] }
 0x4a3   : > { %3829 = vmatmul.mubr.f32.gmra.mrb[54].mxu1 %v796_v33  ;;  %v1048_v33 = vld [vmem:[%s8794_s5 + $0x19d8] sm:$0xff] }
 0x4a4   : > { %5529 = vmatmul.mubr.f32.gmra.mrb[118].mxu0 %v1476_v35  ;;  %3833 = vmatprep.mubr.f32.mxu1 %v818_v37  ;;  %v386_v35 = vld [vmem:[%s8794_s5 + $0x528] sm:$0xff] }
 0x4a5   : > { %5533 = vmatprep.mubr.f32.mxu0 %v1498_v24  ;;  %v1070_v37 = vld [vmem:[%s8794_s5 + $0x1a88] sm:$0xff]  ;;  %v408_v24 = vld [vmem:[%s8794_s5 + $0x5d8] sm:$0xff] }
 0x4a7   : > { %3834 = vmatmul.mubr.f32.gmra.mrb[56].mxu1 %v817_v38  ;;  %v1069_v38 = vld [vmem:[%s8794_s5 + $0x1a80] sm:$0xff] }
 0x4a8   : > { %5534 = vmatmul.mubr.f32.gmra.mrb[120].mxu0 %v1497_v40  ;;  %3838 = vmatprep.mubr.f32.mxu1 %v839_v30  ;;  %v407_v40 = vld [vmem:[%s8794_s5 + $0x5d0] sm:$0xff] }
 0x4a9   : > { %5538 = vmatprep.mubr.f32.mxu0 %v1519_v43  ;;  %v1091_v30 = vld [vmem:[%s8794_s5 + $0x1b30] sm:$0xff]  ;;  %v429_v43 = vld [vmem:[%s8794_s5 + $0x680] sm:$0xff] }
 0x4ab   : > { %3839 = vmatmul.mubr.f32.gmra.mrb[58].mxu1 %v838_v45  ;;  %v1090_v45 = vld [vmem:[%s8794_s5 + $0x1b28] sm:$0xff] }
 0x4ac   : > { %5539 = vmatmul.mubr.f32.gmra.mrb[122].mxu0 %v1518_v46  ;;  %3843 = vmatprep.mubr.f32.mxu1 %v860_v63  ;;  %v428_v46 = vld [vmem:[%s8794_s5 + $0x678] sm:$0xff] }
 0x4ad   : > { %5543 = vmatprep.mubr.f32.mxu0 %v1540_v47  ;;  %v1112_v63 = vld [vmem:[%s8794_s5 + $0x1bd8] sm:$0xff]  ;;  %v450_v47 = vld [vmem:[%s8794_s5 + $0x728] sm:$0xff] }
 0x4af   : > { %3844 = vmatmul.mubr.f32.gmra.mrb[60].mxu1 %v859_v0  ;;  %v1111_v0 = vld [vmem:[%s8794_s5 + $0x1bd0] sm:$0xff] }
 0x4b0   : > { %5544 = vmatmul.mubr.f32.gmra.mrb[124].mxu0 %v1539_v44  ;;  %3848 = vmatprep.mubr.f32.mxu1 %v881_v51  ;;  %v449_v44 = vld [vmem:[%s8794_s5 + $0x720] sm:$0xff] }
 0x4b1   : > { %5548 = vmatprep.mubr.f32.mxu0 %v1561_v52  ;;  %v1133_v51 = vld [vmem:[%s8794_s5 + $0x1c80] sm:$0xff]  ;;  %v471_v52 = vld [vmem:[%s8794_s5 + $0x7d0] sm:$0xff] }
 0x4b3   : > { %3849 = vmatmul.mubr.f32.gmra.mrb[62].mxu1 %v880_v50  ;;  %v1132_v50 = vld [vmem:[%s8794_s5 + $0x1c78] sm:$0xff] }
 0x4b4   : > { %5549 = vmatmul.mubr.f32.gmra.mrb[126].mxu0 %v1560_v54  ;;  %3853 = vmatprep.mubr.f32.mxu1 %v902_v56  ;;  %v470_v54 = vld [vmem:[%s8794_s5 + $0x7c8] sm:$0xff] }
 0x4b5   : > { %5618 = vmatprep.mubr.f32.mxu0 %v240_v57  ;;  %v1154_v56 = vld [vmem:[%s8794_s5 + $0x1d28] sm:$0xff]  ;;  %v492_v57 = vld [vmem:[%s8794_s5 + $0x878] sm:$0xff] }
 0x4b7   : > { %3854 = vmatmul.mubr.f32.gmra.mrb[64].mxu1 %v901_v58  ;;  %v1153_v58 = vld [vmem:[%s8794_s5 + $0x1d20] sm:$0xff] }
 0x4b8   : > { %5619 = vmatmul.mubr.f32.vlgmr.msra.gmra.mrb[0].mxu0 %v239_v59  ;;  %3858 = vmatprep.mubr.f32.mxu1 %v923_v61  ;;  %v491_v59 = vld [vmem:[%s8794_s5 + $0x870] sm:$0xff] }
 0x4b9   : > { %5623 = vmatprep.mubr.f32.mxu0 %v261_v5  ;;  %v1175_v61 = vld [vmem:[%s8794_s5 + $0x1dd0] sm:$0xff]  ;;  %v513_v5 = vld [vmem:[%s8794_s5 + $0x920] sm:$0xff] }
 0x4bb   : > { %3859 = vmatmul.mubr.f32.gmra.mrb[66].mxu1 %v922_v1  ;;  %v1174_v1 = vld [vmem:[%s8794_s5 + $0x1dc8] sm:$0xff] }
 0x4bc   : > { %5624 = vmatmul.mubr.f32.gmra.mrb[2].mxu0 %v260_v2  ;;  %3863 = vmatprep.mubr.f32.mxu1 %v944_v3  ;;  %v512_v2 = vld [vmem:[%s8794_s5 + $0x918] sm:$0xff] }
 0x4bd   : > { %5628 = vmatprep.mubr.f32.mxu0 %v282_v4  ;;  %v1196_v3 = vld [vmem:[%s8794_s5 + $0x1e78] sm:$0xff]  ;;  %v534_v4 = vld [vmem:[%s8794_s5 + $0x9c8] sm:$0xff] }
 0x4bf   : > { %3864 = vmatmul.mubr.f32.gmra.mrb[68].mxu1 %v943_v6  ;;  %v1195_v6 = vld [vmem:[%s8794_s5 + $0x1e70] sm:$0xff] }
 0x4c0   : > { %5629 = vmatmul.mubr.f32.gmra.mrb[4].mxu0 %v281_v7  ;;  %3868 = vmatprep.mubr.f32.mxu1 %v965_v20  ;;  %v533_v7 = vld [vmem:[%s8794_s5 + $0x9c0] sm:$0xff] }
 0x4c1   : > { %5633 = vmatprep.mubr.f32.mxu0 %v303_v9  ;;  %v1217_v20 = vld [vmem:[%s8794_s5 + $0x1f20] sm:$0xff]  ;;  %v555_v9 = vld [vmem:[%s8794_s5 + $0xa70] sm:$0xff] }
 0x4c3   : > { %3869 = vmatmul.mubr.f32.gmra.mrb[70].mxu1 %v964_v11  ;;  %v1216_v11 = vld [vmem:[%s8794_s5 + $0x1f18] sm:$0xff] }
 0x4c4   : > { %5634 = vmatmul.mubr.f32.gmra.mrb[6].mxu0 %v302_v27  ;;  %3873 = vmatprep.mubr.f32.mxu1 %v986_v14  ;;  %v554_v27 = vld [vmem:[%s8794_s5 + $0xa68] sm:$0xff] }
 0x4c5   : > { %5638 = vmatprep.mubr.f32.mxu0 %v324_v15  ;;  %v1238_v14 = vld [vmem:[%s8794_s5 + $0x1fc8] sm:$0xff]  ;;  %v576_v15 = vld [vmem:[%s8794_s5 + $0xb18] sm:$0xff] }
 0x4c7   : > { %3874 = vmatmul.mubr.f32.gmra.mrb[72].mxu1 %v985_v34  ;;  %v1237_v34 = vld [vmem:[%s8794_s5 + $0x1fc0] sm:$0xff] }
 0x4c8   : > { %5639 = vmatmul.mubr.f32.gmra.mrb[8].mxu0 %v323_v17  ;;  %3878 = vmatprep.mubr.f32.mxu1 %v1007_v19  ;;  %v575_v17 = vld [vmem:[%s8794_s5 + $0xb10] sm:$0xff] }
 0x4c9   : > { %5643 = vmatprep.mubr.f32.mxu0 %v345_v21  ;;  %v1259_v19 = vld [vmem:[%s8794_s5 + $0x2070] sm:$0xff]  ;;  %v597_v21 = vld [vmem:[%s8794_s5 + $0xbc0] sm:$0xff] }
 0x4cb   : > { %3879 = vmatmul.mubr.f32.gmra.mrb[74].mxu1 %v1006_v8  ;;  %v1258_v8 = vld [vmem:[%s8794_s5 + $0x2068] sm:$0xff] }
 0x4cc   : > { %5644 = vmatmul.mubr.f32.gmra.mrb[10].mxu0 %v344_v22  ;;  %3883 = vmatprep.mubr.f32.mxu1 %v1028_v41  ;;  %v596_v22 = vld [vmem:[%s8794_s5 + $0xbb8] sm:$0xff] }
 0x4cd   : > { %5648 = vmatprep.mubr.f32.mxu0 %v366_v25  ;;  %v1280_v41 = vld [vmem:[%s8794_s5 + $0x2118] sm:$0xff]  ;;  %v618_v25 = vld [vmem:[%s8794_s5 + $0xc68] sm:$0xff] }
 0x4cf   : > { %3884 = vmatmul.mubr.f32.gmra.mrb[76].mxu1 %v1027_v28  ;;  %v1279_v28 = vld [vmem:[%s8794_s5 + $0x2110] sm:$0xff] }
 0x4d0   : > { %5649 = vmatmul.mubr.f32.gmra.mrb[12].mxu0 %v365_v12  ;;  %3888 = vmatprep.mubr.f32.mxu1 %v1049_v29  ;;  %v617_v12 = vld [vmem:[%s8794_s5 + $0xc60] sm:$0xff] }
 0x4d1   : > { %5653 = vmatprep.mubr.f32.mxu0 %v387_v31  ;;  %v1301_v29 = vld [vmem:[%s8794_s5 + $0x21c0] sm:$0xff]  ;;  %v639_v31 = vld [vmem:[%s8794_s5 + $0xd10] sm:$0xff] }
 0x4d3   : > { %3889 = vmatmul.mubr.f32.gmra.mrb[78].mxu1 %v1048_v33  ;;  %v1300_v33 = vld [vmem:[%s8794_s5 + $0x21b8] sm:$0xff] }
 0x4d4   : > { %5654 = vmatmul.mubr.f32.gmra.mrb[14].mxu0 %v386_v35  ;;  %3893 = vmatprep.mubr.f32.mxu1 %v1070_v37  ;;  %v638_v35 = vld [vmem:[%s8794_s5 + $0xd08] sm:$0xff] }
 0x4d5   : > { %5658 = vmatprep.mubr.f32.mxu0 %v408_v24  ;;  %v1322_v37 = vld [vmem:[%s8794_s5 + $0x2268] sm:$0xff]  ;;  %v660_v24 = vld [vmem:[%s8794_s5 + $0xdb8] sm:$0xff] }
 0x4d7   : > { %3894 = vmatmul.mubr.f32.gmra.mrb[80].mxu1 %v1069_v38  ;;  %v1321_v38 = vld [vmem:[%s8794_s5 + $0x2260] sm:$0xff] }
 0x4d8   : > { %5659 = vmatmul.mubr.f32.gmra.mrb[16].mxu0 %v407_v40  ;;  %3898 = vmatprep.mubr.f32.mxu1 %v1091_v30  ;;  %v659_v40 = vld [vmem:[%s8794_s5 + $0xdb0] sm:$0xff] }
 0x4d9   : > { %5663 = vmatprep.mubr.f32.mxu0 %v429_v43  ;;  %v1343_v30 = vld [vmem:[%s8794_s5 + $0x2310] sm:$0xff]  ;;  %v681_v43 = vld [vmem:[%s8794_s5 + $0xe60] sm:$0xff] }
 0x4db   : > { %3899 = vmatmul.mubr.f32.gmra.mrb[82].mxu1 %v1090_v45  ;;  %v1342_v45 = vld [vmem:[%s8794_s5 + $0x2308] sm:$0xff] }
 0x4dc   : > { %5664 = vmatmul.mubr.f32.gmra.mrb[18].mxu0 %v428_v46  ;;  %3903 = vmatprep.mubr.f32.mxu1 %v1112_v63  ;;  %v680_v46 = vld [vmem:[%s8794_s5 + $0xe58] sm:$0xff] }
 0x4dd   : > { %5668 = vmatprep.mubr.f32.mxu0 %v450_v47  ;;  %v1364_v63 = vld [vmem:[%s8794_s5 + $0x23b8] sm:$0xff]  ;;  %v702_v47 = vld [vmem:[%s8794_s5 + $0xf08] sm:$0xff] }
 0x4df   : > { %3904 = vmatmul.mubr.f32.gmra.mrb[84].mxu1 %v1111_v0  ;;  %v1363_v0 = vld [vmem:[%s8794_s5 + $0x23b0] sm:$0xff] }
 0x4e0   : > { %5669 = vmatmul.mubr.f32.gmra.mrb[20].mxu0 %v449_v44  ;;  %3908 = vmatprep.mubr.f32.mxu1 %v1133_v51  ;;  %v701_v44 = vld [vmem:[%s8794_s5 + $0xf00] sm:$0xff] }
 0x4e1   : > { %5673 = vmatprep.mubr.f32.mxu0 %v471_v52  ;;  %v1385_v51 = vld [vmem:[%s8794_s5 + $0x2460] sm:$0xff]  ;;  %v723_v52 = vld [vmem:[%s8794_s5 + $0xfb0] sm:$0xff] }
 0x4e3   : > { %3909 = vmatmul.mubr.f32.gmra.mrb[86].mxu1 %v1132_v50  ;;  %v1384_v50 = vld [vmem:[%s8794_s5 + $0x2458] sm:$0xff] }
 0x4e4   : > { %5674 = vmatmul.mubr.f32.gmra.mrb[22].mxu0 %v470_v54  ;;  %3913 = vmatprep.mubr.f32.mxu1 %v1154_v56  ;;  %v722_v54 = vld [vmem:[%s8794_s5 + $0xfa8] sm:$0xff] }
 0x4e5   : > { %5678 = vmatprep.mubr.f32.mxu0 %v492_v57  ;;  %v1406_v56 = vld [vmem:[%s8794_s5 + $0x2508] sm:$0xff]  ;;  %v744_v57 = vld [vmem:[%s8794_s5 + $0x1058] sm:$0xff] }
 0x4e7   : > { %3914 = vmatmul.mubr.f32.gmra.mrb[88].mxu1 %v1153_v58  ;;  %v1405_v58 = vld [vmem:[%s8794_s5 + $0x2500] sm:$0xff] }
 0x4e8   : > { %5679 = vmatmul.mubr.f32.gmra.mrb[24].mxu0 %v491_v59  ;;  %3918 = vmatprep.mubr.f32.mxu1 %v1175_v61  ;;  %v743_v59 = vld [vmem:[%s8794_s5 + $0x1050] sm:$0xff] }
 0x4e9   : > { %5683 = vmatprep.mubr.f32.mxu0 %v513_v5  ;;  %v1427_v61 = vld [vmem:[%s8794_s5 + $0x25b0] sm:$0xff]  ;;  %v765_v5 = vld [vmem:[%s8794_s5 + $0x1100] sm:$0xff] }
 0x4eb   : > { %3919 = vmatmul.mubr.f32.gmra.mrb[90].mxu1 %v1174_v1  ;;  %v1426_v1 = vld [vmem:[%s8794_s5 + $0x25a8] sm:$0xff] }
 0x4ec   : > { %5684 = vmatmul.mubr.f32.gmra.mrb[26].mxu0 %v512_v2  ;;  %3923 = vmatprep.mubr.f32.mxu1 %v1196_v3  ;;  %v764_v2 = vld [vmem:[%s8794_s5 + $0x10f8] sm:$0xff] }
 0x4ed   : > { %5688 = vmatprep.mubr.f32.mxu0 %v534_v4  ;;  %v1448_v3 = vld [vmem:[%s8794_s5 + $0x2658] sm:$0xff]  ;;  %v786_v4 = vld [vmem:[%s8794_s5 + $0x11a8] sm:$0xff] }
 0x4ef   : > { %3924 = vmatmul.mubr.f32.gmra.mrb[92].mxu1 %v1195_v6  ;;  %v1447_v6 = vld [vmem:[%s8794_s5 + $0x2650] sm:$0xff] }
 0x4f0   : > { %5689 = vmatmul.mubr.f32.gmra.mrb[28].mxu0 %v533_v7  ;;  %3928 = vmatprep.mubr.f32.mxu1 %v1217_v20  ;;  %v785_v7 = vld [vmem:[%s8794_s5 + $0x11a0] sm:$0xff] }
 0x4f1   : > { %5693 = vmatprep.mubr.f32.mxu0 %v555_v9  ;;  %v1469_v20 = vld [vmem:[%s8794_s5 + $0x2700] sm:$0xff]  ;;  %v807_v9 = vld [vmem:[%s8794_s5 + $0x1250] sm:$0xff] }
 0x4f3   : > { %3929 = vmatmul.mubr.f32.gmra.mrb[94].mxu1 %v1216_v11  ;;  %v1468_v11 = vld [vmem:[%s8794_s5 + $0x26f8] sm:$0xff] }
 0x4f4   : > { %5694 = vmatmul.mubr.f32.gmra.mrb[30].mxu0 %v554_v27  ;;  %3933 = vmatprep.mubr.f32.mxu1 %v1238_v14  ;;  %v806_v27 = vld [vmem:[%s8794_s5 + $0x1248] sm:$0xff] }
 0x4f5   : > { %5698 = vmatprep.mubr.f32.mxu0 %v576_v15  ;;  %v1490_v14 = vld [vmem:[%s8794_s5 + $0x27a8] sm:$0xff]  ;;  %v828_v15 = vld [vmem:[%s8794_s5 + $0x12f8] sm:$0xff] }
 0x4f7   : > { %3934 = vmatmul.mubr.f32.gmra.mrb[96].mxu1 %v1237_v34  ;;  %v1489_v34 = vld [vmem:[%s8794_s5 + $0x27a0] sm:$0xff] }
 0x4f8   : > { %5699 = vmatmul.mubr.f32.gmra.mrb[32].mxu0 %v575_v17  ;;  %3938 = vmatprep.mubr.f32.mxu1 %v1259_v19  ;;  %v827_v17 = vld [vmem:[%s8794_s5 + $0x12f0] sm:$0xff] }
 0x4f9   : > { %5703 = vmatprep.mubr.f32.mxu0 %v597_v21  ;;  %v1511_v19 = vld [vmem:[%s8794_s5 + $0x2850] sm:$0xff]  ;;  %v849_v21 = vld [vmem:[%s8794_s5 + $0x13a0] sm:$0xff] }
 0x4fb   : > { %3939 = vmatmul.mubr.f32.gmra.mrb[98].mxu1 %v1258_v8  ;;  %v1510_v8 = vld [vmem:[%s8794_s5 + $0x2848] sm:$0xff] }
 0x4fc   : > { %5704 = vmatmul.mubr.f32.gmra.mrb[34].mxu0 %v596_v22  ;;  %3943 = vmatprep.mubr.f32.mxu1 %v1280_v41  ;;  %v848_v22 = vld [vmem:[%s8794_s5 + $0x1398] sm:$0xff] }
 0x4fd   : > { %5708 = vmatprep.mubr.f32.mxu0 %v618_v25  ;;  %v1532_v41 = vld [vmem:[%s8794_s5 + $0x28f8] sm:$0xff]  ;;  %v870_v25 = vld [vmem:[%s8794_s5 + $0x1448] sm:$0xff] }
 0x4ff   : > { %3944 = vmatmul.mubr.f32.gmra.mrb[100].mxu1 %v1279_v28  ;;  %v1531_v28 = vld [vmem:[%s8794_s5 + $0x28f0] sm:$0xff] }
 0x500   : > { %5709 = vmatmul.mubr.f32.gmra.mrb[36].mxu0 %v617_v12  ;;  %3948 = vmatprep.mubr.f32.mxu1 %v1301_v29  ;;  %v869_v12 = vld [vmem:[%s8794_s5 + $0x1440] sm:$0xff] }
 0x501   : > { %5713 = vmatprep.mubr.f32.mxu0 %v639_v31  ;;  %v1553_v29 = vld [vmem:[%s8794_s5 + $0x29a0] sm:$0xff]  ;;  %v891_v31 = vld [vmem:[%s8794_s5 + $0x14f0] sm:$0xff] }
 0x503   : > { %3949 = vmatmul.mubr.f32.gmra.mrb[102].mxu1 %v1300_v33  ;;  %v1552_v33 = vld [vmem:[%s8794_s5 + $0x2998] sm:$0xff] }
 0x504   : > { %5714 = vmatmul.mubr.f32.gmra.mrb[38].mxu0 %v638_v35  ;;  %3953 = vmatprep.mubr.f32.mxu1 %v1322_v37  ;;  %v890_v35 = vld [vmem:[%s8794_s5 + $0x14e8] sm:$0xff]  ;;  %v241_v37 = vld [vmem:[%s8794_s5 + $0xa0] sm:$0xff] }
 0x505   : > { %5718 = vmatprep.mubr.f32.mxu0 %v660_v24  ;;  %v912_v24 = vld [vmem:[%s8794_s5 + $0x1598] sm:$0xff] }
 0x507   : > { %3954 = vmatmul.mubr.f32.gmra.mrb[104].mxu1 %v1321_v38  ;;  %v262_v38 = vld [vmem:[%s8794_s5 + $0x148] sm:$0xff] }
 0x508   : > { %5719 = vmatmul.mubr.f32.gmra.mrb[40].mxu0 %v659_v40  ;;  %3958 = vmatprep.mubr.f32.mxu1 %v1343_v30  ;;  %v911_v40 = vld [vmem:[%s8794_s5 + $0x1590] sm:$0xff] }
 0x509   : > { %5723 = vmatprep.mubr.f32.mxu0 %v681_v43  ;;  %v283_v30 = vld [vmem:[%s8794_s5 + $0x1f0] sm:$0xff]  ;;  %v933_v43 = vld [vmem:[%s8794_s5 + $0x1640] sm:$0xff] }
 0x50b   : > { %3959 = vmatmul.mubr.f32.gmra.mrb[106].mxu1 %v1342_v45  ;;  %v304_v45 = vld [vmem:[%s8794_s5 + $0x298] sm:$0xff] }
 0x50c   : > { %5724 = vmatmul.mubr.f32.gmra.mrb[42].mxu0 %v680_v46  ;;  %3963 = vmatprep.mubr.f32.mxu1 %v1364_v63  ;;  %v932_v46 = vld [vmem:[%s8794_s5 + $0x1638] sm:$0xff]  ;;  %v325_v63 = vld [vmem:[%s8794_s5 + $0x340] sm:$0xff] }
 0x50d   : > { %5728 = vmatprep.mubr.f32.mxu0 %v702_v47  ;;  %v954_v47 = vld [vmem:[%s8794_s5 + $0x16e8] sm:$0xff] }
 0x50f   : > { %3964 = vmatmul.mubr.f32.gmra.mrb[108].mxu1 %v1363_v0  ;;  %v346_v0 = vld [vmem:[%s8794_s5 + $0x3e8] sm:$0xff] }
 0x510   : > { %5729 = vmatmul.mubr.f32.gmra.mrb[44].mxu0 %v701_v44  ;;  %3968 = vmatprep.mubr.f32.mxu1 %v1385_v51  ;;  %v953_v44 = vld [vmem:[%s8794_s5 + $0x16e0] sm:$0xff]  ;;  %v367_v51 = vld [vmem:[%s8794_s5 + $0x490] sm:$0xff] }
 0x511   : > { %5733 = vmatprep.mubr.f32.mxu0 %v723_v52  ;;  %v975_v52 = vld [vmem:[%s8794_s5 + $0x1790] sm:$0xff] }
 0x513   : > { %3969 = vmatmul.mubr.f32.gmra.mrb[110].mxu1 %v1384_v50  ;;  %v388_v50 = vld [vmem:[%s8794_s5 + $0x538] sm:$0xff] }
 0x514   : > { %5734 = vmatmul.mubr.f32.gmra.mrb[46].mxu0 %v722_v54  ;;  %3973 = vmatprep.mubr.f32.mxu1 %v1406_v56  ;;  %v974_v54 = vld [vmem:[%s8794_s5 + $0x1788] sm:$0xff]  ;;  %v409_v56 = vld [vmem:[%s8794_s5 + $0x5e0] sm:$0xff] }
 0x515   : > { %5738 = vmatprep.mubr.f32.mxu0 %v744_v57  ;;  %v996_v57 = vld [vmem:[%s8794_s5 + $0x1838] sm:$0xff] }
 0x517   : > { %3974 = vmatmul.mubr.f32.gmra.mrb[112].mxu1 %v1405_v58  ;;  %v430_v58 = vld [vmem:[%s8794_s5 + $0x688] sm:$0xff] }
 0x518   : > { %5739 = vmatmul.mubr.f32.gmra.mrb[48].mxu0 %v743_v59  ;;  %3978 = vmatprep.mubr.f32.mxu1 %v1427_v61  ;;  %v995_v59 = vld [vmem:[%s8794_s5 + $0x1830] sm:$0xff] }
 0x519   : > { %5743 = vmatprep.mubr.f32.mxu0 %v765_v5  ;;  %v451_v61 = vld [vmem:[%s8794_s5 + $0x730] sm:$0xff]  ;;  %v1017_v5 = vld [vmem:[%s8794_s5 + $0x18e0] sm:$0xff] }
 0x51b   : > { %3979 = vmatmul.mubr.f32.gmra.mrb[114].mxu1 %v1426_v1  ;;  %v472_v1 = vld [vmem:[%s8794_s5 + $0x7d8] sm:$0xff] }
 0x51c   : > { %5744 = vmatmul.mubr.f32.gmra.mrb[50].mxu0 %v764_v2  ;;  %3983 = vmatprep.mubr.f32.mxu1 %v1448_v3  ;;  %v1016_v2 = vld [vmem:[%s8794_s5 + $0x18d8] sm:$0xff]  ;;  %v493_v3 = vld [vmem:[%s8794_s5 + $0x880] sm:$0xff] }
 0x51d   : > { %5748 = vmatprep.mubr.f32.mxu0 %v786_v4 }
 0x51f   : > { %3984 = vmatmul.mubr.f32.gmra.mrb[116].mxu1 %v1447_v6  ;;  %v1038_v6 = vld [vmem:[%s8794_s5 + $0x1988] sm:$0xff] }
 0x520   : > { %5749 = vmatmul.mubr.f32.gmra.mrb[52].mxu0 %v785_v7  ;;  %3988 = vmatprep.mubr.f32.mxu1 %v1469_v20  ;;  %v514_v20 = vld [vmem:[%s8794_s5 + $0x928] sm:$0xff] }
 0x521   : > { %5753 = vmatprep.mubr.f32.mxu0 %v807_v9  ;;  %v1037_v9 = vld [vmem:[%s8794_s5 + $0x1980] sm:$0xff] }
 0x523   : > { %3989 = vmatmul.mubr.f32.gmra.mrb[118].mxu1 %v1468_v11  ;;  %v535_v11 = vld [vmem:[%s8794_s5 + $0x9d0] sm:$0xff] }
 0x524   : > { %5754 = vmatmul.mubr.f32.gmra.mrb[54].mxu0 %v806_v27  ;;  %3993 = vmatprep.mubr.f32.mxu1 %v1490_v14  ;;  %v1059_v14 = vld [vmem:[%s8794_s5 + $0x1a30] sm:$0xff] }
 0x525   : > { %5758 = vmatprep.mubr.f32.mxu0 %v828_v15 }
 0x527   : > { %3994 = vmatmul.mubr.f32.gmra.mrb[120].mxu1 %v1489_v34  ;;  %v556_v34 = vld [vmem:[%s8794_s5 + $0xa78] sm:$0xff] }
 0x528   : > { %5759 = vmatmul.mubr.f32.gmra.mrb[56].mxu0 %v827_v17  ;;  %3998 = vmatprep.mubr.f32.mxu1 %v1511_v19  ;;  %v1058_v17 = vld [vmem:[%s8794_s5 + $0x1a28] sm:$0xff]  ;;  %v577_v19 = vld [vmem:[%s8794_s5 + $0xb20] sm:$0xff] }
 0x529   : > { %5763 = vmatprep.mubr.f32.mxu0 %v849_v21 }
 0x52b   : > { %3999 = vmatmul.mubr.f32.gmra.mrb[122].mxu1 %v1510_v8  ;;  %v1080_v8 = vld [vmem:[%s8794_s5 + $0x1ad8] sm:$0xff] }
 0x52c   : > { %5764 = vmatmul.mubr.f32.gmra.mrb[58].mxu0 %v848_v22  ;;  %4003 = vmatprep.mubr.f32.mxu1 %v1532_v41  ;;  %v598_v41 = vld [vmem:[%s8794_s5 + $0xbc8] sm:$0xff] }
 0x52d   : > { %5768 = vmatprep.mubr.f32.mxu0 %v870_v25  ;;  %v1079_v25 = vld [vmem:[%s8794_s5 + $0x1ad0] sm:$0xff] }
 0x52f   : > { %4004 = vmatmul.mubr.f32.gmra.mrb[124].mxu1 %v1531_v28  ;;  %v619_v28 = vld [vmem:[%s8794_s5 + $0xc70] sm:$0xff] }
 0x530   : > { %5769 = vmatmul.mubr.f32.gmra.mrb[60].mxu0 %v869_v12  ;;  %4008 = vmatprep.mubr.f32.mxu1 %v1553_v29  ;;  %v1101_v29 = vld [vmem:[%s8794_s5 + $0x1b80] sm:$0xff] }
 0x531   : > { %5773 = vmatprep.mubr.f32.mxu0 %v891_v31 }
 0x533   : > { %4009 = vmatmul.mubr.f32.gmra.mrb[126].mxu1 %v1552_v33  ;;  %v640_v33 = vld [vmem:[%s8794_s5 + $0xd18] sm:$0xff] }
 0x534   : > { %5774 = vmatmul.mubr.f32.gmra.mrb[62].mxu0 %v890_v35  ;;  %6672 = vmatprep.mubr.msk.f32.mxu1 %vm1896_vm0, %v241_v37  ;;  %v1100_v35 = vld [vmem:[%s8794_s5 + $0x1b78] sm:$0xff]  ;;  %v661_v37 = vld [vmem:[%s8794_s5 + $0xdc0] sm:$0xff] }
 0x535   : > { %5778 = vmatprep.mubr.f32.mxu0 %v912_v24 }
 0x537   : > { %6673 = vmatmul.mubr.msk.f32.vlgmr.msra.gmra.mrb[128].mxu1 %vm1896_vm0, %v262_v38  ;;  %v1122_v38 = vld [vmem:[%s8794_s5 + $0x1c28] sm:$0xff] }
 0x538   : > { %5779 = vmatmul.mubr.f32.gmra.mrb[64].mxu0 %v911_v40  ;;  %6675 = vmatprep.mubr.msk.f32.mxu1 %vm1896_vm0, %v283_v30  ;;  %v682_v30 = vld [vmem:[%s8794_s5 + $0xe68] sm:$0xff] }
 0x539   : > { %5783 = vmatprep.mubr.f32.mxu0 %v933_v43  ;;  %v1121_v43 = vld [vmem:[%s8794_s5 + $0x1c20] sm:$0xff] }
 0x53b   : > { %6676 = vmatmul.mubr.msk.f32.gmra.mrb[130].mxu1 %vm1896_vm0, %v304_v45  ;;  %v703_v45 = vld [vmem:[%s8794_s5 + $0xf10] sm:$0xff] }
 0x53c   : > { %5784 = vmatmul.mubr.f32.gmra.mrb[66].mxu0 %v932_v46  ;;  %6678 = vmatprep.mubr.msk.f32.mxu1 %vm1896_vm0, %v325_v63  ;;  %v1143_v63 = vld [vmem:[%s8794_s5 + $0x1cd0] sm:$0xff] }
 0x53d   : > { %5788 = vmatprep.mubr.f32.mxu0 %v954_v47 }
 0x53f   : > { %6679 = vmatmul.mubr.msk.f32.gmra.mrb[132].mxu1 %vm1896_vm0, %v346_v0  ;;  %v724_v0 = vld [vmem:[%s8794_s5 + $0xfb8] sm:$0xff] }
 0x540   : > { %5789 = vmatmul.mubr.f32.gmra.mrb[68].mxu0 %v953_v44  ;;  %6681 = vmatprep.mubr.msk.f32.mxu1 %vm1896_vm0, %v367_v51  ;;  %v1142_v44 = vld [vmem:[%s8794_s5 + $0x1cc8] sm:$0xff]  ;;  %v745_v51 = vld [vmem:[%s8794_s5 + $0x1060] sm:$0xff] }
 0x541   : > { %5793 = vmatprep.mubr.f32.mxu0 %v975_v52 }
 0x543   : > { %6682 = vmatmul.mubr.msk.f32.gmra.mrb[134].mxu1 %vm1896_vm0, %v388_v50  ;;  %v1164_v50 = vld [vmem:[%s8794_s5 + $0x1d78] sm:$0xff] }
 0x544   : > { %5794 = vmatmul.mubr.f32.gmra.mrb[70].mxu0 %v974_v54  ;;  %6684 = vmatprep.mubr.msk.f32.mxu1 %vm1896_vm0, %v409_v56  ;;  %v766_v56 = vld [vmem:[%s8794_s5 + $0x1108] sm:$0xff] }
 0x545   : > { %5798 = vmatprep.mubr.f32.mxu0 %v996_v57  ;;  %v1163_v57 = vld [vmem:[%s8794_s5 + $0x1d70] sm:$0xff] }
 0x547   : > { %6685 = vmatmul.mubr.msk.f32.gmra.mrb[136].mxu1 %vm1896_vm0, %v430_v58  ;;  %v787_v58 = vld [vmem:[%s8794_s5 + $0x11b0] sm:$0xff] }
 0x548   : > { %5799 = vmatmul.mubr.f32.gmra.mrb[72].mxu0 %v995_v59  ;;  %6687 = vmatprep.mubr.msk.f32.mxu1 %vm1896_vm0, %v451_v61  ;;  %v1185_v61 = vld [vmem:[%s8794_s5 + $0x1e20] sm:$0xff] }
 0x549   : > { %5803 = vmatprep.mubr.f32.mxu0 %v1017_v5 }
 0x54a   : > { %v11300_v4 = vpop.f32.mrb[32].mxu1 }
 0x54b   : > { %v3777_v7 = vpop.f32.mrb[33].mxu1  ;;  %6688 = vmatmul.mubr.msk.f32.gmra.mrb[138].mxu1 %vm1896_vm0, %v472_v1  ;;  %v808_v1 = vld [vmem:[%s8794_s5 + $0x1258] sm:$0xff] }
 0x54c   : > { %5804 = vmatmul.mubr.f32.gmra.mrb[74].mxu0 %v1016_v2  ;;  %6690 = vmatprep.mubr.msk.f32.mxu1 %vm1896_vm0, %v493_v3  ;;  %v1184_v2 = vld [vmem:[%s8794_s5 + $0x1e18] sm:$0xff]  ;;  %v829_v3 = vld [vmem:[%s8794_s5 + $0x1300] sm:$0xff]  ;;  %v1206_v7 = vld [vmem:[%s8794_s5 + $0x1ec8] sm:$0xff] }
 0x54d   : > { %5808 = vmatprep.mubr.f32.mxu0 %v1038_v6 }
 0x54e   : > { %v11308_v27 = vpop.f32.mrb[34].mxu1 }
 0x54f   : > { %v3782_v15 = vpop.f32.mrb[35].mxu1  ;;  %6691 = vmatmul.mubr.msk.f32.gmra.mrb[140].mxu1 %vm1896_vm0, %v514_v20 }
 0x550   : > { %5809 = vmatmul.mubr.f32.gmra.mrb[76].mxu0 %v1037_v9  ;;  %6693 = vmatprep.mubr.msk.f32.mxu1 %vm1896_vm0, %v535_v11  ;;  %v850_v9 = vld [vmem:[%s8794_s5 + $0x13a8] sm:$0xff]  ;;  %v1205_v11 = vld [vmem:[%s8794_s5 + $0x1ec0] sm:$0xff] }
 0x551   : > { %5813 = vmatprep.mubr.f32.mxu0 %v1059_v14  ;;  %v871_v14 = vld [vmem:[%s8794_s5 + $0x1450] sm:$0xff] }
 0x552   : > { %v11316_v21 = vpop.f32.mrb[36].mxu1 }
 0x553   : > { %v3787_v22 = vpop.f32.mrb[37].mxu1  ;;  %6694 = vmatmul.mubr.msk.f32.gmra.mrb[142].mxu1 %vm1896_vm0, %v556_v34  ;;  %v1227_v34 = vld [vmem:[%s8794_s5 + $0x1f70] sm:$0xff] }
 0x554   : > { %5814 = vmatmul.mubr.f32.gmra.mrb[78].mxu0 %v1058_v17  ;;  %6696 = vmatprep.mubr.msk.f32.mxu1 %vm1896_vm0, %v577_v19  ;;  %v892_v19 = vld [vmem:[%s8794_s5 + $0x14f8] sm:$0xff]  ;;  %v913_v22 = vld [vmem:[%s8794_s5 + $0x15a0] sm:$0xff] }
 0x555   : > { %5818 = vmatprep.mubr.f32.mxu0 %v1080_v8  ;;  %v1226_v8 = vld [vmem:[%s8794_s5 + $0x1f68] sm:$0xff] }
 0x556   : > { %v11324_v12 = vpop.f32.mrb[38].mxu1 }
 0x557   : > { %v3792_v31 = vpop.f32.mrb[39].mxu1  ;;  %6697 = vmatmul.mubr.msk.f32.gmra.mrb[144].mxu1 %vm1896_vm0, %v598_v41 }
 0x558   : > { %5819 = vmatmul.mubr.f32.gmra.mrb[80].mxu0 %v1079_v25  ;;  %6699 = vmatprep.mubr.msk.f32.mxu1 %vm1896_vm0, %v619_v28  ;;  %v1248_v25 = vld [vmem:[%s8794_s5 + $0x2018] sm:$0xff]  ;;  %v1247_v31 = vld [vmem:[%s8794_s5 + $0x2010] sm:$0xff] }
 0x559   : > { %5823 = vmatprep.mubr.f32.mxu0 %v1101_v29  ;;  %v934_v29 = vld [vmem:[%s8794_s5 + $0x1648] sm:$0xff] }
 0x55a   : > { %v11332_v24 = vpop.f32.mrb[40].mxu1 }
 0x55b   : > { %v3797_v40 = vpop.f32.mrb[41].mxu1  ;;  %6700 = vmatmul.mubr.msk.f32.gmra.mrb[146].mxu1 %vm1896_vm0, %v640_v33  ;;  %v955_v33 = vld [vmem:[%s8794_s5 + $0x16f0] sm:$0xff] }
 0x55c   : > { %5824 = vmatmul.mubr.f32.gmra.mrb[82].mxu0 %v1100_v35  ;;  %6702 = vmatprep.mubr.msk.f32.mxu1 %vm1896_vm0, %v661_v37  ;;  %v1269_v37 = vld [vmem:[%s8794_s5 + $0x20c0] sm:$0xff]  ;;  %v976_v40 = vld [vmem:[%s8794_s5 + $0x1798] sm:$0xff] }
 0x55d   : > { %5828 = vmatprep.mubr.f32.mxu0 %v1122_v38 }
 0x55e   : > { %v11340_v46 = vpop.f32.mrb[42].mxu1 }
 0x55f   : > { %v3802_v47 = vpop.f32.mrb[43].mxu1  ;;  %6703 = vmatmul.mubr.msk.f32.gmra.mrb[148].mxu1 %vm1896_vm0, %v682_v30  ;;  %v1268_v30 = vld [vmem:[%s8794_s5 + $0x20b8] sm:$0xff] }
 0x560   : > { %5829 = vmatmul.mubr.f32.gmra.mrb[84].mxu0 %v1121_v43  ;;  %6705 = vmatprep.mubr.msk.f32.mxu1 %vm1896_vm0, %v703_v45  ;;  %v997_v43 = vld [vmem:[%s8794_s5 + $0x1840] sm:$0xff] }
 0x561   : > { %5833 = vmatprep.mubr.f32.mxu0 %v1143_v63  ;;  %v1290_v63 = vld [vmem:[%s8794_s5 + $0x2168] sm:$0xff] }
 0x562   : > { %v11348_v52 = vpop.f32.mrb[44].mxu1 }
 0x563   : > { %v3807_v54 = vpop.f32.mrb[45].mxu1  ;;  %6706 = vmatmul.mubr.msk.f32.gmra.mrb[150].mxu1 %vm1896_vm0, %v724_v0  ;;  %v1018_v0 = vld [vmem:[%s8794_s5 + $0x18e8] sm:$0xff] }
 0x564   : > { %5834 = vmatmul.mubr.f32.gmra.mrb[86].mxu0 %v1142_v44  ;;  %6708 = vmatprep.mubr.msk.f32.mxu1 %vm1896_vm0, %v745_v51  ;;  %v1289_v44 = vld [vmem:[%s8794_s5 + $0x2160] sm:$0xff]  ;;  %v1039_v51 = vld [vmem:[%s8794_s5 + $0x1990] sm:$0xff] }
 0x565   : > { %5838 = vmatprep.mubr.f32.mxu0 %v1164_v50  ;;  %v1311_v54 = vld [vmem:[%s8794_s5 + $0x2210] sm:$0xff] }
 0x566   : > { %v11356_v59 = vpop.f32.mrb[46].mxu1 }
 0x567   : > { %v3812_v5 = vpop.f32.mrb[47].mxu1  ;;  %6709 = vmatmul.mubr.msk.f32.gmra.mrb[152].mxu1 %vm1896_vm0, %v766_v56 }
 0x568   : > { %5839 = vmatmul.mubr.f32.gmra.mrb[88].mxu0 %v1163_v57  ;;  %6711 = vmatprep.mubr.msk.f32.mxu1 %vm1896_vm0, %v787_v58  ;;  %v1060_v57 = vld [vmem:[%s8794_s5 + $0x1a38] sm:$0xff]  ;;  %v1310_v58 = vld [vmem:[%s8794_s5 + $0x2208] sm:$0xff] }
 0x569   : > { %5843 = vmatprep.mubr.f32.mxu0 %v1185_v61  ;;  %v1081_v61 = vld [vmem:[%s8794_s5 + $0x1ae0] sm:$0xff] }
 0x56a   : > { %v11364_v6 = vpop.f32.mrb[48].mxu1 }
 0x56b   : > { %v3817_v20 = vpop.f32.mrb[49].mxu1  ;;  %6712 = vmatmul.mubr.msk.f32.gmra.mrb[154].mxu1 %vm1896_vm0, %v808_v1  ;;  %v1332_v1 = vld [vmem:[%s8794_s5 + $0x22b8] sm:$0xff] }
 0x56c   : > { %5844 = vmatmul.mubr.f32.gmra.mrb[90].mxu0 %v1184_v2  ;;  %6714 = vmatprep.mubr.msk.f32.mxu1 %vm1896_vm0, %v829_v3  ;;  %v1102_v3 = vld [vmem:[%s8794_s5 + $0x1b88] sm:$0xff]  ;;  %v1123_v20 = vld [vmem:[%s8794_s5 + $0x1c30] sm:$0xff] }
 0x56d   : > { %5848 = vmatprep.mubr.f32.mxu0 %v1206_v7  ;;  %v1331_v7 = vld [vmem:[%s8794_s5 + $0x22b0] sm:$0xff] }
 0x56e   : > { %v11372_v15 = vpop.f32.mrb[50].mxu1 }
 0x56f   : > { %v3822_v17 = vpop.f32.mrb[51].mxu1  ;;  %6715 = vmatmul.mubr.msk.f32.gmra.mrb[156].mxu1 %vm1896_vm0, %v850_v9 }
 0x570   : > { %5849 = vmatmul.mubr.f32.gmra.mrb[92].mxu0 %v1205_v11  ;;  %6717 = vmatprep.mubr.msk.f32.mxu1 %vm1896_vm0, %v871_v14  ;;  %v1353_v11 = vld [vmem:[%s8794_s5 + $0x2360] sm:$0xff]  ;;  %v1144_v17 = vld [vmem:[%s8794_s5 + $0x1cd8] sm:$0xff] }
 0x571   : > { %5853 = vmatprep.mubr.f32.mxu0 %v1227_v34  ;;  %v11426_v14 = vld [vmem:[%s11941_s2] ss:$0 sm:$0xff] }
 0x572   : > { %v11380_v41 = vpop.f32.mrb[52].mxu1 }
 0x573   : > { %v3827_v28 = vpop.f32.mrb[53].mxu1  ;;  %6718 = vmatmul.mubr.msk.f32.gmra.mrb[158].mxu1 %vm1896_vm0, %v892_v19  ;;  %v1352_v19 = vld [vmem:[%s8794_s5 + $0x2358] sm:$0xff] }
 0x574   : > { %5854 = vmatmul.mubr.f32.gmra.mrb[94].mxu0 %v1226_v8  ;;  %6720 = vmatprep.mubr.msk.f32.mxu1 %vm1896_vm0, %v913_v22  ;;  %v1165_v8 = vld [vmem:[%s8794_s5 + $0x1d80] sm:$0xff]  ;;  %v7288_v22 = vadd.f32 %v11426_v14, %v10994_v26  ;;  %v1374_v28 = vld [vmem:[%s8794_s5 + $0x2408] sm:$0xff] }
 0x575   : > { %5858 = vmatprep.mubr.f32.mxu0 %v1248_v25  ;;  %v1373_v26 = vld [vmem:[%s8794_s5 + $0x2400] sm:$0xff] }
 0x576   : > { %v11388_v35 = vpop.f32.mrb[54].mxu1 }
 0x577   : > { %v3832_v38 = vpop.f32.mrb[55].mxu1  ;;  %6721 = vmatmul.mubr.msk.f32.gmra.mrb[160].mxu1 %vm1896_vm0, %v934_v29 }
 0x578   : > { %5859 = vmatmul.mubr.f32.gmra.mrb[96].mxu0 %v1247_v31  ;;  %6723 = vmatprep.mubr.msk.f32.mxu1 %vm1896_vm0, %v955_v33  ;;  %v1186_v38 = vld [vmem:[%s8794_s5 + $0x1e28] sm:$0xff] }
 0x579   : > { %5863 = vmatprep.mubr.f32.mxu0 %v1269_v37 }
 0x57a   : > { %v11396_v45 = vpop.f32.mrb[56].mxu1 }
 0x57b   : > { %v3837_v47 = vpop.f32.mrb[57].mxu1  ;;  %6724 = vmatmul.mubr.msk.f32.gmra.mrb[162].mxu1 %vm1896_vm0, %v976_v40  ;;  %v1207_v40 = vld [vmem:[%s8794_s5 + $0x1ed0] sm:$0xff] }
 0x57c   : > { %5864 = vmatmul.mubr.f32.gmra.mrb[98].mxu0 %v1268_v30  ;;  %6726 = vmatprep.mubr.msk.f32.mxu1 %vm1896_vm0, %v997_v43  ;;  %v7290_v30 = vadd.f32 %v11426_v14, %v11000_v18  ;;  %v1394_v18 = vld [vmem:[%s8794_s5 + $0x24a8] sm:$0xff] }
 0x57d   : > { %5868 = vmatprep.mubr.f32.mxu0 %v1290_v63  ;;  %v1395_v63 = vld [vmem:[%s8794_s5 + $0x24b0] sm:$0xff] }
 0x57e   : > { %v11404_v50 = vpop.f32.mrb[58].mxu1 }
 0x57f   : > { %v3842_v56 = vpop.f32.mrb[59].mxu1  ;;  %6727 = vmatmul.mubr.msk.f32.gmra.mrb[164].mxu1 %vm1896_vm0, %v1018_v0 }
 0x580   : > { %5869 = vmatmul.mubr.f32.gmra.mrb[100].mxu0 %v1289_v44  ;;  %6729 = vmatprep.mubr.msk.f32.mxu1 %vm1896_vm0, %v1039_v51  ;;  %v1249_v56 = vld [vmem:[%s8794_s5 + $0x2020] sm:$0xff] }
 0x581   : > { %5873 = vmatprep.mubr.f32.mxu0 %v1311_v54  ;;  %v1228_v54 = vld [vmem:[%s8794_s5 + $0x1f78] sm:$0xff] }
 0x582   : > { %v11412_v5 = vpop.f32.mrb[60].mxu1 }
 0x583   : > { %v3847_v2 = vpop.f32.mrb[61].mxu1  ;;  %6730 = vmatmul.mubr.msk.f32.gmra.mrb[166].mxu1 %vm1896_vm0, %v1060_v57  ;;  %v7292_v57 = vadd.f32 %v11426_v14, %v11006_v39  ;;  %v1415_v39 = vld [vmem:[%s8794_s5 + $0x2550] sm:$0xff] }
 0x584   : > { %5874 = vmatmul.mubr.f32.gmra.mrb[102].mxu0 %v1310_v58  ;;  %6732 = vmatprep.mubr.msk.f32.mxu1 %vm1896_vm0, %v1081_v61  ;;  %v1416_v61 = vld [vmem:[%s8794_s5 + $0x2558] sm:$0xff] }
 0x585   : > { %5878 = vmatprep.mubr.f32.mxu0 %v1332_v1 }
 0x586   : > { %v11420_v9 = vpop.f32.mrb[62].mxu1 }
 0x587   : > { %v3852_v34 = vpop.f32.mrb[63].mxu1  ;;  %6733 = vmatmul.mubr.msk.f32.gmra.mrb[168].mxu1 %vm1896_vm0, %v1102_v3 }
 0x588   : > { %5879 = vmatmul.mubr.f32.gmra.mrb[104].mxu0 %v1331_v7  ;;  %6735 = vmatprep.mubr.msk.f32.mxu1 %vm1896_vm0, %v1123_v20  ;;  %v1270_v20 = vld [vmem:[%s8794_s5 + $0x20c8] sm:$0xff]  ;;  %v7294_v34 = vadd.f32 %v11426_v14, %v11012_v36  ;;  %v1436_v36 = vld [vmem:[%s8794_s5 + $0x25f8] sm:$0xff] }
 0x589   : > { %5883 = vmatprep.mubr.f32.mxu0 %v1353_v11  ;;  %v1291_v11 = vld [vmem:[%s8794_s5 + $0x2170] sm:$0xff] }
 0x58a   : > { %v11435_v25 = vpop.f32.mrb[64].mxu1 }
 0x58b   : > { %v5620_v29 = vpop.f32.mrb[0].mxu0  ;;  %v3857_v31 = vpop.f32.mrb[65].mxu1  ;;  %6736 = vmatmul.mubr.msk.f32.gmra.mrb[170].mxu1 %vm1896_vm0, %v1144_v17 }
 0x58c   : > { %v11439_v33 = vadd.f32 %v7288_v22, %v5620_v29  ;;  %v5622_v37 = vpop.f32.mrb[1].mxu0  ;;  %5884 = vmatmul.mubr.f32.gmra.mrb[106].mxu0 %v1352_v19  ;;  %6738 = vmatprep.mubr.msk.f32.mxu1 %vm1896_vm0, %v1165_v8  ;;  %v1437_v19 = vld [vmem:[%s8794_s5 + $0x2600] sm:$0xff]  ;;  %v1312_v31 = vld [vmem:[%s8794_s5 + $0x2218] sm:$0xff] }
 0x58d   : > { %5888 = vmatprep.mubr.f32.mxu0 %v1374_v28  ;;  %v1333_v37 = vld [vmem:[%s8794_s5 + $0x22c0] sm:$0xff] }
 0x58e   : > { %v11447_v43 = vpop.f32.mrb[66].mxu1 }
 0x58f   : > { %v5625_v47 = vpop.f32.mrb[2].mxu0  ;;  %v3862_v0 = vpop.f32.mrb[67].mxu1  ;;  %6739 = vmatmul.mubr.msk.f32.gmra.mrb[172].mxu1 %vm1896_vm0, %v1186_v38  ;;  %v7296_v38 = vadd.f32 %v11426_v14, %v11018_v49  ;;  %v1457_v49 = vld [vmem:[%s8794_s5 + $0x26a0] sm:$0xff] }
 0x590   : > { %v11451_v44 = vadd.f32 %v7290_v30, %v5625_v47  ;;  %v5627_v51 = vpop.f32.mrb[3].mxu0  ;;  %5889 = vmatmul.mubr.f32.gmra.mrb[108].mxu0 %v1373_v26  ;;  %6741 = vmatprep.mubr.msk.f32.mxu1 %vm1896_vm0, %v1207_v40  ;;  %v1458_v40 = vld [vmem:[%s8794_s5 + $0x26a8] sm:$0xff] }
 0x591   : > { %5893 = vmatprep.mubr.f32.mxu0 %v1395_v63  ;;  %v1354_v51 = vld [vmem:[%s8794_s5 + $0x2368] sm:$0xff] }
 0x592   : > { %v11459_v58 = vpop.f32.mrb[68].mxu1 }
 0x593   : > { %v5630_v1 = vpop.f32.mrb[4].mxu0  ;;  %v3867_v2 = vpop.f32.mrb[69].mxu1  ;;  %6742 = vmatmul.mubr.msk.f32.gmra.mrb[174].mxu1 %vm1896_vm0, %v1228_v54  ;;  %v1375_v54 = vld [vmem:[%s8794_s5 + $0x2410] sm:$0xff] }
 0x594   : > { %v11463_v3 = vadd.f32 %v7292_v57, %v5630_v1  ;;  %v5632_v7 = vpop.f32.mrb[5].mxu0  ;;  %5894 = vmatmul.mubr.f32.gmra.mrb[110].mxu0 %v1394_v18  ;;  %6744 = vmatprep.mubr.msk.f32.mxu1 %vm1896_vm0, %v1249_v56  ;;  %v7298_v18 = vadd.f32 %v11426_v14, %v11024_v55  ;;  %v1479_v57 = vld [vmem:[%s8794_s5 + $0x2750] sm:$0xff]  ;;  %v1478_v55 = vld [vmem:[%s8794_s5 + $0x2748] sm:$0xff] }
 0x595   : > { %5898 = vmatprep.mubr.f32.mxu0 %v1416_v61 }
 0x596   : > { %v11471_v17 = vpop.f32.mrb[70].mxu1 }
 0x597   : > { %v5635_v8 = vpop.f32.mrb[6].mxu0  ;;  %v3872_v22 = vpop.f32.mrb[71].mxu1  ;;  %6745 = vmatmul.mubr.msk.f32.gmra.mrb[176].mxu1 %vm1896_vm0, %v1270_v20  ;;  %v1396_v20 = vld [vmem:[%s8794_s5 + $0x24b8] sm:$0xff] }
 0x598   : > { %v11475_v28 = vadd.f32 %v7294_v34, %v5635_v8  ;;  %v5637_v29 = vpop.f32.mrb[7].mxu0  ;;  %5899 = vmatmul.mubr.f32.gmra.mrb[112].mxu0 %v1415_v39  ;;  %6747 = vmatprep.mubr.msk.f32.mxu1 %vm1896_vm0, %v1291_v11  ;;  %v1417_v39 = vld [vmem:[%s8794_s5 + $0x2560] sm:$0xff]  ;;  %v7300_v11 = vadd.f32 %v11426_v14, %v11030_v60  ;;  %v1499_v60 = vld [vmem:[%s8794_s5 + $0x27f0] sm:$0xff] }
 0x599   : > { %5903 = vmatprep.mubr.f32.mxu0 %v1437_v19  ;;  %v1500_v19 = vld [vmem:[%s8794_s5 + $0x27f8] sm:$0xff] }
 0x59a   : > { %v11483_v26 = vpop.f32.mrb[72].mxu1 }
 0x59b   : > { %v5640_v30 = vpop.f32.mrb[8].mxu0  ;;  %v3877_v63 = vpop.f32.mrb[73].mxu1  ;;  %6748 = vmatmul.mubr.msk.f32.gmra.mrb[178].mxu1 %vm1896_vm0, %v1312_v31 }
 0x59c   : > { %v11487_v47 = vadd.f32 %v7296_v38, %v5640_v30  ;;  %v5642_v0 = vpop.f32.mrb[9].mxu0  ;;  %5904 = vmatmul.mubr.f32.gmra.mrb[114].mxu0 %v1436_v36  ;;  %6750 = vmatprep.mubr.msk.f32.mxu1 %vm1896_vm0, %v1333_v37  ;;  %v1438_v36 = vld [vmem:[%s8794_s5 + $0x2608] sm:$0xff]  ;;  %v1459_v37 = vld [vmem:[%s8794_s5 + $0x26b0] sm:$0xff]  ;;  %v7302_v38 = vadd.f32 %v11426_v14, %v11036_v13  ;;  %v1521_v30 = vld [vmem:[%s8794_s5 + $0x28a0] sm:$0xff] }
 0x59d   : > { %5908 = vmatprep.mubr.f32.mxu0 %v1458_v40  ;;  %v1520_v13 = vld [vmem:[%s8794_s5 + $0x2898] sm:$0xff] }
 0x59e   : > { %v11495_v56 = vpop.f32.mrb[74].mxu1 }
 0x59f   : > { %v5645_v61 = vpop.f32.mrb[10].mxu0  ;;  %v3882_v1 = vpop.f32.mrb[75].mxu1  ;;  %6751 = vmatmul.mubr.msk.f32.gmra.mrb[180].mxu1 %vm1896_vm0, %v1354_v51 }
 0x5a0   : > { %v11499_v2 = vadd.f32 %v7298_v18, %v5645_v61  ;;  %v5647_v7 = vpop.f32.mrb[11].mxu0  ;;  %5909 = vmatmul.mubr.f32.gmra.mrb[116].mxu0 %v1457_v49  ;;  %6753 = vmatprep.mubr.msk.f32.mxu1 %vm1896_vm0, %v1375_v54  ;;  %v1480_v54 = vld [vmem:[%s8794_s5 + $0x2758] sm:$0xff]  ;;  %v1501_v18 = vld [vmem:[%s8794_s5 + $0x2800] sm:$0xff]  ;;  %v1542_v1 = vld [vmem:[%s8794_s5 + $0x2948] sm:$0xff] }
 0x5a1   : > { %5913 = vmatprep.mubr.f32.mxu0 %v1479_v57  ;;  %v7304_v57 = vadd.f32 %v11426_v14, %v11042_v10  ;;  %v1543_v10 = vld [vmem:[%s8794_s5 + $0x2950] sm:$0xff] }
 0x5a2   : > { %v11507_v34 = vpop.f32.mrb[76].mxu1 }
 0x5a3   : > { %v5650_v8 = vpop.f32.mrb[12].mxu0  ;;  %v3887_v22 = vpop.f32.mrb[77].mxu1  ;;  %6754 = vmatmul.mubr.msk.f32.gmra.mrb[182].mxu1 %vm1896_vm0, %v1396_v20 }
 0x5a4   : > { %v11511_v29 = vadd.f32 %v7300_v11, %v5650_v8  ;;  %v5652_v31 = vpop.f32.mrb[13].mxu0  ;;  %5914 = vmatmul.mubr.f32.gmra.mrb[118].mxu0 %v1478_v55  ;;  %6756 = vmatprep.mubr.msk.f32.mxu1 %vm1896_vm0, %v1417_v39  ;;  %v1522_v11 = vld [vmem:[%s8794_s5 + $0x28a8] sm:$0xff]  ;;  %v7306_v8 = vadd.f32 %v11426_v14, %v11048_v16 }
 0x5a5   : > { %5918 = vmatprep.mubr.f32.mxu0 %v1500_v19  ;;  %v1541_v19 = vld [vmem:[%s8794_s5 + $0x2940] sm:$0xff]  ;;  %v1563_v31 = vld [vmem:[%s8794_s5 + $0x29f0] sm:$0xff] }
 0x5a6   : > { %v11519_v40 = vpop.f32.mrb[78].mxu1 }
 0x5a7   : > { %v5655_v63 = vpop.f32.mrb[14].mxu0  ;;  %v3892_v0 = vpop.f32.mrb[79].mxu1  ;;  %6757 = vmatmul.mubr.msk.f32.gmra.mrb[184].mxu1 %vm1896_vm0, %v1438_v36 }
 0x5a8   : > { %v11523_v51 = vadd.f32 %v7302_v38, %v5655_v63  ;;  %v5657_v49 = vpop.f32.mrb[15].mxu0  ;;  %5919 = vmatmul.mubr.f32.gmra.mrb[120].mxu0 %v1499_v60  ;;  %6759 = vmatprep.mubr.msk.f32.mxu1 %vm1896_vm0, %v1459_v37  ;;  %v1562_v63 = vld [vmem:[%s8794_s5 + $0x29e8] sm:$0xff]  ;;  %v7308_v0 = vadd.f32 %v11426_v14, %v11054_v23 }
 0x5a9   : > { %5923 = vmatprep.mubr.f32.mxu0 %v1521_v30  ;;  %v1564_v30 = vld [vmem:[%s8794_s5 + $0x29f8] sm:$0xff]  ;;  %s6527_s5 = sshll.u32 %s6519_s3, 6 }
 0x5aa   : > { %v11531_v61 = vpop.f32.mrb[80].mxu1  ;;  %p216_p7 = scmp.lt.s32.totalorder %s6527_s5, 255 }
 0x5ab   : > { %v5660_v7 = vpop.f32.mrb[16].mxu0  ;;  %v3897_v20 = vpop.f32.mrb[81].mxu1  ;;  %6760 = vmatmul.mubr.msk.f32.gmra.mrb[186].mxu1 %vm1896_vm0, %v1480_v54 }
 0x5ac   : > { %v11535_v55 = vadd.f32 %v7304_v57, %v5660_v7  ;;  %v5662_v39 = vpop.f32.mrb[17].mxu0  ;;  %5924 = vmatmul.mubr.f32.gmra.mrb[122].mxu0 %v1520_v13  ;;  %6762 = vmatprep.mubr.msk.f32.mxu1 %vm1896_vm0, %v1501_v18  ;;  %v7310_v57 = vadd.f32 %v11426_v14, %v11065_v32  ;;  %v7314_v32 = vadd.f32 %v11426_v14, %v11079_v48  ;;  %s11980_s5 = smov (!%p216_p7, %s6527_s5), 255 }
 0x5ad   : > { %5928 = vmatprep.mubr.f32.mxu0 %v1542_v1  ;;  %v7318_v48 = vadd.f32 %v11426_v14, %v11091_v62  ;;  %v7322_v62 = vadd.f32 %v11426_v14, %v11308_v27  ;;  %v7326_v27 = vadd.f32 %v11426_v14, %v11324_v12  ;;  %v7330_v12 = vadd.f32 %v11426_v14, %v11340_v46  ;;  %s6528_s18 = sshll.u32 %s11980_s5, 3 }
 0x5ae   : > { %v11543_v22 = vpop.f32.mrb[82].mxu1  ;;  %v7334_v46 = vadd.f32 %v11426_v14, %v11356_v59  ;;  %v7338_v59 = vadd.f32 %v11426_v14, %v11372_v15  ;;  %v7342_v15 = vadd.f32 %v11426_v14, %v11388_v35  ;;  %v7346_v35 = vadd.f32 %v11426_v14, %v11404_v50  ;;  %s11708_s14 = scalar_lea.vmem %s11943_s4, %s6528_s18 }
 0x5af   : > { %v5665_v36 = vpop.f32.mrb[18].mxu0  ;;  %v3902_v60 = vpop.f32.mrb[83].mxu1  ;;  %6763 = vmatmul.mubr.msk.f32.gmra.mrb[188].mxu1 %vm1896_vm0, %v1522_v11  ;;  %v7312_v11 = vadd.f32 %v11426_v14, %v11073_v42  ;;  %v7316_v42 = vadd.f32 %v11426_v14, %v11085_v53  ;;  %v7320_v53 = vadd.f32 %v11426_v14, %v11300_v4  ;;  %v7324_v4 = vadd.f32 %v11426_v14, %v11316_v21 }
 0x5b0   : > { %v11547_v37 = vadd.f32 %v7306_v8, %v5665_v36  ;;  %v5667_v38 = vpop.f32.mrb[19].mxu0  ;;  %5929 = vmatmul.mubr.f32.gmra.mrb[124].mxu0 %v1541_v19  ;;  %6765 = vmatprep.mubr.msk.f32.mxu1 %vm1896_vm0, %v1543_v10  ;;  %v7328_v21 = vadd.f32 %v11426_v14, %v11332_v24  ;;  %v7332_v24 = vadd.f32 %v11426_v14, %v11348_v52 }
 0x5b1   : > { %5933 = vmatprep.mubr.f32.mxu0 %v1563_v31  ;;  %v7336_v52 = vadd.f32 %v11426_v14, %v11364_v6  ;;  %v7340_v6 = vadd.f32 %v11426_v14, %v11380_v41  ;;  %v7344_v41 = vadd.f32 %v11426_v14, %v11396_v45  ;;  %v7348_v45 = vadd.f32 %v11426_v14, %v11412_v5 }
 0x5b2   : > { %v11554_v16 = vpop.f32.mrb[84].mxu1  ;;  %v7350_v50 = vadd.f32 %v11426_v14, %v11420_v9  ;;  %v7352_v5 = vadd.f32 %v11426_v14, %v11435_v25 }
 0x5b3   : > { %v5670_v49 = vpop.f32.mrb[20].mxu0  ;;  %v3907_v54 = vpop.f32.mrb[85].mxu1  ;;  %6766 = vmatmul.mubr.msk.f32.gmra.mrb[190].mxu1 %vm1896_vm0, %v1564_v30 }
 0x5b4   : > { %v11557_v13 = vadd.f32 %v7308_v0, %v5670_v49  ;;  %v5672_v18 = vpop.f32.mrb[21].mxu0  ;;  %5934 = vmatmul.mubr.f32.gmra.mrb[126].mxu0 %v1562_v63 }
 0x5b6   : > { %v11561_v1 = vpop.f32.mrb[86].mxu1 }
 0x5b7   : > { %v5675_v7 = vpop.f32.mrb[22].mxu0  ;;  %v3912_v20 = vpop.f32.mrb[87].mxu1 }
 0x5b8   : > { %v11563_v39 = vadd.f32 %v7310_v57, %v5675_v7  ;;  %v5677_v23 = vpop.f32.mrb[23].mxu0 }
 0x5ba   : > { %v11567_v19 = vpop.f32.mrb[88].mxu1 }
 0x5bb   : > { %v5680_v10 = vpop.f32.mrb[24].mxu0  ;;  %v3917_v8 = vpop.f32.mrb[89].mxu1 }
 0x5bc   : > { %v11569_v31 = vadd.f32 %v7312_v11, %v5680_v10  ;;  %v5682_v36 = vpop.f32.mrb[25].mxu0 }
 0x5be   : > { %v11573_v60 = vpop.f32.mrb[90].mxu1 }
 0x5bf   : > { %v5685_v38 = vpop.f32.mrb[26].mxu0  ;;  %v3922_v30 = vpop.f32.mrb[91].mxu1 }
 0x5c0   : > { %v11575_v63 = vadd.f32 %v7314_v32, %v5685_v38  ;;  %v5687_v0 = vpop.f32.mrb[27].mxu0 }
 0x5c2   : > { %v11579_v49 = vpop.f32.mrb[92].mxu1 }
 0x5c3   : > { %v5690_v54 = vpop.f32.mrb[28].mxu0  ;;  %v3927_v18 = vpop.f32.mrb[93].mxu1 }
 0x5c4   : > { %v11581_v57 = vadd.f32 %v7316_v42, %v5690_v54  ;;  %v5692_v7 = vpop.f32.mrb[29].mxu0 }
 0x5c6   : > { %v11585_v20 = vpop.f32.mrb[94].mxu1 }
 0x5c7   : > { %v5695_v23 = vpop.f32.mrb[30].mxu0  ;;  %v3932_v11 = vpop.f32.mrb[95].mxu1 }
 0x5c8   : > { %v11587_v10 = vadd.f32 %v7318_v48, %v5695_v23  ;;  %v5697_v8 = vpop.f32.mrb[31].mxu0 }
 0x5ca   : > { %v11591_v36 = vpop.f32.mrb[96].mxu1 }
 0x5cb   : > { %v5700_v32 = vpop.f32.mrb[32].mxu0  ;;  %v3937_v38 = vpop.f32.mrb[97].mxu1 }
 0x5cc   : > { %v11593_v30 = vadd.f32 %v7320_v53, %v5700_v32  ;;  %v5702_v0 = vpop.f32.mrb[33].mxu0 }
 0x5ce   : > { %v11597_v42 = vpop.f32.mrb[98].mxu1 }
 0x5cf   : > { %v5705_v54 = vpop.f32.mrb[34].mxu0  ;;  %v3942_v18 = vpop.f32.mrb[99].mxu1 }
 0x5d0   : > { %v11599_v7 = vadd.f32 %v7322_v62, %v5705_v54  ;;  %v5707_v48 = vpop.f32.mrb[35].mxu0 }
 0x5d2   : > { %v11603_v23 = vpop.f32.mrb[100].mxu1 }
 0x5d3   : > { %11947 = vst [vmem:[#allocation5_spill] sm:$0xff] %v11603_v23  ;;  %v5710_v11 = vpop.f32.mrb[36].mxu0  ;;  %v3947_v8 = vpop.f32.mrb[101].mxu1 }
 0x5d4   : > { %v11605_v53 = vadd.f32 %v7324_v4, %v5710_v11  ;;  %v5712_v32 = vpop.f32.mrb[37].mxu0 }
 0x5d6   : > { %v11609_v38 = vpop.f32.mrb[102].mxu1 }
 0x5d7   : > { %11948 = vst [vmem:[#allocation6_spill] sm:$0xff] %v11609_v38  ;;  %v5715_v0 = vpop.f32.mrb[38].mxu0  ;;  %v3952_v18 = vpop.f32.mrb[103].mxu1 }
 0x5d8   : > { %v11611_v62 = vadd.f32 %v7326_v27, %v5715_v0  ;;  %v5717_v54 = vpop.f32.mrb[39].mxu0 }
 0x5da   : > { %v11615_v48 = vpop.f32.mrb[104].mxu1 }
 0x5db   : > { %11949 = vst [vmem:[#allocation7_spill] sm:$0xff] %v11615_v48  ;;  %v5720_v23 = vpop.f32.mrb[40].mxu0  ;;  %v3957_v8 = vpop.f32.mrb[105].mxu1 }
 0x5dc   : > { %v11617_v4 = vadd.f32 %v7328_v21, %v5720_v23  ;;  %v5722_v11 = vpop.f32.mrb[41].mxu0 }
 0x5de   : > { %v11621_v32 = vpop.f32.mrb[106].mxu1 }
 0x5df   : > { %11950 = vst [vmem:[#allocation8_spill] sm:$0xff] %v11621_v32  ;;  %v5725_v38 = vpop.f32.mrb[42].mxu0  ;;  %v3962_v18 = vpop.f32.mrb[107].mxu1 }
 0x5e0   : > { %v11623_v27 = vadd.f32 %v7330_v12, %v5725_v38  ;;  %v5727_v0 = vpop.f32.mrb[43].mxu0 }
 0x5e2   : > { %v11627_v54 = vpop.f32.mrb[108].mxu1 }
 0x5e3   : > { %11951 = vst [vmem:[#allocation9_spill] sm:$0xff] %v11627_v54  ;;  %v5730_v48 = vpop.f32.mrb[44].mxu0  ;;  %v3967_v8 = vpop.f32.mrb[109].mxu1 }
 0x5e4   : > { %v11629_v23 = vadd.f32 %v7332_v24, %v5730_v48  ;;  %v5732_v21 = vpop.f32.mrb[45].mxu0 }
 0x5e6   : > { %v11633_v11 = vpop.f32.mrb[110].mxu1 }
 0x5e7   : > { %11952 = vst [vmem:[#allocation10_spill] sm:$0xff] %v11633_v11  ;;  %v5735_v32 = vpop.f32.mrb[46].mxu0  ;;  %v3972_v18 = vpop.f32.mrb[111].mxu1 }
 0x5e8   : > { %v11635_v38 = vadd.f32 %v7334_v46, %v5735_v32  ;;  %v5737_v12 = vpop.f32.mrb[47].mxu0 }
 0x5ea   : > { %v11639_v0 = vpop.f32.mrb[112].mxu1 }
 0x5eb   : > { %11953 = vst [vmem:[#allocation11_spill] sm:$0xff] %v11639_v0  ;;  %v5740_v54 = vpop.f32.mrb[48].mxu0  ;;  %v3977_v8 = vpop.f32.mrb[113].mxu1 }
 0x5ec   : > { %v11641_v48 = vadd.f32 %v7336_v52, %v5740_v54  ;;  %v5742_v24 = vpop.f32.mrb[49].mxu0 }
 0x5ee   : > { %v11645_v21 = vpop.f32.mrb[114].mxu1 }
 0x5ef   : > { %11954 = vst [vmem:[#allocation12_spill] sm:$0xff] %v11645_v21  ;;  %v5745_v11 = vpop.f32.mrb[50].mxu0  ;;  %v3982_v18 = vpop.f32.mrb[115].mxu1 }
 0x5f0   : > { %v11647_v32 = vadd.f32 %v7338_v59, %v5745_v11  ;;  %v5747_v46 = vpop.f32.mrb[51].mxu0 }
 0x5f2   : > { %v11651_v12 = vpop.f32.mrb[116].mxu1 }
 0x5f3   : > { %11955 = vst [vmem:[#allocation13_spill] sm:$0xff] %v11651_v12  ;;  %v5750_v0 = vpop.f32.mrb[52].mxu0  ;;  %v3987_v8 = vpop.f32.mrb[117].mxu1 }
 0x5f4   : > { %v11653_v54 = vadd.f32 %v7340_v6, %v5750_v0  ;;  %v5752_v52 = vpop.f32.mrb[53].mxu0 }
 0x5f6   : > { %v11657_v24 = vpop.f32.mrb[118].mxu1 }
 0x5f7   : > { %11956 = vst [vmem:[#allocation14_spill] sm:$0xff] %v11657_v24  ;;  %v5755_v21 = vpop.f32.mrb[54].mxu0  ;;  %v3992_v18 = vpop.f32.mrb[119].mxu1 }
 0x5f8   : > { %v11659_v11 = vadd.f32 %v7342_v15, %v5755_v21  ;;  %v5757_v59 = vpop.f32.mrb[55].mxu0 }
 0x5fa   : > { %v11663_v46 = vpop.f32.mrb[120].mxu1 }
 0x5fb   : > { %11957 = vst [vmem:[#allocation15_spill] sm:$0xff] %v11663_v46  ;;  %v5760_v12 = vpop.f32.mrb[56].mxu0  ;;  %v3997_v8 = vpop.f32.mrb[121].mxu1 }
 0x5fc   : > { %v11665_v0 = vadd.f32 %v7344_v41, %v5760_v12  ;;  %v5762_v6 = vpop.f32.mrb[57].mxu0 }
 0x5fe   : > { %v11669_v52 = vpop.f32.mrb[122].mxu1 }
 0x5ff   : > { %11958 = vst [vmem:[#allocation16_spill] sm:$0xff] %v11669_v52  ;;  %v5765_v18 = vpop.f32.mrb[58].mxu0  ;;  %v4002_v21 = vpop.f32.mrb[123].mxu1 }
 0x600   : > { %v11671_v15 = vadd.f32 %v7346_v35, %v5765_v18  ;;  %v5767_v59 = vpop.f32.mrb[59].mxu0 }
 0x602   : > { %v11675_v46 = vpop.f32.mrb[124].mxu1 }
 0x603   : > { %11959 = vst [vmem:[#allocation17_spill] sm:$0xff] %v11675_v46  ;;  %v5770_v8 = vpop.f32.mrb[60].mxu0  ;;  %v4007_v12 = vpop.f32.mrb[125].mxu1 }
 0x604   : > { %v11677_v41 = vadd.f32 %v7348_v45, %v5770_v8  ;;  %v5772_v6 = vpop.f32.mrb[61].mxu0 }
 0x606   : > { %v11681_v24 = vpop.f32.mrb[126].mxu1 }
 0x607   : > { %11960 = vst [vmem:[#allocation18_spill] sm:$0xff] %v11681_v24  ;;  %v5775_v52 = vpop.f32.mrb[62].mxu0  ;;  %v4012_v21 = vpop.f32.mrb[127].mxu1 }
 0x608   : > { %v11685_v35 = vadd.f32 %v7350_v50, %v5775_v52  ;;  %v5777_v18 = vpop.f32.mrb[63].mxu0  ;;  %v7354_v52 = vadd.f32 %v11426_v14, %v11447_v43 }
 0x60a   : > { %v6674_v59 = vpop.f32.mrb[128].mxu1 }
 0x60b   : > { %v5780_v45 = vpop.f32.mrb[64].mxu0  ;;  %v6011_v8 = vadd.f32 %v11451_v44, %v6674_v59  ;;  %v6005_v12 = vpop.f32.mrb[129].mxu1 }
 0x60c   : > { %v11690_v6 = vadd.f32 %v7352_v5, %v5780_v45  ;;  %v5782_v9 = vpop.f32.mrb[65].mxu0  ;;  %v6006_v24 = vadd.f32 %v11439_v33, %v6005_v12  ;;  %v7356_v33 = vadd.f32 %v11426_v14, %v11459_v58  ;;  %v7358_v58 = vadd.f32 %v11426_v14, %v11471_v17 }
 0x60d   : > { %8485 = vtanh.f32 %v6011_v8  ;;  %v7360_v17 = vadd.f32 %v11426_v14, %v11483_v26  ;;  %v7362_v26 = vadd.f32 %v11426_v14, %v11495_v56  ;;  %v7364_v56 = vadd.f32 %v11426_v14, %v11507_v34 }
 0x60e   : > { %8487 = vtanh.f32 %v6006_v24  ;;  %v6677_v50 = vpop.f32.mrb[130].mxu1  ;;  %v7366_v34 = vadd.f32 %v11426_v14, %v11519_v40  ;;  %v7368_v40 = vadd.f32 %v11426_v14, %v11531_v61  ;;  %v7370_v61 = vadd.f32 %v11426_v14, %v11543_v22 }
 0x60f   : > { %v5785_v21 = vpop.f32.mrb[66].mxu0  ;;  %v6021_v25 = vadd.f32 %v11475_v28, %v6677_v50  ;;  %v6015_v18 = vpop.f32.mrb[131].mxu1  ;;  %v7372_v22 = vadd.f32 %v11426_v14, %v11554_v16  ;;  %v7374_v16 = vadd.f32 %v11426_v14, %v11561_v1  ;;  %v7376_v1 = vadd.f32 %v11426_v14, %v11567_v19 }
 0x610   : > { %v11696_v46 = vadd.f32 %v7354_v52, %v5785_v21  ;;  %v5787_v44 = vpop.f32.mrb[67].mxu0  ;;  %v6016_v5 = vadd.f32 %v11463_v3, %v6015_v18  ;;  %v7378_v19 = vadd.f32 %v11426_v14, %v11573_v60  ;;  %v7380_v60 = vadd.f32 %v11426_v14, %v11579_v49 }
 0x611   : > { %8489 = vtanh.f32 %v6021_v25  ;;  %v7382_v49 = vadd.f32 %v11426_v14, %v11585_v20  ;;  %v7384_v20 = vadd.f32 %v11426_v14, %v11591_v36  ;;  %v11825_v14 = vld [vmem:[%s11941_s2] ss:$0 sm:$0xff] }
 0x612   : > { %8491 = vtanh.f32 %v6016_v5  ;;  %v6680_v59 = vpop.f32.mrb[132].mxu1  ;;  %v7386_v36 = vadd.f32 %v11825_v14, %v11597_v42 }
 0x613   : > { %v5790_v43 = vpop.f32.mrb[68].mxu0  ;;  %v6031_v24 = vadd.f32 %v11499_v2, %v6680_v59  ;;  %v6025_v45 = vpop.f32.mrb[133].mxu1 }
 0x614   : > { %v11702_v8 = vadd.f32 %v7356_v33, %v5790_v43  ;;  %v5792_v28 = vpop.f32.mrb[69].mxu0  ;;  %v6026_v12 = vadd.f32 %v11487_v47, %v6025_v45 }
 0x615   : > { %8493 = vtanh.f32 %v6031_v24 }
 0x616   : > { %8495 = vtanh.f32 %v6026_v12  ;;  %v6683_v3 = vpop.f32.mrb[134].mxu1 }
 0x617   : > { %v8486_v2 = vpop.eup %8485  ;;  %v5795_v9 = vpop.f32.mrb[70].mxu0  ;;  %v6041_v52 = vadd.f32 %v11523_v51, %v6683_v3 }
 0x618   : > { %v6035_v50 = vpop.f32.mrb[135].mxu1  ;;  %v8488_v47 = vpop.eup %8487  ;;  %6389 = vst [vmem:[%s11708_s14 + $0x8] sm:$0xff] %v8486_v2  ;;  %v11714_v21 = vadd.f32 %v7358_v58, %v5795_v9 }
 0x619   : > { %v5797_v25 = vpop.f32.mrb[71].mxu0  ;;  %v6036_v18 = vadd.f32 %v11511_v29, %v6035_v50  ;;  %6388 = vst [vmem:[%s11708_s14] sm:$0xff] %v8488_v47  ;;  %8497 = vtanh.f32 %v6041_v52 }
 0x61a   : > { %v6686_v44 = vpop.f32.mrb[136].mxu1 }
 0x61b   : > { %8499 = vtanh.f32 %v6036_v18  ;;  %v8490_v5 = vpop.eup %8489  ;;  %v5800_v33 = vpop.f32.mrb[72].mxu0  ;;  %v6051_v51 = vadd.f32 %v11547_v37, %v6686_v44 }
 0x61c   : > { %v6045_v59 = vpop.f32.mrb[137].mxu1  ;;  %v8492_v43 = vpop.eup %8491  ;;  %6391 = vst [vmem:[%s11708_s14 + $0x18] sm:$0xff] %v8490_v5  ;;  %v11722_v24 = vadd.f32 %v7360_v17, %v5800_v33 }
 0x61d   : > { %v5802_v45 = vpop.f32.mrb[73].mxu0  ;;  %v6046_v29 = vadd.f32 %v11535_v55, %v6045_v59  ;;  %6390 = vst [vmem:[%s11708_s14 + $0x10] sm:$0xff] %v8492_v43  ;;  %8501 = vtanh.f32 %v6051_v51 }
 0x61e   : > { %v6689_v28 = vpop.f32.mrb[138].mxu1 }
 0x61f   : > { %8503 = vtanh.f32 %v6046_v29  ;;  %v8494_v12 = vpop.eup %8493  ;;  %v5805_v58 = vpop.f32.mrb[74].mxu0  ;;  %v6061_v37 = vadd.f32 %v11563_v39, %v6689_v28 }
 0x620   : > { %v6055_v3 = vpop.f32.mrb[139].mxu1  ;;  %v8496_v2 = vpop.eup %8495  ;;  %6393 = vst [vmem:[%s11708_s14 + $0x28] sm:$0xff] %v8494_v12  ;;  %v11730_v9 = vadd.f32 %v7362_v26, %v5805_v58 }
 0x621   : > { %v5807_v52 = vpop.f32.mrb[75].mxu0  ;;  %v6056_v55 = vadd.f32 %v11557_v13, %v6055_v3  ;;  %6392 = vst [vmem:[%s11708_s14 + $0x20] sm:$0xff] %v8496_v2  ;;  %8505 = vtanh.f32 %v6061_v37 }
 0x622   : > { %v6692_v50 = vpop.f32.mrb[140].mxu1 }
 0x623   : > { %8507 = vtanh.f32 %v6056_v55  ;;  %v8498_v47 = vpop.eup %8497  ;;  %v5810_v25 = vpop.f32.mrb[76].mxu0  ;;  %v6071_v39 = vadd.f32 %v11575_v63, %v6692_v50 }
 0x624   : > { %v6065_v18 = vpop.f32.mrb[141].mxu1  ;;  %6395 = vst [vmem:[%s11708_s14 + $0x38] sm:$0xff] %v8498_v47  ;;  %v11738_v44 = vadd.f32 %v7364_v56, %v5810_v25  ;;  %v5812_v5 = vpop.f32.mrb[77].mxu0 }
 0x625   : > { %v8500_v17 = vpop.eup %8499  ;;  %v6066_v13 = vadd.f32 %v11569_v31, %v6065_v18  ;;  %8509 = vtanh.f32 %v6071_v39 }
 0x626   : > { %6394 = vst [vmem:[%s11708_s14 + $0x30] sm:$0xff] %v8500_v17  ;;  %v6695_v33 = vpop.f32.mrb[142].mxu1 }
 0x627   : > { %8511 = vtanh.f32 %v6066_v13  ;;  %v8502_v51 = vpop.eup %8501  ;;  %v5815_v59 = vpop.f32.mrb[78].mxu0  ;;  %v6081_v63 = vadd.f32 %v11587_v10, %v6695_v33 }
 0x628   : > { %v6075_v43 = vpop.f32.mrb[143].mxu1  ;;  %6397 = vst [vmem:[%s11708_s14 + $0x48] sm:$0xff] %v8502_v51  ;;  %v11746_v29 = vadd.f32 %v7366_v34, %v5815_v59  ;;  %v5817_v26 = vpop.f32.mrb[79].mxu0 }
 0x629   : > { %v8504_v45 = vpop.eup %8503  ;;  %v6076_v31 = vadd.f32 %v11581_v57, %v6075_v43  ;;  %8513 = vtanh.f32 %v6081_v63 }
 0x62a   : > { %6396 = vst [vmem:[%s11708_s14 + $0x40] sm:$0xff] %v8504_v45  ;;  %v6698_v28 = vpop.f32.mrb[144].mxu1 }
 0x62b   : > { %8515 = vtanh.f32 %v6076_v31  ;;  %v8506_v12 = vpop.eup %8505  ;;  %v5820_v58 = vpop.f32.mrb[80].mxu0  ;;  %v6091_v10 = vadd.f32 %v11599_v7, %v6698_v28 }
 0x62c   : > { %v6085_v37 = vpop.f32.mrb[145].mxu1  ;;  %6399 = vst [vmem:[%s11708_s14 + $0x58] sm:$0xff] %v8506_v12  ;;  %v11754_v2 = vadd.f32 %v7368_v40, %v5820_v58  ;;  %v5822_v52 = vpop.f32.mrb[81].mxu0 }
 0x62d   : > { %v8508_v3 = vpop.eup %8507  ;;  %v6086_v57 = vadd.f32 %v11593_v30, %v6085_v37  ;;  %8517 = vtanh.f32 %v6091_v10 }
 0x62e   : > { %6398 = vst [vmem:[%s11708_s14 + $0x50] sm:$0xff] %v8508_v3  ;;  %v6701_v55 = vpop.f32.mrb[146].mxu1 }
 0x62f   : > { %8519 = vtanh.f32 %v6086_v57  ;;  %v8510_v56 = vpop.eup %8509  ;;  %v5825_v50 = vpop.f32.mrb[82].mxu0  ;;  %v6101_v7 = vadd.f32 %v11611_v62, %v6701_v55 }
 0x630   : > { %v6095_v47 = vpop.f32.mrb[147].mxu1  ;;  %6401 = vst [vmem:[%s11708_s14 + $0x68] sm:$0xff] %v8510_v56  ;;  %v11762_v39 = vadd.f32 %v7370_v61, %v5825_v50  ;;  %v5827_v18 = vpop.f32.mrb[83].mxu0 }
 0x631   : > { %v8512_v25 = vpop.eup %8511  ;;  %v6096_v30 = vadd.f32 %v11605_v53, %v6095_v47  ;;  %8521 = vtanh.f32 %v6101_v7 }
 0x632   : > { %6400 = vst [vmem:[%s11708_s14 + $0x60] sm:$0xff] %v8512_v25  ;;  %v6704_v17 = vpop.f32.mrb[148].mxu1 }
 0x633   : > { %8523 = vtanh.f32 %v6096_v30  ;;  %v8514_v5 = vpop.eup %8513  ;;  %v5830_v13 = vpop.f32.mrb[84].mxu0  ;;  %v6111_v62 = vadd.f32 %v11623_v27, %v6704_v17 }
 0x634   : > { %v6105_v34 = vpop.f32.mrb[149].mxu1  ;;  %6403 = vst [vmem:[%s11708_s14 + $0x78] sm:$0xff] %v8514_v5  ;;  %v11770_v51 = vadd.f32 %v7372_v22, %v5830_v13  ;;  %v5832_v59 = vpop.f32.mrb[85].mxu0 }
 0x635   : > { %v8516_v33 = vpop.eup %8515  ;;  %v6106_v53 = vadd.f32 %v11617_v4, %v6105_v34  ;;  %8525 = vtanh.f32 %v6111_v62 }
 0x636   : > { %6402 = vst [vmem:[%s11708_s14 + $0x70] sm:$0xff] %v8516_v33  ;;  %v6707_v63 = vpop.f32.mrb[150].mxu1 }
 0x637   : > { %8527 = vtanh.f32 %v6106_v53  ;;  %v8518_v43 = vpop.eup %8517  ;;  %v5835_v45 = vpop.f32.mrb[86].mxu0  ;;  %v6121_v27 = vadd.f32 %v11635_v38, %v6707_v63 }
 0x638   : > { %v6115_v26 = vpop.f32.mrb[151].mxu1  ;;  %6405 = vst [vmem:[%s11708_s14 + $0x88] sm:$0xff] %v8518_v43  ;;  %v11778_v40 = vadd.f32 %v7374_v16, %v5835_v45  ;;  %v5837_v28 = vpop.f32.mrb[87].mxu0 }
 0x639   : > { %v8520_v31 = vpop.eup %8519  ;;  %v6116_v4 = vadd.f32 %v11629_v23, %v6115_v26  ;;  %8529 = vtanh.f32 %v6121_v27 }
 0x63a   : > { %6404 = vst [vmem:[%s11708_s14 + $0x80] sm:$0xff] %v8520_v31  ;;  %v6710_v12 = vpop.f32.mrb[152].mxu1 }
 0x63b   : > { %8531 = vtanh.f32 %v6116_v4  ;;  %v8522_v58 = vpop.eup %8521  ;;  %v5840_v10 = vpop.f32.mrb[88].mxu0  ;;  %v6131_v38 = vadd.f32 %v11647_v32, %v6710_v12 }
 0x63c   : > { %v6125_v37 = vpop.f32.mrb[153].mxu1  ;;  %6407 = vst [vmem:[%s11708_s14 + $0x98] sm:$0xff] %v8522_v58  ;;  %v11786_v52 = vadd.f32 %v7376_v1, %v5840_v10  ;;  %v5842_v57 = vpop.f32.mrb[89].mxu0 }
 0x63d   : > { %v8524_v3 = vpop.eup %8523  ;;  %v6126_v23 = vadd.f32 %v11641_v48, %v6125_v37  ;;  %8533 = vtanh.f32 %v6131_v38 }
 0x63e   : > { %6406 = vst [vmem:[%s11708_s14 + $0x90] sm:$0xff] %v8524_v3  ;;  %v6713_v61 = vpop.f32.mrb[154].mxu1 }
 0x63f   : > { %8535 = vtanh.f32 %v6126_v23  ;;  %v8526_v55 = vpop.eup %8525  ;;  %v5845_v56 = vpop.f32.mrb[90].mxu0  ;;  %v6141_v32 = vadd.f32 %v11659_v11, %v6713_v61  ;;  %v11961_v23 = vld [vmem:[#allocation5_spill] sm:$0xff] }
 0x640   : > { %v6135_v50 = vpop.f32.mrb[155].mxu1  ;;  %6409 = vst [vmem:[%s11708_s14 + $0xa8] sm:$0xff] %v8526_v55  ;;  %v11794_v47 = vadd.f32 %v7378_v19, %v5845_v56  ;;  %v5847_v25 = vpop.f32.mrb[91].mxu0  ;;  %v7388_v42 = vadd.f32 %v11825_v14, %v11961_v23 }
 0x641   : > { %v8528_v7 = vpop.eup %8527  ;;  %v6136_v48 = vadd.f32 %v11653_v54, %v6135_v50  ;;  %8537 = vtanh.f32 %v6141_v32  ;;  %v11962_v25 = vld [vmem:[#allocation6_spill] sm:$0xff] }
 0x642   : > { %6408 = vst [vmem:[%s11708_s14 + $0xa0] sm:$0xff] %v8528_v7  ;;  %v6716_v18 = vpop.f32.mrb[156].mxu1 }
 0x643   : > { %8539 = vtanh.f32 %v6136_v48  ;;  %v8530_v30 = vpop.eup %8529  ;;  %v5850_v22 = vpop.f32.mrb[92].mxu0  ;;  %v6151_v11 = vadd.f32 %v11671_v15, %v6716_v18  ;;  %v7390_v48 = vadd.f32 %v11825_v14, %v11962_v25 }
 0x644   : > { %v6145_v17 = vpop.f32.mrb[157].mxu1  ;;  %6411 = vst [vmem:[%s11708_s14 + $0xb8] sm:$0xff] %v8530_v30  ;;  %v11802_v13 = vadd.f32 %v7380_v60, %v5850_v22  ;;  %v5852_v62 = vpop.f32.mrb[93].mxu0 }
 0x645   : > { %v8532_v5 = vpop.eup %8531  ;;  %v6146_v54 = vadd.f32 %v11665_v0, %v6145_v17  ;;  %8541 = vtanh.f32 %v6151_v11  ;;  %v11963_v62 = vld [vmem:[#allocation7_spill] sm:$0xff] }
 0x646   : > { %6410 = vst [vmem:[%s11708_s14 + $0xb0] sm:$0xff] %v8532_v5  ;;  %v6719_v34 = vpop.f32.mrb[158].mxu1 }
 0x647   : > { %8543 = vtanh.f32 %v6146_v54  ;;  %v8534_v33 = vpop.eup %8533  ;;  %v5855_v59 = vpop.f32.mrb[94].mxu0  ;;  %v6161_v15 = vadd.f32 %v11685_v35, %v6719_v34  ;;  %v7392_v54 = vadd.f32 %v11825_v14, %v11963_v62 }
 0x648   : > { %v6155_v53 = vpop.f32.mrb[159].mxu1  ;;  %6413 = vst [vmem:[%s11708_s14 + $0xc8] sm:$0xff] %v8534_v33  ;;  %v11810_v63 = vadd.f32 %v7382_v49, %v5855_v59  ;;  %v5857_v43 = vpop.f32.mrb[95].mxu0 }
 0x649   : > { %v8536_v16 = vpop.eup %8535  ;;  %v6156_v0 = vadd.f32 %v11677_v41, %v6155_v53  ;;  %8545 = vtanh.f32 %v6161_v15  ;;  %v11964_v43 = vld [vmem:[#allocation8_spill] sm:$0xff] }
 0x64a   : > { %6412 = vst [vmem:[%s11708_s14 + $0xc0] sm:$0xff] %v8536_v16  ;;  %v6722_v45 = vpop.f32.mrb[160].mxu1 }
 0x64b   : > { %8547 = vtanh.f32 %v6156_v0  ;;  %v8538_v27 = vpop.eup %8537  ;;  %v5860_v26 = vpop.f32.mrb[96].mxu0  ;;  %v6171_v35 = vadd.f32 %v11696_v46, %v6722_v45  ;;  %v7394_v0 = vadd.f32 %v11825_v14, %v11964_v43 }
 0x64c   : > { %v6165_v31 = vpop.f32.mrb[161].mxu1  ;;  %6415 = vst [vmem:[%s11708_s14 + $0xd8] sm:$0xff] %v8538_v27  ;;  %v11818_v4 = vadd.f32 %v7384_v20, %v5860_v26  ;;  %v5862_v1 = vpop.f32.mrb[97].mxu0 }
 0x64d   : > { %v8540_v28 = vpop.eup %8539  ;;  %v6166_v41 = vadd.f32 %v11690_v6, %v6165_v31  ;;  %8549 = vtanh.f32 %v6171_v35  ;;  %v11965_v1 = vld [vmem:[#allocation9_spill] sm:$0xff] }
 0x64e   : > { %6414 = vst [vmem:[%s11708_s14 + $0xd0] sm:$0xff] %v8540_v28  ;;  %v6725_v46 = vpop.f32.mrb[162].mxu1 }
 0x64f   : > { %8551 = vtanh.f32 %v6166_v41  ;;  %v8542_v12 = vpop.eup %8541  ;;  %v5865_v58 = vpop.f32.mrb[98].mxu0  ;;  %v6181_v10 = vadd.f32 %v11714_v21, %v6725_v46  ;;  %v7396_v41 = vadd.f32 %v11825_v14, %v11965_v1 }
 0x650   : > { %v6175_v38 = vpop.f32.mrb[163].mxu1  ;;  %6417 = vst [vmem:[%s11708_s14 + $0xe8] sm:$0xff] %v8542_v12  ;;  %v11831_v37 = vadd.f32 %v7386_v36, %v5865_v58  ;;  %v5867_v3 = vpop.f32.mrb[99].mxu0 }
 0x651   : > { %v8544_v6 = vpop.eup %8543  ;;  %v6176_v57 = vadd.f32 %v11702_v8, %v6175_v38  ;;  %8553 = vtanh.f32 %v6181_v10  ;;  %v11966_v3 = vld [vmem:[#allocation10_spill] sm:$0xff] }
 0x652   : > { %6416 = vst [vmem:[%s11708_s14 + $0xe0] sm:$0xff] %v8544_v6  ;;  %v6728_v19 = vpop.f32.mrb[164].mxu1 }
 0x653   : > { %8555 = vtanh.f32 %v6176_v57  ;;  %v8546_v61 = vpop.eup %8545  ;;  %v5870_v55 = vpop.f32.mrb[100].mxu0  ;;  %v6191_v21 = vadd.f32 %v11730_v9, %v6728_v19  ;;  %v7398_v57 = vadd.f32 %v11825_v14, %v11966_v3 }
 0x654   : > { %v6185_v56 = vpop.f32.mrb[165].mxu1  ;;  %6419 = vst [vmem:[%s11708_s14 + $0xf8] sm:$0xff] %v8546_v61  ;;  %v11839_v50 = vadd.f32 %v7388_v42, %v5870_v55  ;;  %v5872_v7 = vpop.f32.mrb[101].mxu0 }
 0x655   : > { %v8548_v32 = vpop.eup %8547  ;;  %v6186_v8 = vadd.f32 %v11722_v24, %v6185_v56  ;;  %8557 = vtanh.f32 %v6191_v21 }
 0x656   : > { %6418 = vst [vmem:[%s11708_s14 + $0xf0] sm:$0xff] %v8548_v32  ;;  %v6731_v60 = vpop.f32.mrb[166].mxu1  ;;  %v11967_v32 = vld [vmem:[#allocation11_spill] sm:$0xff] }
 0x657   : > { %8559 = vtanh.f32 %v6186_v8  ;;  %v8550_v18 = vpop.eup %8549  ;;  %v5875_v30 = vpop.f32.mrb[102].mxu0  ;;  %v6201_v9 = vadd.f32 %v11746_v29, %v6731_v60  ;;  %v7400_v7 = vadd.f32 %v11825_v14, %v11967_v32 }
 0x658   : > { %v6195_v22 = vpop.f32.mrb[167].mxu1  ;;  %6421 = vst [vmem:[%s11708_s14 + $0x108] sm:$0xff] %v8550_v18  ;;  %v11847_v17 = vadd.f32 %v7390_v48, %v5875_v30  ;;  %v5877_v5 = vpop.f32.mrb[103].mxu0 }
 0x659   : > { %v8552_v11 = vpop.eup %8551  ;;  %v6196_v24 = vadd.f32 %v11738_v44, %v6195_v22  ;;  %8561 = vtanh.f32 %v6201_v9  ;;  %v11968_v22 = vld [vmem:[#allocation12_spill] sm:$0xff] }
 0x65a   : > { %6420 = vst [vmem:[%s11708_s14 + $0x100] sm:$0xff] %v8552_v11  ;;  %v6734_v49 = vpop.f32.mrb[168].mxu1  ;;  %v7402_v11 = vadd.f32 %v11825_v14, %v11968_v22 }
 0x65b   : > { %8563 = vtanh.f32 %v6196_v24  ;;  %v8554_v34 = vpop.eup %8553  ;;  %v5880_v33 = vpop.f32.mrb[104].mxu0  ;;  %v6211_v29 = vadd.f32 %v11762_v39, %v6734_v49 }
 0x65c   : > { %v6205_v59 = vpop.f32.mrb[169].mxu1  ;;  %6423 = vst [vmem:[%s11708_s14 + $0x118] sm:$0xff] %v8554_v34  ;;  %v11855_v53 = vadd.f32 %v7392_v54, %v5880_v33  ;;  %v5882_v16 = vpop.f32.mrb[105].mxu0 }
 0x65d   : > { %v8556_v15 = vpop.eup %8555  ;;  %v6206_v44 = vadd.f32 %v11754_v2, %v6205_v59  ;;  %8565 = vtanh.f32 %v6211_v29  ;;  %v11969_v29 = vld [vmem:[#allocation13_spill] sm:$0xff] }
 0x65e   : > { %6422 = vst [vmem:[%s11708_s14 + $0x110] sm:$0xff] %v8556_v15  ;;  %v6737_v20 = vpop.f32.mrb[170].mxu1  ;;  %v7404_v59 = vadd.f32 %v11825_v14, %v11969_v29 }
 0x65f   : > { %8567 = vtanh.f32 %v6206_v44  ;;  %v8558_v45 = vpop.eup %8557  ;;  %v5885_v27 = vpop.f32.mrb[106].mxu0  ;;  %v6221_v39 = vadd.f32 %v11778_v40, %v6737_v20 }
 0x660   : > { %v6215_v26 = vpop.f32.mrb[171].mxu1  ;;  %6425 = vst [vmem:[%s11708_s14 + $0x128] sm:$0xff] %v8558_v45  ;;  %v11863_v31 = vadd.f32 %v7394_v0, %v5885_v27  ;;  %v5887_v28 = vpop.f32.mrb[107].mxu0  ;;  %v11970_v27 = vld [vmem:[#allocation14_spill] sm:$0xff] }
 0x661   : > { %v8560_v35 = vpop.eup %8559  ;;  %v6216_v2 = vadd.f32 %v11770_v51, %v6215_v26  ;;  %8569 = vtanh.f32 %v6221_v39  ;;  %v7406_v39 = vadd.f32 %v11825_v14, %v11970_v27 }
 0x662   : > { %6424 = vst [vmem:[%s11708_s14 + $0x120] sm:$0xff] %v8560_v35  ;;  %v6740_v36 = vpop.f32.mrb[172].mxu1 }
 0x663   : > { %8571 = vtanh.f32 %v6216_v2  ;;  %v8562_v46 = vpop.eup %8561  ;;  %v5890_v12 = vpop.f32.mrb[108].mxu0  ;;  %v6231_v40 = vadd.f32 %v11794_v47, %v6740_v36 }
 0x664   : > { %v6225_v58 = vpop.f32.mrb[173].mxu1  ;;  %6427 = vst [vmem:[%s11708_s14 + $0x138] sm:$0xff] %v8562_v46  ;;  %v11871_v38 = vadd.f32 %v7396_v41, %v5890_v12  ;;  %v5892_v6 = vpop.f32.mrb[109].mxu0 }
 0x665   : > { %v8564_v10 = vpop.eup %8563  ;;  %v6226_v51 = vadd.f32 %v11786_v52, %v6225_v58  ;;  %8573 = vtanh.f32 %v6231_v40 }
 0x666   : > { %6426 = vst [vmem:[%s11708_s14 + $0x130] sm:$0xff] %v8564_v10  ;;  %v6743_v23 = vpop.f32.mrb[174].mxu1 }
 0x667   : > { %8575 = vtanh.f32 %v6226_v51  ;;  %v8566_v42 = vpop.eup %8565  ;;  %v5895_v19 = vpop.f32.mrb[110].mxu0  ;;  %v6241_v47 = vadd.f32 %v11810_v63, %v6743_v23 }
 0x668   : > { %v6235_v61 = vpop.f32.mrb[175].mxu1  ;;  %6429 = vst [vmem:[%s11708_s14 + $0x148] sm:$0xff] %v8566_v42  ;;  %v7399_v21 = vadd.f32 %v7398_v57, %v5895_v19  ;;  %v5897_v56 = vpop.f32.mrb[111].mxu0 }
 0x669   : > { %v8568_v55 = vpop.eup %8567  ;;  %v6236_v52 = vadd.f32 %v11802_v13, %v6235_v61  ;;  %8577 = vtanh.f32 %v6241_v47 }
 0x66a   : > { %6428 = vst [vmem:[%s11708_s14 + $0x140] sm:$0xff] %v8568_v55  ;;  %v6746_v8 = vpop.f32.mrb[176].mxu1 }
 0x66b   : > { %8579 = vtanh.f32 %v6236_v52  ;;  %v8570_v25 = vpop.eup %8569  ;;  %v5900_v48 = vpop.f32.mrb[112].mxu0  ;;  %v6251_v63 = vadd.f32 %v11831_v37, %v6746_v8 }
 0x66c   : > { %v6245_v60 = vpop.f32.mrb[177].mxu1  ;;  %6431 = vst [vmem:[%s11708_s14 + $0x158] sm:$0xff] %v8570_v25  ;;  %v7401_v30 = vadd.f32 %v7400_v7, %v5900_v48  ;;  %v5902_v9 = vpop.f32.mrb[113].mxu0  ;;  %v11973_v25 = vld [vmem:[#allocation17_spill] sm:$0xff] }
 0x66d   : > { %v8572_v18 = vpop.eup %8571  ;;  %v6246_v13 = vadd.f32 %v11818_v4, %v6245_v60  ;;  %8581 = vtanh.f32 %v6251_v63  ;;  %v7412_v48 = vadd.f32 %v11825_v14, %v11973_v25 }
 0x66e   : > { %6430 = vst [vmem:[%s11708_s14 + $0x150] sm:$0xff] %v8572_v18  ;;  %v6749_v5 = vpop.f32.mrb[178].mxu1 }
 0x66f   : > { %8583 = vtanh.f32 %v6246_v13  ;;  %v8574_v24 = vpop.eup %8573  ;;  %v5905_v62 = vpop.f32.mrb[114].mxu0  ;;  %v6261_v37 = vadd.f32 %v11847_v17, %v6749_v5 }
 0x670   : > { %v6255_v54 = vpop.f32.mrb[179].mxu1  ;;  %6433 = vst [vmem:[%s11708_s14 + $0x168] sm:$0xff] %v8574_v24  ;;  %v7403_v34 = vadd.f32 %v7402_v11, %v5905_v62  ;;  %v5907_v33 = vpop.f32.mrb[115].mxu0  ;;  %v11974_v24 = vld [vmem:[#allocation18_spill] sm:$0xff] }
 0x671   : > { %v8576_v49 = vpop.eup %8575  ;;  %v6256_v4 = vadd.f32 %v11839_v50, %v6255_v54  ;;  %8585 = vtanh.f32 %v6261_v37  ;;  %v7414_v62 = vadd.f32 %v11825_v14, %v11974_v24 }
 0x672   : > { %6432 = vst [vmem:[%s11708_s14 + $0x160] sm:$0xff] %v8576_v49  ;;  %v6752_v15 = vpop.f32.mrb[180].mxu1 }
 0x673   : > { %8587 = vtanh.f32 %v6256_v4  ;;  %v8578_v16 = vpop.eup %8577  ;;  %v5910_v44 = vpop.f32.mrb[116].mxu0  ;;  %v6271_v17 = vadd.f32 %v11863_v31, %v6752_v15 }
 0x674   : > { %v6265_v43 = vpop.f32.mrb[181].mxu1  ;;  %6435 = vst [vmem:[%s11708_s14 + $0x178] sm:$0xff] %v8578_v16  ;;  %v7405_v20 = vadd.f32 %v7404_v59, %v5910_v44  ;;  %v5912_v45 = vpop.f32.mrb[117].mxu0 }
 0x675   : > { %v8580_v0 = vpop.eup %8579  ;;  %v6266_v50 = vadd.f32 %v11855_v53, %v6265_v43  ;;  %8589 = vtanh.f32 %v6271_v17  ;;  %v11971_v53 = vld [vmem:[#allocation15_spill] sm:$0xff] }
 0x676   : > { %6434 = vst [vmem:[%s11708_s14 + $0x170] sm:$0xff] %v8580_v0  ;;  %v6755_v26 = vpop.f32.mrb[182].mxu1  ;;  %v7408_v12 = vadd.f32 %v11825_v14, %v11971_v53 }
 0x677   : > { %8591 = vtanh.f32 %v6266_v50  ;;  %v8582_v35 = vpop.eup %8581  ;;  %v5915_v28 = vpop.f32.mrb[118].mxu0  ;;  %v6281_v2 = vadd.f32 %v7399_v21, %v6755_v26 }
 0x678   : > { %v6275_v31 = vpop.f32.mrb[183].mxu1  ;;  %6437 = vst [vmem:[%s11708_s14 + $0x188] sm:$0xff] %v8582_v35  ;;  %v7407_v41 = vadd.f32 %v7406_v39, %v5915_v28  ;;  %v5917_v36 = vpop.f32.mrb[119].mxu0 }
 0x679   : > { %v8584_v1 = vpop.eup %8583  ;;  %v6276_v46 = vadd.f32 %v11871_v38, %v6275_v31  ;;  %8593 = vtanh.f32 %v6281_v2  ;;  %v11972_v38 = vld [vmem:[#allocation16_spill] sm:$0xff] }
 0x67a   : > { %6436 = vst [vmem:[%s11708_s14 + $0x180] sm:$0xff] %v8584_v1  ;;  %v6758_v40 = vpop.f32.mrb[184].mxu1  ;;  %v7410_v19 = vadd.f32 %v11825_v14, %v11972_v38 }
 0x67b   : > { %8595 = vtanh.f32 %v6276_v46  ;;  %v8586_v58 = vpop.eup %8585  ;;  %v5920_v10 = vpop.f32.mrb[120].mxu0  ;;  %v6291_v6 = vadd.f32 %v7403_v34, %v6758_v40 }
 0x67c   : > { %v6285_v51 = vpop.f32.mrb[185].mxu1  ;;  %6439 = vst [vmem:[%s11708_s14 + $0x198] sm:$0xff] %v8586_v58  ;;  %v7409_v57 = vadd.f32 %v7408_v12, %v5920_v10  ;;  %v5922_v23 = vpop.f32.mrb[121].mxu0 }
 0x67d   : > { %v8588_v3 = vpop.eup %8587  ;;  %v6286_v42 = vadd.f32 %v7401_v30, %v6285_v51  ;;  %8597 = vtanh.f32 %v6291_v6 }
 0x67e   : > { %6438 = vst [vmem:[%s11708_s14 + $0x190] sm:$0xff] %v8588_v3  ;;  %v6761_v47 = vpop.f32.mrb[186].mxu1 }
 0x67f   : > { %8599 = vtanh.f32 %v6286_v42  ;;  %v8590_v61 = vpop.eup %8589  ;;  %v5925_v55 = vpop.f32.mrb[122].mxu0  ;;  %v6301_v21 = vadd.f32 %v7407_v41, %v6761_v47 }
 0x680   : > { %v6295_v56 = vpop.f32.mrb[187].mxu1  ;;  %6441 = vst [vmem:[%s11708_s14 + $0x1a8] sm:$0xff] %v8590_v61  ;;  %v7411_v32 = vadd.f32 %v7410_v19, %v5925_v55  ;;  %v5927_v7 = vpop.f32.mrb[123].mxu0 }
 0x681   : > { %v8592_v52 = vpop.eup %8591  ;;  %v6296_v8 = vadd.f32 %v7405_v20, %v6295_v56  ;;  %8601 = vtanh.f32 %v6301_v21 }
 0x682   : > { %6440 = vst [vmem:[%s11708_s14 + $0x1a0] sm:$0xff] %v8592_v52  ;;  %v6764_v63 = vpop.f32.mrb[188].mxu1 }
 0x683   : > { %8603 = vtanh.f32 %v6296_v8  ;;  %v8594_v60 = vpop.eup %8593  ;;  %v5930_v18 = vpop.f32.mrb[124].mxu0  ;;  %v6311_v30 = vadd.f32 %v7411_v32, %v6764_v63 }
 0x684   : > { %v6305_v9 = vpop.f32.mrb[189].mxu1  ;;  %6443 = vst [vmem:[%s11708_s14 + $0x1b8] sm:$0xff] %v8594_v60  ;;  %v7413_v22 = vadd.f32 %v7412_v48, %v5930_v18  ;;  %v5932_v11 = vpop.f32.mrb[125].mxu0 }
 0x685   : > { %v8596_v13 = vpop.eup %8595  ;;  %v6306_v5 = vadd.f32 %v7409_v57, %v6305_v9  ;;  %8605 = vtanh.f32 %v6311_v30 }
 0x686   : > { %6442 = vst [vmem:[%s11708_s14 + $0x1b0] sm:$0xff] %v8596_v13  ;;  %v6767_v37 = vpop.f32.mrb[190].mxu1 }
 0x687   : > { %8607 = vtanh.f32 %v6306_v5  ;;  %v8598_v54 = vpop.eup %8597  ;;  %v5935_v49 = vpop.f32.mrb[126].mxu0 }
 0x688   : > { %v6315_v34 = vpop.f32.mrb[191].mxu1  ;;  %6445 = vst [vmem:[%s11708_s14 + $0x1c8] sm:$0xff] %v8598_v54  ;;  %v7415_v4 = vadd.f32 %v7414_v62, %v5935_v49  ;;  %v5937_v29 = vpop.f32.mrb[127].mxu0 }
 0x689   : > { %v8600_v33 = vpop.eup %8599  ;;  %v6316_v59 = vadd.f32 %v7413_v22, %v6315_v34 }
 0x68a   : > { %6444 = vst [vmem:[%s11708_s14 + $0x1c0] sm:$0xff] %v8600_v33  ;;  %v6321_v15 = vadd.f32 %v7415_v4, %v6767_v37 }
 0x68b   : > { %8609 = vtanh.f32 %v6316_v59  ;;  %v8602_v14 = vpop.eup %8601 }
 0x68c   : > { %6447 = vst [vmem:[%s11708_s14 + $0x1d8] sm:$0xff] %v8602_v14  ;;  %8611 = vtanh.f32 %v6321_v15 }
 0x68d   : > { %v8604_v16 = vpop.eup %8603 }
 0x68e   : > { %6446 = vst [vmem:[%s11708_s14 + $0x1d0] sm:$0xff] %v8604_v16 }
 0x68f   : > { %v8606_v44 = vpop.eup %8605 }
 0x690   : > { %6449 = vst [vmem:[%s11708_s14 + $0x1e8] sm:$0xff] %v8606_v44 }
 0x691   : > { %v8608_v17 = vpop.eup %8607 }
 0x692   : > { %6448 = vst [vmem:[%s11708_s14 + $0x1e0] sm:$0xff] %v8608_v17 }
 0x695   : > { %v8610_v43 = vpop.eup %8609 }
 0x696   : > { %6450 = vst [vmem:[%s11708_s14 + $0x1f0] sm:$0xff] %v8610_v43  ;;  %v8612_v0 = vpop.eup %8611 }
 0x697   : > { %6451 = vst [vmem:[%s11708_s14 + $0x1f8] sm:$0xff] %v8612_v0 }
 0x698 PF: > { %p14_p8 = scmp.ge.s32.totalorder %s8729_s19, 6   ;;  %s11975_s15 = smov %s8670_s16 }
 0x699   : > { %s11976_s16 = smov %s8674_s17  ;;  %s11977_s17 = smov %s8739_s22 }
 0x69a   : > { %s11978_s18 = smov %s8729_s19  ;;  %16 = sbr.rel (!%p14_p8) target bundleno = 3 (0x3), region = 76 }
 0x6a1   :  { %6474 = vsyncpa [#allocation3], 1 }
 0x6a2   :  { %6476 = vsyncpa [#allocation3 + $0x1], 1 }

</bundles_post_ra>
